<compile_context>
chip_gen: v7x
topology: tpu7x:2x2x1
jax: 0.10.0
libtpu: 0.0.40
codegen_flags: <defaults>
</compile_context>

<pallas_src>
import numpy as np
import jax
import jax.numpy as jnp
from jax import lax
from jax.experimental import pallas as pl
from jax.experimental.pallas import tpu as pltpu

EPS = 1e-5
_HI = lax.Precision.HIGHEST
_TAPS = tuple((dy, dx) for dy in range(3) for dx in range(3))


# ---------------------------------------------------------------------------
# In-kernel helpers
# ---------------------------------------------------------------------------
def _gn_swish_3d(x3, gamma2, beta2, groups):
    """GroupNorm (biased var, eps=1e-5) + Swish on one (H, W, C) block, exact f32.

    Group aggregation uses a (G, C) 0/1 membership mask with VPU multiplies and
    XLU reductions — no MXU dots, no Precision.HIGHEST emulation.
    """
    H, W, C = x3.shape
    cg = C // groups
    n = float(H * W * cg)

    gi = lax.broadcasted_iota(jnp.int32, (groups, C), 0)
    ci = lax.broadcasted_iota(jnp.int32, (groups, C), 1)
    m_gc = ((ci >= gi * cg) & (ci < (gi + 1) * cg)).astype(jnp.float32)   # (G, C)

    xf = x3.astype(jnp.float32)
    s = jnp.sum(jnp.sum(xf, axis=0), axis=0, keepdims=True)               # (1, C)
    mean_g = jnp.sum(s * m_gc, axis=1, keepdims=True) / n                 # (G, 1)
    mean_c = jnp.sum(mean_g * m_gc, axis=0, keepdims=True)                # (1, C)
    d = xf - mean_c.reshape(1, 1, C)
    s2 = jnp.sum(jnp.sum(d * d, axis=0), axis=0, keepdims=True)           # (1, C)
    var_g = jnp.sum(s2 * m_gc, axis=1, keepdims=True) / n                 # biased var
    inv_g = lax.rsqrt(var_g + EPS)                                        # (G, 1)
    inv_c = jnp.sum(inv_g * m_gc, axis=0, keepdims=True)                  # (1, C)
    scale = (inv_c * gamma2.astype(jnp.float32)).reshape(1, 1, C)
    shift = beta2.astype(jnp.float32).reshape(1, 1, C)
    y = d * scale + shift
    return y * jax.nn.sigmoid(y)                                          # Swish


def _zero_halo(ypad_ref):
    """Zero only the 1-px halo of a (H+2, W+2, C) padded VMEM scratch."""
    Hp, Wp, C = ypad_ref.shape
    dt = ypad_ref.dtype
    ypad_ref[0:1, :, :] = jnp.zeros((1, Wp, C), dt)
    ypad_ref[Hp - 1:Hp, :, :] = jnp.zeros((1, Wp, C), dt)
    ypad_ref[1:Hp - 1, 0:1, :] = jnp.zeros((Hp - 2, 1, C), dt)
    ypad_ref[1:Hp - 1, Wp - 1:Wp, :] = jnp.zeros((Hp - 2, 1, C), dt)


def _conv3x3_from_pad(ypad_ref, w_ref, H, W):
    """3x3 SAME conv as 9 accumulated per-tap MXU dots (no im2col buffer)."""
    acc = None
    for t, (dy, dx) in enumerate(_TAPS):
        tap = ypad_ref[dy:dy + H, dx:dx + W, :]                           # (H,W,C) bf16
        c = lax.dot_general(tap, w_ref[t], (((2,), (0,)), ((), ())),
                            preferred_element_type=jnp.float32)           # (H,W,Cout)
        acc = c if acc is None else acc + c
    return acc


# ---------------------------------------------------------------------------
# Fused kernel: GN+Swish+Conv3x3 (+noise)  ->  GN+Swish+Conv3x3 + residual 1x1
# ---------------------------------------------------------------------------
def _make_fused_kernel(groups):
    def kernel(x_ref, g1_ref, b1_ref, w1_ref, add1_ref,
               g2_ref, b2_ref, w2_ref, wres_ref, b2add_ref,
               o_ref, ypad1_ref, h_ref, ypad2_ref):
        _, H, W, Cin = x_ref.shape
        Cout = w1_ref.shape[-1]

        # Keep the conv halo zero; the interior is fully overwritten each step.
        _zero_halo(ypad1_ref)
        _zero_halo(ypad2_ref)

        # --- block1: GroupNorm + Swish + Conv3x3, plus (conv1 bias + noise add)
        y1 = _gn_swish_3d(x_ref[0], g1_ref[...], b1_ref[...], groups)
        ypad1_ref[1:H + 1, 1:W + 1, :] = y1.astype(ypad1_ref.dtype)
        h = _conv3x3_from_pad(ypad1_ref, w1_ref, H, W) + add1_ref[...]
        h_ref[...] = h                                  # h stays in VMEM (f32)

        # --- block2: GroupNorm + Swish + Conv3x3, plus residual 1x1 conv
        y2 = _gn_swish_3d(h_ref[...], g2_ref[...], b2_ref[...], groups)
        ypad2_ref[1:H + 1, 1:W + 1, :] = y2.astype(ypad2_ref.dtype)
        acc = _conv3x3_from_pad(ypad2_ref, w2_ref, H, W)
        # TODO(synk): skip path runs bf16 on the MXU; switch to an f32 dot if a
        #             tighter end-to-end tolerance is required for deep stacks.
        acc = acc + lax.dot_general(x_ref[0].astype(jnp.bfloat16), wres_ref[...],
                                    (((2,), (0,)), ((), ())),
                                    preferred_element_type=jnp.float32)
        acc = acc + b2add_ref[...]                      # conv2 bias + res_conv bias
        o_ref[...] = acc.reshape(1, H, W, Cout).astype(o_ref.dtype)
    return kernel


# ---------------------------------------------------------------------------
# ResnetBlock forward (NCHW in / NCHW out, like the PyTorch module)
# ---------------------------------------------------------------------------
def resnet_block_forward(params, x_nchw, time_emb):
    groups = int(params["groups"])
    fdt, bdt = jnp.float32, jnp.bfloat16

    x = jnp.transpose(x_nchw, (0, 2, 3, 1)).astype(fdt)                  # NCHW -> NHWC
    B, H, W, Cin = x.shape
    Cout = params["conv1_w"].shape[-1]
    assert Cin % groups == 0 and Cout % groups == 0, "GroupNorm needs C % groups == 0"

    # FeatureWiseAffine projection hoisted out of the kernel; conv1 bias folded in.
    noise = time_emb.astype(fdt) @ params["noise_w"].astype(fdt) + params["noise_b"]
    add1 = (noise + params["conv1_b"]).reshape(B, 1, Cout).astype(fdt)    # (B,1,Cout)

    w1 = params["conv1_w"].reshape(9, Cin, Cout).astype(bdt)              # per-tap slabs
    w2 = params["conv2_w"].reshape(9, Cout, Cout).astype(bdt)
    wres = params["res_w"].astype(bdt)                                    # (Cin, Cout)
    b2add = (params["conv2_b"] + params["res_b"]).reshape(1, 1, Cout).astype(fdt)

    g1 = params["gn1_gamma"].reshape(1, Cin).astype(fdt)
    be1 = params["gn1_beta"].reshape(1, Cin).astype(fdt)
    g2 = params["gn2_gamma"].reshape(1, Cout).astype(fdt)
    be2 = params["gn2_beta"].reshape(1, Cout).astype(fdt)

    # Explicit scoped-VMEM budget: double-buffered blocks + scratch + headroom.
    def nbytes(shape, dt):
        return int(np.prod(shape)) * jnp.dtype(dt).itemsize
    est = (2 * nbytes((1, H, W, Cin), fdt) + 2 * nbytes((1, H, W, Cout), fdt)
           + nbytes((9, Cin, Cout), bdt) + nbytes((9, Cout, Cout), bdt)
           + nbytes((Cin, Cout), bdt)
           + nbytes((H + 2, W + 2, Cin), bdt) + nbytes((H + 2, W + 2, Cout), bdt)
           + nbytes((H, W, Cout), fdt)
           + 6 * nbytes((H, W, max(Cin, Cout)), fdt))        # transient GN/acc values
    vmem_limit = int(min(max(2 * est, 16 * 2 ** 20), 64 * 2 ** 20))

    flops = 2 * B * H * W * (9 * Cin * Cout + 9 * Cout * Cout + Cin * Cout)

    out = pl.pallas_call(
        _make_fused_kernel(groups),
        out_shape=jax.ShapeDtypeStruct((B, H, W, Cout), fdt),
        grid_spec=pltpu.PrefetchScalarGridSpec(
            num_scalar_prefetch=0,
            grid=(B,),
            in_specs=[
                pl.BlockSpec((1, H, W, Cin), lambda bi: (bi, 0, 0, 0)),   # x
                pl.BlockSpec((1, Cin), lambda bi: (0, 0)),                # gn1 gamma
                pl.BlockSpec((1, Cin), lambda bi: (0, 0)),                # gn1 beta
                pl.BlockSpec((9, Cin, Cout), lambda bi: (0, 0, 0)),       # conv1 w
                pl.BlockSpec((1, 1, Cout), lambda bi: (bi, 0, 0)),        # bias1+noise
                pl.BlockSpec((1, Cout), lambda bi: (0, 0)),               # gn2 gamma
                pl.BlockSpec((1, Cout), lambda bi: (0, 0)),               # gn2 beta
                pl.BlockSpec((9, Cout, Cout), lambda bi: (0, 0, 0)),      # conv2 w
                pl.BlockSpec((Cin, Cout), lambda bi: (0, 0)),             # res 1x1 w
                pl.BlockSpec((1, 1, Cout), lambda bi: (0, 0, 0)),         # bias2+res_b
            ],
            out_specs=pl.BlockSpec((1, H, W, Cout), lambda bi: (bi, 0, 0, 0)),
            scratch_shapes=[
                pltpu.VMEM((H + 2, W + 2, Cin), bdt),    # padded Swish(GN(x)), bf16
                pltpu.VMEM((H, W, Cout), fdt),           # h (never leaves VMEM)
                pltpu.VMEM((H + 2, W + 2, Cout), bdt),   # padded Swish(GN(h)), bf16
            ],
        ),
        compiler_params=pltpu.CompilerParams(
            dimension_semantics=("parallel",),
            vmem_limit_bytes=vmem_limit),
        cost_estimate=pl.CostEstimate(
            flops=flops,
            transcendentals=B * H * W * (Cin + Cout),
            bytes_accessed=(4 * B * H * W * (Cin + Cout)
                            + 2 * (9 * Cin * Cout + 9 * Cout * Cout + Cin * Cout)
                            + 4 * (B + 1) * Cout)),
    )(x, g1, be1, w1, add1, g2, be2, w2, wres, b2add)

    # TODO(synk): use_affine_level=True, dropout>0 and use_CA (CALayer) branches
    #             are not implemented (module defaults used).
    return jnp.transpose(out, (0, 3, 1, 2))                               # NHWC -> NCHW


# ---------------------------------------------------------------------------
# Pure-JAX reference (f32, HIGHEST precision) for the correctness check
# ---------------------------------------------------------------------------
def ref_forward(params, x_nchw, time_emb):
    G = params["groups"]

    def gn_swish(x, gamma, beta):
        B, C, H, W = x.shape
        xg = x.reshape(B, G, C // G, H, W)
        mean = xg.mean(axis=(2, 3, 4), keepdims=True)
        var = xg.var(axis=(2, 3, 4), keepdims=True)
        xn = ((xg - mean) / jnp.sqrt(var + EPS)).reshape(B, C, H, W)
        y = xn * gamma.reshape(1, C, 1, 1) + beta.reshape(1, C, 1, 1)
        return y * jax.nn.sigmoid(y)

    def conv3(x, w, b):
        y = lax.conv_general_dilated(x, w, (1, 1), "SAME",
                                     dimension_numbers=("NCHW", "HWIO", "NCHW"),
                                     precision=_HI)
        return y + b.reshape(1, -1, 1, 1)

    h = conv3(gn_swish(x_nchw, params["gn1_gamma"], params["gn1_beta"]),
              params["conv1_w"], params["conv1_b"])
    noise = time_emb @ params["noise_w"] + params["noise_b"]
    h = h + noise[:, :, None, None]
    h = conv3(gn_swish(h, params["gn2_gamma"], params["gn2_beta"]),
              params["conv2_w"], params["conv2_b"])
    res = lax.conv_general_dilated(x_nchw, params["res_w"][None, None], (1, 1), "SAME",
                                   dimension_numbers=("NCHW", "HWIO", "NCHW"),
                                   precision=_HI) + params["res_b"].reshape(1, -1, 1, 1)
    return h + res


if __name__ == "__main__":
    B, Cin, Cout, H, W = 2, 4, 8, 16, 16
    groups = 2           # norm_groups (must divide both dim and dim_out)
    emb = 8              # noise_level_emb_dim

    key = jax.random.PRNGKey(0)
    ks = jax.random.split(key, 14)
    params = dict(
        groups=groups,
        gn1_gamma=1.0 + 0.1 * jax.random.normal(ks[0], (Cin,), jnp.float32),
        gn1_beta=0.1 * jax.random.normal(ks[1], (Cin,), jnp.float32),
        conv1_w=0.2 * jax.random.normal(ks[2], (3, 3, Cin, Cout), jnp.float32),
        conv1_b=0.1 * jax.random.normal(ks[3], (Cout,), jnp.float32),
        noise_w=0.2 * jax.random.normal(ks[4], (emb, Cout), jnp.float32),
        noise_b=0.1 * jax.random.normal(ks[5], (Cout,), jnp.float32),
        gn2_gamma=1.0 + 0.1 * jax.random.normal(ks[6], (Cout,), jnp.float32),
        gn2_beta=0.1 * jax.random.normal(ks[7], (Cout,), jnp.float32),
        conv2_w=0.2 * jax.random.normal(ks[8], (3, 3, Cout, Cout), jnp.float32),
        conv2_b=0.1 * jax.random.normal(ks[9], (Cout,), jnp.float32),
        res_w=0.2 * jax.random.normal(ks[10], (Cin, Cout), jnp.float32),
        res_b=0.1 * jax.random.normal(ks[11], (Cout,), jnp.float32),
    )
    x = jax.random.normal(ks[12], (B, Cin, H, W), jnp.float32)
    temb = jax.random.normal(ks[13], (B, emb), jnp.float32)

    out = resnet_block_forward(params, x, temb)
    out = jax.block_until_ready(out)
    assert out.shape == (B, Cout, H, W)

    ref = ref_forward(params, x, temb)
    # Kernel runs the conv GEMMs with bf16 MXU operands (f32 accumulation);
    # reference is full f32 HIGHEST, hence the relaxed tolerance.
    np.testing.assert_allclose(np.asarray(out), np.asarray(ref), rtol=5e-2, atol=8e-2)
    print("KERNEL_OK")
</pallas_src>

<mosaic_0001>
module attributes {stable_mosaic.version = 11 : i64} {
  func.func @kernel(%arg0: i32, %arg1: memref<1x16x16x4xf32, #tpu.memory_space<vmem>>, %arg2: memref<1x4xf32, #tpu.memory_space<vmem>>, %arg3: memref<1x4xf32, #tpu.memory_space<vmem>>, %arg4: memref<9x4x8xbf16, #tpu.memory_space<vmem>>, %arg5: memref<1x1x8xf32, #tpu.memory_space<vmem>>, %arg6: memref<1x8xf32, #tpu.memory_space<vmem>>, %arg7: memref<1x8xf32, #tpu.memory_space<vmem>>, %arg8: memref<9x8x8xbf16, #tpu.memory_space<vmem>>, %arg9: memref<4x8xbf16, #tpu.memory_space<vmem>>, %arg10: memref<1x1x8xf32, #tpu.memory_space<vmem>>, %arg11: memref<1x16x16x8xf32, #tpu.memory_space<vmem>>, %arg12: memref<18x18x4xbf16, #tpu.memory_space<vmem>>, %arg13: memref<16x16x8xf32, #tpu.memory_space<vmem>>, %arg14: memref<18x18x8xbf16, #tpu.memory_space<vmem>>) attributes {dimension_semantics = [#tpu.dimension_semantics<parallel>], iteration_bounds = array<i64: 2>, scalar_prefetch = 0 : i64, scratch_operands = 3 : i64, tpu.core_type = #tpu.core_type<tc>, window_params = [{transform_indices = @transform_0, window_bounds = array<i64: 1, 16, 16, 4>}, {pipeline_mode = #tpu.pipeline_mode<synchronous>, transform_indices = @transform_1, window_bounds = array<i64: 1, 4>}, {pipeline_mode = #tpu.pipeline_mode<synchronous>, transform_indices = @transform_2, window_bounds = array<i64: 1, 4>}, {pipeline_mode = #tpu.pipeline_mode<synchronous>, transform_indices = @transform_3, window_bounds = array<i64: 9, 4, 8>}, {transform_indices = @transform_4, window_bounds = array<i64: 1, 1, 8>}, {pipeline_mode = #tpu.pipeline_mode<synchronous>, transform_indices = @transform_5, window_bounds = array<i64: 1, 8>}, {pipeline_mode = #tpu.pipeline_mode<synchronous>, transform_indices = @transform_6, window_bounds = array<i64: 1, 8>}, {pipeline_mode = #tpu.pipeline_mode<synchronous>, transform_indices = @transform_7, window_bounds = array<i64: 9, 8, 8>}, {pipeline_mode = #tpu.pipeline_mode<synchronous>, transform_indices = @transform_8, window_bounds = array<i64: 4, 8>}, {pipeline_mode = #tpu.pipeline_mode<synchronous>, transform_indices = @transform_9, window_bounds = array<i64: 1, 1, 8>}, {transform_indices = @transform_10, window_bounds = array<i64: 1, 16, 16, 8>}]} {
    %cst = arith.constant 0.000000e+00 : bf16
    %0 = vector.broadcast %cst : bf16 to vector<1x18x4xbf16>
    %c0 = arith.constant 0 : index
    %c0_0 = arith.constant 0 : index
    %c0_1 = arith.constant 0 : index
    %1 = vector.load %arg12[%c0, %c0_0, %c0_1] : memref<18x18x4xbf16, #tpu.memory_space<vmem>>, vector<1x18x4xbf16>
    tpu.vector_store %arg12[%c0, %c0_0, %c0_1], %0 {strides = array<i32>} : memref<18x18x4xbf16, #tpu.memory_space<vmem>>, vector<1x18x4xbf16>,
    %cst_2 = arith.constant 0.000000e+00 : bf16
    %2 = vector.broadcast %cst_2 : bf16 to vector<1x18x4xbf16>
    %c17 = arith.constant 17 : index
    %c0_3 = arith.constant 0 : index
    %c0_4 = arith.constant 0 : index
    %3 = vector.load %arg12[%c17, %c0_3, %c0_4] : memref<18x18x4xbf16, #tpu.memory_space<vmem>>, vector<1x18x4xbf16>
    tpu.vector_store %arg12[%c17, %c0_3, %c0_4], %2 {strides = array<i32>} : memref<18x18x4xbf16, #tpu.memory_space<vmem>>, vector<1x18x4xbf16>,
    %cst_5 = arith.constant 0.000000e+00 : bf16
    %4 = vector.broadcast %cst_5 : bf16 to vector<16x1x4xbf16>
    %c1 = arith.constant 1 : index
    %c0_6 = arith.constant 0 : index
    %c0_7 = arith.constant 0 : index
    %5 = vector.load %arg12[%c1, %c0_6, %c0_7] : memref<18x18x4xbf16, #tpu.memory_space<vmem>>, vector<16x1x4xbf16>
    tpu.vector_store %arg12[%c1, %c0_6, %c0_7], %4 {strides = array<i32>} : memref<18x18x4xbf16, #tpu.memory_space<vmem>>, vector<16x1x4xbf16>,
    %cst_8 = arith.constant 0.000000e+00 : bf16
    %6 = vector.broadcast %cst_8 : bf16 to vector<16x1x4xbf16>
    %c1_9 = arith.constant 1 : index
    %c17_10 = arith.constant 17 : index
    %c0_11 = arith.constant 0 : index
    %7 = vector.load %arg12[%c1_9, %c17_10, %c0_11] : memref<18x18x4xbf16, #tpu.memory_space<vmem>>, vector<16x1x4xbf16>
    tpu.vector_store %arg12[%c1_9, %c17_10, %c0_11], %6 {strides = array<i32>} : memref<18x18x4xbf16, #tpu.memory_space<vmem>>, vector<16x1x4xbf16>,
    %cst_12 = arith.constant 0.000000e+00 : bf16
    %8 = vector.broadcast %cst_12 : bf16 to vector<1x18x8xbf16>
    %c0_13 = arith.constant 0 : index
    %c0_14 = arith.constant 0 : index
    %c0_15 = arith.constant 0 : index
    %9 = vector.load %arg14[%c0_13, %c0_14, %c0_15] : memref<18x18x8xbf16, #tpu.memory_space<vmem>>, vector<1x18x8xbf16>
    tpu.vector_store %arg14[%c0_13, %c0_14, %c0_15], %8 {strides = array<i32>} : memref<18x18x8xbf16, #tpu.memory_space<vmem>>, vector<1x18x8xbf16>,
    %cst_16 = arith.constant 0.000000e+00 : bf16
    %10 = vector.broadcast %cst_16 : bf16 to vector<1x18x8xbf16>
    %c17_17 = arith.constant 17 : index
    %c0_18 = arith.constant 0 : index
    %c0_19 = arith.constant 0 : index
    %11 = vector.load %arg14[%c17_17, %c0_18, %c0_19] : memref<18x18x8xbf16, #tpu.memory_space<vmem>>, vector<1x18x8xbf16>
    tpu.vector_store %arg14[%c17_17, %c0_18, %c0_19], %10 {strides = array<i32>} : memref<18x18x8xbf16, #tpu.memory_space<vmem>>, vector<1x18x8xbf16>,
    %cst_20 = arith.constant 0.000000e+00 : bf16
    %12 = vector.broadcast %cst_20 : bf16 to vector<16x1x8xbf16>
    %c1_21 = arith.constant 1 : index
    %c0_22 = arith.constant 0 : index
    %c0_23 = arith.constant 0 : index
    %13 = vector.load %arg14[%c1_21, %c0_22, %c0_23] : memref<18x18x8xbf16, #tpu.memory_space<vmem>>, vector<16x1x8xbf16>
    tpu.vector_store %arg14[%c1_21, %c0_22, %c0_23], %12 {strides = array<i32>} : memref<18x18x8xbf16, #tpu.memory_space<vmem>>, vector<16x1x8xbf16>,
    %cst_24 = arith.constant 0.000000e+00 : bf16
    %14 = vector.broadcast %cst_24 : bf16 to vector<16x1x8xbf16>
    %c1_25 = arith.constant 1 : index
    %c17_26 = arith.constant 17 : index
    %c0_27 = arith.constant 0 : index
    %15 = vector.load %arg14[%c1_25, %c17_26, %c0_27] : memref<18x18x8xbf16, #tpu.memory_space<vmem>>, vector<16x1x8xbf16>
    tpu.vector_store %arg14[%c1_25, %c17_26, %c0_27], %14 {strides = array<i32>} : memref<18x18x8xbf16, #tpu.memory_space<vmem>>, vector<16x1x8xbf16>,
    %c0_28 = arith.constant 0 : index
    %c0_29 = arith.constant 0 : index
    %c0_30 = arith.constant 0 : index
    %c0_31 = arith.constant 0 : index
    %16 = vector.load %arg1[%c0_28, %c0_29, %c0_30, %c0_31] : memref<1x16x16x4xf32, #tpu.memory_space<vmem>>, vector<1x16x16x4xf32>
    %17 = vector.shape_cast %16 : vector<1x16x16x4xf32> to vector<16x16x4xf32>
    %c0_32 = arith.constant 0 : index
    %c0_33 = arith.constant 0 : index
    %18 = vector.load %arg2[%c0_32, %c0_33] : memref<1x4xf32, #tpu.memory_space<vmem>>, vector<1x4xf32>
    %c0_34 = arith.constant 0 : index
    %c0_35 = arith.constant 0 : index
    %19 = vector.load %arg3[%c0_34, %c0_35] : memref<1x4xf32, #tpu.memory_space<vmem>>, vector<1x4xf32>
    %20 = tpu.iota {dimensions = array<i32: 0>} : vector<2x4xi32>
    %21 = tpu.iota {dimensions = array<i32: 1>} : vector<2x4xi32>
    %c2_i32 = arith.constant 2 : i32
    %22 = vector.broadcast %c2_i32 : i32 to vector<2x4xi32>
    %23 = arith.muli %20, %22 : vector<2x4xi32>
    %24 = arith.cmpi sge, %21, %23 : vector<2x4xi32>
    %c1_i32 = arith.constant 1 : i32
    %25 = vector.broadcast %c1_i32 : i32 to vector<2x4xi32>
    %26 = arith.addi %20, %25 : vector<2x4xi32>
    %c2_i32_36 = arith.constant 2 : i32
    %27 = vector.broadcast %c2_i32_36 : i32 to vector<2x4xi32>
    %28 = arith.muli %26, %27 : vector<2x4xi32>
    %29 = arith.cmpi slt, %21, %28 : vector<2x4xi32>
    %30 = arith.andi %24, %29 : vector<2x4xi1>
    %31 = arith.extui %30 : vector<2x4xi1> to vector<2x4xi32>
    %32 = arith.sitofp %31 : vector<2x4xi32> to vector<2x4xf32>
    %cst_37 = arith.constant dense<0.000000e+00> : vector<16x4xf32>
    %33 = vector.multi_reduction <add>, %17, %cst_37 [0] : vector<16x16x4xf32> to vector<16x4xf32>
    %cst_38 = arith.constant dense<0.000000e+00> : vector<4xf32>
    %34 = vector.multi_reduction <add>, %33, %cst_38 [0] : vector<16x4xf32> to vector<4xf32>
    %35 = vector.shape_cast %34 : vector<4xf32> to vector<1x4xf32>
    %36 = vector.broadcast %35 : vector<1x4xf32> to vector<2x4xf32>
    %37 = arith.mulf %36, %32 : vector<2x4xf32>
    %cst_39 = arith.constant dense<0.000000e+00> : vector<2xf32>
    %38 = vector.multi_reduction <add>, %37, %cst_39 [1] : vector<2x4xf32> to vector<2xf32>
    %39 = vector.shape_cast %38 : vector<2xf32> to vector<2x1xf32>
    %cst_40 = arith.constant 5.120000e+02 : f32
    %40 = vector.broadcast %cst_40 : f32 to vector<2x1xf32>
    %41 = arith.divf %39, %40 : vector<2x1xf32>
    %42 = vector.broadcast %41 : vector<2x1xf32> to vector<2x4xf32>
    %43 = arith.mulf %42, %32 : vector<2x4xf32>
    %cst_41 = arith.constant dense<0.000000e+00> : vector<4xf32>
    %44 = vector.multi_reduction <add>, %43, %cst_41 [0] : vector<2x4xf32> to vector<4xf32>
    %45 = vector.shape_cast %44 : vector<4xf32> to vector<1x4xf32>
    %46 = vector.shape_cast %45 : vector<1x4xf32> to vector<1x1x4xf32>
    %47 = vector.broadcast %46 : vector<1x1x4xf32> to vector<16x16x4xf32>
    %48 = arith.subf %17, %47 : vector<16x16x4xf32>
    %49 = arith.mulf %48, %48 : vector<16x16x4xf32>
    %cst_42 = arith.constant dense<0.000000e+00> : vector<16x4xf32>
    %50 = vector.multi_reduction <add>, %49, %cst_42 [0] : vector<16x16x4xf32> to vector<16x4xf32>
    %cst_43 = arith.constant dense<0.000000e+00> : vector<4xf32>
    %51 = vector.multi_reduction <add>, %50, %cst_43 [0] : vector<16x4xf32> to vector<4xf32>
    %52 = vector.shape_cast %51 : vector<4xf32> to vector<1x4xf32>
    %53 = vector.broadcast %52 : vector<1x4xf32> to vector<2x4xf32>
    %54 = arith.mulf %53, %32 : vector<2x4xf32>
    %cst_44 = arith.constant dense<0.000000e+00> : vector<2xf32>
    %55 = vector.multi_reduction <add>, %54, %cst_44 [1] : vector<2x4xf32> to vector<2xf32>
    %56 = vector.shape_cast %55 : vector<2xf32> to vector<2x1xf32>
    %cst_45 = arith.constant 5.120000e+02 : f32
    %57 = vector.broadcast %cst_45 : f32 to vector<2x1xf32>
    %58 = arith.divf %56, %57 : vector<2x1xf32>
    %cst_46 = arith.constant 9.99999974E-6 : f32
    %59 = vector.broadcast %cst_46 : f32 to vector<2x1xf32>
    %60 = arith.addf %58, %59 : vector<2x1xf32>
    %61 = math.rsqrt %60 : vector<2x1xf32>
    %62 = vector.broadcast %61 : vector<2x1xf32> to vector<2x4xf32>
    %63 = arith.mulf %62, %32 : vector<2x4xf32>
    %cst_47 = arith.constant dense<0.000000e+00> : vector<4xf32>
    %64 = vector.multi_reduction <add>, %63, %cst_47 [0] : vector<2x4xf32> to vector<4xf32>
    %65 = vector.shape_cast %64 : vector<4xf32> to vector<1x4xf32>
    %66 = arith.mulf %65, %18 : vector<1x4xf32>
    %67 = vector.shape_cast %66 : vector<1x4xf32> to vector<1x1x4xf32>
    %68 = vector.shape_cast %19 : vector<1x4xf32> to vector<1x1x4xf32>
    %69 = vector.broadcast %67 : vector<1x1x4xf32> to vector<16x16x4xf32>
    %70 = arith.mulf %48, %69 : vector<16x16x4xf32>
    %71 = vector.broadcast %68 : vector<1x1x4xf32> to vector<16x16x4xf32>
    %72 = arith.addf %70, %71 : vector<16x16x4xf32>
    %73 = arith.negf %72 : vector<16x16x4xf32>
    %74 = math.exp %73 : vector<16x16x4xf32>
    %cst_48 = arith.constant 1.000000e+00 : f32
    %75 = vector.broadcast %cst_48 : f32 to vector<16x16x4xf32>
    %76 = arith.addf %75, %74 : vector<16x16x4xf32>
    %77 = arith.divf %75, %76 : vector<16x16x4xf32>
    %78 = arith.mulf %72, %77 : vector<16x16x4xf32>
    %79 = arith.truncf %78 : vector<16x16x4xf32> to vector<16x16x4xbf16>
    %c1_49 = arith.constant 1 : index
    %c1_50 = arith.constant 1 : index
    %c0_51 = arith.constant 0 : index
    %80 = vector.load %arg12[%c1_49, %c1_50, %c0_51] : memref<18x18x4xbf16, #tpu.memory_space<vmem>>, vector<16x16x4xbf16>
    tpu.vector_store %arg12[%c1_49, %c1_50, %c0_51], %79 {strides = array<i32>} : memref<18x18x4xbf16, #tpu.memory_space<vmem>>, vector<16x16x4xbf16>,
    %c0_52 = arith.constant 0 : index
    %c0_53 = arith.constant 0 : index
    %c0_54 = arith.constant 0 : index
    %81 = vector.load %arg12[%c0_52, %c0_53, %c0_54] : memref<18x18x4xbf16, #tpu.memory_space<vmem>>, vector<16x16x4xbf16>
    %c0_55 = arith.constant 0 : index
    %c0_56 = arith.constant 0 : index
    %c0_57 = arith.constant 0 : index
    %82 = vector.load %arg4[%c0_55, %c0_56, %c0_57] : memref<9x4x8xbf16, #tpu.memory_space<vmem>>, vector<1x4x8xbf16>
    %83 = vector.shape_cast %82 : vector<1x4x8xbf16> to vector<4x8xbf16>
    %cst_58 = arith.constant dense<0.000000e+00> : vector<16x16x8xf32>
    %84 = tpu.matmul %81, %83, %cst_58 {dimension_numbers = #tpu.dot_dimension_numbers<[2], [0], [0, 1], [1], [0, 0, 0, 1, 1, 1], [], []>} : vector<16x16x4xbf16>, vector<4x8xbf16>, vector<16x16x8xf32> -> vector<16x16x8xf32>
    %c0_59 = arith.constant 0 : index
    %c1_60 = arith.constant 1 : index
    %c0_61 = arith.constant 0 : index
    %85 = vector.load %arg12[%c0_59, %c1_60, %c0_61] : memref<18x18x4xbf16, #tpu.memory_space<vmem>>, vector<16x16x4xbf16>
    %c1_62 = arith.constant 1 : index
    %c0_63 = arith.constant 0 : index
    %c0_64 = arith.constant 0 : index
    %86 = vector.load %arg4[%c1_62, %c0_63, %c0_64] : memref<9x4x8xbf16, #tpu.memory_space<vmem>>, vector<1x4x8xbf16>
    %87 = vector.shape_cast %86 : vector<1x4x8xbf16> to vector<4x8xbf16>
    %cst_65 = arith.constant dense<0.000000e+00> : vector<16x16x8xf32>
    %88 = tpu.matmul %85, %87, %cst_65 {dimension_numbers = #tpu.dot_dimension_numbers<[2], [0], [0, 1], [1], [0, 0, 0, 1, 1, 1], [], []>} : vector<16x16x4xbf16>, vector<4x8xbf16>, vector<16x16x8xf32> -> vector<16x16x8xf32>
    %89 = arith.addf %84, %88 : vector<16x16x8xf32>
    %c0_66 = arith.constant 0 : index
    %c2 = arith.constant 2 : index
    %c0_67 = arith.constant 0 : index
    %90 = vector.load %arg12[%c0_66, %c2, %c0_67] : memref<18x18x4xbf16, #tpu.memory_space<vmem>>, vector<16x16x4xbf16>
    %c2_68 = arith.constant 2 : index
    %c0_69 = arith.constant 0 : index
    %c0_70 = arith.constant 0 : index
    %91 = vector.load %arg4[%c2_68, %c0_69, %c0_70] : memref<9x4x8xbf16, #tpu.memory_space<vmem>>, vector<1x4x8xbf16>
    %92 = vector.shape_cast %91 : vector<1x4x8xbf16> to vector<4x8xbf16>
    %cst_71 = arith.constant dense<0.000000e+00> : vector<16x16x8xf32>
    %93 = tpu.matmul %90, %92, %cst_71 {dimension_numbers = #tpu.dot_dimension_numbers<[2], [0], [0, 1], [1], [0, 0, 0, 1, 1, 1], [], []>} : vector<16x16x4xbf16>, vector<4x8xbf16>, vector<16x16x8xf32> -> vector<16x16x8xf32>
    %94 = arith.addf %89, %93 : vector<16x16x8xf32>
    %c1_72 = arith.constant 1 : index
    %c0_73 = arith.constant 0 : index
    %c0_74 = arith.constant 0 : index
    %95 = vector.load %arg12[%c1_72, %c0_73, %c0_74] : memref<18x18x4xbf16, #tpu.memory_space<vmem>>, vector<16x16x4xbf16>
    %c3 = arith.constant 3 : index
    %c0_75 = arith.constant 0 : index
    %c0_76 = arith.constant 0 : index
    %96 = vector.load %arg4[%c3, %c0_75, %c0_76] : memref<9x4x8xbf16, #tpu.memory_space<vmem>>, vector<1x4x8xbf16>
    %97 = vector.shape_cast %96 : vector<1x4x8xbf16> to vector<4x8xbf16>
    %cst_77 = arith.constant dense<0.000000e+00> : vector<16x16x8xf32>
    %98 = tpu.matmul %95, %97, %cst_77 {dimension_numbers = #tpu.dot_dimension_numbers<[2], [0], [0, 1], [1], [0, 0, 0, 1, 1, 1], [], []>} : vector<16x16x4xbf16>, vector<4x8xbf16>, vector<16x16x8xf32> -> vector<16x16x8xf32>
    %99 = arith.addf %94, %98 : vector<16x16x8xf32>
    %c1_78 = arith.constant 1 : index
    %c1_79 = arith.constant 1 : index
    %c0_80 = arith.constant 0 : index
    %100 = vector.load %arg12[%c1_78, %c1_79, %c0_80] : memref<18x18x4xbf16, #tpu.memory_space<vmem>>, vector<16x16x4xbf16>
    %c4 = arith.constant 4 : index
    %c0_81 = arith.constant 0 : index
    %c0_82 = arith.constant 0 : index
    %101 = vector.load %arg4[%c4, %c0_81, %c0_82] : memref<9x4x8xbf16, #tpu.memory_space<vmem>>, vector<1x4x8xbf16>
    %102 = vector.shape_cast %101 : vector<1x4x8xbf16> to vector<4x8xbf16>
    %cst_83 = arith.constant dense<0.000000e+00> : vector<16x16x8xf32>
    %103 = tpu.matmul %100, %102, %cst_83 {dimension_numbers = #tpu.dot_dimension_numbers<[2], [0], [0, 1], [1], [0, 0, 0, 1, 1, 1], [], []>} : vector<16x16x4xbf16>, vector<4x8xbf16>, vector<16x16x8xf32> -> vector<16x16x8xf32>
    %104 = arith.addf %99, %103 : vector<16x16x8xf32>
    %c1_84 = arith.constant 1 : index
    %c2_85 = arith.constant 2 : index
    %c0_86 = arith.constant 0 : index
    %105 = vector.load %arg12[%c1_84, %c2_85, %c0_86] : memref<18x18x4xbf16, #tpu.memory_space<vmem>>, vector<16x16x4xbf16>
    %c5 = arith.constant 5 : index
    %c0_87 = arith.constant 0 : index
    %c0_88 = arith.constant 0 : index
    %106 = vector.load %arg4[%c5, %c0_87, %c0_88] : memref<9x4x8xbf16, #tpu.memory_space<vmem>>, vector<1x4x8xbf16>
    %107 = vector.shape_cast %106 : vector<1x4x8xbf16> to vector<4x8xbf16>
    %cst_89 = arith.constant dense<0.000000e+00> : vector<16x16x8xf32>
    %108 = tpu.matmul %105, %107, %cst_89 {dimension_numbers = #tpu.dot_dimension_numbers<[2], [0], [0, 1], [1], [0, 0, 0, 1, 1, 1], [], []>} : vector<16x16x4xbf16>, vector<4x8xbf16>, vector<16x16x8xf32> -> vector<16x16x8xf32>
    %109 = arith.addf %104, %108 : vector<16x16x8xf32>
    %c2_90 = arith.constant 2 : index
    %c0_91 = arith.constant 0 : index
    %c0_92 = arith.constant 0 : index
    %110 = vector.load %arg12[%c2_90, %c0_91, %c0_92] : memref<18x18x4xbf16, #tpu.memory_space<vmem>>, vector<16x16x4xbf16>
    %c6 = arith.constant 6 : index
    %c0_93 = arith.constant 0 : index
    %c0_94 = arith.constant 0 : index
    %111 = vector.load %arg4[%c6, %c0_93, %c0_94] : memref<9x4x8xbf16, #tpu.memory_space<vmem>>, vector<1x4x8xbf16>
    %112 = vector.shape_cast %111 : vector<1x4x8xbf16> to vector<4x8xbf16>
    %cst_95 = arith.constant dense<0.000000e+00> : vector<16x16x8xf32>
    %113 = tpu.matmul %110, %112, %cst_95 {dimension_numbers = #tpu.dot_dimension_numbers<[2], [0], [0, 1], [1], [0, 0, 0, 1, 1, 1], [], []>} : vector<16x16x4xbf16>, vector<4x8xbf16>, vector<16x16x8xf32> -> vector<16x16x8xf32>
    %114 = arith.addf %109, %113 : vector<16x16x8xf32>
    %c2_96 = arith.constant 2 : index
    %c1_97 = arith.constant 1 : index
    %c0_98 = arith.constant 0 : index
    %115 = vector.load %arg12[%c2_96, %c1_97, %c0_98] : memref<18x18x4xbf16, #tpu.memory_space<vmem>>, vector<16x16x4xbf16>
    %c7 = arith.constant 7 : index
    %c0_99 = arith.constant 0 : index
    %c0_100 = arith.constant 0 : index
    %116 = vector.load %arg4[%c7, %c0_99, %c0_100] : memref<9x4x8xbf16, #tpu.memory_space<vmem>>, vector<1x4x8xbf16>
    %117 = vector.shape_cast %116 : vector<1x4x8xbf16> to vector<4x8xbf16>
    %cst_101 = arith.constant dense<0.000000e+00> : vector<16x16x8xf32>
    %118 = tpu.matmul %115, %117, %cst_101 {dimension_numbers = #tpu.dot_dimension_numbers<[2], [0], [0, 1], [1], [0, 0, 0, 1, 1, 1], [], []>} : vector<16x16x4xbf16>, vector<4x8xbf16>, vector<16x16x8xf32> -> vector<16x16x8xf32>
    %119 = arith.addf %114, %118 : vector<16x16x8xf32>
    %c2_102 = arith.constant 2 : index
    %c2_103 = arith.constant 2 : index
    %c0_104 = arith.constant 0 : index
    %120 = vector.load %arg12[%c2_102, %c2_103, %c0_104] : memref<18x18x4xbf16, #tpu.memory_space<vmem>>, vector<16x16x4xbf16>
    %c8 = arith.constant 8 : index
    %c0_105 = arith.constant 0 : index
    %c0_106 = arith.constant 0 : index
    %121 = vector.load %arg4[%c8, %c0_105, %c0_106] : memref<9x4x8xbf16, #tpu.memory_space<vmem>>, vector<1x4x8xbf16>
    %122 = vector.shape_cast %121 : vector<1x4x8xbf16> to vector<4x8xbf16>
    %cst_107 = arith.constant dense<0.000000e+00> : vector<16x16x8xf32>
    %123 = tpu.matmul %120, %122, %cst_107 {dimension_numbers = #tpu.dot_dimension_numbers<[2], [0], [0, 1], [1], [0, 0, 0, 1, 1, 1], [], []>} : vector<16x16x4xbf16>, vector<4x8xbf16>, vector<16x16x8xf32> -> vector<16x16x8xf32>
    %124 = arith.addf %119, %123 : vector<16x16x8xf32>
    %c0_108 = arith.constant 0 : index
    %c0_109 = arith.constant 0 : index
    %c0_110 = arith.constant 0 : index
    %125 = vector.load %arg5[%c0_108, %c0_109, %c0_110] : memref<1x1x8xf32, #tpu.memory_space<vmem>>, vector<1x1x8xf32>
    %126 = vector.broadcast %125 : vector<1x1x8xf32> to vector<16x16x8xf32>
    %127 = arith.addf %124, %126 : vector<16x16x8xf32>
    %c0_111 = arith.constant 0 : index
    %c0_112 = arith.constant 0 : index
    %c0_113 = arith.constant 0 : index
    %128 = vector.load %arg13[%c0_111, %c0_112, %c0_113] : memref<16x16x8xf32, #tpu.memory_space<vmem>>, vector<16x16x8xf32>
    tpu.vector_store %arg13[%c0_111, %c0_112, %c0_113], %127 {strides = array<i32>} : memref<16x16x8xf32, #tpu.memory_space<vmem>>, vector<16x16x8xf32>,
    %c0_114 = arith.constant 0 : index
    %c0_115 = arith.constant 0 : index
    %c0_116 = arith.constant 0 : index
    %129 = vector.load %arg13[%c0_114, %c0_115, %c0_116] : memref<16x16x8xf32, #tpu.memory_space<vmem>>, vector<16x16x8xf32>
    %c0_117 = arith.constant 0 : index
    %c0_118 = arith.constant 0 : index
    %130 = vector.load %arg6[%c0_117, %c0_118] : memref<1x8xf32, #tpu.memory_space<vmem>>, vector<1x8xf32>
    %c0_119 = arith.constant 0 : index
    %c0_120 = arith.constant 0 : index
    %131 = vector.load %arg7[%c0_119, %c0_120] : memref<1x8xf32, #tpu.memory_space<vmem>>, vector<1x8xf32>
    %132 = tpu.iota {dimensions = array<i32: 0>} : vector<2x8xi32>
    %133 = tpu.iota {dimensions = array<i32: 1>} : vector<2x8xi32>
    %c4_i32 = arith.constant 4 : i32
    %134 = vector.broadcast %c4_i32 : i32 to vector<2x8xi32>
    %135 = arith.muli %132, %134 : vector<2x8xi32>
    %136 = arith.cmpi sge, %133, %135 : vector<2x8xi32>
    %c1_i32_121 = arith.constant 1 : i32
    %137 = vector.broadcast %c1_i32_121 : i32 to vector<2x8xi32>
    %138 = arith.addi %132, %137 : vector<2x8xi32>
    %c4_i32_122 = arith.constant 4 : i32
    %139 = vector.broadcast %c4_i32_122 : i32 to vector<2x8xi32>
    %140 = arith.muli %138, %139 : vector<2x8xi32>
    %141 = arith.cmpi slt, %133, %140 : vector<2x8xi32>
    %142 = arith.andi %136, %141 : vector<2x8xi1>
    %143 = arith.extui %142 : vector<2x8xi1> to vector<2x8xi32>
    %144 = arith.sitofp %143 : vector<2x8xi32> to vector<2x8xf32>
    %cst_123 = arith.constant dense<0.000000e+00> : vector<16x8xf32>
    %145 = vector.multi_reduction <add>, %129, %cst_123 [0] : vector<16x16x8xf32> to vector<16x8xf32>
    %cst_124 = arith.constant dense<0.000000e+00> : vector<8xf32>
    %146 = vector.multi_reduction <add>, %145, %cst_124 [0] : vector<16x8xf32> to vector<8xf32>
    %147 = vector.shape_cast %146 : vector<8xf32> to vector<1x8xf32>
    %148 = vector.broadcast %147 : vector<1x8xf32> to vector<2x8xf32>
    %149 = arith.mulf %148, %144 : vector<2x8xf32>
    %cst_125 = arith.constant dense<0.000000e+00> : vector<2xf32>
    %150 = vector.multi_reduction <add>, %149, %cst_125 [1] : vector<2x8xf32> to vector<2xf32>
    %151 = vector.shape_cast %150 : vector<2xf32> to vector<2x1xf32>
    %cst_126 = arith.constant 1.024000e+03 : f32
    %152 = vector.broadcast %cst_126 : f32 to vector<2x1xf32>
    %153 = arith.divf %151, %152 : vector<2x1xf32>
    %154 = vector.broadcast %153 : vector<2x1xf32> to vector<2x8xf32>
    %155 = arith.mulf %154, %144 : vector<2x8xf32>
    %cst_127 = arith.constant dense<0.000000e+00> : vector<8xf32>
    %156 = vector.multi_reduction <add>, %155, %cst_127 [0] : vector<2x8xf32> to vector<8xf32>
    %157 = vector.shape_cast %156 : vector<8xf32> to vector<1x8xf32>
    %158 = vector.shape_cast %157 : vector<1x8xf32> to vector<1x1x8xf32>
    %159 = vector.broadcast %158 : vector<1x1x8xf32> to vector<16x16x8xf32>
    %160 = arith.subf %129, %159 : vector<16x16x8xf32>
    %161 = arith.mulf %160, %160 : vector<16x16x8xf32>
    %cst_128 = arith.constant dense<0.000000e+00> : vector<16x8xf32>
    %162 = vector.multi_reduction <add>, %161, %cst_128 [0] : vector<16x16x8xf32> to vector<16x8xf32>
    %cst_129 = arith.constant dense<0.000000e+00> : vector<8xf32>
    %163 = vector.multi_reduction <add>, %162, %cst_129 [0] : vector<16x8xf32> to vector<8xf32>
    %164 = vector.shape_cast %163 : vector<8xf32> to vector<1x8xf32>
    %165 = vector.broadcast %164 : vector<1x8xf32> to vector<2x8xf32>
    %166 = arith.mulf %165, %144 : vector<2x8xf32>
    %cst_130 = arith.constant dense<0.000000e+00> : vector<2xf32>
    %167 = vector.multi_reduction <add>, %166, %cst_130 [1] : vector<2x8xf32> to vector<2xf32>
    %168 = vector.shape_cast %167 : vector<2xf32> to vector<2x1xf32>
    %cst_131 = arith.constant 1.024000e+03 : f32
    %169 = vector.broadcast %cst_131 : f32 to vector<2x1xf32>
    %170 = arith.divf %168, %169 : vector<2x1xf32>
    %cst_132 = arith.constant 9.99999974E-6 : f32
    %171 = vector.broadcast %cst_132 : f32 to vector<2x1xf32>
    %172 = arith.addf %170, %171 : vector<2x1xf32>
    %173 = math.rsqrt %172 : vector<2x1xf32>
    %174 = vector.broadcast %173 : vector<2x1xf32> to vector<2x8xf32>
    %175 = arith.mulf %174, %144 : vector<2x8xf32>
    %cst_133 = arith.constant dense<0.000000e+00> : vector<8xf32>
    %176 = vector.multi_reduction <add>, %175, %cst_133 [0] : vector<2x8xf32> to vector<8xf32>
    %177 = vector.shape_cast %176 : vector<8xf32> to vector<1x8xf32>
    %178 = arith.mulf %177, %130 : vector<1x8xf32>
    %179 = vector.shape_cast %178 : vector<1x8xf32> to vector<1x1x8xf32>
    %180 = vector.shape_cast %131 : vector<1x8xf32> to vector<1x1x8xf32>
    %181 = vector.broadcast %179 : vector<1x1x8xf32> to vector<16x16x8xf32>
    %182 = arith.mulf %160, %181 : vector<16x16x8xf32>
    %183 = vector.broadcast %180 : vector<1x1x8xf32> to vector<16x16x8xf32>
    %184 = arith.addf %182, %183 : vector<16x16x8xf32>
    %185 = arith.negf %184 : vector<16x16x8xf32>
    %186 = math.exp %185 : vector<16x16x8xf32>
    %cst_134 = arith.constant 1.000000e+00 : f32
    %187 = vector.broadcast %cst_134 : f32 to vector<16x16x8xf32>
    %188 = arith.addf %187, %186 : vector<16x16x8xf32>
    %189 = arith.divf %187, %188 : vector<16x16x8xf32>
    %190 = arith.mulf %184, %189 : vector<16x16x8xf32>
    %191 = arith.truncf %190 : vector<16x16x8xf32> to vector<16x16x8xbf16>
    %c1_135 = arith.constant 1 : index
    %c1_136 = arith.constant 1 : index
    %c0_137 = arith.constant 0 : index
    %192 = vector.load %arg14[%c1_135, %c1_136, %c0_137] : memref<18x18x8xbf16, #tpu.memory_space<vmem>>, vector<16x16x8xbf16>
    tpu.vector_store %arg14[%c1_135, %c1_136, %c0_137], %191 {strides = array<i32>} : memref<18x18x8xbf16, #tpu.memory_space<vmem>>, vector<16x16x8xbf16>,
    %c0_138 = arith.constant 0 : index
    %c0_139 = arith.constant 0 : index
    %c0_140 = arith.constant 0 : index
    %193 = vector.load %arg14[%c0_138, %c0_139, %c0_140] : memref<18x18x8xbf16, #tpu.memory_space<vmem>>, vector<16x16x8xbf16>
    %c0_141 = arith.constant 0 : index
    %c0_142 = arith.constant 0 : index
    %c0_143 = arith.constant 0 : index
    %194 = vector.load %arg8[%c0_141, %c0_142, %c0_143] : memref<9x8x8xbf16, #tpu.memory_space<vmem>>, vector<1x8x8xbf16>
    %195 = vector.shape_cast %194 : vector<1x8x8xbf16> to vector<8x8xbf16>
    %cst_144 = arith.constant dense<0.000000e+00> : vector<16x16x8xf32>
    %196 = tpu.matmul %193, %195, %cst_144 {dimension_numbers = #tpu.dot_dimension_numbers<[2], [0], [0, 1], [1], [0, 0, 0, 1, 1, 1], [], []>} : vector<16x16x8xbf16>, vector<8x8xbf16>, vector<16x16x8xf32> -> vector<16x16x8xf32>
    %c0_145 = arith.constant 0 : index
    %c1_146 = arith.constant 1 : index
    %c0_147 = arith.constant 0 : index
    %197 = vector.load %arg14[%c0_145, %c1_146, %c0_147] : memref<18x18x8xbf16, #tpu.memory_space<vmem>>, vector<16x16x8xbf16>
    %c1_148 = arith.constant 1 : index
    %c0_149 = arith.constant 0 : index
    %c0_150 = arith.constant 0 : index
    %198 = vector.load %arg8[%c1_148, %c0_149, %c0_150] : memref<9x8x8xbf16, #tpu.memory_space<vmem>>, vector<1x8x8xbf16>
    %199 = vector.shape_cast %198 : vector<1x8x8xbf16> to vector<8x8xbf16>
    %cst_151 = arith.constant dense<0.000000e+00> : vector<16x16x8xf32>
    %200 = tpu.matmul %197, %199, %cst_151 {dimension_numbers = #tpu.dot_dimension_numbers<[2], [0], [0, 1], [1], [0, 0, 0, 1, 1, 1], [], []>} : vector<16x16x8xbf16>, vector<8x8xbf16>, vector<16x16x8xf32> -> vector<16x16x8xf32>
    %201 = arith.addf %196, %200 : vector<16x16x8xf32>
    %c0_152 = arith.constant 0 : index
    %c2_153 = arith.constant 2 : index
    %c0_154 = arith.constant 0 : index
    %202 = vector.load %arg14[%c0_152, %c2_153, %c0_154] : memref<18x18x8xbf16, #tpu.memory_space<vmem>>, vector<16x16x8xbf16>
    %c2_155 = arith.constant 2 : index
    %c0_156 = arith.constant 0 : index
    %c0_157 = arith.constant 0 : index
    %203 = vector.load %arg8[%c2_155, %c0_156, %c0_157] : memref<9x8x8xbf16, #tpu.memory_space<vmem>>, vector<1x8x8xbf16>
    %204 = vector.shape_cast %203 : vector<1x8x8xbf16> to vector<8x8xbf16>
    %cst_158 = arith.constant dense<0.000000e+00> : vector<16x16x8xf32>
    %205 = tpu.matmul %202, %204, %cst_158 {dimension_numbers = #tpu.dot_dimension_numbers<[2], [0], [0, 1], [1], [0, 0, 0, 1, 1, 1], [], []>} : vector<16x16x8xbf16>, vector<8x8xbf16>, vector<16x16x8xf32> -> vector<16x16x8xf32>
    %206 = arith.addf %201, %205 : vector<16x16x8xf32>
    %c1_159 = arith.constant 1 : index
    %c0_160 = arith.constant 0 : index
    %c0_161 = arith.constant 0 : index
    %207 = vector.load %arg14[%c1_159, %c0_160, %c0_161] : memref<18x18x8xbf16, #tpu.memory_space<vmem>>, vector<16x16x8xbf16>
    %c3_162 = arith.constant 3 : index
    %c0_163 = arith.constant 0 : index
    %c0_164 = arith.constant 0 : index
    %208 = vector.load %arg8[%c3_162, %c0_163, %c0_164] : memref<9x8x8xbf16, #tpu.memory_space<vmem>>, vector<1x8x8xbf16>
    %209 = vector.shape_cast %208 : vector<1x8x8xbf16> to vector<8x8xbf16>
    %cst_165 = arith.constant dense<0.000000e+00> : vector<16x16x8xf32>
    %210 = tpu.matmul %207, %209, %cst_165 {dimension_numbers = #tpu.dot_dimension_numbers<[2], [0], [0, 1], [1], [0, 0, 0, 1, 1, 1], [], []>} : vector<16x16x8xbf16>, vector<8x8xbf16>, vector<16x16x8xf32> -> vector<16x16x8xf32>
    %211 = arith.addf %206, %210 : vector<16x16x8xf32>
    %c1_166 = arith.constant 1 : index
    %c1_167 = arith.constant 1 : index
    %c0_168 = arith.constant 0 : index
    %212 = vector.load %arg14[%c1_166, %c1_167, %c0_168] : memref<18x18x8xbf16, #tpu.memory_space<vmem>>, vector<16x16x8xbf16>
    %c4_169 = arith.constant 4 : index
    %c0_170 = arith.constant 0 : index
    %c0_171 = arith.constant 0 : index
    %213 = vector.load %arg8[%c4_169, %c0_170, %c0_171] : memref<9x8x8xbf16, #tpu.memory_space<vmem>>, vector<1x8x8xbf16>
    %214 = vector.shape_cast %213 : vector<1x8x8xbf16> to vector<8x8xbf16>
    %cst_172 = arith.constant dense<0.000000e+00> : vector<16x16x8xf32>
    %215 = tpu.matmul %212, %214, %cst_172 {dimension_numbers = #tpu.dot_dimension_numbers<[2], [0], [0, 1], [1], [0, 0, 0, 1, 1, 1], [], []>} : vector<16x16x8xbf16>, vector<8x8xbf16>, vector<16x16x8xf32> -> vector<16x16x8xf32>
    %216 = arith.addf %211, %215 : vector<16x16x8xf32>
    %c1_173 = arith.constant 1 : index
    %c2_174 = arith.constant 2 : index
    %c0_175 = arith.constant 0 : index
    %217 = vector.load %arg14[%c1_173, %c2_174, %c0_175] : memref<18x18x8xbf16, #tpu.memory_space<vmem>>, vector<16x16x8xbf16>
    %c5_176 = arith.constant 5 : index
    %c0_177 = arith.constant 0 : index
    %c0_178 = arith.constant 0 : index
    %218 = vector.load %arg8[%c5_176, %c0_177, %c0_178] : memref<9x8x8xbf16, #tpu.memory_space<vmem>>, vector<1x8x8xbf16>
    %219 = vector.shape_cast %218 : vector<1x8x8xbf16> to vector<8x8xbf16>
    %cst_179 = arith.constant dense<0.000000e+00> : vector<16x16x8xf32>
    %220 = tpu.matmul %217, %219, %cst_179 {dimension_numbers = #tpu.dot_dimension_numbers<[2], [0], [0, 1], [1], [0, 0, 0, 1, 1, 1], [], []>} : vector<16x16x8xbf16>, vector<8x8xbf16>, vector<16x16x8xf32> -> vector<16x16x8xf32>
    %221 = arith.addf %216, %220 : vector<16x16x8xf32>
    %c2_180 = arith.constant 2 : index
    %c0_181 = arith.constant 0 : index
    %c0_182 = arith.constant 0 : index
    %222 = vector.load %arg14[%c2_180, %c0_181, %c0_182] : memref<18x18x8xbf16, #tpu.memory_space<vmem>>, vector<16x16x8xbf16>
    %c6_183 = arith.constant 6 : index
    %c0_184 = arith.constant 0 : index
    %c0_185 = arith.constant 0 : index
    %223 = vector.load %arg8[%c6_183, %c0_184, %c0_185] : memref<9x8x8xbf16, #tpu.memory_space<vmem>>, vector<1x8x8xbf16>
    %224 = vector.shape_cast %223 : vector<1x8x8xbf16> to vector<8x8xbf16>
    %cst_186 = arith.constant dense<0.000000e+00> : vector<16x16x8xf32>
    %225 = tpu.matmul %222, %224, %cst_186 {dimension_numbers = #tpu.dot_dimension_numbers<[2], [0], [0, 1], [1], [0, 0, 0, 1, 1, 1], [], []>} : vector<16x16x8xbf16>, vector<8x8xbf16>, vector<16x16x8xf32> -> vector<16x16x8xf32>
    %226 = arith.addf %221, %225 : vector<16x16x8xf32>
    %c2_187 = arith.constant 2 : index
    %c1_188 = arith.constant 1 : index
    %c0_189 = arith.constant 0 : index
    %227 = vector.load %arg14[%c2_187, %c1_188, %c0_189] : memref<18x18x8xbf16, #tpu.memory_space<vmem>>, vector<16x16x8xbf16>
    %c7_190 = arith.constant 7 : index
    %c0_191 = arith.constant 0 : index
    %c0_192 = arith.constant 0 : index
    %228 = vector.load %arg8[%c7_190, %c0_191, %c0_192] : memref<9x8x8xbf16, #tpu.memory_space<vmem>>, vector<1x8x8xbf16>
    %229 = vector.shape_cast %228 : vector<1x8x8xbf16> to vector<8x8xbf16>
    %cst_193 = arith.constant dense<0.000000e+00> : vector<16x16x8xf32>
    %230 = tpu.matmul %227, %229, %cst_193 {dimension_numbers = #tpu.dot_dimension_numbers<[2], [0], [0, 1], [1], [0, 0, 0, 1, 1, 1], [], []>} : vector<16x16x8xbf16>, vector<8x8xbf16>, vector<16x16x8xf32> -> vector<16x16x8xf32>
    %231 = arith.addf %226, %230 : vector<16x16x8xf32>
    %c2_194 = arith.constant 2 : index
    %c2_195 = arith.constant 2 : index
    %c0_196 = arith.constant 0 : index
    %232 = vector.load %arg14[%c2_194, %c2_195, %c0_196] : memref<18x18x8xbf16, #tpu.memory_space<vmem>>, vector<16x16x8xbf16>
    %c8_197 = arith.constant 8 : index
    %c0_198 = arith.constant 0 : index
    %c0_199 = arith.constant 0 : index
    %233 = vector.load %arg8[%c8_197, %c0_198, %c0_199] : memref<9x8x8xbf16, #tpu.memory_space<vmem>>, vector<1x8x8xbf16>
    %234 = vector.shape_cast %233 : vector<1x8x8xbf16> to vector<8x8xbf16>
    %cst_200 = arith.constant dense<0.000000e+00> : vector<16x16x8xf32>
    %235 = tpu.matmul %232, %234, %cst_200 {dimension_numbers = #tpu.dot_dimension_numbers<[2], [0], [0, 1], [1], [0, 0, 0, 1, 1, 1], [], []>} : vector<16x16x8xbf16>, vector<8x8xbf16>, vector<16x16x8xf32> -> vector<16x16x8xf32>
    %236 = arith.addf %231, %235 : vector<16x16x8xf32>
    %c0_201 = arith.constant 0 : index
    %c0_202 = arith.constant 0 : index
    %c0_203 = arith.constant 0 : index
    %c0_204 = arith.constant 0 : index
    %237 = vector.load %arg1[%c0_201, %c0_202, %c0_203, %c0_204] : memref<1x16x16x4xf32, #tpu.memory_space<vmem>>, vector<1x16x16x4xf32>
    %238 = vector.shape_cast %237 : vector<1x16x16x4xf32> to vector<16x16x4xf32>
    %239 = arith.truncf %238 : vector<16x16x4xf32> to vector<16x16x4xbf16>
    %c0_205 = arith.constant 0 : index
    %c0_206 = arith.constant 0 : index
    %240 = vector.load %arg9[%c0_205, %c0_206] : memref<4x8xbf16, #tpu.memory_space<vmem>>, vector<4x8xbf16>
    %cst_207 = arith.constant dense<0.000000e+00> : vector<16x16x8xf32>
    %241 = tpu.matmul %239, %240, %cst_207 {dimension_numbers = #tpu.dot_dimension_numbers<[2], [0], [0, 1], [1], [0, 0, 0, 1, 1, 1], [], []>} : vector<16x16x4xbf16>, vector<4x8xbf16>, vector<16x16x8xf32> -> vector<16x16x8xf32>
    %242 = arith.addf %236, %241 : vector<16x16x8xf32>
    %c0_208 = arith.constant 0 : index
    %c0_209 = arith.constant 0 : index
    %c0_210 = arith.constant 0 : index
    %243 = vector.load %arg10[%c0_208, %c0_209, %c0_210] : memref<1x1x8xf32, #tpu.memory_space<vmem>>, vector<1x1x8xf32>
    %244 = vector.broadcast %243 : vector<1x1x8xf32> to vector<16x16x8xf32>
    %245 = arith.addf %242, %244 : vector<16x16x8xf32>
    %246 = vector.shape_cast %245 : vector<16x16x8xf32> to vector<1x16x16x8xf32>
    %c0_211 = arith.constant 0 : index
    %c0_212 = arith.constant 0 : index
    %c0_213 = arith.constant 0 : index
    %c0_214 = arith.constant 0 : index
    %247 = vector.load %arg11[%c0_211, %c0_212, %c0_213, %c0_214] : memref<1x16x16x8xf32, #tpu.memory_space<vmem>>, vector<1x16x16x8xf32>
    tpu.vector_store %arg11[%c0_211, %c0_212, %c0_213, %c0_214], %246 {strides = array<i32>} : memref<1x16x16x8xf32, #tpu.memory_space<vmem>>, vector<1x16x16x8xf32>,
    return
  }
  func.func @transform_0(%arg0: i32) -> (i32, i32, i32, i32) {
    %c0_i32 = arith.constant 0 : i32
    %c0_i32_0 = arith.constant 0 : i32
    %c0_i32_1 = arith.constant 0 : i32
    %c0_i32_2 = arith.constant 0 : i32
    return %arg0, %c0_i32, %c0_i32_0, %c0_i32_1 : i32, i32, i32, i32
  }
  func.func @transform_1(%arg0: i32) -> (i32, i32) {
    %c0_i32 = arith.constant 0 : i32
    %c0_i32_0 = arith.constant 0 : i32
    %c0_i32_1 = arith.constant 0 : i32
    return %c0_i32, %c0_i32_0 : i32, i32
  }
  func.func @transform_2(%arg0: i32) -> (i32, i32) {
    %c0_i32 = arith.constant 0 : i32
    %c0_i32_0 = arith.constant 0 : i32
    %c0_i32_1 = arith.constant 0 : i32
    return %c0_i32, %c0_i32_0 : i32, i32
  }
  func.func @transform_3(%arg0: i32) -> (i32, i32, i32) {
    %c0_i32 = arith.constant 0 : i32
    %c0_i32_0 = arith.constant 0 : i32
    %c0_i32_1 = arith.constant 0 : i32
    %c0_i32_2 = arith.constant 0 : i32
    return %c0_i32, %c0_i32_0, %c0_i32_1 : i32, i32, i32
  }
  func.func @transform_4(%arg0: i32) -> (i32, i32, i32) {
    %c0_i32 = arith.constant 0 : i32
    %c0_i32_0 = arith.constant 0 : i32
    %c0_i32_1 = arith.constant 0 : i32
    return %arg0, %c0_i32, %c0_i32_0 : i32, i32, i32
  }
  func.func @transform_5(%arg0: i32) -> (i32, i32) {
    %c0_i32 = arith.constant 0 : i32
    %c0_i32_0 = arith.constant 0 : i32
    %c0_i32_1 = arith.constant 0 : i32
    return %c0_i32, %c0_i32_0 : i32, i32
  }
  func.func @transform_6(%arg0: i32) -> (i32, i32) {
    %c0_i32 = arith.constant 0 : i32
    %c0_i32_0 = arith.constant 0 : i32
    %c0_i32_1 = arith.constant 0 : i32
    return %c0_i32, %c0_i32_0 : i32, i32
  }
  func.func @transform_7(%arg0: i32) -> (i32, i32, i32) {
    %c0_i32 = arith.constant 0 : i32
    %c0_i32_0 = arith.constant 0 : i32
    %c0_i32_1 = arith.constant 0 : i32
    %c0_i32_2 = arith.constant 0 : i32
    return %c0_i32, %c0_i32_0, %c0_i32_1 : i32, i32, i32
  }
  func.func @transform_8(%arg0: i32) -> (i32, i32) {
    %c0_i32 = arith.constant 0 : i32
    %c0_i32_0 = arith.constant 0 : i32
    %c0_i32_1 = arith.constant 0 : i32
    return %c0_i32, %c0_i32_0 : i32, i32
  }
  func.func @transform_9(%arg0: i32) -> (i32, i32, i32) {
    %c0_i32 = arith.constant 0 : i32
    %c0_i32_0 = arith.constant 0 : i32
    %c0_i32_1 = arith.constant 0 : i32
    %c0_i32_2 = arith.constant 0 : i32
    return %c0_i32, %c0_i32_0, %c0_i32_1 : i32, i32, i32
  }
  func.func @transform_10(%arg0: i32) -> (i32, i32, i32, i32) {
    %c0_i32 = arith.constant 0 : i32
    %c0_i32_0 = arith.constant 0 : i32
    %c0_i32_1 = arith.constant 0 : i32
    %c0_i32_2 = arith.constant 0 : i32
    return %arg0, %c0_i32, %c0_i32_0, %c0_i32_1 : i32, i32, i32, i32
  }
}

</mosaic_0001>

<bundles_post_ra>
// kernel: tpu_custom_call.1
= control target key start
LH: loop header
LB: loop body
LE: loop exit
PB: predicated region body
PF: predicated region fallthrough
CT: control target
= control target key end

     0   :  { %s15309_s13 = smov 0   ;;  %s21462_s0 = inlined_call_operand.vmem [shape: f32[2,16,16,4], index: 0, kind: input, shape index: {}]   ;;  %s21463_s1 = inlined_call_operand.vmem [shape: f32[1,4], index: 1, kind: input, shape index: {}]   ;;  %s21464_s2 = inlined_call_operand.vmem [shape: f32[1,4], index: 2, kind: input, shape index: {}]   ;;  %s21465_s3 = inlined_call_operand.vmem [shape: bf16[9,4,8], index: 3, kind: input, shape index: {}]   ;;  %s21466_s4 = inlined_call_operand.vmem [shape: f32[2,1,8], index: 4, kind: input, shape index: {}]   ;;  %s21467_s5 = inlined_call_operand.vmem [shape: f32[1,8], index: 5, kind: input, shape index: {}]   ;;  %s21468_s6 = inlined_call_operand.vmem [shape: f32[1,8], index: 6, kind: input, shape index: {}]   ;;  %s21469_s7 = inlined_call_operand.vmem [shape: bf16[9,8,8], index: 7, kind: input, shape index: {}]   ;;  %s21470_s8 = inlined_call_operand.vmem [shape: bf16[4,8], index: 8, kind: input, shape index: {}]   ;;  %s21471_s9 = inlined_call_operand.vmem [shape: f32[1,1,8], index: 9, kind: input, shape index: {}]   ;;  %s21472_s10 = inlined_call_operand.vmem [shape: f32[2,16,16,8], index: 10, kind: output, shape index: {}]  }
   0x1 LB: > { %s12423_s14 = sadd.s32 4294967295, %s15250_s13   ;;  %p12427_p0 = scmp.ge.s32.totalorder %s15250_s13, 1  ;;  %s15250_s13 = sphi %s15309_s13, %s20_s13  }
   0x2   : > { %p320_p1 = scmp.lt.s32.totalorder %s15250_s13, 3 }
   0x4   : > { %p321_p2 = pnand %p12427_p0, %p320_p1 }
   0x6   : > { %324 = sbr.rel (%p321_p2) target bundleno = 2841 (0xb19), region = 60 }
   0xd   : > { %p361_p3 = scmp.lt.s32.totalorder %s12423_s14, 1  ;;  %vm378_vm0 = vcmask 24576   ;;  %vm386_vm1 = vsmask.f32 256  ;;  %v21698_v0 = vmov 0  ;;  %vm641_vm5 = vcmask 31744  }
   0xe   : > { %vm15319_vm2 = vmand %vm378_vm0, %vm386_vm1  ;;  %v400_v1 = vld [vmem:[#allocation2 + $0x3c] sm:$0x1]  ;;  %v403_v2 = vld [vmem:[#allocation2 + $0x48] sm:$0x1]  ;;  %vm436_vm3 = vsmask.f32 7938 }
   0xf   : > { %v21699_v0 = vsel %vm15319_vm2, 4294967295, %v21698_v0  ;;  %s22293_s14 = smov (!%p361_p3, %s12423_s14), 1  ;;  %v401_v3 = vsel %vm15319_vm2, 0, %v400_v1  ;;  %v404_v4 = vsel %vm15319_vm2, 0, %v403_v2  ;;  %v406_v5 = vld [vmem:[#allocation2 + $0x54] sm:$0x1]  ;;  %vm15344_vm4 = vmand %vm378_vm0, %vm436_vm3 }
  0x10   : > { %21700 = vst [vmem:[#allocation5_spill] sm:$0xff] %v21699_v0  ;;  %402 = vst [vmem:[#allocation2 + $0x3c] sm:$0x1] %v401_v3  ;;  %v407_v6 = vsel %vm15319_vm2, 0, %v406_v5  ;;  %v409_v7 = vld [vmem:[#allocation2 + $0x60] sm:$0x1]  ;;  %s368_s29 = scalar_lea.vmem %s21466_s4, %s22293_s14 }
  0x11   : > { %405 = vst [vmem:[#allocation2 + $0x48] sm:$0x1] %v404_v4  ;;  %v412_v8 = vld [vmem:[#allocation2 + $0x6c] sm:$0x1]  ;;  %408 = vst [vmem:[#allocation2 + $0x54] sm:$0x1] %v407_v6 }
  0x12   : > { %v410_v9 = vsel %vm15319_vm2, 0, %v409_v7  ;;  %v413_v10 = vsel %vm15319_vm2, 0, %v412_v8  ;;  %v415_v11 = vld [vmem:[#allocation2 + $0x78] sm:$0x1]  ;;  %s13272_s15 = sshll.u32 %s22293_s14, 8  ;;  %vm714_vm9 = vcmask 25600  }
  0x13   : > { %411 = vst [vmem:[#allocation2 + $0x60] sm:$0x1] %v410_v9  ;;  %414 = vst [vmem:[#allocation2 + $0x6c] sm:$0x1] %v413_v10  ;;  %v416_v12 = vsel %vm15319_vm2, 0, %v415_v11  ;;  %s15365_s18 = scalar_lea.vmem %s21462_s0, %s13272_s15  ;;  %vm375_vm10 = vcmask 27648   ;;  %s21346_s26 = scalar_lea.vmem %s21472_s10, %s13272_s15 }
  0x14   : > { %v418_v13 = vld [vmem:[#allocation2 + $0x84] sm:$0x1]  ;;  %v421_v14 = vld [vmem:[#allocation2 + $0x90] sm:$0x1]  ;;  %417 = vst [vmem:[#allocation2 + $0x78] sm:$0x1] %v416_v12 }
  0x15   : > { %v419_v15 = vsel %vm15319_vm2, 0, %v418_v13  ;;  %v422_v16 = vsel %vm15319_vm2, 0, %v421_v14  ;;  %v424_v17 = vld [vmem:[#allocation2 + $0x9c] sm:$0x1]  ;;  %v427_v18 = vld [vmem:[#allocation2 + $0xa8] sm:$0x1] }
  0x16   : > { %420 = vst [vmem:[#allocation2 + $0x84] sm:$0x1] %v419_v15  ;;  %423 = vst [vmem:[#allocation2 + $0x90] sm:$0x1] %v422_v16  ;;  %v425_v20 = vsel %vm15319_vm2, 0, %v424_v17  ;;  %v428_v21 = vsel %vm15319_vm2, 0, %v427_v18 }
  0x17   : > { %v430_v22 = vld [vmem:[#allocation2 + $0xb4] sm:$0x1]  ;;  %v433_v23 = vld [vmem:[#allocation2 + $0xc0] sm:$0x1]  ;;  %426 = vst [vmem:[#allocation2 + $0x9c] sm:$0x1] %v425_v20 }
  0x18   : > { %429 = vst [vmem:[#allocation2 + $0xa8] sm:$0x1] %v428_v21  ;;  %v431_v24 = vsel %vm15319_vm2, 0, %v430_v22  ;;  %v434_v25 = vsel %vm15319_vm2, 0, %v433_v23  ;;  %v456_v26 = vld [vmem:[#allocation2 + $0x5c] sm:$0x1] }
  0x19   : > { %v459_v27 = vld [vmem:[#allocation2 + $0x68] sm:$0x1]  ;;  %432 = vst [vmem:[#allocation2 + $0xb4] sm:$0x1] %v431_v24  ;;  %435 = vst [vmem:[#allocation2 + $0xc0] sm:$0x1] %v434_v25 }
  0x1a   : > { %v457_v28 = vsel %vm15344_vm4, 0, %v456_v26  ;;  %v460_v29 = vsel %vm15344_vm4, 0, %v459_v27  ;;  %v462_v30 = vld [vmem:[#allocation2 + $0x74] sm:$0x1]  ;;  %v465_v31 = vld [vmem:[#allocation2 + $0x80] sm:$0x1] }
  0x1b   : > { %458 = vst [vmem:[#allocation2 + $0x5c] sm:$0x1] %v457_v28  ;;  %461 = vst [vmem:[#allocation2 + $0x68] sm:$0x1] %v460_v29  ;;  %v463_v32 = vsel %vm15344_vm4, 0, %v462_v30  ;;  %v466_v33 = vsel %vm15344_vm4, 0, %v465_v31 }
  0x1c   : > { %v468_v34 = vld [vmem:[#allocation2 + $0x8c] sm:$0x1]  ;;  %v471_v35 = vld [vmem:[#allocation2 + $0x98] sm:$0x1]  ;;  %464 = vst [vmem:[#allocation2 + $0x74] sm:$0x1] %v463_v32 }
  0x1d   : > { %467 = vst [vmem:[#allocation2 + $0x80] sm:$0x1] %v466_v33  ;;  %v469_v36 = vsel %vm15344_vm4, 0, %v468_v34  ;;  %v472_v37 = vsel %vm15344_vm4, 0, %v471_v35  ;;  %v474_v38 = vld [vmem:[#allocation2 + $0xa4] sm:$0x1] }
  0x1e   : > { %v477_v39 = vld [vmem:[#allocation2 + $0xb0] sm:$0x1]  ;;  %470 = vst [vmem:[#allocation2 + $0x8c] sm:$0x1] %v469_v36  ;;  %473 = vst [vmem:[#allocation2 + $0x98] sm:$0x1] %v472_v37 }
  0x1f   : > { %v475_v40 = vsel %vm15344_vm4, 0, %v474_v38  ;;  %v478_v41 = vsel %vm15344_vm4, 0, %v477_v39  ;;  %v480_v42 = vld [vmem:[#allocation2 + $0xbc] sm:$0x1]  ;;  %v483_v43 = vld [vmem:[#allocation2 + $0xc8] sm:$0x1] }
  0x20   : > { %476 = vst [vmem:[#allocation2 + $0xa4] sm:$0x1] %v475_v40  ;;  %479 = vst [vmem:[#allocation2 + $0xb0] sm:$0x1] %v478_v41  ;;  %v481_v44 = vsel %vm15344_vm4, 0, %v480_v42  ;;  %v484_v45 = vsel %vm15344_vm4, 0, %v483_v43 }
  0x21   : > { %v15384_v46 = vld [vmem:[%s15365_s18] sm:$0xff]  ;;  %v15387_v47 = vld [vmem:[%s15365_s18 + $0x8] sm:$0xff]  ;;  %v15390_v48 = vld [vmem:[%s15365_s18 + $0x10] sm:$0xff]  ;;  %482 = vst [vmem:[#allocation2 + $0xbc] sm:$0x1] %v481_v44  ;;  %vm2243_vm11 = vcmask 1041408  }
  0x22   : > { %485 = vst [vmem:[#allocation2 + $0xc8] sm:$0x1] %v484_v45  ;;  %v15393_v49 = vld [vmem:[%s15365_s18 + $0x18] sm:$0xff]  ;;  %v15396_v50 = vld [vmem:[%s15365_s18 + $0x20] sm:$0xff]  ;;  %v15399_v51 = vld [vmem:[%s15365_s18 + $0x28] sm:$0xff]  ;;  %v642_v53 = vsel %vm641_vm5, %v15384_v46, 0.0 }
  0x23   : > { %v15402_v52 = vld [vmem:[%s15365_s18 + $0x30] sm:$0xff]  ;;  %v643_v54 = vsel %vm641_vm5, %v15390_v48, 0.0  ;;  %v645_v55 = vsel %vm641_vm5, %v15396_v50, 0.0  ;;  %v15411_v56 = vld [vmem:[%s15365_s18 + $0x38] sm:$0xff]  ;;  %v15414_v57 = vld [vmem:[%s15365_s18 + $0x40] sm:$0xff]  ;;  %v673_v59 = vsel %vm641_vm5, %v15387_v47, 0.0 }
  0x24   : > { %v644_v58 = vadd.f32 %v643_v54, %v642_v53  ;;  %v647_v60 = vsel %vm641_vm5, %v15402_v52, 0.0  ;;  %v674_v61 = vsel %vm641_vm5, %v15393_v49, 0.0  ;;  %v676_v62 = vsel %vm641_vm5, %v15399_v51, 0.0  ;;  %v15425_v63 = vld [vmem:[%s15365_s18 + $0x48] sm:$0xff]  ;;  %v15428_v1 = vld [vmem:[%s15365_s18 + $0x50] sm:$0xff]  ;;  %v15435_v6 = vld [vmem:[%s15365_s18 + $0x58] sm:$0xff] }
  0x25   : > { %v675_v3 = vadd.f32 %v674_v61, %v673_v59  ;;  %v649_v4 = vsel %vm641_vm5, %v15414_v57, 0.0  ;;  %v678_v5 = vsel %vm641_vm5, %v15411_v56, 0.0  ;;  %v15438_v7 = vld [vmem:[%s15365_s18 + $0x60] sm:$0xff]  ;;  %v651_v10 = vsel %vm641_vm5, %v15428_v1, 0.0  ;;  %v15445_v12 = vld [vmem:[%s15365_s18 + $0x68] sm:$0xff]  ;;  %v15448_v13 = vld [vmem:[%s15365_s18 + $0x70] sm:$0xff] }
  0x26   : > { %v646_v2 = vadd.f32 %v645_v55, %v644_v58  ;;  %v680_v11 = vsel %vm641_vm5, %v15425_v63, 0.0  ;;  %v653_v16 = vsel %vm641_vm5, %v15438_v7, 0.0  ;;  %v682_v17 = vsel %vm641_vm5, %v15435_v6, 0.0  ;;  %v15455_v18 = vld [vmem:[%s15365_s18 + $0x78] sm:$0xff]  ;;  %v15458_v20 = vld [vmem:[%s15365_s18 + $0x80] sm:$0xff]  ;;  %v15465_v25 = vld [vmem:[%s15365_s18 + $0x88] sm:$0xff] }
  0x27   : > { %v677_v9 = vadd.f32 %v676_v62, %v675_v3  ;;  %v655_v23 = vsel %vm641_vm5, %v15448_v13, 0.0  ;;  %v684_v24 = vsel %vm641_vm5, %v15445_v12, 0.0  ;;  %v15468_v26 = vld [vmem:[%s15365_s18 + $0x90] sm:$0xff]  ;;  %v657_v29 = vsel %vm641_vm5, %v15458_v20, 0.0  ;;  %v15475_v31 = vld [vmem:[%s15365_s18 + $0x98] sm:$0xff]  ;;  %v15478_v32 = vld [vmem:[%s15365_s18 + $0xa0] sm:$0xff] }
  0x28   : > { %v648_v8 = vadd.f32 %v647_v60, %v646_v2  ;;  %v686_v30 = vsel %vm641_vm5, %v15455_v18, 0.0  ;;  %v659_v35 = vsel %vm641_vm5, %v15468_v26, 0.0  ;;  %v688_v36 = vsel %vm641_vm5, %v15465_v25, 0.0  ;;  %v15485_v37 = vld [vmem:[%s15365_s18 + $0xa8] sm:$0xff]  ;;  %v15488_v38 = vld [vmem:[%s15365_s18 + $0xb0] sm:$0xff]  ;;  %v15495_v43 = vld [vmem:[%s15365_s18 + $0xb8] sm:$0xff] }
  0x29   : > { %v679_v15 = vadd.f32 %v678_v5, %v677_v9  ;;  %v661_v41 = vsel %vm641_vm5, %v15478_v32, 0.0  ;;  %v690_v42 = vsel %vm641_vm5, %v15475_v31, 0.0  ;;  %v15498_v44 = vld [vmem:[%s15365_s18 + $0xc0] sm:$0xff]  ;;  %v663_v54 = vsel %vm641_vm5, %v15488_v38, 0.0  ;;  %v15505_v58 = vld [vmem:[%s15365_s18 + $0xc8] sm:$0xff]  ;;  %v15508_v59 = vld [vmem:[%s15365_s18 + $0xd0] sm:$0xff] }
  0x2a   : > { %v650_v14 = vadd.f32 %v649_v4, %v648_v8  ;;  %v692_v55 = vsel %vm641_vm5, %v15485_v37, 0.0  ;;  %v665_v62 = vsel %vm641_vm5, %v15498_v44, 0.0  ;;  %v694_v2 = vsel %vm641_vm5, %v15495_v43, 0.0  ;;  %v15515_v3 = vld [vmem:[%s15365_s18 + $0xd8] sm:$0xff]  ;;  %v15518_v4 = vld [vmem:[%s15365_s18 + $0xe0] sm:$0xff] }
  0x2b   : > { %v681_v22 = vadd.f32 %v680_v11, %v679_v15  ;;  %v667_v9 = vsel %vm641_vm5, %v15508_v59, 0.0  ;;  %v15525_v11 = vld [vmem:[%s15365_s18 + $0xe8] sm:$0xff]  ;;  %v629_v15 = vlaneseq  ;;  %vm1760_vm12 = vsmask.f32 3328 }
  0x2c   : > { %v652_v21 = vadd.f32 %v651_v10, %v650_v14  ;;  %v696_v10 = vsel %vm641_vm5, %v15505_v58, 0.0  ;;  %v15528_v14 = vld [vmem:[%s15365_s18 + $0xf0] sm:$0xff]  ;;  %vm1761_vm13 = vsmask.f32 7440  ;;  %vm1273_vm15 = vsmask.f32 4368 }
  0x2d   : > { %v683_v28 = vadd.f32 %v682_v17, %v681_v22  ;;  %v698_v22 = vsel %vm641_vm5, %v15515_v3, 0.0  ;;  %vm16062_vm14 = vmor %vm1760_vm12, %vm1761_vm13  ;;  %vm6305_vm12 = vcmask 64512  }
  0x2e   : > { %v654_v27 = vadd.f32 %v653_v16, %v652_v21  ;;  %v669_v21 = vsel %vm641_vm5, %v15518_v4, 0.0 }
  0x2f   : > { %v685_v34 = vadd.f32 %v684_v24, %v683_v28  ;;  %v671_v28 = vsel %vm641_vm5, %v15528_v14, 0.0 }
  0x30   : > { %v656_v33 = vadd.f32 %v655_v23, %v654_v27  ;;  %v15535_v23 = vld [vmem:[%s15365_s18 + $0xf8] sm:$0xff] }
  0x31   : > { %v687_v40 = vadd.f32 %v686_v30, %v685_v34  ;;  %v15541_v30 = vshrl.u32 %v629_v15, 7 }
  0x32   : > { %v658_v39 = vadd.f32 %v657_v29, %v656_v33  ;;  %v700_v29 = vsel %vm641_vm5, %v15525_v11, 0.0 }
  0x33   : > { %v689_v53 = vadd.f32 %v688_v36, %v687_v40  ;;  %21703 = vst [vmem:[#allocation6_spill] sm:$0xff] %v15541_v30  ;;  %v15546_v40 = vadd.s32 1, %v15541_v30 }
  0x34   : > { %v660_v45 = vadd.f32 %v659_v35, %v658_v39  ;;  %v702_v35 = vsel %vm641_vm5, %v15535_v23, 0.0 }
  0x35   : > { %v691_v61 = vadd.f32 %v690_v42, %v689_v53  ;;  %21704 = vst [vmem:[#allocation7_spill] sm:$0xff] %v15546_v40 }
  0x36   : > { %v662_v60 = vadd.f32 %v661_v41, %v660_v45 }
  0x37   : > { %v693_v8 = vadd.f32 %v692_v55, %v691_v61  ;;  %v633_v55 = vmul.u32 2, %v15541_v30 }
  0x38   : > { %v664_v5 = vadd.f32 %v663_v54, %v662_v60  ;;  %v15550_v54 = vand.u32 127, %v629_v15  ;;  %v636_v60 = vmul.u32 2, %v15546_v40 }
  0x39   : > { %v695_v17 = vadd.f32 %v694_v2, %v693_v8 }
  0x3a   : > { %v666_v16 = vadd.f32 %v665_v62, %v664_v5  ;;  %21705 = vst [vmem:[#allocation8_spill] sm:$0xff] %v15550_v54  ;;  %vm634_vm6 = vcmp.ge.s32.totalorder %v15550_v54, %v633_v55  ;;  %vm637_vm7 = vcmp.lt.s32.totalorder %v15550_v54, %v636_v60 }
  0x3b   : > { %v697_v27 = vadd.f32 %v696_v10, %v695_v17  ;;  %vm638_vm8 = vmand %vm634_vm6, %vm637_vm7  ;;  %vm2751_vm6 = vcmask 1046532  }
  0x3c   : > { %v668_v24 = vadd.f32 %v667_v9, %v666_v16  ;;  %v21474_v9 = vmov 0.0  }
  0x3d   : > { %v699_v34 = vadd.f32 %v698_v22, %v697_v27  ;;  %v15557_v10 = vsel %vm638_vm8, 1.0, %v21474_v9  ;;  %vm486_vm8 = vcmask 60416  }
  0x3e   : > { %v670_v33 = vadd.f32 %v669_v21, %v668_v24 }
  0x3f   : > { %v701_v39 = vadd.f32 %v700_v29, %v699_v34 }
  0x40   : > { %v672_v36 = vadd.f32 %v671_v28, %v670_v33 }
  0x41   : > { %v703_v41 = vadd.f32 %v702_v35, %v701_v39 }
  0x42   : > { %v704_v42 = vsel %vm641_vm5, %v672_v36, 0.0 }
  0x43   : > { %v705_v45 = vsel %vm641_vm5, %v703_v41, 0.0 }
  0x44   : > { %v706_v53 = vadd.f32 %v705_v45, %v704_v42 }
  0x46   : > { %v707_v61 = vrot.slane %v706_v53, 4 }
  0x48   : > { %v708_v62 = vadd.f32 %v707_v61, %v706_v53 }
  0x4a   : > { %v709_v2 = vrot.slane %v708_v62, 2 }
  0x4c   : > { %v710_v5 = vadd.f32 %v709_v2, %v708_v62 }
  0x4e   : > { %v711_v8 = vrot.slane %v710_v5, 1 }
  0x50   : > { %v712_v15 = vadd.f32 %v711_v8, %v710_v5 }
  0x52   : > { %v713_v16 = vmul.f32 %v15557_v10, %v712_v15 }
  0x54   : > { %v715_v17 = vsel %vm714_vm9, %v713_v16, 0.0 }
  0x55   : > { %716 = vadd.xlane.f32.xlu0 %v715_v17 }
  0xe2   : > { %v717_v21 = vpop.xlane.xlu0 %716 }
  0xe3   : > { %v719_v22 = vmul.f32 0.001953125, %v717_v21 }
  0xe5   : > { %v720_v24 = vmul.f32 %v15557_v10, %v719_v22 }
  0xe7   : > { %v721_v27 = vsel %vm714_vm9, %v720_v24, 0.0 }
  0xe8   : > { %v722_v28 = vrot.slane %v721_v27, 4 }
  0xea   : > { %v723_v29 = vadd.f32 %v722_v28, %v721_v27 }
  0xec   : > { %v724_v33 = vrot.slane %v723_v29, 2 }
  0xee   : > { %v725_v34 = vadd.f32 %v724_v33, %v723_v29 }
  0xf0   : > { %v726_v35 = vrot.slane %v725_v34, 1 }
  0xf2   : > { %v15563_v36 = vadd.f32 %v726_v35, %v725_v34 }
  0xf4   : > { %v15567_v39 = vsub.f32 %v15384_v46, %v15563_v36  ;;  %v15571_v41 = vsub.f32 %v15390_v48, %v15563_v36  ;;  %v15575_v42 = vsub.f32 %v15396_v50, %v15563_v36  ;;  %v15579_v45 = vsub.f32 %v15387_v47, %v15563_v36 }
  0xf5   : > { %v15583_v53 = vsub.f32 %v15393_v49, %v15563_v36  ;;  %v15587_v46 = vsub.f32 %v15402_v52, %v15563_v36  ;;  %v15595_v50 = vsub.f32 %v15399_v51, %v15563_v36  ;;  %v15599_v47 = vsub.f32 %v15414_v57, %v15563_v36 }
  0xf6   : > { %v760_v48 = vmul.f32 %v15567_v39, %v15567_v39  ;;  %v762_v55 = vmul.f32 %v15571_v41, %v15571_v41  ;;  %v764_v49 = vmul.f32 %v15575_v42, %v15575_v42  ;;  %v15605_v52 = vsub.f32 %v15411_v56, %v15563_v36 }
  0xf7   : > { %v15609_v60 = vsub.f32 %v15428_v1, %v15563_v36  ;;  %v761_v61 = vmul.f32 %v15579_v45, %v15579_v45  ;;  %v763_v51 = vmul.f32 %v15583_v53, %v15583_v53  ;;  %v766_v57 = vmul.f32 %v15587_v46, %v15587_v46 }
  0xf8   : > { %v792_v62 = vsel %vm641_vm5, %v760_v48, 0.0  ;;  %v793_v2 = vsel %vm641_vm5, %v762_v55, 0.0  ;;  %v15621_v56 = vsub.f32 %v15425_v63, %v15563_v36  ;;  %v15625_v1 = vsub.f32 %v15438_v7, %v15563_v36 }
  0xf9   : > { %v794_v5 = vadd.f32 %v793_v2, %v792_v62  ;;  %v765_v8 = vmul.f32 %v15595_v50, %v15595_v50  ;;  %v768_v15 = vmul.f32 %v15599_v47, %v15599_v47  ;;  %v795_v16 = vsel %vm641_vm5, %v764_v49, 0.0 }
  0xfa   : > { %v15634_v17 = vsub.f32 %v15435_v6, %v15563_v36  ;;  %v15638_v63 = vsub.f32 %v15448_v13, %v15563_v36  ;;  %v767_v7 = vmul.f32 %v15605_v52, %v15605_v52  ;;  %v770_v22 = vmul.f32 %v15609_v60, %v15609_v60 }
  0xfb   : > { %v796_v21 = vadd.f32 %v795_v16, %v794_v5  ;;  %v797_v24 = vsel %vm641_vm5, %v766_v57, 0.0  ;;  %v823_v27 = vsel %vm641_vm5, %v761_v61, 0.0  ;;  %v824_v28 = vsel %vm641_vm5, %v763_v51, 0.0 }
  0xfc   : > { %v15649_v6 = vsub.f32 %v15445_v12, %v15563_v36  ;;  %v15653_v13 = vsub.f32 %v15458_v20, %v15563_v36  ;;  %v825_v33 = vadd.f32 %v824_v28, %v823_v27  ;;  %v769_v34 = vmul.f32 %v15621_v56, %v15621_v56 }
  0xfd   : > { %v798_v29 = vadd.f32 %v797_v24, %v796_v21  ;;  %v772_v35 = vmul.f32 %v15625_v1, %v15625_v1  ;;  %v799_v48 = vsel %vm641_vm5, %v768_v15, 0.0  ;;  %v826_v55 = vsel %vm641_vm5, %v765_v8, 0.0 }
  0xfe   : > { %v15663_v12 = vsub.f32 %v15455_v18, %v15563_v36  ;;  %v15667_v20 = vsub.f32 %v15468_v26, %v15563_v36  ;;  %v827_v61 = vadd.f32 %v826_v55, %v825_v33  ;;  %v771_v51 = vmul.f32 %v15634_v17, %v15634_v17 }
  0xff   : > { %v800_v49 = vadd.f32 %v799_v48, %v798_v29  ;;  %v774_v57 = vmul.f32 %v15638_v63, %v15638_v63  ;;  %v801_v62 = vsel %vm641_vm5, %v770_v22, 0.0  ;;  %v828_v2 = vsel %vm641_vm5, %v767_v7, 0.0 }
 0x100   : > { %v15677_v18 = vsub.f32 %v15465_v25, %v15563_v36  ;;  %v15681_v26 = vsub.f32 %v15478_v32, %v15563_v36  ;;  %v829_v8 = vadd.f32 %v828_v2, %v827_v61  ;;  %v773_v15 = vmul.f32 %v15649_v6, %v15649_v6 }
 0x101   : > { %v802_v5 = vadd.f32 %v801_v62, %v800_v49  ;;  %v776_v16 = vmul.f32 %v15653_v13, %v15653_v13  ;;  %v803_v21 = vsel %vm641_vm5, %v772_v35, 0.0  ;;  %v830_v7 = vsel %vm641_vm5, %v769_v34, 0.0 }
 0x102   : > { %v15691_v25 = vsub.f32 %v15475_v31, %v15563_v36  ;;  %v15695_v32 = vsub.f32 %v15488_v38, %v15563_v36  ;;  %v831_v24 = vadd.f32 %v830_v7, %v829_v8  ;;  %v775_v27 = vmul.f32 %v15663_v12, %v15663_v12 }
 0x103   : > { %v804_v22 = vadd.f32 %v803_v21, %v802_v5  ;;  %v778_v28 = vmul.f32 %v15667_v20, %v15667_v20  ;;  %v805_v29 = vsel %vm641_vm5, %v774_v57, 0.0  ;;  %v832_v33 = vsel %vm641_vm5, %v771_v51, 0.0 }
 0x104   : > { %v15705_v31 = vsub.f32 %v15485_v37, %v15563_v36  ;;  %v15709_v38 = vsub.f32 %v15498_v44, %v15563_v36  ;;  %v833_v35 = vadd.f32 %v832_v33, %v831_v24  ;;  %v777_v48 = vmul.f32 %v15677_v18, %v15677_v18 }
 0x105   : > { %v806_v34 = vadd.f32 %v805_v29, %v804_v22  ;;  %v780_v55 = vmul.f32 %v15681_v26, %v15681_v26  ;;  %v807_v49 = vsel %vm641_vm5, %v776_v16, 0.0  ;;  %v834_v61 = vsel %vm641_vm5, %v773_v15, 0.0 }
 0x106   : > { %v15719_v37 = vsub.f32 %v15495_v43, %v15563_v36  ;;  %v15723_v44 = vsub.f32 %v15508_v59, %v15563_v36  ;;  %v835_v57 = vadd.f32 %v834_v61, %v833_v35  ;;  %v779_v62 = vmul.f32 %v15691_v25, %v15691_v25 }
 0x107   : > { %v808_v51 = vadd.f32 %v807_v49, %v806_v34  ;;  %v782_v2 = vmul.f32 %v15695_v32, %v15695_v32  ;;  %v809_v5 = vsel %vm641_vm5, %v778_v28, 0.0  ;;  %v836_v8 = vsel %vm641_vm5, %v775_v27, 0.0 }
 0x108   : > { %v15733_v43 = vsub.f32 %v15505_v58, %v15563_v36  ;;  %v15737_v59 = vsub.f32 %v15518_v4, %v15563_v36  ;;  %v837_v16 = vadd.f32 %v836_v8, %v835_v57  ;;  %v781_v21 = vmul.f32 %v15705_v31, %v15705_v31 }
 0x109   : > { %v810_v15 = vadd.f32 %v809_v5, %v808_v51  ;;  %v784_v7 = vmul.f32 %v15709_v38, %v15709_v38  ;;  %v811_v22 = vsel %vm641_vm5, %v780_v55, 0.0  ;;  %v838_v24 = vsel %vm641_vm5, %v777_v48, 0.0 }
 0x10a   : > { %v15747_v58 = vsub.f32 %v15515_v3, %v15563_v36  ;;  %v15751_v4 = vsub.f32 %v15528_v14, %v15563_v36  ;;  %v839_v28 = vadd.f32 %v838_v24, %v837_v16  ;;  %v783_v29 = vmul.f32 %v15719_v37, %v15719_v37 }
 0x10b   : > { %v812_v27 = vadd.f32 %v811_v22, %v810_v15  ;;  %v786_v33 = vmul.f32 %v15723_v44, %v15723_v44  ;;  %v813_v34 = vsel %vm641_vm5, %v782_v2, 0.0  ;;  %v840_v35 = vsel %vm641_vm5, %v779_v62, 0.0 }
 0x10c   : > { %v15761_v3 = vsub.f32 %v15525_v11, %v15563_v36  ;;  %v841_v55 = vadd.f32 %v840_v35, %v839_v28  ;;  %v785_v14 = vmul.f32 %v15733_v43, %v15733_v43  ;;  %v788_v49 = vmul.f32 %v15737_v59, %v15737_v59 }
 0x10d   : > { %v814_v48 = vadd.f32 %v813_v34, %v812_v27  ;;  %v815_v61 = vsel %vm641_vm5, %v784_v7, 0.0  ;;  %v842_v51 = vsel %vm641_vm5, %v781_v21, 0.0  ;;  %v15771_v57 = vsub.f32 %v15535_v23, %v15563_v36 }
 0x10e   : > { %v843_v2 = vadd.f32 %v842_v51, %v841_v55  ;;  %v787_v11 = vmul.f32 %v15747_v58, %v15747_v58  ;;  %v790_v5 = vmul.f32 %v15751_v4, %v15751_v4  ;;  %v817_v8 = vsel %vm641_vm5, %v786_v33, 0.0 }
 0x10f   : > { %v816_v62 = vadd.f32 %v815_v61, %v814_v48  ;;  %v844_v15 = vsel %vm641_vm5, %v783_v29, 0.0  ;;  %v789_v21 = vmul.f32 %v15761_v3, %v15761_v3  ;;  %v819_v23 = vsel %vm641_vm5, %v788_v49, 0.0 }
 0x110   : > { %v845_v7 = vadd.f32 %v844_v15, %v843_v2  ;;  %v846_v36 = vsel %vm641_vm5, %v785_v14, 0.0  ;;  %v791_v27 = vmul.f32 %v15771_v57, %v15771_v57  ;;  %v821_v28 = vsel %vm641_vm5, %v790_v5, 0.0 }
 0x111   : > { %v818_v16 = vadd.f32 %v817_v8, %v816_v62  ;;  %v848_v33 = vsel %vm641_vm5, %v787_v11, 0.0  ;;  %v850_v35 = vsel %vm641_vm5, %v789_v21, 0.0 }
 0x112   : > { %v847_v24 = vadd.f32 %v846_v36, %v845_v7  ;;  %v852_v55 = vsel %vm641_vm5, %v791_v27, 0.0 }
 0x113   : > { %v820_v22 = vadd.f32 %v819_v23, %v818_v16 }
 0x114   : > { %v849_v29 = vadd.f32 %v848_v33, %v847_v24 }
 0x115   : > { %v822_v34 = vadd.f32 %v821_v28, %v820_v22 }
 0x116   : > { %v851_v48 = vadd.f32 %v850_v35, %v849_v29 }
 0x117   : > { %v854_v49 = vsel %vm641_vm5, %v822_v34, 0.0 }
 0x118   : > { %v853_v61 = vadd.f32 %v852_v55, %v851_v48  ;;  %v388_v48 = vld [vmem:[#allocation2 + $0xc] sm:$0x1]  ;;  %v438_v55 = vld [vmem:[#allocation2 + $0x14] sm:$0x1] }
 0x11a   : > { %v855_v14 = vsel %vm641_vm5, %v853_v61, 0.0  ;;  %v389_v61 = vsel %vm15319_vm2, 0, %v388_v48 }
 0x11b   : > { %v856_v51 = vadd.f32 %v855_v14, %v854_v49  ;;  %v439_v49 = vsel %vm15344_vm4, 0, %v438_v55  ;;  %390 = vst [vmem:[#allocation2 + $0xc] sm:$0x1] %v389_v61  ;;  %v391_v14 = vld [vmem:[#allocation2 + $0x18] sm:$0x1] }
 0x11c   : > { %440 = vst [vmem:[#allocation2 + $0x14] sm:$0x1] %v439_v49 }
 0x11d   : > { %v857_v62 = vrot.slane %v856_v51, 4 }
 0x11f   : > { %v858_v2 = vadd.f32 %v857_v62, %v856_v51  ;;  %v441_v51 = vld [vmem:[#allocation2 + $0x20] sm:$0x1]  ;;  %v392_v62 = vsel %vm15319_vm2, 0, %v391_v14 }
 0x120   : > { %393 = vst [vmem:[#allocation2 + $0x18] sm:$0x1] %v392_v62 }
 0x121   : > { %v859_v8 = vrot.slane %v858_v2, 2 }
 0x123   : > { %v860_v15 = vadd.f32 %v859_v8, %v858_v2  ;;  %v442_v2 = vsel %vm15344_vm4, 0, %v441_v51  ;;  %v627_v8 = vld [vmem:[%s21463_s1] sm:$0x1] }
 0x124   : > { %443 = vst [vmem:[#allocation2 + $0x20] sm:$0x1] %v442_v2 }
 0x125   : > { %v861_v5 = vrot.slane %v860_v15, 1 }
 0x127   : > { %v862_v16 = vadd.f32 %v861_v5, %v860_v15  ;;  %v394_v15 = vld [vmem:[#allocation2 + $0x24] sm:$0x1]  ;;  %v444_v5 = vld [vmem:[#allocation2 + $0x2c] sm:$0x1] }
 0x129   : > { %v863_v11 = vmul.f32 %v15557_v10, %v862_v16  ;;  %v395_v16 = vsel %vm15319_vm2, 0, %v394_v15 }
 0x12a   : > { %396 = vst [vmem:[#allocation2 + $0x24] sm:$0x1] %v395_v16 }
 0x12b   : > { %v864_v7 = vsel %vm714_vm9, %v863_v11, 0.0  ;;  %v445_v11 = vsel %vm15344_vm4, 0, %v444_v5 }
 0x12c   : > { %865 = vadd.xlane.f32.xlu0 %v864_v7  ;;  %v21473_v7 = vsub.s32 0, %v15541_v30  ;;  %446 = vst [vmem:[#allocation2 + $0x2c] sm:$0x1] %v445_v11 }
 0x1b9   : > { %v866_v21 = vpop.xlane.xlu0 %865 }
 0x1ba   : > { %v867_v23 = vmul.f32 0.001953125, %v866_v21 }
 0x1bc   : > { %v868_v36 = vadd.f32 1e-05, %v867_v23 }
 0x1be   : > { %14962 = vrsqrt.f32 %v868_v36 }
 0x1c8   : > { %v14963_v22 = vpop.eup %14962 }
 0x1c9   : > { %v870_v24 = vmul.f32 %v14963_v22, %v15557_v10 }
 0x1cb   : > { %v871_v27 = vsel %vm714_vm9, %v870_v24, 0.0  ;;  %vm489_vm9 = vcmask 57344  }
 0x1cc   : > { %v872_v28 = vrot.slane %v871_v27, 4 }
 0x1ce   : > { %v873_v33 = vadd.f32 %v872_v28, %v871_v27  ;;  %v15820_v28 = vld [vmem:[%s21464_s2] ss:$0 sm:$0xff] }
 0x1d0   : > { %v874_v34 = vrot.slane %v873_v33, 2 }
 0x1d2   : > { %v875_v29 = vadd.f32 %v874_v34, %v873_v33 }
 0x1d4   : > { %v876_v35 = vrot.slane %v875_v29, 1 }
 0x1d6   : > { %v877_v10 = vadd.f32 %v876_v35, %v875_v29 }
 0x1d8   : > { %v878_v21 = vmul.f32 %v877_v10, %v627_v8 }
 0x1da   : > { %v882_v23 = vrot.slane %v878_v21, %v21473_v7 }
 0x1dc   : > { %v883_v36 = vmul.f32 %v882_v23, %v15567_v39  ;;  %v884_v22 = vmul.f32 %v882_v23, %v15579_v45  ;;  %v885_v24 = vmul.f32 %v882_v23, %v15571_v41  ;;  %v886_v27 = vmul.f32 %v882_v23, %v15583_v53 }
 0x1dd   : > { %v887_v33 = vmul.f32 %v882_v23, %v15575_v42  ;;  %v888_v34 = vmul.f32 %v882_v23, %v15595_v50  ;;  %v889_v29 = vmul.f32 %v882_v23, %v15587_v46  ;;  %v890_v35 = vmul.f32 %v882_v23, %v15605_v52 }
 0x1de   : > { %v891_v39 = vmul.f32 %v882_v23, %v15599_v47  ;;  %v892_v45 = vmul.f32 %v882_v23, %v15621_v56  ;;  %v893_v41 = vmul.f32 %v882_v23, %v15609_v60  ;;  %v894_v53 = vmul.f32 %v882_v23, %v15634_v17 }
 0x1df   : > { %v895_v48 = vmul.f32 %v882_v23, %v15625_v1  ;;  %v896_v55 = vmul.f32 %v882_v23, %v15649_v6  ;;  %v897_v42 = vmul.f32 %v882_v23, %v15638_v63  ;;  %v898_v50 = vmul.f32 %v882_v23, %v15663_v12 }
 0x1e0   : > { %v899_v46 = vmul.f32 %v882_v23, %v15653_v13  ;;  %v15836_v52 = vadd.f32 %v15820_v28, %v883_v36  ;;  %v15839_v47 = vadd.f32 %v15820_v28, %v884_v22  ;;  %v15842_v60 = vadd.f32 %v15820_v28, %v885_v24 }
 0x1e1   : > { %v900_v56 = vmul.f32 %v882_v23, %v15677_v18  ;;  %v901_v1 = vmul.f32 %v882_v23, %v15667_v20  ;;  %v902_v17 = vmul.f32 %v882_v23, %v15691_v25  ;;  %v15848_v63 = vadd.f32 %v15820_v28, %v886_v27 }
 0x1e2   : > { %v903_v6 = vmul.f32 %v882_v23, %v15681_v26  ;;  %v15852_v13 = vmul.f32 %v882_v23, %v15705_v31  ;;  %v15855_v12 = vmul.f32 %v882_v23, %v15695_v32  ;;  %v15858_v61 = vadd.f32 %v15820_v28, %v887_v33 }
 0x1e3   : > { %v15861_v18 = vmul.f32 %v882_v23, %v15719_v37  ;;  %v15864_v20 = vmul.f32 %v882_v23, %v15709_v38  ;;  %v15867_v25 = vmul.f32 %v882_v23, %v15733_v43  ;;  %v15870_v26 = vadd.f32 %v15820_v28, %v888_v34  ;;  %v12498_v34 = vld [vmem:[%s21465_s3 + $0x2] sm:$0x3] }
 0x1e4   : > { %v15873_v31 = vadd.f32 %v15820_v28, %v889_v29  ;;  %v12434_v32 = vmul.f32 -1.442695, %v15836_v52  ;;  %v12435_v49 = vmul.f32 -1.442695, %v15839_v47  ;;  %v12436_v14 = vmul.f32 -1.442695, %v15842_v60  ;;  %14853 = vmatprep.subr.msk.bf16.mxu0 %vm2243_vm11, %v12498_v34 }
 0x1e5   : > { %v15879_v37 = vmul.f32 %v882_v23, %v15723_v44  ;;  %v15882_v38 = vmul.f32 %v882_v23, %v15747_v58  ;;  %v15885_v43 = vadd.f32 %v15820_v28, %v890_v35  ;;  %v12437_v51 = vmul.f32 -1.442695, %v15848_v63  ;;  %v397_v29 = vld [vmem:[#allocation2 + $0x30] sm:$0x1] }
 0x1e6   : > { %v15889_v10 = vmul.f32 %v882_v23, %v15737_v59  ;;  %v15892_v62 = vadd.f32 %v15820_v28, %v891_v39  ;;  %14964 = vpow2.f32 %v12434_v32  ;;  %v12438_v2 = vmul.f32 -1.442695, %v15858_v61 }
 0x1e7   : > { %v15896_v44 = vmul.f32 %v882_v23, %v15761_v3  ;;  %v15899_v58 = vadd.f32 %v15820_v28, %v892_v45  ;;  %14966 = vpow2.f32 %v12435_v49  ;;  %v12439_v8 = vmul.f32 -1.442695, %v15870_v26 }
 0x1e8   : > { %v15903_v15 = vmul.f32 %v882_v23, %v15751_v4  ;;  %v15906_v59 = vadd.f32 %v15820_v28, %v893_v41  ;;  %14968 = vpow2.f32 %v12436_v14  ;;  %v12440_v5 = vmul.f32 -1.442695, %v15873_v31  ;;  %v1741_v41 = vld [vmem:[%s21465_s3] sm:$0x3] }
 0x1e9   : > { %v15910_v16 = vmul.f32 %v882_v23, %v15771_v57  ;;  %v15913_v3 = vadd.f32 %v15820_v28, %v894_v53  ;;  %14970 = vpow2.f32 %v12437_v51  ;;  %v12441_v11 = vmul.f32 -1.442695, %v15885_v43  ;;  %v447_v53 = vld [vmem:[#allocation2 + $0x38] sm:$0x1] }
 0x1ea   : > { %v15917_v21 = vadd.f32 %v15820_v28, %v895_v48  ;;  %v15920_v4 = vadd.f32 %v15820_v28, %v896_v55  ;;  %14972 = vpow2.f32 %v12438_v2  ;;  %v12442_v36 = vmul.f32 -1.442695, %v15892_v62 }
 0x1eb   : > { %v15924_v22 = vadd.f32 %v15820_v28, %v897_v42  ;;  %v15927_v57 = vadd.f32 %v15820_v28, %v898_v50  ;;  %14974 = vpow2.f32 %v12439_v8  ;;  %v12443_v23 = vmul.f32 -1.442695, %v15899_v58  ;;  %v450_v42 = vld [vmem:[#allocation2 + $0x44] sm:$0x1] }
 0x1ec   : > { %v15931_v24 = vadd.f32 %v15820_v28, %v899_v46  ;;  %v15934_v27 = vadd.f32 %v15820_v28, %v900_v56  ;;  %14976 = vpow2.f32 %v12440_v5  ;;  %v12444_v33 = vmul.f32 -1.442695, %v15906_v59  ;;  %v453_v56 = vld [vmem:[#allocation2 + $0x50] sm:$0x1] }
 0x1ed   : > { %v15941_v35 = vadd.f32 %v15820_v28, %v901_v1  ;;  %v15944_v39 = vadd.f32 %v15820_v28, %v902_v17  ;;  %14978 = vpow2.f32 %v12441_v11  ;;  %v12445_v45 = vmul.f32 -1.442695, %v15913_v3 }
 0x1ee   : > { %v15951_v48 = vadd.f32 %v15820_v28, %v903_v6  ;;  %14980 = vpow2.f32 %v12442_v36  ;;  %v12446_v55 = vmul.f32 -1.442695, %v15917_v21  ;;  %v12447_v50 = vmul.f32 -1.442695, %v15920_v4 }
 0x1ef   : > { %14982 = vpow2.f32 %v12443_v23  ;;  %v2245_v46 = vsel %vm2243_vm11, %v12498_v34, 0  ;;  %v15961_v17 = vadd.f32 %v15820_v28, %v15852_v13  ;;  %v12448_v6 = vmul.f32 -1.442695, %v15924_v22 }
 0x1f0   : > { %v15957_v1 = vpop.eup %14964  ;;  %14984 = vpow2.f32 %v12444_v33  ;;  %13662 = vmatpush3.bf16.msra.mxu0 %v2245_v46  ;;  %v21475_v32 = vmov 0   ;;  %v398_v13 = vsel %vm15319_vm2, 0, %v397_v29  ;;  %v12449_v14 = vmul.f32 -1.442695, %v15927_v57 }
 0x1f1   : > { %376 = vst.msk [vmem:[#allocation2] sm:$0xf] %vm375_vm10, %v21475_v32  ;;  %377 = vst.msk [vmem:[#allocation2 + $0x4] sm:$0xf] %vm375_vm10, %v21475_v32  ;;  %v15978_v49 = vpop.eup %14966  ;;  %14986 = vpow2.f32 %v12445_v45  ;;  %14854 = vmatprep.subr.msk.bf16.mxu0 %vm2243_vm11, %v1741_v41  ;;  %v448_v51 = vsel %vm15344_vm4, 0, %v447_v53  ;;  %v451_v2 = vsel %vm15344_vm4, 0, %v450_v42  ;;  %v15990_v5 = vadd.f32 %v15820_v28, %v15855_v12 }
 0x1f2   : > { %379 = vst.msk [vmem:[#allocation2 + $0x8] sm:$0x1] %vm378_vm0, %v21475_v32  ;;  %383 = vst.msk [vmem:[#allocation2 + $0xd4] sm:$0x1] %vm378_vm0, %v21475_v32  ;;  %v15986_v8 = vpop.eup %14968  ;;  %14988 = vpow2.f32 %v12446_v55  ;;  %v12450_v11 = vmul.f32 -1.442695, %v15931_v24  ;;  %v15999_v33 = vadd.f32 %v15820_v28, %v15861_v18  ;;  %v16003_v34 = vadd.f32 %v15820_v28, %v15864_v20 }
 0x1f3   : > { %381 = vst.msk [vmem:[#allocation2 + $0xcc] sm:$0xf] %vm375_vm10, %v21475_v32  ;;  %382 = vst.msk [vmem:[#allocation2 + $0xd0] sm:$0xf] %vm375_vm10, %v21475_v32  ;;  %v454_v36 = vsel %vm15344_vm4, 0, %v453_v56  ;;  %v15995_v23 = vpop.eup %14970  ;;  %14990 = vpow2.f32 %v12447_v50  ;;  %v16010_v19 = vadd.f32 %v15820_v28, %v15867_v25  ;;  %v16014_v45 = vadd.f32 %v15820_v28, %v15879_v37 }
 0x1f4   : > { %399 = vst [vmem:[#allocation2 + $0x30] sm:$0x1] %v398_v13  ;;  %449 = vst [vmem:[#allocation2 + $0x38] sm:$0x1] %v448_v51  ;;  %v12451_v12 = vmul.f32 -1.442695, %v15934_v27  ;;  %v16006_v29 = vpop.eup %14972  ;;  %14992 = vpow2.f32 %v12448_v6  ;;  %v16021_v20 = vadd.f32 %v15820_v28, %v15882_v38  ;;  %v16025_v53 = vadd.f32 %v15820_v28, %v15889_v10 }
 0x1f5   : > { %452 = vst [vmem:[#allocation2 + $0x44] sm:$0x1] %v451_v2  ;;  %21706 = vst [vmem:[#allocation9_spill] sm:$0xff] %v16003_v34  ;;  %v12452_v18 = vmul.f32 -1.442695, %v15941_v35  ;;  %v16017_v41 = vpop.eup %14974  ;;  %14994 = vpow2.f32 %v12449_v14  ;;  %v16037_v38 = vadd.f32 %v15820_v28, %v15896_v44  ;;  %v16041_v10 = vadd.f32 %v15820_v28, %v15903_v15 }
 0x1f6   : > { %455 = vst [vmem:[#allocation2 + $0x50] sm:$0x1] %v454_v36  ;;  %21707 = vst [vmem:[#allocation10_spill] sm:$0xff] %v16014_v45  ;;  %v12453_v25 = vmul.f32 -1.442695, %v15944_v39  ;;  %v16028_v55 = vpop.eup %14976  ;;  %14996 = vpow2.f32 %v12450_v11 }
 0x1f7   : > { %21708 = vst [vmem:[#allocation11_spill] sm:$0xff] %v16021_v20  ;;  %21709 = vst [vmem:[#allocation12_spill] sm:$0xff] %v16025_v53  ;;  %v12454_v37 = vmul.f32 -1.442695, %v15951_v48  ;;  %v12455_v42 = vmul.f32 -1.442695, %v15961_v17  ;;  %v16033_v46 = vpop.eup %14978  ;;  %14998 = vpow2.f32 %v12451_v12 }
 0x1f8   : > { %v12456_v50 = vmul.f32 -1.442695, %v15990_v5  ;;  %21710 = vst [vmem:[#allocation13_spill] sm:$0xff] %v16037_v38  ;;  %21711 = vst [vmem:[#allocation14_spill] sm:$0xff] %v16041_v10  ;;  %v12457_v56 = vmul.f32 -1.442695, %v15999_v33  ;;  %v16044_v14 = vpop.eup %14980  ;;  %15000 = vpow2.f32 %v12452_v18 }
 0x1f9   : > { %v1709_v6 = vld [vmem:[#allocation2] sm:$0xf]  ;;  %v1710_v13 = vld [vmem:[#allocation2 + $0x4] sm:$0xf]  ;;  %v12458_v51 = vmul.f32 -1.442695, %v16003_v34  ;;  %v16047_v36 = vpop.eup %14982  ;;  %15002 = vpow2.f32 %v12453_v25  ;;  %vm16309_vm0 = vmor %vm386_vm1, %vm1273_vm15 }
 0x1fa   : > { %v1764_v2 = vshrl.u32 %v1709_v6, 16  ;;  %v1767_v11 = vshll.u32 %v1709_v6, 16  ;;  %v1742_v44 = vld [vmem:[#allocation2 + $0x8] sm:$0x1]  ;;  %v1773_v7 = vshll.u32 %v1710_v13, 16  ;;  %v1777_v15 = vshrl.u32 %v1710_v13, 16  ;;  %v16049_v9 = vpop.eup %14984  ;;  %vm16408_vm4 = vmand %vm375_vm10, %vm436_vm3 }
 0x1fb   : > { %15004 = vpow2.f32 %v12454_v37  ;;  %v16051_v54 = vpop.eup %14986  ;;  %v12459_v18 = vmul.f32 -1.442695, %v16010_v19  ;;  %v12460_v25 = vmul.f32 -1.442695, %v16014_v45  ;;  %v1783_v34 = vshll.u32 %v1742_v44, 16 }
 0x1fc   : > { %v1766_v12 = vrot.slane %v1764_v2, 4  ;;  %v1769_v32 = vrot.slane %v1767_v11, 5  ;;  %15006 = vpow2.f32 %v12455_v42  ;;  %v1775_v40 = vrot.slane %v1773_v7, 5  ;;  %v14989_v30 = vpop.eup %14988 }
 0x1fd   : > { %v1779_v6 = vrot.slane %v1777_v15, 4  ;;  %15008 = vpow2.f32 %v12456_v50  ;;  %v14991_v13 = vpop.eup %14990  ;;  %v16057_v37 = vadd.f32 %v15820_v28, %v15910_v16  ;;  %v12461_v2 = vmul.f32 -1.442695, %v16021_v20 }
 0x1fe   : > { %v1770_v0 = vor.u32 %v1769_v32, %v1766_v12  ;;  %15010 = vpow2.f32 %v12457_v56  ;;  %v21713_v42 = vmov 0  ;;  %v14993_v50 = vpop.eup %14992  ;;  %v12462_v32 = vmul.f32 -1.442695, %v16025_v53 }
 0x1ff   : > { %21712 = vst [vmem:[#allocation15_spill] sm:$0xff] %v16057_v37  ;;  %v21714_v42 = vsel %vm16062_vm14, 4294967295, %v21713_v42  ;;  %v1780_v7 = vor.u32 %v1779_v6, %v1775_v40  ;;  %15012 = vpow2.f32 %v12458_v51  ;;  %v1785_v44 = vrot.slane %v1783_v34, 5  ;;  %v14995_v15 = vpop.eup %14994 }
 0x200   : > { %21715 = vst [vmem:[#allocation16_spill] sm:$0xff] %v21714_v42  ;;  %v1771_v11 = vrot.slane %v1770_v0, 4  ;;  %15014 = vpow2.f32 %v12459_v18  ;;  %v12463_v28 = vmul.f32 -1.442695, %v16037_v38  ;;  %v14997_v56 = vpop.eup %14996  ;;  %v12464_v12 = vmul.f32 -1.442695, %v16041_v10 }
 0x201   : > { %v1781_v16 = vrot.slane %v1780_v7, 4  ;;  %15016 = vpow2.f32 %v12460_v25  ;;  %v14999_v45 = vpop.eup %14998  ;;  %v12465_v51 = vmul.f32 -1.442695, %v16057_v37  ;;  %v1049_v18 = vadd.f32 1.0, %v15957_v1 }
 0x202   : > { %v1776_v20 = vsel %vm16062_vm14, %v1771_v11, %v1775_v40  ;;  %15018 = vpow2.f32 %v12461_v2  ;;  %v15001_v34 = vpop.eup %15000  ;;  %v1050_v25 = vadd.f32 1.0, %v15978_v49  ;;  %v1051_v40 = vadd.f32 1.0, %v15986_v8 }
 0x203   : > { %v1786_v0 = vsel %vm16062_vm14, %v1781_v16, %v1785_v44  ;;  %15020 = vpow2.f32 %v12462_v32  ;;  %v15003_v7 = vpop.eup %15002  ;;  %v1052_v11 = vadd.f32 1.0, %v15995_v23  ;;  %v1053_v32 = vadd.f32 1.0, %v16006_v29 }
 0x204   : > { %v12499_v6 = vcombine.low %v1776_v20, %v1786_v0  ;;  %15022 = vpow2.f32 %v12463_v28  ;;  %v1054_v20 = vadd.f32 1.0, %v16017_v41  ;;  %v1055_v49 = vadd.f32 1.0, %v16028_v55 }
 0x205   : > { %v15005_v10 = vpop.eup %15004  ;;  %15024 = vpow2.f32 %v12464_v12  ;;  %v1056_v8 = vadd.f32 1.0, %v16033_v46  ;;  %v1058_v29 = vadd.f32 1.0, %v16047_v36  ;;  %v1059_v0 = vadd.f32 1.0, %v16049_v9 }
 0x206   : > { %13663 = vmatprep.mubr.msk.bf16.mxu0 %vm641_vm5, %v12499_v6  ;;  %v15007_v2 = vpop.eup %15006  ;;  %15026 = vpow2.f32 %v12465_v51  ;;  %v1057_v51 = vadd.f32 1.0, %v16044_v14  ;;  %v1061_v6 = vadd.f32 1.0, %v14989_v30  ;;  %v1062_v55 = vadd.f32 1.0, %v14991_v13 }
 0x207   : > { %v15009_v44 = vpop.eup %15008  ;;  %15028 = vrcp.f32 %v1049_v18  ;;  %v1060_v18 = vadd.f32 1.0, %v16051_v54  ;;  %v1064_v46 = vadd.f32 1.0, %v14995_v15  ;;  %v1066_v14 = vadd.f32 1.0, %v14999_v45 }
 0x208   : > { %v15011_v1 = vpop.eup %15010  ;;  %15030 = vrcp.f32 %v1050_v25  ;;  %v1068_v37 = vadd.f32 1.0, %v15003_v7  ;;  %v1069_v38 = vadd.f32 1.0, %v15005_v10  ;;  %v1070_v9 = vadd.f32 1.0, %v15007_v2 }
 0x209   : > { %v15013_v28 = vpop.eup %15012  ;;  %15032 = vrcp.f32 %v1051_v40  ;;  %v1063_v40 = vadd.f32 1.0, %v14993_v50  ;;  %v16087_v54 = vadd.f32 1.0, %v15011_v1 }
 0x20a   : > { %v15015_v16 = vpop.eup %15014  ;;  %15034 = vrcp.f32 %v1052_v11  ;;  %v1065_v11 = vadd.f32 1.0, %v14997_v56  ;;  %v16089_v30 = vadd.f32 1.0, %v15013_v28 }
 0x20b   : > { %v15017_v12 = vpop.eup %15016  ;;  %15036 = vrcp.f32 %v1053_v32  ;;  %v1067_v32 = vadd.f32 1.0, %v15001_v34  ;;  %v16091_v13 = vadd.f32 1.0, %v15015_v16 }
 0x20c   : > { %v15019_v23 = vpop.eup %15018  ;;  %15038 = vrcp.f32 %v1054_v20  ;;  %v1071_v20 = vadd.f32 1.0, %v15009_v44  ;;  %v16093_v15 = vadd.f32 1.0, %v15017_v12 }
 0x20d   : > { %v15021_v41 = vpop.eup %15020  ;;  %15040 = vrcp.f32 %v1055_v49  ;;  %v16095_v45 = vadd.f32 1.0, %v15019_v23 }
 0x20e   : > { %v15023_v25 = vpop.eup %15022  ;;  %15042 = vrcp.f32 %v1056_v8  ;;  %v16098_v34 = vadd.f32 1.0, %v15021_v41 }
 0x20f   : > { %v15025_v42 = vpop.eup %15024  ;;  %15044 = vrcp.f32 %v1057_v51  ;;  %v16100_v7 = vadd.f32 1.0, %v15023_v25 }
 0x210   : > { %v15027_v36 = vpop.eup %15026  ;;  %15046 = vrcp.f32 %v1058_v29  ;;  %v16103_v1 = vadd.f32 1.0, %v15025_v42 }
 0x211   : > { %v15029_v53 = vpop.eup %15028  ;;  %15048 = vrcp.f32 %v1059_v0  ;;  %v16106_v8 = vadd.f32 1.0, %v15027_v36 }
 0x212   : > { %v15031_v50 = vpop.eup %15030  ;;  %15050 = vrcp.f32 %v1060_v18  ;;  %v1145_v56 = vmul.f32 %v15029_v53, %v15836_v52 }
 0x213   : > { %v15033_v10 = vpop.eup %15032  ;;  %15052 = vrcp.f32 %v1061_v6  ;;  %v1146_v2 = vmul.f32 %v15031_v50, %v15839_v47 }
 0x214   : > { %v15035_v44 = vpop.eup %15034  ;;  %15054 = vrcp.f32 %v1062_v55  ;;  %v1147_v28 = vmul.f32 %v15033_v10, %v15842_v60  ;;  %v13274_v49 = vpack.c.bf16 %v1145_v56, %v1145_v56 }
 0x215   : > { %v15037_v16 = vpop.eup %15036  ;;  %15056 = vrcp.f32 %v1063_v40  ;;  %v1148_v52 = vmul.f32 %v15035_v44, %v15848_v63  ;;  %v13275_v53 = vpack.c.bf16 %v1146_v2, %v1146_v2 }
 0x216   : > { %v15039_v12 = vpop.eup %15038  ;;  %15058 = vrcp.f32 %v1064_v46  ;;  %v1149_v51 = vmul.f32 %v15037_v16, %v15858_v61  ;;  %v16110_v23 = vpack.c.bf16 %v1147_v28, %v1147_v28  ;;  %v1276_v47 = vshrl.u32 %v13274_v49, 16 }
 0x217   : > { %v15041_v42 = vpop.eup %15040  ;;  %15060 = vrcp.f32 %v1065_v11  ;;  %v1150_v29 = vmul.f32 %v15039_v12, %v15870_v26  ;;  %v16113_v60 = vpack.c.bf16 %v1148_v52, %v1148_v52  ;;  %v1279_v0 = vshll.u32 %v13274_v49, 16 }
 0x218   : > { %v15043_v41 = vpop.eup %15042  ;;  %15062 = vrcp.f32 %v1066_v14  ;;  %v1151_v18 = vmul.f32 %v15041_v42, %v15873_v31  ;;  %v16116_v63 = vpack.c.bf16 %v1149_v51, %v1149_v51  ;;  %v16118_v6 = vrot.slane %v1276_v47, 7 }
 0x219   : > { %v15045_v55 = vpop.eup %15044  ;;  %15064 = vrcp.f32 %v1067_v32  ;;  %v1152_v61 = vmul.f32 %v15043_v41, %v15885_v43  ;;  %v16121_v25 = vpack.c.bf16 %v1150_v29, %v1150_v29  ;;  %v1284_v40 = vshrl.u32 %v13275_v53, 16 }
 0x21a   : > { %v15047_v46 = vpop.eup %15046  ;;  %15066 = vrcp.f32 %v1068_v37  ;;  %v1153_v26 = vmul.f32 %v15045_v55, %v15892_v62  ;;  %v16124_v11 = vpack.c.bf16 %v1151_v18, %v1151_v18  ;;  %v16127_v14 = vor.u32 %v1279_v0, %v16118_v6 }
 0x21b   : > { %v15049_v31 = vpop.eup %15048  ;;  %15068 = vrcp.f32 %v1069_v38  ;;  %v1154_v36 = vmul.f32 %v15047_v46, %v15899_v58  ;;  %v16130_v50 = vpack.c.bf16 %v1152_v61, %v1152_v61  ;;  %v16136_v62 = vrot.slane %v1284_v40, 7 }
 0x21c   : > { %v15051_v32 = vpop.eup %15050  ;;  %15070 = vrcp.f32 %v1070_v9  ;;  %v1155_v56 = vmul.f32 %v15049_v31, %v15906_v59  ;;  %v16134_v37 = vpack.c.bf16 %v1153_v26, %v1153_v26  ;;  %v1287_v38 = vshll.u32 %v13275_v53, 16 }
 0x21d   : > { %v15053_v10 = vpop.eup %15052  ;;  %15072 = vrcp.f32 %v1071_v20  ;;  %v1156_v2 = vmul.f32 %v15051_v32, %v15913_v3  ;;  %v16139_v44 = vpack.c.bf16 %v1154_v36, %v1154_v36  ;;  %v1293_v53 = vshrl.u32 %v16110_v23, 16 }
 0x21e   : > { %v15055_v58 = vpop.eup %15054  ;;  %15074 = vrcp.f32 %v16087_v54  ;;  %v1157_v28 = vmul.f32 %v15053_v10, %v15917_v21  ;;  %v16143_v49 = vpack.c.bf16 %v1155_v56, %v1155_v56  ;;  %v16151_v3 = vor.u32 %v1287_v38, %v16136_v62 }
 0x21f   : > { %v15057_v9 = vpop.eup %15056  ;;  %15076 = vrcp.f32 %v16089_v30  ;;  %v1158_v16 = vmul.f32 %v15055_v58, %v15920_v4  ;;  %v16148_v20 = vpack.c.bf16 %v1156_v2, %v1156_v2  ;;  %v1296_v51 = vshll.u32 %v16110_v23, 16 }
 0x220   : > { %v15059_v52 = vpop.eup %15058  ;;  %15078 = vrcp.f32 %v16091_v13  ;;  %v1159_v54 = vmul.f32 %v15057_v9, %v15924_v22  ;;  %v16155_v21 = vpack.c.bf16 %v1157_v28, %v1157_v28  ;;  %v16167_v22 = vrot.slane %v1293_v53, 7  ;;  %v21716_v28 = vld [vmem:[#allocation9_spill] sm:$0xff] }
 0x221   : > { %v15061_v12 = vpop.eup %15060  ;;  %15080 = vrcp.f32 %v16093_v15  ;;  %v1160_v30 = vmul.f32 %v15059_v52, %v15927_v57  ;;  %v16160_v4 = vpack.c.bf16 %v1158_v16, %v1158_v16  ;;  %v1301_v57 = vshrl.u32 %v16113_v60, 16 }
 0x222   : > { %v15063_v47 = vpop.eup %15062  ;;  %15082 = vrcp.f32 %v16095_v45  ;;  %v1161_v13 = vmul.f32 %v15061_v12, %v15931_v24  ;;  %v16165_v42 = vpack.c.bf16 %v1159_v54, %v1159_v54  ;;  %v16179_v24 = vor.u32 %v1296_v51, %v16167_v22  ;;  %v21718_v51 = vld [vmem:[#allocation10_spill] sm:$0xff] }
 0x223   : > { %v15065_v29 = vpop.eup %15064  ;;  %15084 = vrcp.f32 %v16098_v34  ;;  %v1162_v15 = vmul.f32 %v15063_v47, %v15934_v27  ;;  %v16171_v0 = vpack.c.bf16 %v1160_v30, %v1160_v30  ;;  %v16190_v40 = vrot.slane %v1301_v57, 7  ;;  %v21720_v57 = vld [vmem:[#allocation11_spill] sm:$0xff] }
 0x224   : > { %v15067_v41 = vpop.eup %15066  ;;  %15086 = vrcp.f32 %v16100_v7  ;;  %v1163_v45 = vmul.f32 %v15065_v29, %v15941_v35  ;;  %v16176_v23 = vpack.c.bf16 %v1161_v13, %v1161_v13  ;;  %v1318_v16 = vshrl.u32 %v16121_v25, 16 }
 0x225   : > { %v15069_v18 = vpop.eup %15068  ;;  %15088 = vrcp.f32 %v16103_v1  ;;  %v1164_v34 = vmul.f32 %v15067_v41, %v15944_v39  ;;  %v16183_v27 = vpack.c.bf16 %v1162_v15, %v1162_v15  ;;  %v1304_v39 = vshll.u32 %v16113_v60, 16 }
 0x226   : > { %v15071_v61 = vpop.eup %15070  ;;  %15090 = vrcp.f32 %v16106_v8  ;;  %v1165_v7 = vmul.f32 %v15069_v18, %v15951_v48  ;;  %v16188_v35 = vpack.c.bf16 %v1163_v45, %v1163_v45  ;;  %v1310_v1 = vshrl.u32 %v16116_v63, 16 }
 0x227   : > { %v15073_v46 = vpop.eup %15072  ;;  %v1166_v26 = vmul.f32 %v15071_v61, %v15961_v17  ;;  %v16193_v31 = vpack.c.bf16 %v1164_v34, %v1164_v34  ;;  %v1313_v8 = vshll.u32 %v16116_v63, 16  ;;  %v16206_v17 = vor.u32 %v1304_v39, %v16190_v40  ;;  %v21721_v61 = vld [vmem:[#allocation12_spill] sm:$0xff] }
 0x228   : > { %v15075_v36 = vpop.eup %15074  ;;  %v1167_v32 = vmul.f32 %v15073_v46, %v15990_v5  ;;  %v16198_v56 = vpack.c.bf16 %v1165_v7, %v1165_v7  ;;  %v16208_v60 = vrot.slane %v1310_v1, 7  ;;  %v1321_v52 = vshll.u32 %v16121_v25, 16 }
 0x229   : > { %v15077_v10 = vpop.eup %15076  ;;  %v1168_v2 = vmul.f32 %v15075_v36, %v15999_v33  ;;  %v16203_v38 = vpack.c.bf16 %v1166_v26, %v1166_v26  ;;  %v16225_v29 = vrot.slane %v1318_v16, 7  ;;  %v1327_v15 = vshrl.u32 %v16124_v11, 16  ;;  %v21722_v36 = vld [vmem:[#allocation13_spill] sm:$0xff] }
 0x22a   : > { %v15079_v58 = vpop.eup %15078  ;;  %v1169_v9 = vmul.f32 %v15077_v10, %v21716_v28  ;;  %v16211_v5 = vpack.c.bf16 %v1167_v32, %v1167_v32  ;;  %v16219_v53 = vor.u32 %v1313_v8, %v16208_v60  ;;  %v1330_v45 = vshll.u32 %v16124_v11, 16 }
 0x22b   : > { %v15081_v63 = vpop.eup %15080  ;;  %v1170_v54 = vmul.f32 %v15079_v58, %v16010_v19  ;;  %v16216_v33 = vpack.c.bf16 %v1168_v2, %v1168_v2  ;;  %21719 = vst [vmem:[#allocation10_spill] sm:$0xff] %v16225_v29  ;;  %v1335_v18 = vshrl.u32 %v16130_v50, 16  ;;  %v16237_v26 = vor.u32 %v1321_v52, %v16225_v29  ;;  %v21725_v58 = vld [vmem:[#allocation14_spill] sm:$0xff] }
 0x22c   : > { %21717 = vst [vmem:[#allocation9_spill] sm:$0xff] %v16219_v53  ;;  %v15083_v30 = vpop.eup %15082  ;;  %v1171_v47 = vmul.f32 %v15081_v63, %v21718_v51  ;;  %v16223_v13 = vpack.c.bf16 %v1169_v9, %v1169_v9  ;;  %v16243_v10 = vrot.slane %v1327_v15, 7  ;;  %v1338_v16 = vshll.u32 %v16130_v50, 16  ;;  %v21726_v63 = vld [vmem:[#allocation15_spill] sm:$0xff]  ;;  %v1692_v53 = vld [vmem:[#allocation2 + $0xb0] sm:$0x1] }
 0x22d   : > { %v15085_v25 = vpop.eup %15084  ;;  %v1172_v41 = vmul.f32 %v15083_v30, %v21720_v57  ;;  %v16229_v19 = vpack.c.bf16 %v1170_v54, %v1170_v54  ;;  %v16245_v11 = vrot.slane %v1335_v18, 7  ;;  %v1344_v52 = vshrl.u32 %v16134_v37, 16 }
 0x22e   : > { %v15087_v34 = vpop.eup %15086  ;;  %v1173_v7 = vmul.f32 %v15085_v25, %v21721_v61  ;;  %v16234_v46 = vpack.c.bf16 %v1171_v47, %v1171_v47  ;;  %21723 = vst [vmem:[#allocation11_spill] sm:$0xff] %v16243_v10  ;;  %v16256_v51 = vor.u32 %v1330_v45, %v16243_v10  ;;  %v1347_v18 = vshll.u32 %v16134_v37, 16  ;;  %v1678_v10 = vld [vmem:[#allocation2 + $0x98] sm:$0x1] }
 0x22f   : > { %v15089_v1 = vpop.eup %15088  ;;  %v1174_v32 = vmul.f32 %v15087_v34, %v21722_v36  ;;  %v16241_v8 = vpack.c.bf16 %v1172_v41, %v1172_v41  ;;  %21724 = vst [vmem:[#allocation12_spill] sm:$0xff] %v16245_v11  ;;  %v16262_v25 = vor.u32 %v1338_v16, %v16245_v11  ;;  %v16265_v41 = vrot.slane %v1344_v52, 7  ;;  %v1671_v11 = vld [vmem:[#allocation2 + $0x8c] sm:$0x1] }
 0x230   : > { %v15091_v2 = vpop.eup %15090  ;;  %v1175_v28 = vmul.f32 %v15089_v1, %v21725_v58  ;;  %v16248_v9 = vpack.c.bf16 %v1173_v7, %v1173_v7  ;;  %21727 = vst [vmem:[#allocation13_spill] sm:$0xff] %v16256_v51  ;;  %v1352_v34 = vshrl.u32 %v16139_v44, 16  ;;  %v1355_v45 = vshll.u32 %v16139_v44, 16  ;;  %v1674_v51 = vld [vmem:[#allocation2 + $0x90] sm:$0xf] }
 0x231   : > { %v1176_v54 = vmul.f32 %v15091_v2, %v21726_v63  ;;  %v16253_v30 = vpack.c.bf16 %v1174_v32, %v1174_v32  ;;  %21728 = vst [vmem:[#allocation14_spill] sm:$0xff] %v16262_v25  ;;  %21729 = vst [vmem:[#allocation15_spill] sm:$0xff] %v16265_v41  ;;  %v1361_v7 = vshrl.u32 %v16143_v49, 16  ;;  %v1364_v1 = vshll.u32 %v16143_v49, 16 }
 0x232   : > { %v16259_v15 = vpack.c.bf16 %v1175_v28, %v1175_v28  ;;  %v1369_v36 = vshrl.u32 %v16148_v20, 16  ;;  %v16277_v32 = vor.u32 %v1347_v18, %v16265_v41  ;;  %v16279_v2 = vrot.slane %v1352_v34, 7 }
 0x233   : > { %v16267_v50 = vpack.c.bf16 %v1176_v54, %v1176_v54  ;;  %v1372_v58 = vshll.u32 %v16148_v20, 16  ;;  %v1378_v37 = vshrl.u32 %v16155_v21, 16  ;;  %v16283_v28 = vrot.slane %v1361_v7, 7 }
 0x234   : > { %21730 = vst [vmem:[#allocation17_spill] sm:$0xff] %v16279_v2  ;;  %v16285_v44 = vrot.slane %v1369_v36, 7  ;;  %v1381_v16 = vshll.u32 %v16155_v21, 16  ;;  %v1386_v52 = vshrl.u32 %v16160_v4, 16  ;;  %v16290_v49 = vor.u32 %v1355_v45, %v16279_v2  ;;  %v1667_v2 = vld [vmem:[#allocation2 + $0x84] sm:$0xf] }
 0x235   : > { %21731 = vst [vmem:[#allocation18_spill] sm:$0xff] %v16283_v28  ;;  %v1380_v54 = vrot.slane %v1378_v37, 7  ;;  %v1389_v18 = vshll.u32 %v16160_v4, 16  ;;  %v16295_v20 = vor.u32 %v1364_v1, %v16283_v28  ;;  %v1395_v63 = vshrl.u32 %v16165_v42, 16 }
 0x236   : > { %21732 = vst [vmem:[#allocation19_spill] sm:$0xff] %v16285_v44  ;;  %21733 = vst [vmem:[#allocation20_spill] sm:$0xff] %v16290_v49  ;;  %v16299_v7 = vor.u32 %v1372_v58, %v16285_v44  ;;  %v16304_v45 = vrot.slane %v1386_v52, 7  ;;  %v21735_v4 = vmov 0  ;;  %v1398_v1 = vshll.u32 %v16165_v42, 16 }
 0x237   : > { %v16302_v36 = vor.u32 %v1381_v16, %v1380_v54  ;;  %v1384_v61 = vrot.slane %v1380_v54, 4  ;;  %v21736_v4 = vsel %vm16309_vm0, 4294967295, %v21735_v4  ;;  %v1403_v58 = vshrl.u32 %v16171_v0, 16 }
 0x238   : > { %21734 = vst [vmem:[#allocation21_spill] sm:$0xff] %v16299_v7  ;;  %21737 = vst [vmem:[#allocation22_spill] sm:$0xff] %v21736_v4  ;;  %v1406_v37 = vshll.u32 %v16171_v0, 16  ;;  %v1412_v16 = vshrl.u32 %v16176_v23, 16  ;;  %v1391_v54 = vor.u32 %v1389_v18, %v16304_v45  ;;  %v1397_v21 = vrot.slane %v1395_v63, 7 }
 0x239   : > { %v1415_v34 = vshll.u32 %v16176_v23, 16  ;;  %v16320_v57 = vrot.slane %v1403_v58, 7  ;;  %v1420_v39 = vshrl.u32 %v16183_v27, 16  ;;  %v1423_v42 = vshll.u32 %v16183_v27, 16  ;;  %v1664_v7 = vld [vmem:[#allocation2 + $0x80] sm:$0x1] }
 0x23a   : > { %v1414_v47 = vrot.slane %v1412_v16, 7  ;;  %v1392_v12 = vsel %vm16309_vm0, %v1384_v61, %v1391_v54  ;;  %v16326_v0 = vor.u32 %v1398_v1, %v1397_v21  ;;  %v1401_v48 = vrot.slane %v1397_v21, 4 }
 0x23b   : > { %v1429_v18 = vshrl.u32 %v16188_v35, 16  ;;  %v1408_v55 = vor.u32 %v1406_v37, %v16320_v57  ;;  %1642 = vst.msk [vmem:[#allocation2 + $0x58] sm:$0xf] %vm375_vm10, %v1392_v12  ;;  %v16334_v16 = vrot.slane %v1420_v39, 7  ;;  %v1432_v59 = vshll.u32 %v16188_v35, 16 }
 0x23c   : > { %v16331_v23 = vor.u32 %v1415_v34, %v1414_v47  ;;  %v1418_v58 = vrot.slane %v1414_v47, 4  ;;  %v1437_v61 = vshrl.u32 %v16193_v31, 16  ;;  %v1440_v1 = vshll.u32 %v16193_v31, 16 }
 0x23d   : > { %v1431_v27 = vrot.slane %v1429_v18, 7  ;;  %v1409_v21 = vsel %vm16309_vm0, %v1401_v48, %v1408_v55  ;;  %v1446_v37 = vshrl.u32 %v16198_v56, 16  ;;  %v1449_v34 = vshll.u32 %v16198_v56, 16 }
 0x23e   : > { %v1425_v47 = vor.u32 %v1423_v42, %v16334_v16  ;;  %1649 = vst.msk [vmem:[#allocation2 + $0x64] sm:$0xf] %vm375_vm10, %v1409_v21  ;;  %v16348_v35 = vrot.slane %v1437_v61, 7  ;;  %v1454_v55 = vshrl.u32 %v16203_v38, 16  ;;  %v1457_v31 = vshll.u32 %v16203_v38, 16 }
 0x23f   : > { %v16345_v39 = vor.u32 %v1432_v59, %v1431_v27  ;;  %v1435_v54 = vrot.slane %v1431_v27, 4  ;;  %v1448_v18 = vrot.slane %v1446_v37, 7  ;;  %v1463_v56 = vshrl.u32 %v16211_v5, 16 }
 0x240   : > { %v1426_v48 = vsel %vm16309_vm0, %v1418_v58, %v1425_v47  ;;  %v1466_v42 = vshll.u32 %v16211_v5, 16  ;;  %v1471_v59 = vshrl.u32 %v16216_v33, 16  ;;  %v1442_v27 = vor.u32 %v1440_v1, %v16348_v35 }
 0x241   : > { %v16359_v61 = vor.u32 %v1449_v34, %v1448_v18  ;;  %v1452_v37 = vrot.slane %v1448_v18, 4  ;;  %1656 = vst.msk [vmem:[#allocation2 + $0x70] sm:$0xf] %vm375_vm10, %v1426_v48  ;;  %v16362_v43 = vrot.slane %v1454_v55, 7  ;;  %v1465_v38 = vrot.slane %v1463_v56, 7 }
 0x242   : > { %v16364_v12 = vrot.slane %v1471_v59, 7  ;;  %v1474_v58 = vshll.u32 %v16216_v33, 16  ;;  %v1443_v5 = vsel %vm16309_vm0, %v1435_v54, %v1442_v27  ;;  %v1480_v47 = vshrl.u32 %v16223_v13, 16 }
 0x243   : > { %v1483_v1 = vshll.u32 %v16223_v13, 16  ;;  %v1488_v34 = vshrl.u32 %v16229_v19, 16  ;;  %v1459_v18 = vor.u32 %v1457_v31, %v16362_v43  ;;  %v16374_v55 = vor.u32 %v1466_v42, %v1465_v38  ;;  %1663 = vst.msk [vmem:[#allocation2 + $0x7c] sm:$0xf] %vm375_vm10, %v1443_v5 }
 0x244   : > { %v1469_v56 = vrot.slane %v1465_v38, 4  ;;  %v1476_v33 = vor.u32 %v1474_v58, %v16364_v12  ;;  %v1482_v54 = vrot.slane %v1480_v47, 7  ;;  %v1491_v21 = vshll.u32 %v16229_v19, 16 }
 0x245   : > { %v16379_v27 = vrot.slane %v1488_v34, 7  ;;  %v1460_v13 = vsel %vm16309_vm0, %v1452_v37, %v1459_v18  ;;  %v1497_v31 = vshrl.u32 %v16234_v46, 16  ;;  %v1500_v42 = vshll.u32 %v16234_v46, 16  ;;  %v1625_v46 = vld [vmem:[#allocation2 + $0x3c] sm:$0xf] }
 0x246   : > { %v1477_v38 = vsel %vm16309_vm0, %v1469_v56, %v1476_v33  ;;  %v16388_v5 = vor.u32 %v1483_v1, %v1482_v54  ;;  %v1486_v58 = vrot.slane %v1482_v54, 4  ;;  %1670 = vst.msk [vmem:[#allocation2 + $0x88] sm:$0xf] %vm375_vm10, %v1460_v13  ;;  %v1505_v37 = vshrl.u32 %v16241_v8, 16  ;;  %v1632_v54 = vld [vmem:[#allocation2 + $0x48] sm:$0xf] }
 0x247   : > { %v1493_v47 = vor.u32 %v1491_v21, %v16379_v27  ;;  %v1499_v34 = vrot.slane %v1497_v31, 7  ;;  %v1508_v19 = vshll.u32 %v16241_v8, 16  ;;  %1677 = vst.msk [vmem:[#allocation2 + $0x94] sm:$0xf] %vm375_vm10, %v1477_v38  ;;  %v1514_v18 = vshrl.u32 %v16248_v9, 16  ;;  %v21768_v38 = vld [vmem:[#allocation17_spill] sm:$0xff] }
 0x248   : > { %v1517_v1 = vshll.u32 %v16248_v9, 16  ;;  %v1522_v56 = vshrl.u32 %v16253_v30, 16  ;;  %v1525_v33 = vshll.u32 %v16253_v30, 16  ;;  %v1639_v13 = vld [vmem:[#allocation2 + $0x54] sm:$0xf]  ;;  %v16404_v8 = vrot.slane %v1505_v37, 7 }
 0x249   : > { %v1494_v21 = vsel %vm16309_vm0, %v1486_v58, %v1493_v47  ;;  %v16402_v31 = vor.u32 %v1500_v42, %v1499_v34  ;;  %v1503_v59 = vrot.slane %v1499_v34, 4  ;;  %v1643_v9 = vld [vmem:[#allocation2 + $0x5c] sm:$0x1]  ;;  %v1516_v48 = vrot.slane %v1514_v18, 7  ;;  %v1646_v42 = vld [vmem:[#allocation2 + $0x60] sm:$0xf] }
 0x24a   : > { %v16412_v63 = vrot.slane %v1522_v56, 7  ;;  %v1531_v30 = vshrl.u32 %v16259_v15, 16  ;;  %v1534_v52 = vshll.u32 %v16259_v15, 16  ;;  %1684 = vst.msk [vmem:[#allocation2 + $0xa0] sm:$0xf] %vm375_vm10, %v1494_v21  ;;  %v1510_v37 = vor.u32 %v1508_v19, %v16404_v8 }
 0x24b   : > { %v1650_v58 = vld [vmem:[#allocation2 + $0x68] sm:$0x1]  ;;  %v1653_v47 = vld [vmem:[#allocation2 + $0x6c] sm:$0xf]  ;;  %v1657_v34 = vld [vmem:[#allocation2 + $0x74] sm:$0x1]  ;;  %v16421_v41 = vor.u32 %v1517_v1, %v1516_v48  ;;  %v1633_v49 = vsel %vm16408_vm4, %v16295_v20, %v1632_v54  ;;  %v1647_v54 = vsel %vm16408_vm4, %v16326_v0, %v1646_v42 }
 0x24c   : > { %v1539_v28 = vshrl.u32 %v16267_v50, 16  ;;  %v1542_v18 = vshll.u32 %v16267_v50, 16  ;;  %v1660_v56 = vld [vmem:[#allocation2 + $0x78] sm:$0xf]  ;;  %v1520_v15 = vrot.slane %v1516_v48, 4  ;;  %v1527_v21 = vor.u32 %v1525_v33, %v16412_v63 }
 0x24d   : > { %v1681_v19 = vld [vmem:[#allocation2 + $0x9c] sm:$0xf]  ;;  %v1511_v44 = vsel %vm16309_vm0, %v1503_v59, %v1510_v37  ;;  %v1533_v25 = vrot.slane %v1531_v30, 7  ;;  %v1626_v50 = vsel %vm16408_vm4, %v16277_v32, %v1625_v46  ;;  %v1685_v1 = vld [vmem:[#allocation2 + $0xa4] sm:$0x1]  ;;  %v1640_v59 = vsel %vm16408_vm4, %v16302_v36, %v1639_v13 }
 0x24e   : > { %v16427_v29 = vrot.slane %v1539_v28, 7  ;;  %v1688_v48 = vld [vmem:[#allocation2 + $0xa8] sm:$0xf]  ;;  %v1528_v33 = vsel %vm16309_vm0, %v1520_v15, %v1527_v21  ;;  %v21740_v28 = vrot.slane %v16304_v45, 4  ;;  %1691 = vst.msk [vmem:[#allocation2 + $0xac] sm:$0xf] %vm375_vm10, %v1511_v44 }
 0x24f   : > { %1627 = vst [vmem:[#allocation2 + $0x3c] sm:$0xf] %v1626_v50  ;;  %v1536_v32 = vor.u32 %v1534_v52, %v1533_v25  ;;  %v1537_v46 = vrot.slane %v1533_v25, 4  ;;  %1698 = vst.msk [vmem:[#allocation2 + $0xb8] sm:$0xf] %vm375_vm10, %v1528_v33  ;;  %v21742_v44 = vrot.slane %v16320_v57, 4  ;;  %v1661_v57 = vsel %vm16408_vm4, %v16345_v39, %v1660_v56 }
 0x250   : > { %v1644_v37 = vsel %vm15319_vm2, %v21740_v28, %v1643_v9  ;;  %v1544_v15 = vor.u32 %v1542_v18, %v16427_v29  ;;  %v1546_v21 = vrot.slane %v16427_v29, 4  ;;  %1634 = vst [vmem:[#allocation2 + $0x48] sm:$0xf] %v1633_v49  ;;  %1641 = vst [vmem:[#allocation2 + $0x54] sm:$0xf] %v1640_v59  ;;  %v1654_v29 = vsel %vm16408_vm4, %v16331_v23, %v1653_v47 }
 0x251   : > { %1645 = vst [vmem:[#allocation2 + $0x5c] sm:$0x1] %v1644_v37  ;;  %v1695_v20 = vld [vmem:[#allocation2 + $0xb4] sm:$0xf]  ;;  %v1699_v36 = vld [vmem:[#allocation2 + $0xbc] sm:$0x1]  ;;  %v1651_v25 = vsel %vm15319_vm2, %v21742_v44, %v1650_v58  ;;  %v1668_v23 = vsel %vm16408_vm4, %v16359_v61, %v1667_v2  ;;  %v1675_v39 = vsel %vm16408_vm4, %v16374_v55, %v1674_v51  ;;  %v1682_v2 = vsel %vm16408_vm4, %v16388_v5, %v1681_v19 }
 0x252   : > { %v1702_v45 = vld [vmem:[#allocation2 + $0xc0] sm:$0xf]  ;;  %v21743_v49 = vrot.slane %v16334_v16, 4  ;;  %v1706_v13 = vld [vmem:[#allocation2 + $0xc8] sm:$0x1]  ;;  %v1545_v9 = vsel %vm16309_vm0, %v1537_v46, %v1544_v15  ;;  %v21744_v0 = vrot.slane %v16348_v35, 4  ;;  %v1696_v5 = vsel %vm16408_vm4, %v16421_v41, %v1695_v20 }
 0x253   : > { %1655 = vst [vmem:[#allocation2 + $0x6c] sm:$0xf] %v1654_v29  ;;  %1648 = vst [vmem:[#allocation2 + $0x60] sm:$0xf] %v1647_v54  ;;  %v21745_v16 = vrot.slane %v16362_v43, 4  ;;  %v21750_v41 = vrot.slane %v16118_v6, 4 }
 0x254   : > { %v1658_v52 = vsel %vm15319_vm2, %v21743_v49, %v1657_v34  ;;  %v1665_v42 = vsel %vm15319_vm2, %v21744_v0, %v1664_v7  ;;  %1652 = vst [vmem:[#allocation2 + $0x68] sm:$0x1] %v1651_v25  ;;  %1662 = vst [vmem:[#allocation2 + $0x78] sm:$0xf] %v1661_v57  ;;  %v21746_v7 = vrot.slane %v16364_v12, 4  ;;  %v21748_v12 = vrot.slane %v16404_v8, 4 }
 0x255   : > { %1659 = vst [vmem:[#allocation2 + $0x74] sm:$0x1] %v1658_v52  ;;  %1669 = vst [vmem:[#allocation2 + $0x84] sm:$0xf] %v1668_v23  ;;  %v1672_v58 = vsel %vm15319_vm2, %v21745_v16, %v1671_v11  ;;  %v1597_v43 = vld [vmem:[#allocation2 + $0xc] sm:$0xf]  ;;  %v1703_v8 = vsel %vm16408_vm4, %v1536_v32, %v1702_v45  ;;  %v1290_v19 = vsel %vm16309_vm0, %v21750_v41, %v16151_v3 }
 0x256   : > { %v1679_v35 = vsel %vm15319_vm2, %v21746_v7, %v1678_v10  ;;  %1705 = vst.msk [vmem:[#allocation2 + $0xc4] sm:$0xf] %vm375_vm10, %v1545_v9  ;;  %1666 = vst [vmem:[#allocation2 + $0x80] sm:$0x1] %v1665_v42  ;;  %v1601_v61 = vld [vmem:[#allocation2 + $0x14] sm:$0x1]  ;;  %v1689_v10 = vsel %vm16408_vm4, %v16402_v31, %v1688_v48  ;;  %v1693_v55 = vsel %vm15319_vm2, %v21748_v12, %v1692_v53 }
 0x257   : > { %v1604_v47 = vld [vmem:[#allocation2 + $0x18] sm:$0xf]  ;;  %1673 = vst [vmem:[#allocation2 + $0x8c] sm:$0x1] %v1672_v58  ;;  %1676 = vst [vmem:[#allocation2 + $0x90] sm:$0xf] %v1675_v39  ;;  %v1707_v53 = vsel %vm15319_vm2, %v1546_v21, %v1706_v13 }
 0x258   : > { %1680 = vst [vmem:[#allocation2 + $0x98] sm:$0x1] %v1679_v35  ;;  %1683 = vst [vmem:[#allocation2 + $0x9c] sm:$0xf] %v1682_v2  ;;  %v21747_v11 = vrot.slane %v16379_v27, 4  ;;  %v21749_v27 = vrot.slane %v16412_v63, 4  ;;  %v1598_v63 = vsel %vm16408_vm4, %v16127_v14, %v1597_v43  ;;  %v1605_v59 = vsel %vm16408_vm4, %v16179_v24, %v1604_v47 }
 0x259   : > { %v1608_v34 = vld [vmem:[#allocation2 + $0x20] sm:$0x1]  ;;  %v1611_v18 = vld [vmem:[#allocation2 + $0x24] sm:$0xf]  ;;  %v1615_v56 = vld [vmem:[#allocation2 + $0x2c] sm:$0x1] }
 0x25a   : > { %v1686_v51 = vsel %vm15319_vm2, %v21747_v11, %v1685_v1  ;;  %1690 = vst [vmem:[#allocation2 + $0xa8] sm:$0xf] %v1689_v10  ;;  %1694 = vst [vmem:[#allocation2 + $0xb0] sm:$0x1] %v1693_v55  ;;  %v1700_v31 = vsel %vm15319_vm2, %v21749_v27, %v1699_v36  ;;  %v1618_v50 = vld [vmem:[#allocation2 + $0x30] sm:$0xf] }
 0x25b   : > { %1687 = vst [vmem:[#allocation2 + $0xa4] sm:$0x1] %v1686_v51  ;;  %1697 = vst [vmem:[#allocation2 + $0xb4] sm:$0xf] %v1696_v5  ;;  %v1622_v1 = vld [vmem:[#allocation2 + $0x38] sm:$0x1] }
 0x25c   : > { %1701 = vst [vmem:[#allocation2 + $0xbc] sm:$0x1] %v1700_v31  ;;  %1704 = vst [vmem:[#allocation2 + $0xc0] sm:$0xf] %v1703_v8  ;;  %v21751_v48 = vrot.slane %v16136_v62, 4  ;;  %v21752_v6 = vrot.slane %v16167_v22, 4 }
 0x25d   : > { %1708 = vst [vmem:[#allocation2 + $0xc8] sm:$0x1] %v1707_v53  ;;  %1600 = vst.msk [vmem:[#allocation2 + $0x10] sm:$0xf] %vm375_vm10, %v1290_v19  ;;  %v1629_v28 = vld [vmem:[#allocation2 + $0x44] sm:$0x1] }
 0x25e   : > { %v1602_v33 = vsel %vm15319_vm2, %v21751_v48, %v1601_v61  ;;  %v1307_v3 = vsel %vm16309_vm0, %v21752_v6, %v16206_v17  ;;  %v16532_v37 = vld [vmem:[#allocation2 + $0x3c] sm:$0xf]  ;;  %1599 = vst [vmem:[#allocation2 + $0xc] sm:$0xf] %v1598_v63  ;;  %1606 = vst [vmem:[#allocation2 + $0x18] sm:$0xf] %v1605_v59 }
 0x25f   : > { %1603 = vst [vmem:[#allocation2 + $0x14] sm:$0x1] %v1602_v33  ;;  %1607 = vst.msk [vmem:[#allocation2 + $0x1c] sm:$0xf] %vm375_vm10, %v1307_v3  ;;  %v21753_v14 = vrot.slane %v16190_v40, 4  ;;  %v21754_v22 = vrot.slane %v16208_v60, 4 }
 0x260   : > { %v21755_v24 = vld [vmem:[#allocation9_spill] sm:$0xff]  ;;  %v21756_v46 = vld [vmem:[#allocation10_spill] sm:$0xff]  ;;  %v16551_v40 = vld [vmem:[#allocation2 + $0x48] sm:$0xf]  ;;  %v21769_v23 = vrot.slane %v21768_v38, 4  ;;  %v1884_v58 = vshrl.u32 %v16532_v37, 16 }
 0x261   : > { %v1609_v62 = vsel %vm15319_vm2, %v21753_v14, %v1608_v34  ;;  %v1324_v17 = vsel %vm16309_vm0, %v21754_v22, %v16237_v26  ;;  %v1612_v32 = vsel %vm16408_vm4, %v21755_v24, %v1611_v18  ;;  %v21757_v15 = vrot.slane %v21756_v46, 4  ;;  %v1636_v20 = vld [vmem:[#allocation2 + $0x50] sm:$0x1]  ;;  %v1723_v36 = vld [vmem:[#allocation2 + $0x54] sm:$0xf]  ;;  %v21758_v60 = vld [vmem:[#allocation14_spill] sm:$0xff] }
 0x262   : > { %1610 = vst [vmem:[#allocation2 + $0x20] sm:$0x1] %v1609_v62  ;;  %1613 = vst [vmem:[#allocation2 + $0x24] sm:$0xf] %v1612_v32  ;;  %v21759_v26 = vld [vmem:[#allocation11_spill] sm:$0xff]  ;;  %v21761_v44 = vld [vmem:[#allocation13_spill] sm:$0xff]  ;;  %v1630_v16 = vsel %vm15319_vm2, %v21769_v23, %v1629_v28 }
 0x263   : > { %v1616_v21 = vsel %vm15319_vm2, %v21757_v15, %v1615_v56  ;;  %1614 = vst.msk [vmem:[#allocation2 + $0x28] sm:$0xf] %vm375_vm10, %v1324_v17  ;;  %v21760_v45 = vrot.slane %v21759_v26, 4  ;;  %v1619_v25 = vsel %vm16408_vm4, %v21761_v44, %v1618_v50  ;;  %v21762_v29 = vld [vmem:[#allocation12_spill] sm:$0xff]  ;;  %v21765_v9 = vld [vmem:[#allocation15_spill] sm:$0xff]  ;;  %v1887_v39 = vshll.u32 %v16532_v37, 16 }
 0x264   : > { %1617 = vst [vmem:[#allocation2 + $0x2c] sm:$0x1] %v1616_v21  ;;  %v21763_v49 = vrot.slane %v21762_v29, 4  ;;  %v21764_v13 = vld [vmem:[#allocation20_spill] sm:$0xff]  ;;  %v21766_v57 = vrot.slane %v21765_v9, 4  ;;  %v21770_v7 = vld [vmem:[#allocation21_spill] sm:$0xff] }
 0x265   : > { %v1341_v54 = vsel %vm16309_vm0, %v21760_v45, %v21758_v60  ;;  %v16571_v42 = vld [vmem:[#allocation2 + $0x58] sm:$0xf]  ;;  %1620 = vst [vmem:[#allocation2 + $0x30] sm:$0xf] %v1619_v25  ;;  %1631 = vst [vmem:[#allocation2 + $0x44] sm:$0x1] %v1630_v16 }
 0x266   : > { %v1623_v52 = vsel %vm15319_vm2, %v21763_v49, %v1622_v1  ;;  %v1358_v0 = vsel %vm16309_vm0, %v21766_v57, %v21764_v13  ;;  %21767 = vst [vmem:[#allocation5_spill] sm:$0xff] %v16571_v42  ;;  %1621 = vst.msk [vmem:[#allocation2 + $0x34] sm:$0xf] %vm375_vm10, %v1341_v54  ;;  %v21771_v35 = vld [vmem:[#allocation18_spill] sm:$0xff]  ;;  %v21773_v61 = vld [vmem:[#allocation19_spill] sm:$0xff]  ;;  %v1908_v51 = vshrl.u32 %v16551_v40, 16 }
 0x267   : > { %1624 = vst [vmem:[#allocation2 + $0x38] sm:$0x1] %v1623_v52  ;;  %1628 = vst.msk [vmem:[#allocation2 + $0x40] sm:$0xf] %vm375_vm10, %v1358_v0  ;;  %v21772_v2 = vrot.slane %v21771_v35, 4  ;;  %v21774_v47 = vrot.slane %v21773_v61, 4 }
 0x268   : > { %v1911_v10 = vshll.u32 %v16551_v40, 16  ;;  %v1932_v12 = vshrl.u32 %v1723_v36, 16  ;;  %v16593_v55 = vrot.slane %v1884_v58, 4  ;;  %v16595_v5 = vrot.slane %v1887_v39, 5  ;;  %v15222_v56 = vld [vmem:[%s21465_s3] sm:$0x3] }
 0x269   : > { %v1375_v43 = vsel %vm16309_vm0, %v21772_v2, %v21770_v7  ;;  %v1637_v11 = vsel %vm15319_vm2, %v21774_v47, %v1636_v20  ;;  %v1935_v34 = vshll.u32 %v1723_v36, 16  ;;  %v1941_v18 = vshll.u32 %v16571_v42, 16  ;;  %v16608_v8 = vld [vmem:[#allocation2 + $0x5c] sm:$0x1]  ;;  %v16610_v53 = vld [vmem:[#allocation2 + $0x10] sm:$0xf] }
 0x26a   : > { %1635 = vst.msk [vmem:[#allocation2 + $0x4c] sm:$0xf] %vm375_vm10, %v1375_v43  ;;  %1638 = vst [vmem:[#allocation2 + $0x50] sm:$0x1] %v1637_v11  ;;  %v16602_v30 = vsel %vm2243_vm11, %v15222_v56, 0  ;;  %v16604_v27 = vrot.slane %v1908_v51, 4  ;;  %v1890_v3 = vor.u32 %v16595_v5, %v16593_v55 }
 0x26b   : > { %v16606_v31 = vrot.slane %v1911_v10, 5  ;;  %v16612_v41 = vrot.slane %v1932_v12, 4  ;;  %v16614_v19 = vrot.slane %v1935_v34, 5  ;;  %v16616_v50 = vrot.slane %v1941_v18, 5  ;;  %v16619_v63 = vld [vmem:[#allocation2 + $0xc] sm:$0xf]  ;;  %vm18135_vm10 = vmand %vm489_vm9, %vm386_vm1 }
 0x26c   : > { %v1945_v1 = vshrl.u32 %v16571_v42, 16  ;;  %v16621_v48 = vld [vmem:[#allocation2 + $0x14] sm:$0x1]  ;;  %v1797_v33 = vshll.u32 %v16610_v53, 16  ;;  %v1801_v6 = vshrl.u32 %v16610_v53, 16  ;;  %v1788_v59 = vshrl.u32 %v16619_v63, 16  ;;  %vm18362_vm1 = vmand %vm489_vm9, %vm436_vm3 }
 0x26d   : > { %v1791_v28 = vshll.u32 %v16619_v63, 16  ;;  %v1807_v14 = vshll.u32 %v16621_v48, 16  ;;  %v16630_v62 = vld [vmem:[#allocation2 + $0x18] sm:$0xf]  ;;  %v1951_v22 = vshll.u32 %v16608_v8, 16  ;;  %v1914_v15 = vor.u32 %v16606_v31, %v16604_v27 }
 0x26e   : > { %v1799_v17 = vrot.slane %v1797_v33, 5  ;;  %v1803_v24 = vrot.slane %v1801_v6, 4  ;;  %v16633_v32 = vld [vmem:[#allocation2 + $0x1c] sm:$0xf]  ;;  %v1812_v46 = vshrl.u32 %v16630_v62, 16  ;;  %v1790_v21 = vrot.slane %v1788_v59, 4 }
 0x26f   : > { %v1793_v20 = vrot.slane %v1791_v28, 5  ;;  %v1809_v36 = vrot.slane %v1807_v14, 5  ;;  %v16638_v60 = vld [vmem:[#allocation2 + $0x20] sm:$0x1]  ;;  %v1815_v26 = vshll.u32 %v16630_v62, 16  ;;  %v1821_v44 = vshll.u32 %v16633_v32, 16 }
 0x270   : > { %v1804_v45 = vor.u32 %v1803_v24, %v1799_v17  ;;  %v1814_v54 = vrot.slane %v1812_v46, 4  ;;  %v1825_v25 = vshrl.u32 %v16633_v32, 16  ;;  %v16643_v29 = vld [vmem:[#allocation2 + $0x24] sm:$0xf]  ;;  %v1831_v13 = vshll.u32 %v16638_v60, 16 }
 0x271   : > { %v1794_v49 = vor.u32 %v1793_v20, %v1790_v21  ;;  %v1817_v52 = vrot.slane %v1815_v26, 5  ;;  %v16646_v9 = vld [vmem:[#allocation2 + $0x28] sm:$0xf]  ;;  %v1938_v57 = vor.u32 %v16614_v19, %v16612_v41  ;;  %v1823_v38 = vrot.slane %v1821_v44, 5  ;;  %v16651_v35 = vld [vmem:[#allocation2 + $0x2c] sm:$0x1] }
 0x272   : > { %v1805_v0 = vrot.slane %v1804_v45, 4  ;;  %v1827_v23 = vrot.slane %v1825_v25, 4  ;;  %v1836_v16 = vshrl.u32 %v16643_v29, 16  ;;  %v1833_v7 = vrot.slane %v1831_v13, 5  ;;  %v16657_v10 = vld [vmem:[#allocation2 + $0x30] sm:$0xf] }
 0x273   : > { %v1795_v58 = vrot.slane %v1794_v49, 4  ;;  %v1818_v39 = vor.u32 %v1817_v52, %v1814_v54  ;;  %v1839_v2 = vshll.u32 %v16643_v29, 16  ;;  %v1845_v51 = vshll.u32 %v16646_v9, 16  ;;  %v16662_v33 = vld [vmem:[#allocation2 + $0x34] sm:$0xf] }
 0x274   : > { %v1810_v61 = vsel %vm16062_vm14, %v1805_v0, %v1809_v36  ;;  %v1828_v47 = vor.u32 %v1827_v23, %v1823_v38  ;;  %v1838_v11 = vrot.slane %v1836_v16, 4  ;;  %v1849_v56 = vshrl.u32 %v16646_v9, 16  ;;  %v16667_v20 = vld [vmem:[#allocation2 + $0x38] sm:$0x1]  ;;  %v16673_v36 = vld [vmem:[%s21465_s3 + $0x4] sm:$0x3] }
 0x275   : > { %v1800_v12 = vsel %vm16062_vm14, %v1795_v58, %v1799_v17  ;;  %v1819_v34 = vrot.slane %v1818_v39, 4  ;;  %v1841_v18 = vrot.slane %v1839_v2, 5  ;;  %v1847_v28 = vrot.slane %v1845_v51, 5  ;;  %v16680_v25 = vld [vmem:[#allocation2 + $0x40] sm:$0xf] }
 0x276   : > { %v12500_v6 = vcombine.low %v1800_v12, %v1810_v61  ;;  %v1829_v59 = vrot.slane %v1828_v47, 4  ;;  %v1855_v14 = vshll.u32 %v16651_v35, 16  ;;  %v1851_v21 = vrot.slane %v1849_v56, 4  ;;  %v16685_v39 = vld [vmem:[#allocation2 + $0x44] sm:$0x1] }
 0x277   : > { %v1824_v24 = vsel %vm16062_vm14, %v1819_v34, %v1823_v38  ;;  %v1842_v46 = vor.u32 %v1841_v18, %v1838_v11  ;;  %v1860_v17 = vshrl.u32 %v16657_v10, 16  ;;  %v1863_v54 = vshll.u32 %v16657_v10, 16  ;;  %v16697_v34 = vld [vmem:[#allocation2 + $0x4c] sm:$0xf] }
 0x278   : > { %13664 = vmatmul.mubr.msk.bf16.vlgmr.msra.gmra.mrb[0].mxu0 %vm641_vm5, %v12500_v6  ;;  %v1834_v26 = vsel %vm16062_vm14, %v1829_v59, %v1833_v7  ;;  %v1857_v45 = vrot.slane %v1855_v14, 5  ;;  %v1869_v44 = vshll.u32 %v16662_v33, 16  ;;  %v1852_v13 = vor.u32 %v1851_v21, %v1847_v28  ;;  %v16702_v59 = vld [vmem:[#allocation2 + $0x50] sm:$0x1] }
 0x279   : > { %13696 = vmatpush3.bf16.msra.mxu0 %v16602_v30  ;;  %v12501_v49 = vcombine.low %v1824_v24, %v1834_v26  ;;  %v1843_v52 = vrot.slane %v1842_v46, 4  ;;  %v1862_v0 = vrot.slane %v1860_v17, 4  ;;  %v1865_v38 = vrot.slane %v1863_v54, 5 }
 0x27a   : > { %v1871_v23 = vrot.slane %v1869_v44, 5  ;;  %v1873_v16 = vshrl.u32 %v16662_v33, 16  ;;  %v1879_v58 = vshll.u32 %v16667_v20, 16  ;;  %14855 = vmatprep.subr.msk.bf16.mxu0 %vm2243_vm11, %v16673_v36  ;;  %v1853_v7 = vrot.slane %v1852_v13, 4 }
 0x27b   : > { %13667 = vmatprep.mubr.msk.bf16.mxu0 %vm641_vm5, %v12501_v49  ;;  %v1848_v30 = vsel %vm16062_vm14, %v1843_v52, %v1847_v28  ;;  %v1891_v2 = vrot.slane %v1890_v3, 4  ;;  %v1893_v61 = vshll.u32 %v16680_v25, 16  ;;  %v1866_v47 = vor.u32 %v1865_v38, %v1862_v0  ;;  %v16720_v52 = vld [vmem:[#allocation2 + $0x60] sm:$0xf] }
 0x27c   : > { %v1875_v11 = vrot.slane %v1873_v16, 4  ;;  %v1881_v51 = vrot.slane %v1879_v58, 5  ;;  %v1897_v12 = vshrl.u32 %v16680_v25, 16  ;;  %v1858_v18 = vsel %vm16062_vm14, %v1853_v7, %v1857_v45  ;;  %v16726_v16 = vld [vmem:[#allocation2 + $0x64] sm:$0xf] }
 0x27d   : > { %v1895_v56 = vrot.slane %v1893_v61, 5  ;;  %v1903_v6 = vshll.u32 %v16685_v39, 16  ;;  %v1915_v55 = vrot.slane %v1914_v15, 4  ;;  %v12502_v5 = vcombine.low %v1848_v30, %v1858_v18 }
 0x27e   : > { %v1867_v3 = vrot.slane %v1866_v47, 4  ;;  %v1876_v28 = vor.u32 %v1875_v11, %v1871_v23  ;;  %v1899_v14 = vrot.slane %v1897_v12, 4  ;;  %v1917_v21 = vshll.u32 %v16697_v34, 16 }
 0x27f   : > { %v1896_v24 = vsel %vm16062_vm14, %v1891_v2, %v1895_v56  ;;  %v1905_v46 = vrot.slane %v1903_v6, 5  ;;  %v1921_v17 = vshrl.u32 %v16697_v34, 16  ;;  %v1927_v31 = vshll.u32 %v16702_v59, 16  ;;  %v16740_v2 = vld [vmem:[#allocation2 + $0x6c] sm:$0xf] }
 0x280   : > { %13668 = vmatmul.mubr.msk.bf16.gmra.mrb[4].mxu0 %vm641_vm5, %v12502_v5  ;;  %v1872_v26 = vsel %vm16062_vm14, %v1867_v3, %v1871_v23  ;;  %v1877_v45 = vrot.slane %v1876_v28, 4  ;;  %v1900_v27 = vor.u32 %v1899_v14, %v1895_v56  ;;  %v1919_v15 = vrot.slane %v1917_v21, 5  ;;  %v16750_v28 = vld [vmem:[#allocation2 + $0x74] sm:$0x1] }
 0x281   : > { %v1923_v54 = vrot.slane %v1921_v17, 4  ;;  %v1939_v44 = vrot.slane %v1938_v57, 4  ;;  %v1947_v49 = vrot.slane %v1945_v1, 4  ;;  %v1929_v38 = vrot.slane %v1927_v31, 5  ;;  %v16733_v57 = vld [vmem:[#allocation2 + $0x68] sm:$0x1] }
 0x282   : > { %v1882_v13 = vsel %vm16062_vm14, %v1877_v45, %v1881_v51  ;;  %v1901_v0 = vrot.slane %v1900_v27, 4  ;;  %v1953_v23 = vrot.slane %v1951_v22, 5  ;;  %v1920_v41 = vsel %vm16062_vm14, %v1915_v55, %v1919_v15 }
 0x283   : > { %v12503_v58 = vcombine.low %v1872_v26, %v1882_v13  ;;  %v1924_v19 = vor.u32 %v1923_v54, %v1919_v15  ;;  %v1944_v1 = vsel %vm16062_vm14, %v1939_v44, %v16616_v50  ;;  %v1948_v7 = vor.u32 %v1947_v49, %v16616_v50  ;;  %v16746_v50 = vld [vmem:[#allocation2 + $0x70] sm:$0xf]  ;;  %v16756_v26 = vld [vmem:[#allocation2 + $0x78] sm:$0xf]  ;;  %v16759_v54 = vld [vmem:[#allocation2 + $0x7c] sm:$0xf] }
 0x284   : > { %v1906_v30 = vsel %vm16062_vm14, %v1901_v0, %v1905_v46  ;;  %v1956_v8 = vshrl.u32 %v16720_v52, 16  ;;  %v1959_v22 = vshll.u32 %v16720_v52, 16  ;;  %v1965_v11 = vshll.u32 %v16726_v16, 16 }
 0x285   : > { %13671 = vmatprep.mubr.msk.bf16.mxu0 %vm641_vm5, %v12503_v58  ;;  %v12504_v61 = vcombine.low %v1896_v24, %v1906_v30  ;;  %v1925_v47 = vrot.slane %v1924_v19, 4  ;;  %v1969_v51 = vshrl.u32 %v16726_v16, 16  ;;  %v1949_v12 = vrot.slane %v1948_v7, 4 }
 0x286   : > { %v1958_v18 = vrot.slane %v1956_v8, 4  ;;  %v1961_v56 = vrot.slane %v1959_v22, 5  ;;  %v1975_v6 = vshll.u32 %v16733_v57, 16  ;;  %v1967_v5 = vrot.slane %v1965_v11, 5 }
 0x287   : > { %v1930_v55 = vsel %vm16062_vm14, %v1925_v47, %v1929_v38  ;;  %v1971_v3 = vrot.slane %v1969_v51, 4  ;;  %v1980_v14 = vshrl.u32 %v16740_v2, 16  ;;  %v1954_v46 = vsel %vm16062_vm14, %v1949_v12, %v1953_v23  ;;  %v16765_v38 = vld [vmem:[#allocation2 + $0x80] sm:$0x1]  ;;  %v16767_v23 = vld [vmem:[#allocation2 + $0x84] sm:$0xf] }
 0x288   : > { %13672 = vmatmul.mubr.msk.bf16.gmra.mrb[8].mxu0 %vm641_vm5, %v12504_v61  ;;  %v12505_v24 = vcombine.low %v1920_v41, %v1930_v55  ;;  %v1962_v21 = vor.u32 %v1961_v56, %v1958_v18  ;;  %v1977_v17 = vrot.slane %v1975_v6, 5  ;;  %v12506_v45 = vcombine.low %v1944_v1, %v1954_v46  ;;  %v16775_v12 = vld [vmem:[#allocation2 + $0x88] sm:$0xf] }
 0x289   : > { %v1972_v27 = vor.u32 %v1971_v3, %v1967_v5  ;;  %v1982_v31 = vrot.slane %v1980_v14, 4  ;;  %v1983_v15 = vshll.u32 %v16740_v2, 16  ;;  %v1989_v49 = vshll.u32 %v16746_v50, 16  ;;  %v16779_v3 = vld [vmem:[#allocation2 + $0x8c] sm:$0x1] }
 0x28a   : > { %13675 = vmatprep.mubr.msk.bf16.mxu0 %vm641_vm5, %v12505_v24  ;;  %v1963_v44 = vrot.slane %v1962_v21, 4  ;;  %v1993_v13 = vshrl.u32 %v16746_v50, 16  ;;  %v1999_v0 = vshll.u32 %v16750_v28, 16  ;;  %v2004_v19 = vshrl.u32 %v16756_v26, 16  ;;  %21776 = vst [vmem:[#allocation9_spill] sm:$0xff] %v16779_v3 }
 0x28b   : > { %v1973_v58 = vrot.slane %v1972_v27, 4  ;;  %v1985_v41 = vrot.slane %v1983_v15, 5  ;;  %v2007_v1 = vshll.u32 %v16756_v26, 16  ;;  %v1991_v7 = vrot.slane %v1989_v49, 5  ;;  %v16783_v21 = vld [vmem:[#allocation2 + $0x90] sm:$0xf] }
 0x28c   : > { %v1968_v30 = vsel %vm16062_vm14, %v1963_v44, %v1967_v5  ;;  %v1995_v8 = vrot.slane %v1993_v13, 4  ;;  %v2001_v22 = vrot.slane %v1999_v0, 5  ;;  %v2006_v11 = vrot.slane %v2004_v19, 4  ;;  %v16787_v44 = vld [vmem:[#allocation2 + $0x94] sm:$0xf] }
 0x28d   : > { %v1978_v61 = vsel %vm16062_vm14, %v1973_v58, %v1977_v17  ;;  %v1986_v47 = vor.u32 %v1985_v41, %v1982_v31  ;;  %v2009_v51 = vrot.slane %v2007_v1, 5  ;;  %v2013_v6 = vshll.u32 %v16759_v54, 16 }
 0x28e   : > { %v12507_v18 = vcombine.low %v1968_v30, %v1978_v61  ;;  %v1996_v56 = vor.u32 %v1995_v8, %v1991_v7  ;;  %v2017_v55 = vshrl.u32 %v16759_v54, 16  ;;  %v2023_v24 = vshll.u32 %v16765_v38, 16 }
 0x28f   : > { %v1987_v5 = vrot.slane %v1986_v47, 4  ;;  %v2010_v14 = vor.u32 %v2009_v51, %v2006_v11  ;;  %v2028_v46 = vshrl.u32 %v16767_v23, 16  ;;  %v2015_v27 = vrot.slane %v2013_v6, 5  ;;  %v16799_v47 = vld [vmem:[#allocation2 + $0x98] sm:$0x1] }
 0x290   : > { %13676 = vmatmul.mubr.msk.bf16.gmra.mrb[12].mxu0 %vm641_vm5, %v12506_v45  ;;  %v1997_v17 = vrot.slane %v1996_v56, 4  ;;  %v2019_v31 = vrot.slane %v2017_v55, 4  ;;  %v2031_v15 = vshll.u32 %v16767_v23, 16  ;;  %v2025_v0 = vrot.slane %v2023_v24, 5  ;;  %21777 = vst [vmem:[#allocation10_spill] sm:$0xff] %v16799_v47 }
 0x291   : > { %13679 = vmatprep.mubr.msk.bf16.mxu0 %vm641_vm5, %v12507_v18  ;;  %v1992_v49 = vsel %vm16062_vm14, %v1987_v5, %v1991_v7  ;;  %v2011_v13 = vrot.slane %v2010_v14, 4  ;;  %v2030_v58 = vrot.slane %v2028_v46, 4  ;;  %v2037_v1 = vshll.u32 %v16775_v12, 16  ;;  %v16801_v7 = vld [vmem:[#allocation2 + $0x9c] sm:$0xf] }
 0x292   : > { %v2002_v41 = vsel %vm16062_vm14, %v1997_v17, %v2001_v22  ;;  %v2020_v19 = vor.u32 %v2019_v31, %v2015_v27  ;;  %v2033_v45 = vrot.slane %v2031_v15, 5  ;;  %v2041_v8 = vshrl.u32 %v16775_v12, 16  ;;  %v16804_v56 = vld [vmem:[#allocation2 + $0xa0] sm:$0xf] }
 0x293   : > { %v2016_v30 = vsel %vm16062_vm14, %v2011_v13, %v2015_v27  ;;  %v2047_v61 = vshll.u32 %v16779_v3, 16  ;;  %v2039_v18 = vrot.slane %v2037_v1, 5  ;;  %v2052_v22 = vshrl.u32 %v16783_v21, 16 }
 0x294   : > { %v2021_v11 = vrot.slane %v2020_v19, 4  ;;  %v2034_v51 = vor.u32 %v2033_v45, %v2030_v58  ;;  %v12508_v6 = vcombine.low %v1992_v49, %v2002_v41  ;;  %v2043_v55 = vrot.slane %v2041_v8, 4  ;;  %v16811_v19 = vld [vmem:[#allocation2 + $0xa4] sm:$0x1] }
 0x295   : > { %v2055_v5 = vshll.u32 %v16783_v21, 16  ;;  %v2061_v14 = vshll.u32 %v16787_v44, 16  ;;  %v2054_v17 = vrot.slane %v2052_v22, 4  ;;  %v2065_v27 = vshrl.u32 %v16787_v44, 16  ;;  %21778 = vst [vmem:[#allocation14_spill] sm:$0xff] %v16811_v19 }
 0x296   : > { %v2026_v24 = vsel %vm16062_vm14, %v2021_v11, %v2025_v0  ;;  %v2035_v46 = vrot.slane %v2034_v51, 4  ;;  %v2044_v15 = vor.u32 %v2043_v55, %v2039_v18  ;;  %v2049_v49 = vrot.slane %v2047_v61, 5  ;;  %v16819_v51 = vld [vmem:[#allocation2 + $0xac] sm:$0xf] }
 0x297   : > { %v12509_v31 = vcombine.low %v2016_v30, %v2026_v24  ;;  %v2057_v13 = vrot.slane %v2055_v5, 5  ;;  %v2063_v58 = vrot.slane %v2061_v14, 5  ;;  %v2067_v41 = vrot.slane %v2065_v27, 4  ;;  %v16824_v5 = vld [vmem:[#allocation2 + $0xa8] sm:$0xf] }
 0x298   : > { %13680 = vmatmul.mubr.msk.bf16.gmra.mrb[16].mxu0 %vm641_vm5, %v12508_v6  ;;  %v2071_v45 = vshll.u32 %v16799_v47, 16  ;;  %v2076_v1 = vshrl.u32 %v16801_v7, 16  ;;  %v2045_v0 = vrot.slane %v2044_v15, 4  ;;  %v2079_v11 = vshll.u32 %v16801_v7, 16 }
 0x299   : > { %13683 = vmatprep.mubr.msk.bf16.mxu0 %vm641_vm5, %v12509_v31  ;;  %v2058_v8 = vor.u32 %v2057_v13, %v2054_v17  ;;  %v2085_v30 = vshll.u32 %v16804_v56, 16  ;;  %v2040_v22 = vsel %vm16062_vm14, %v2035_v46, %v2039_v18  ;;  %v2068_v6 = vor.u32 %v2067_v41, %v2063_v58 }
 0x29a   : > { %v2078_v61 = vrot.slane %v2076_v1, 4  ;;  %v2089_v55 = vshrl.u32 %v16804_v56, 16  ;;  %v2050_v14 = vsel %vm16062_vm14, %v2045_v0, %v2049_v49  ;;  %v2081_v17 = vrot.slane %v2079_v11, 5  ;;  %v16838_v11 = vld [vmem:[#allocation2 + $0xb4] sm:$0xf] }
 0x29b   : > { %v2059_v24 = vrot.slane %v2058_v8, 4  ;;  %v2087_v27 = vrot.slane %v2085_v30, 5  ;;  %v2069_v31 = vrot.slane %v2068_v6, 4  ;;  %v2073_v15 = vrot.slane %v2071_v45, 5  ;;  %v16835_v8 = vld [vmem:[#allocation2 + $0xb0] sm:$0x1] }
 0x29c   : > { %v2091_v13 = vrot.slane %v2089_v55, 4  ;;  %v2095_v4 = vshll.u32 %v16811_v19, 16  ;;  %v2082_v46 = vor.u32 %v2081_v17, %v2078_v61  ;;  %v2100_v41 = vshrl.u32 %v16824_v5, 16  ;;  %21779 = vst [vmem:[#allocation11_spill] sm:$0xff] %v16835_v8  ;;  %v16840_v61 = vld [vmem:[#allocation2 + $0xb8] sm:$0xf] }
 0x29d   : > { %v2064_v18 = vsel %vm16062_vm14, %v2059_v24, %v2063_v58  ;;  %v2103_v1 = vshll.u32 %v16824_v5, 16  ;;  %v12510_v42 = vcombine.low %v2040_v22, %v2050_v14  ;;  %v2074_v49 = vsel %vm16062_vm14, %v2069_v31, %v2073_v15 }
 0x29e   : > { %v2092_v0 = vor.u32 %v2091_v13, %v2087_v27  ;;  %v2109_v45 = vshll.u32 %v16819_v51, 16  ;;  %v12511_v30 = vcombine.low %v2064_v18, %v2074_v49  ;;  %v2083_v6 = vrot.slane %v2082_v46, 4  ;;  %v16846_v13 = vld [vmem:[#allocation2 + $0xbc] sm:$0x1] }
 0x29f   : > { %v2102_v55 = vrot.slane %v2100_v41, 4  ;;  %v2105_v58 = vrot.slane %v2103_v1, 5  ;;  %v2097_v22 = vrot.slane %v2095_v4, 5  ;;  %v2113_v17 = vshrl.u32 %v16819_v51, 16 }
 0x2a0   : > { %13684 = vmatmul.mubr.msk.bf16.gmra.mrb[20].mxu0 %vm641_vm5, %v12510_v42  ;;  %v2093_v24 = vrot.slane %v2092_v0, 4  ;;  %v2111_v14 = vrot.slane %v2109_v45, 5  ;;  %v2119_v15 = vshll.u32 %v16835_v8, 16  ;;  %v2124_v18 = vshrl.u32 %v16838_v11, 16 }
 0x2a1   : > { %13687 = vmatprep.mubr.msk.bf16.mxu0 %vm641_vm5, %v12511_v30  ;;  %v2106_v31 = vor.u32 %v2105_v58, %v2102_v55  ;;  %v2127_v46 = vshll.u32 %v16838_v11, 16  ;;  %v2088_v41 = vsel %vm16062_vm14, %v2083_v6, %v2087_v27  ;;  %v2115_v42 = vrot.slane %v2113_v17, 4 }
 0x2a2   : > { %v2098_v4 = vsel %vm16062_vm14, %v2093_v24, %v2097_v22  ;;  %v2133_v1 = vshll.u32 %v16840_v61, 16  ;;  %v2762_v49 = vrot.slane %v16610_v53, 5  ;;  %v2126_v45 = vrot.slane %v2124_v18, 4 }
 0x2a3   : > { %v2107_v0 = vrot.slane %v2106_v31, 4  ;;  %v2129_v30 = vrot.slane %v2127_v46, 5  ;;  %v2116_v55 = vor.u32 %v2115_v42, %v2111_v14  ;;  %v2137_v8 = vshrl.u32 %v16840_v61, 16 }
 0x2a4   : > { %v2135_v58 = vrot.slane %v2133_v1, 5  ;;  %v2143_v19 = vshll.u32 %v16846_v13, 16  ;;  %v12512_v47 = vcombine.low %v2088_v41, %v2098_v4  ;;  %v2121_v3 = vrot.slane %v2119_v15, 5 }
 0x2a5   : > { %v2130_v27 = vor.u32 %v2129_v30, %v2126_v45  ;;  %v12532_v6 = vcombine.low %v16619_v63, %v16610_v53  ;;  %v2112_v24 = vsel %vm16062_vm14, %v2107_v0, %v2111_v14  ;;  %v2117_v22 = vrot.slane %v2116_v55, 4 }
 0x2a6   : > { %v2139_v17 = vrot.slane %v2137_v8, 4  ;;  %v12533_v31 = vcombine.low %v16630_v62, %v16633_v32  ;;  %v12534_v46 = vcombine.low %v16643_v29, %v16646_v9  ;;  %v2145_v8 = vrot.slane %v2143_v19, 5  ;;  %v16897_v19 = vld [vmem:[#allocation2 + $0x4] sm:$0xf] }
 0x2a7   : > { %v2131_v18 = vrot.slane %v2130_v27, 4  ;;  %v2122_v14 = vsel %vm16062_vm14, %v2117_v22, %v2121_v3  ;;  %v2701_v27 = vld [vmem:[#allocation2 + $0xc] sm:$0xe]  ;;  %vm2750_vm2 = vcmask 1042432   ;;  %v2764_v3 = vrot.slane %v2762_v49, 4 }
 0x2a8   : > { %13688 = vmatmul.mubr.msk.bf16.gmra.mrb[24].mxu0 %vm641_vm5, %v12512_v47  ;;  %v2140_v4 = vor.u32 %v2139_v17, %v2135_v58  ;;  %v12513_v1 = vcombine.low %v2112_v24, %v2122_v14  ;;  %v2702_v17 = vld [vmem:[#allocation2 + $0x18] sm:$0xe]  ;;  %v2765_v14 = vrot.slane %v16621_v48, 5  ;;  %vm16900_vm7 = vmor %vm2750_vm2, %vm2751_vm6  ;;  %v12565_v24 = vrot.slane %v2701_v27, 9  ;;  %v2703_v22 = vld [vmem:[#allocation2 + $0x24] sm:$0xe] }
 0x2a9   : > { %v2136_v0 = vsel %vm16062_vm14, %v2131_v18, %v2135_v58  ;;  %v21780_v58 = vmov 0  ;;  %v12566_v30 = vrot.slane %v2702_v17, 9  ;;  %v2769_v45 = vrot.slane %v16633_v32, 5 }
 0x2aa   : > { %v2141_v55 = vrot.slane %v2140_v4, 4  ;;  %13691 = vmatprep.mubr.msk.bf16.mxu0 %vm641_vm5, %v12513_v1  ;;  %v15223_v4 = vld [vmem:[#allocation2] sm:$0xf]  ;;  %v21781_v58 = vsel %vm16900_vm7, 4294967295, %v21780_v58  ;;  %v16911_v48 = vsel %vm16900_vm7, %v2764_v3, %v2765_v14  ;;  %v12567_v17 = vrot.slane %v2703_v22, 9 }
 0x2ab   : > { %v12531_v1 = vcombine.low %v15223_v4, %v16897_v19  ;;  %21782 = vst [vmem:[#allocation13_spill] sm:$0xff] %v21781_v58  ;;  %v2705_v4 = vld [vmem:[#allocation2 + $0x3c] sm:$0xe]  ;;  %v2771_v42 = vrot.slane %v2769_v45, 4  ;;  %v16922_v3 = vsel %vm16900_vm7, %v12566_v30, %v2769_v45  ;;  %v2790_v45 = vrot.slane %v16680_v25, 5 }
 0x2ac   : > { %v2146_v18 = vsel %vm16062_vm14, %v2141_v55, %v2145_v8  ;;  %v16907_v8 = vsel %vm16900_vm7, %v12565_v24, %v2762_v49  ;;  %v2704_v55 = vld [vmem:[#allocation2 + $0x30] sm:$0xe]  ;;  %v2962_v49 = vsel %vm2243_vm11, %v16673_v36, 0  ;;  %v2776_v24 = vrot.slane %v16646_v9, 5 }
 0x2ad   : > { %v12514_v47 = vcombine.low %v2136_v0, %v2146_v18  ;;  %v2772_v0 = vrot.slane %v16638_v60, 5  ;;  %v2706_v18 = vld [vmem:[#allocation2 + $0x48] sm:$0xe]  ;;  %v12568_v14 = vrot.slane %v2704_v55, 9  ;;  %v2783_v60 = vrot.slane %v16662_v33, 5  ;;  %v21784_v9 = vld [vmem:[#allocation9_spill] sm:$0xff] }
 0x2ae   : > { %v12569_v22 = vrot.slane %v2705_v4, 9  ;;  %v2778_v27 = vrot.slane %v2776_v24, 4  ;;  %v2779_v36 = vrot.slane %v16651_v35, 5  ;;  %v16936_v30 = vsel %vm16900_vm7, %v12567_v17, %v2776_v24  ;;  %v2708_v24 = vld [vmem:[#allocation2 + $0x60] sm:$0xe] }
 0x2af   : > { %v2785_v15 = vrot.slane %v2783_v60, 4  ;;  %v2792_v4 = vrot.slane %v2790_v45, 4  ;;  %v2797_v41 = vrot.slane %v16697_v34, 5  ;;  %v16949_v17 = vsel %vm16900_vm7, %v12568_v14, %v2783_v60 }
 0x2b0   : > { %13692 = vmatmul.mubr.msk.bf16.gmra.mrb[28].mxu0 %vm641_vm5, %v12514_v47  ;;  %v16927_v47 = vsel %vm16900_vm7, %v2771_v42, %v2772_v0  ;;  %v2786_v42 = vrot.slane %v16667_v20, 5  ;;  %v12570_v0 = vrot.slane %v2706_v18, 9  ;;  %v16941_v55 = vsel %vm16900_vm7, %v2778_v27, %v2779_v36  ;;  %v2709_v18 = vld [vmem:[#allocation2 + $0x6c] sm:$0xe] }
 0x2b1   : > { %13697 = vmatprep.mubr.msk.bf16.mxu0 %vm641_vm5, %v12531_v1  ;;  %v2793_v1 = vrot.slane %v16685_v39, 5  ;;  %v16957_v27 = vsel %vm16900_vm7, %v12569_v22, %v2790_v45  ;;  %v16962_v39 = vld [vmem:[%s21465_s3 + $0x6] sm:$0x3]  ;;  %v2800_v60 = vrot.slane %v16702_v59, 5  ;;  %v12572_v53 = vrot.slane %v2708_v24, 9 }
 0x2b2   : > { %v16953_v20 = vsel %vm16900_vm7, %v2785_v15, %v2786_v42  ;;  %v2799_v15 = vrot.slane %v2797_v41, 4  ;;  %v16979_v45 = vsel %vm16900_vm7, %v12570_v0, %v2797_v41  ;;  %v2710_v42 = vld [vmem:[#allocation2 + $0x78] sm:$0xe]  ;;  %v2811_v63 = vrot.slane %v16726_v16, 5  ;;  %v2713_v41 = vld [vmem:[#allocation2 + $0x9c] sm:$0xe] }
 0x2b3   : > { %v16968_v14 = vsel %vm16900_vm7, %v2792_v4, %v2793_v1  ;;  %v2814_v62 = vrot.slane %v16733_v57, 5  ;;  %v12574_v32 = vrot.slane %v2710_v42, 9  ;;  %v2821_v4 = vrot.slane %v16750_v28, 5  ;;  %v2712_v42 = vld [vmem:[#allocation2 + $0x90] sm:$0xe]  ;;  %v21786_v28 = vld [vmem:[#allocation14_spill] sm:$0xff] }
 0x2b4   : > { %v16987_v59 = vsel %vm16900_vm7, %v2799_v15, %v2800_v60  ;;  %v2813_v1 = vrot.slane %v2811_v63, 4  ;;  %v2825_v24 = vrot.slane %v16759_v54, 5  ;;  %v2828_v57 = vrot.slane %v16765_v38, 5 }
 0x2b5   : > { %v2832_v38 = vrot.slane %v16775_v12, 5  ;;  %v2849_v36 = vrot.slane %v21786_v28, 5  ;;  %vm6451_vm2 = vcmask 58368   ;;  %vm7975_vm6 = vcmask 1043456  }
 0x2b6   : > { %v17004_v15 = vsel %vm16900_vm7, %v2813_v1, %v2814_v62  ;;  %v12576_v62 = vrot.slane %v2712_v42, 9  ;;  %v2846_v1 = vrot.slane %v16804_v56, 5 }
 0x2b7   : > { %v2834_v29 = vrot.slane %v2832_v38, 4 }
 0x2b8   : > { %13698 = vmatmul.mubr.msk.bf16.vlgmr.msra.gmra.mrb[0].mxu0 %vm641_vm5, %v12532_v6  ;;  %v12573_v6 = vrot.slane %v2709_v18, 9  ;;  %v17000_v18 = vsel %vm16900_vm7, %v12572_v53, %v2811_v63  ;;  %v2827_v53 = vrot.slane %v2825_v24, 4 }
 0x2b9   : > { %13730 = vmatpush3.bf16.msra.mxu0 %v2962_v49  ;;  %13701 = vmatprep.mubr.msk.bf16.mxu0 %vm641_vm5, %v12533_v31  ;;  %v2818_v49 = vrot.slane %v16746_v50, 5  ;;  %v2711_v31 = vld [vmem:[#allocation2 + $0x84] sm:$0xe] }
 0x2ba   : > { %14856 = vmatprep.subr.msk.bf16.mxu0 %vm2243_vm11, %v16962_v39  ;;  %v12575_v63 = vrot.slane %v2711_v31, 9  ;;  %v2839_v31 = vrot.slane %v16787_v44, 5 }
 0x2bb   : > { %v2820_v0 = vrot.slane %v2818_v49, 4  ;;  %v17008_v60 = vsel %vm16900_vm7, %v12573_v6, %v2818_v49  ;;  %v17021_v6 = vsel %vm16900_vm7, %v12574_v32, %v2825_v24  ;;  %v17030_v49 = vsel %vm16900_vm7, %v2827_v53, %v2828_v57 }
 0x2bc   : > { %v21783_v32 = vcombine.low %v16657_v10, %v16662_v33  ;;  %v17043_v57 = vsel %vm16900_vm7, %v12575_v63, %v2832_v38  ;;  %v2841_v42 = vrot.slane %v2839_v31, 4  ;;  %v2848_v33 = vrot.slane %v2846_v1, 4 }
 0x2bd   : > { %v17015_v22 = vsel %vm16900_vm7, %v2820_v0, %v2821_v4  ;;  %v12577_v0 = vrot.slane %v2713_v41, 9  ;;  %v2714_v4 = vld [vmem:[#allocation2 + $0xa8] sm:$0xe]  ;;  %v21785_v41 = vld [vmem:[#allocation10_spill] sm:$0xff]  ;;  %v2853_v24 = vrot.slane %v16819_v51, 5  ;;  %v17056_v63 = vsel %vm16900_vm7, %v12576_v62, %v2839_v31 }
 0x2be   : > { %v2842_v53 = vrot.slane %v21785_v41, 5  ;;  %v21787_v41 = vld [vmem:[#allocation11_spill] sm:$0xff] }
 0x2bf   : > { %v17064_v28 = vsel %vm16900_vm7, %v12577_v0, %v2846_v1  ;;  %v2856_v35 = vrot.slane %v21787_v41, 5  ;;  %v21789_v41 = vcombine.low %v16551_v40, %v16697_v34  ;;  %v21791_v40 = vcombine.low %v16720_v52, %v16726_v16 }
 0x2c0   : > { %13702 = vmatmul.mubr.msk.bf16.gmra.mrb[4].mxu0 %vm641_vm5, %v12534_v46  ;;  %v2835_v46 = vrot.slane %v21784_v9, 5  ;;  %v2715_v9 = vld [vmem:[#allocation2 + $0xb4] sm:$0xe]  ;;  %v17060_v38 = vsel %vm16900_vm7, %v2841_v42, %v2842_v53  ;;  %v2860_v42 = vrot.slane %v16840_v61, 5  ;;  %v21792_v34 = vcombine.low %v16740_v2, %v16746_v50  ;;  %v2700_v2 = vld [vmem:[#allocation2] sm:$0xe] }
 0x2c1   : > { %13705 = vmatprep.mubr.msk.bf16.mxu0 %vm641_vm5, %v21783_v32  ;;  %v12578_v32 = vrot.slane %v2714_v4, 9  ;;  %v12579_v31 = vrot.slane %v2715_v9, 9  ;;  %v2863_v9 = vrot.slane %v16846_v13, 5  ;;  %v21793_v13 = vcombine.low %v16756_v26, %v16759_v54  ;;  %v15226_v50 = vld [vmem:[#allocation2 + $0x8] sm:$0x1] }
 0x2c2   : > { %v17049_v10 = vsel %vm16900_vm7, %v2834_v29, %v2835_v46  ;;  %v17070_v29 = vsel %vm16900_vm7, %v2848_v33, %v2849_v36  ;;  %v2855_v46 = vrot.slane %v2853_v24, 4  ;;  %v21788_v36 = vcombine.low %v16532_v37, %v16680_v25  ;;  %v17320_v53 = vld [vmem:[#allocation2 + $0x98] sm:$0x1] }
 0x2c3   : > { %v17078_v1 = vsel %vm16900_vm7, %v12578_v32, %v2853_v24  ;;  %v2862_v33 = vrot.slane %v2860_v42, 4  ;;  %v15225_v24 = vld [vmem:[#allocation2 + $0x54] sm:$0xf]  ;;  %v21795_v52 = vcombine.low %v16783_v21, %v16787_v44  ;;  %v2755_v16 = vrot.slane %v16897_v19, 5  ;;  %v15227_v19 = vld [vmem:[#allocation2 + $0x58] sm:$0xf] }
 0x2c4   : > { %v17082_v0 = vsel %vm16900_vm7, %v2855_v46, %v2856_v35  ;;  %v17097_v35 = vsel %vm16900_vm7, %v12579_v31, %v2860_v42  ;;  %v21790_v32 = vld [vmem:[#allocation5_spill] sm:$0xff]  ;;  %v21794_v31 = vcombine.low %v16767_v23, %v16775_v12  ;;  %v2758_v42 = vrot.slane %v15226_v50, 5  ;;  %v17201_v50 = vld [vmem:[#allocation2 + $0x4c] sm:$0xf] }
 0x2c5   : > { %v17101_v37 = vsel %vm16900_vm7, %v2862_v33, %v2863_v9  ;;  %v12538_v46 = vcombine.low %v15225_v24, %v21790_v32  ;;  %v2757_v33 = vrot.slane %v2755_v16, 4  ;;  %v21796_v26 = vcombine.low %v16801_v7, %v16804_v56  ;;  %v17150_v56 = vld [vmem:[%s21465_s3 + $0x8] sm:$0x3]  ;;  %v17186_v32 = vld [vmem:[#allocation2 + $0x34] sm:$0xf] }
 0x2c6   : > { %v21797_v54 = vcombine.low %v16824_v5, %v16819_v51  ;;  %v21798_v44 = vcombine.low %v16838_v11, %v16840_v61  ;;  %v3320_v7 = vsel %vm2243_vm11, %v16962_v39, 0  ;;  %v21799_v51 = vcombine.low %v16907_v8, %v16911_v48  ;;  %v2707_v48 = vld [vmem:[#allocation2 + $0x54] sm:$0xe] }
 0x2c7   : > { %v2759_v12 = vsel %vm16900_vm7, %v2757_v33, %v2758_v42  ;;  %v21800_v5 = vcombine.low %v16922_v3, %v16927_v47  ;;  %v21801_v11 = vcombine.low %v16936_v30, %v16941_v55  ;;  %v21802_v61 = vcombine.low %v16949_v17, %v16953_v20  ;;  %v15228_v55 = vld [vmem:[#allocation2 + $0x5c] sm:$0x1]  ;;  %v17180_v20 = vld [vmem:[#allocation2 + $0x28] sm:$0xf] }
 0x2c8   : > { %13706 = vmatmul.mubr.msk.bf16.gmra.mrb[8].mxu0 %vm641_vm5, %v21788_v36  ;;  %v12564_v36 = vrot.slane %v2700_v2, 9  ;;  %v2804_v8 = vrot.slane %v15227_v19, 5  ;;  %v21803_v3 = vcombine.low %v16957_v27, %v16968_v14  ;;  %v21804_v47 = vcombine.low %v16979_v45, %v16987_v59  ;;  %v17184_v27 = vld [vmem:[#allocation2 + $0x2c] sm:$0x1]  ;;  %v4246_v33 = vld [vmem:[#allocation2 + $0x48] sm:$0xe] }
 0x2c9   : > { %13709 = vmatprep.mubr.msk.bf16.mxu0 %vm641_vm5, %v21789_v41  ;;  %v12571_v30 = vrot.slane %v2707_v48, 9  ;;  %v2807_v9 = vrot.slane %v15228_v55, 5  ;;  %v4243_v41 = vld [vmem:[#allocation2 + $0x24] sm:$0xe]  ;;  %v4323_v59 = vrot.slane %v17180_v20, 5  ;;  %v21805_v2 = vcombine.low %v17000_v18, %v17004_v15 }
 0x2ca   : > { %v2756_v23 = vsel %vm16900_vm7, %v12564_v36, %v2755_v16  ;;  %v2806_v39 = vrot.slane %v2804_v8, 4  ;;  %v12681_v45 = vrot.slane %v4243_v41, 9  ;;  %v4326_v16 = vrot.slane %v17184_v27, 5  ;;  %v4247_v15 = vld [vmem:[#allocation2 + $0x54] sm:$0xe] }
 0x2cb   : > { %v12580_v21 = vcombine.low %v2756_v23, %v2759_v12  ;;  %v2805_v24 = vsel %vm16900_vm7, %v12571_v30, %v2804_v8  ;;  %v4330_v36 = vrot.slane %v17186_v32, 5  ;;  %v12684_v8 = vrot.slane %v4246_v33, 9  ;;  %v17263_v33 = vld [vmem:[#allocation2 + $0x7c] sm:$0xf]  ;;  %v17311_v41 = vld [vmem:[#allocation2 + $0xa0] sm:$0xf] }
 0x2cc   : > { %v2808_v17 = vsel %vm16900_vm7, %v2806_v39, %v2807_v9  ;;  %v4344_v48 = vrot.slane %v17201_v50, 5  ;;  %v17228_v39 = vld [vmem:[#allocation2 + $0x64] sm:$0xf]  ;;  %v12685_v30 = vrot.slane %v4247_v15, 9  ;;  %v4248_v9 = vld [vmem:[#allocation2 + $0x60] sm:$0xe] }
 0x2cd   : > { %v12587_v14 = vcombine.low %v2805_v24, %v2808_v17  ;;  %v17239_v17 = vld [vmem:[#allocation2 + $0x70] sm:$0xf]  ;;  %v12686_v15 = vrot.slane %v4248_v9, 9 }
 0x2d0   : > { %13710 = vmatmul.mubr.msk.bf16.gmra.mrb[12].mxu0 %vm641_vm5, %v12538_v46  ;;  %v4244_v46 = vld [vmem:[#allocation2 + $0x30] sm:$0xe] }
 0x2d1   : > { %13713 = vmatprep.mubr.msk.bf16.mxu0 %vm641_vm5, %v21791_v40  ;;  %v17189_v40 = vld [vmem:[#allocation2 + $0x40] sm:$0xf]  ;;  %v12682_v42 = vrot.slane %v4244_v46, 9  ;;  %v17248_v46 = vld [vmem:[#allocation2 + $0x68] sm:$0x1] }
 0x2d2   : > { %v4337_v18 = vrot.slane %v17189_v40, 5 }
 0x2d8   : > { %13714 = vmatmul.mubr.msk.bf16.gmra.mrb[16].mxu0 %vm641_vm5, %v21792_v34  ;;  %v4245_v34 = vld [vmem:[#allocation2 + $0x3c] sm:$0xe] }
 0x2d9   : > { %13717 = vmatprep.mubr.msk.bf16.mxu0 %vm641_vm5, %v21793_v13  ;;  %v17192_v13 = vld [vmem:[#allocation2 + $0x38] sm:$0x1]  ;;  %v12683_v12 = vrot.slane %v4245_v34, 9  ;;  %v17250_v34 = vld [vmem:[#allocation2 + $0x74] sm:$0x1] }
 0x2e0   : > { %13718 = vmatmul.mubr.msk.bf16.gmra.mrb[20].mxu0 %vm641_vm5, %v21794_v31  ;;  %v17194_v31 = vld [vmem:[#allocation2 + $0x44] sm:$0x1] }
 0x2e1   : > { %13721 = vmatprep.mubr.msk.bf16.mxu0 %vm641_vm5, %v21795_v52  ;;  %v4325_v52 = vrot.slane %v4323_v59, 4  ;;  %v4340_v19 = vrot.slane %v17194_v31, 5 }
 0x2e3   : > { %v17212_v23 = vsel %vm16900_vm7, %v4325_v52, %v4326_v16  ;;  %v17256_v16 = vsel %vm16900_vm7, %v12684_v8, %v4344_v48  ;;  %v4252_v52 = vld [vmem:[#allocation2 + $0x90] sm:$0xe] }
 0x2e4   : > { %21807 = vst [vmem:[#allocation20_spill] sm:$0xff] %v17212_v23  ;;  %21812 = vst [vmem:[#allocation19_spill] sm:$0xff] %v17256_v16  ;;  %v3627_v16 = vshrl.u32 %v17180_v20, 16 }
 0x2e8   : > { %13722 = vmatmul.mubr.msk.bf16.gmra.mrb[24].mxu0 %vm641_vm5, %v21796_v26  ;;  %v17204_v26 = vld [vmem:[#allocation2 + $0x58] sm:$0xf] }
 0x2e9   : > { %13725 = vmatprep.mubr.msk.bf16.mxu0 %vm641_vm5, %v21797_v54  ;;  %v17208_v54 = vsel %vm16900_vm7, %v12681_v45, %v4323_v59  ;;  %v4351_v55 = vrot.slane %v17204_v26, 5  ;;  %v4249_v59 = vld [vmem:[#allocation2 + $0x6c] sm:$0xe] }
 0x2ea   : > { %21806 = vst [vmem:[#allocation12_spill] sm:$0xff] %v17208_v54  ;;  %v12687_v8 = vrot.slane %v4249_v59, 9  ;;  %v4368_v59 = vrot.slane %v17250_v34, 5 }
 0x2f0   : > { %13726 = vmatmul.mubr.msk.bf16.gmra.mrb[28].mxu0 %vm641_vm5, %v21798_v44 }
 0x2f1   : > { %13731 = vmatprep.mubr.msk.bf16.mxu0 %vm641_vm5, %v12580_v21  ;;  %v17215_v21 = vld [vmem:[#allocation2 + $0x50] sm:$0x1] }
 0x2f2   : > { %v4347_v45 = vrot.slane %v17215_v21, 5 }
 0x2f8   : > { %13732 = vmatmul.mubr.msk.bf16.vlgmr.msra.gmra.mrb[0].mxu0 %vm641_vm5, %v21799_v51  ;;  %v4332_v51 = vrot.slane %v4330_v36, 4 }
 0x2f9   : > { %13764 = vmatpush3.bf16.msra.mxu0 %v3320_v7  ;;  %13735 = vmatprep.mubr.msk.bf16.mxu0 %vm641_vm5, %v21800_v5  ;;  %v17221_v7 = vsel %vm16900_vm7, %v12682_v42, %v4330_v36  ;;  %v4333_v5 = vrot.slane %v17192_v13, 5  ;;  %v21813_v36 = vcombine.low %v17008_v60, %v17015_v22  ;;  %v17278_v22 = vld [vmem:[#allocation2 + $0x88] sm:$0xf] }
 0x2fa   : > { %14857 = vmatprep.subr.msk.bf16.mxu0 %vm2243_vm11, %v17150_v56  ;;  %21808 = vst [vmem:[#allocation15_spill] sm:$0xff] %v17221_v7  ;;  %v4379_v60 = vrot.slane %v17278_v22, 5 }
 0x300   : > { %13736 = vmatmul.mubr.msk.bf16.gmra.mrb[4].mxu0 %vm641_vm5, %v21801_v11  ;;  %v17224_v11 = vld [vmem:[#allocation2 + $0x5c] sm:$0x1] }
 0x301   : > { %13739 = vmatprep.mubr.msk.bf16.mxu0 %vm641_vm5, %v21802_v61  ;;  %v4339_v61 = vrot.slane %v4337_v18, 4  ;;  %v4354_v42 = vrot.slane %v17224_v11, 5 }
 0x303   : > { %v17245_v24 = vsel %vm16900_vm7, %v4339_v61, %v4340_v19  ;;  %v21816_v61 = vcombine.low %v17021_v6, %v17030_v49 }
 0x304   : > { %21811 = vst [vmem:[#allocation18_spill] sm:$0xff] %v17245_v24 }
 0x308   : > { %13740 = vmatmul.mubr.msk.bf16.gmra.mrb[8].mxu0 %vm641_vm5, %v21803_v3  ;;  %v17232_v3 = vsel %vm16900_vm7, %v4332_v51, %v4333_v5  ;;  %v4358_v51 = vrot.slane %v17228_v39, 5  ;;  %v4250_v5 = vld [vmem:[#allocation2 + $0x78] sm:$0xe] }
 0x309   : > { %13743 = vmatprep.mubr.msk.bf16.mxu0 %vm641_vm5, %v21804_v47  ;;  %21809 = vst [vmem:[#allocation17_spill] sm:$0xff] %v17232_v3  ;;  %v17236_v47 = vsel %vm16900_vm7, %v12683_v12, %v4337_v18  ;;  %v17271_v18 = vsel %vm16900_vm7, %v12685_v30, %v4351_v55  ;;  %v4251_v30 = vld [vmem:[#allocation2 + $0x84] sm:$0xe] }
 0x30a   : > { %21810 = vst [vmem:[#allocation21_spill] sm:$0xff] %v17236_v47  ;;  %21815 = vst [vmem:[#allocation10_spill] sm:$0xff] %v17271_v18  ;;  %v17293_v49 = vsel %vm16900_vm7, %v12686_v15, %v4358_v51  ;;  %v4360_v9 = vrot.slane %v4358_v51, 4  ;;  %v12689_v51 = vrot.slane %v4251_v30, 9 }
 0x30b   : > { %21818 = vst [vmem:[#allocation11_spill] sm:$0xff] %v17293_v49 }
 0x30c   : > { %v17339_v4 = vsel %vm16900_vm7, %v12689_v51, %v4379_v60  ;;  %v4255_v51 = vld [vmem:[#allocation2 + $0xb4] sm:$0xe] }
 0x30d   : > { %21824 = vst [vmem:[#allocation27_spill] sm:$0xff] %v17339_v4  ;;  %v4256_v4 = vld [vmem:[#allocation2 + $0xc0] sm:$0xe] }
 0x310   : > { %13744 = vmatmul.mubr.msk.bf16.gmra.mrb[12].mxu0 %vm641_vm5, %v12587_v14  ;;  %v4346_v14 = vrot.slane %v4344_v48, 4  ;;  %v4365_v48 = vrot.slane %v17239_v17, 5 }
 0x311   : > { %13747 = vmatprep.mubr.msk.bf16.mxu0 %vm641_vm5, %v21805_v2  ;;  %v4353_v2 = vrot.slane %v4351_v55, 4  ;;  %v17287_v55 = vld [vmem:[#allocation2 + $0x80] sm:$0x1] }
 0x312   : > { %v17267_v12 = vsel %vm16900_vm7, %v4346_v14, %v4347_v45  ;;  %v4361_v14 = vrot.slane %v17248_v46, 5  ;;  %v17296_v45 = vld [vmem:[#allocation2 + $0x8c] sm:$0x1]  ;;  %v17308_v15 = vsel %vm16900_vm7, %v12687_v8, %v4365_v48  ;;  %v17322_v8 = vld [vmem:[#allocation2 + $0xa4] sm:$0x1] }
 0x313   : > { %21814 = vst [vmem:[#allocation9_spill] sm:$0xff] %v17267_v12  ;;  %v17284_v19 = vsel %vm16900_vm7, %v4353_v2, %v4354_v42  ;;  %v4367_v2 = vrot.slane %v4365_v48, 4  ;;  %v12688_v42 = vrot.slane %v4250_v5, 9  ;;  %21820 = vst [vmem:[#allocation23_spill] sm:$0xff] %v17308_v15  ;;  %v4381_v5 = vrot.slane %v4379_v60, 4 }
 0x314   : > { %21817 = vst [vmem:[#allocation14_spill] sm:$0xff] %v17284_v19  ;;  %v17304_v6 = vsel %vm16900_vm7, %v4360_v9, %v4361_v14  ;;  %v4375_v9 = vrot.slane %v17287_v55, 5  ;;  %v4253_v14 = vld [vmem:[#allocation2 + $0x9c] sm:$0xe]  ;;  %v4382_v62 = vrot.slane %v17296_v45, 5  ;;  %v3623_v12 = vshll.u32 %v17180_v20, 16 }
 0x315   : > { %21819 = vst [vmem:[#allocation5_spill] sm:$0xff] %v17304_v6  ;;  %v17317_v44 = vsel %vm16900_vm7, %v4367_v2, %v4368_v59  ;;  %v17331_v2 = vld [vmem:[#allocation2 + $0xac] sm:$0xf]  ;;  %v12690_v6 = vrot.slane %v4252_v52, 9  ;;  %v12691_v60 = vrot.slane %v4253_v14, 9  ;;  %v4393_v52 = vrot.slane %v17311_v41, 5 }
 0x316   : > { %21821 = vst [vmem:[#allocation24_spill] sm:$0xff] %v17317_v44  ;;  %v4254_v44 = vld [vmem:[#allocation2 + $0xa8] sm:$0xe]  ;;  %v17368_v14 = vld [vmem:[#allocation2 + $0xbc] sm:$0x1] }
 0x317   : > { %v4395_v15 = vrot.slane %v4393_v52, 4 }
 0x318   : > { %13748 = vmatmul.mubr.msk.bf16.gmra.mrb[16].mxu0 %vm641_vm5, %v21813_v36  ;;  %v4372_v36 = vrot.slane %v17263_v33, 5 }
 0x319   : > { %13751 = vmatprep.mubr.msk.bf16.mxu0 %vm641_vm5, %v21816_v61  ;;  %v17300_v61 = vld [vmem:[#allocation2 + $0x94] sm:$0xf] }
 0x31a   : > { %v4374_v25 = vrot.slane %v4372_v36, 4  ;;  %v17328_v30 = vsel %vm16900_vm7, %v12688_v42, %v4372_v36  ;;  %v4386_v48 = vrot.slane %v17300_v61, 5  ;;  %v21825_v42 = vcombine.low %v17043_v57, %v17049_v10  ;;  %v17346_v36 = vld [vmem:[#allocation2 + $0xb8] sm:$0xf]  ;;  %v17359_v57 = vld [vmem:[#allocation2 + $0xb0] sm:$0x1] }
 0x31b   : > { %21822 = vst [vmem:[#allocation25_spill] sm:$0xff] %v17328_v30  ;;  %v4403_v19 = vrot.slane %v17359_v57, 5 }
 0x31c   : > { %v17335_v59 = vsel %vm16900_vm7, %v4374_v25, %v4375_v9  ;;  %v17352_v25 = vsel %vm16900_vm7, %v4381_v5, %v4382_v62  ;;  %v21827_v9 = vcombine.low %v17056_v63, %v17060_v38  ;;  %v4388_v62 = vrot.slane %v4386_v48, 4 }
 0x31d   : > { %21823 = vst [vmem:[#allocation26_spill] sm:$0xff] %v17335_v59  ;;  %21826 = vst [vmem:[#allocation28_spill] sm:$0xff] %v17352_v25  ;;  %v4389_v5 = vrot.slane %v17320_v53, 5  ;;  %v4396_v59 = vrot.slane %v17322_v8, 5  ;;  %v12692_v63 = vrot.slane %v4254_v44, 9  ;;  %v4400_v38 = vrot.slane %v17331_v2, 5 }
 0x31e   : > { %v4407_v25 = vrot.slane %v17346_v36, 5 }
 0x31f   : > { %v17376_v10 = vsel %vm16900_vm7, %v4388_v62, %v4389_v5  ;;  %v17387_v44 = vsel %vm16900_vm7, %v4395_v15, %v4396_v59  ;;  %v4402_v49 = vrot.slane %v4400_v38, 4  ;;  %v17390_v62 = vld [vmem:[#allocation2 + $0xc8] sm:$0x1]  ;;  %v17397_v5 = vsel %vm16900_vm7, %v12692_v63, %v4400_v38 }
 0x320   : > { %13752 = vmatmul.mubr.msk.bf16.gmra.mrb[20].mxu0 %vm641_vm5, %v21825_v42  ;;  %v17365_v42 = vsel %vm16900_vm7, %v12690_v6, %v4386_v48  ;;  %21829 = vst [vmem:[#allocation30_spill] sm:$0xff] %v17376_v10  ;;  %v17380_v6 = vsel %vm16900_vm7, %v12691_v60, %v4393_v52  ;;  %v12693_v48 = vrot.slane %v4255_v51, 9  ;;  %21831 = vst [vmem:[#allocation32_spill] sm:$0xff] %v17387_v44  ;;  %v4409_v52 = vrot.slane %v4407_v25, 4  ;;  %v17457_v10 = vld [vmem:[#allocation2 + $0x1c] sm:$0xf] }
 0x321   : > { %13755 = vmatprep.mubr.msk.bf16.mxu0 %vm641_vm5, %v21827_v9  ;;  %21828 = vst [vmem:[#allocation29_spill] sm:$0xff] %v17365_v42  ;;  %v17372_v9 = vld [vmem:[#allocation2 + $0xc4] sm:$0xf]  ;;  %21830 = vst [vmem:[#allocation31_spill] sm:$0xff] %v17380_v6  ;;  %v4410_v51 = vrot.slane %v17368_v14, 5  ;;  %v17401_v30 = vsel %vm16900_vm7, %v4402_v49, %v4403_v19  ;;  %v12694_v15 = vrot.slane %v4256_v4, 9  ;;  %v21837_v63 = vcombine.low %v17064_v28, %v17070_v29 }
 0x322   : > { %21832 = vst [vmem:[#allocation33_spill] sm:$0xff] %v17390_v62  ;;  %21833 = vst [vmem:[#allocation34_spill] sm:$0xff] %v17397_v5  ;;  %v4414_v59 = vrot.slane %v17372_v9, 5  ;;  %v17408_v60 = vsel %vm16900_vm7, %v12693_v48, %v4407_v25  ;;  %v4417_v49 = vrot.slane %v17390_v62, 5  ;;  %v21838_v38 = vcombine.low %v17078_v1, %v17082_v0  ;;  %v14893_v48 = vld [vmem:[#allocation2 + $0xc] sm:$0xff]   ;;  %v14894_v1 = vld [vmem:[#allocation2 + $0x18] sm:$0xff]  }
 0x323   : > { %21834 = vst [vmem:[#allocation35_spill] sm:$0xff] %v17401_v30  ;;  %21835 = vst [vmem:[#allocation36_spill] sm:$0xff] %v17408_v60  ;;  %v17412_v44 = vsel %vm16900_vm7, %v4409_v52, %v4410_v51  ;;  %v21841_v52 = vcombine.low %v17097_v35, %v17101_v37  ;;  %v4046_v0 = vsel %vm2243_vm11, %v17150_v56, 0  ;;  %v14895_v51 = vld [vmem:[#allocation2 + $0x24] sm:$0xff]   ;;  %v3515_v35 = vld [vmem:[#allocation2 + $0xc] sm:$0xf] }
 0x324   : > { %21836 = vst [vmem:[#allocation37_spill] sm:$0xff] %v17412_v44  ;;  %v4416_v19 = vrot.slane %v4414_v59, 4  ;;  %v17427_v25 = vsel %vm16900_vm7, %v12694_v15, %v4414_v59  ;;  %v17445_v15 = vld [vmem:[%s21465_s3 + $0xa] sm:$0x3]  ;;  %v17449_v37 = vld [vmem:[#allocation2 + $0x10] sm:$0xf] }
 0x325   : > { %21839 = vst [vmem:[#allocation38_spill] sm:$0xff] %v17427_v25  ;;  %v3566_v59 = vshrl.u32 %v3515_v35, 16  ;;  %v3575_v56 = vshll.u32 %v17449_v37, 16  ;;  %21842 = vst [vmem:[#allocation40_spill] sm:$0xff] %v17457_v10  ;;  %v3599_v30 = vshll.u32 %v17457_v10, 16 }
 0x326   : > { %v17431_v28 = vsel %vm16900_vm7, %v4416_v19, %v4417_v49  ;;  %v3579_v19 = vshrl.u32 %v17449_v37, 16  ;;  %v3518_v49 = vld [vmem:[#allocation2 + $0x18] sm:$0xf]  ;;  %v3524_v6 = vld [vmem:[#allocation2 + $0x30] sm:$0xf] }
 0x327   : > { %21840 = vst [vmem:[#allocation39_spill] sm:$0xff] %v17431_v28  ;;  %v3577_v29 = vrot.slane %v3575_v56, 5  ;;  %v17459_v28 = vld [vmem:[#allocation2 + $0x14] sm:$0x1]  ;;  %v3638_v24 = vshrl.u32 %v3524_v6, 16  ;;  %v3641_v47 = vshll.u32 %v3524_v6, 16 }
 0x328   : > { %13756 = vmatmul.mubr.msk.bf16.gmra.mrb[24].mxu0 %vm641_vm5, %v21837_v63  ;;  %v3569_v63 = vshll.u32 %v3515_v35, 16  ;;  %v3581_v4 = vrot.slane %v3579_v19, 4  ;;  %v3521_v35 = vld [vmem:[#allocation2 + $0x24] sm:$0xf]  ;;  %21843 = vst [vmem:[#allocation41_spill] sm:$0xff] %v17459_v28  ;;  %v14899_v56 = vld [vmem:[#allocation2 + $0x54] sm:$0xff]  }
 0x329   : > { %13759 = vmatprep.mubr.msk.bf16.mxu0 %vm641_vm5, %v21838_v38  ;;  %v14896_v38 = vld [vmem:[#allocation2 + $0x30] sm:$0xff]   ;;  %v3585_v19 = vshll.u32 %v17459_v28, 16  ;;  %v3633_v6 = vshll.u32 %v17184_v27, 16  ;;  %v3643_v7 = vrot.slane %v3641_v47, 5  ;;  %v3675_v47 = vshrl.u32 %v17189_v40, 16  ;;  %v14902_v28 = vld [vmem:[#allocation2 + $0x78] sm:$0xff]  }
 0x32a   : > { %v3582_v5 = vor.u32 %v3581_v4, %v3577_v29  ;;  %v17678_v62 = vld [vmem:[#allocation2 + $0x5c] sm:$0x1] }
 0x32b   : > { %v3587_v3 = vrot.slane %v3585_v19, 5  ;;  %v3640_v19 = vrot.slane %v3638_v24, 4  ;;  %21863 = vst [vmem:[#allocation60_spill] sm:$0xff] %v17678_v62 }
 0x32c   : > { %v3583_v4 = vrot.slane %v3582_v5, 4 }
 0x330   : > { %13760 = vmatmul.mubr.msk.bf16.gmra.mrb[28].mxu0 %vm641_vm5, %v21841_v52  ;;  %v3568_v52 = vrot.slane %v3566_v59, 4  ;;  %v3603_v59 = vshrl.u32 %v17457_v10, 16 }
 0x331   : > { %13765 = vmatprep.mubr.msk.bf16.mxu0 %vm641_vm5, %v14893_v48  ;;  %v14897_v48 = vld [vmem:[#allocation2 + $0x3c] sm:$0xff]  }
 0x338   : > { %13766 = vmatmul.mubr.msk.bf16.vlgmr.msra.gmra.mrb[0].mxu0 %vm641_vm5, %v14894_v1  ;;  %v3571_v1 = vrot.slane %v3569_v63, 5  ;;  %v3614_v63 = vshrl.u32 %v3521_v35, 16 }
 0x339   : > { %13798 = vmatpush3.bf16.msra.mxu0 %v4046_v0  ;;  %13769 = vmatprep.mubr.msk.bf16.mxu0 %vm641_vm5, %v14895_v51  ;;  %v3590_v0 = vshrl.u32 %v3518_v49, 16  ;;  %v3593_v51 = vshll.u32 %v3518_v49, 16  ;;  %v14898_v49 = vld [vmem:[#allocation2 + $0x48] sm:$0xff]  }
 0x33a   : > { %14858 = vmatprep.subr.msk.bf16.mxu0 %vm2243_vm11, %v17445_v15  ;;  %v3572_v25 = vor.u32 %v3571_v1, %v3568_v52  ;;  %v17467_v1 = vrot.slane %v3599_v30, 5  ;;  %v3616_v18 = vrot.slane %v3614_v63, 4  ;;  %v3651_v30 = vshrl.u32 %v17186_v32, 16 }
 0x33b   : > { %v3592_v44 = vrot.slane %v3590_v0, 4  ;;  %v3595_v60 = vrot.slane %v3593_v51, 5  ;;  %v3605_v51 = vrot.slane %v3603_v59, 4  ;;  %v3527_v59 = vld [vmem:[#allocation2 + $0x3c] sm:$0xf]  ;;  %v3588_v63 = vsel %vm16062_vm14, %v3583_v4, %v3587_v3 }
 0x33c   : > { %v3573_v42 = vrot.slane %v3572_v25, 4  ;;  %v3647_v25 = vshll.u32 %v17186_v32, 16  ;;  %v3629_v32 = vrot.slane %v3627_v16, 4  ;;  %v3662_v23 = vshrl.u32 %v3527_v59, 16 }
 0x33d   : > { %v3596_v52 = vor.u32 %v3595_v60, %v3592_v44  ;;  %v3606_v20 = vor.u32 %v3605_v51, %v17467_v1  ;;  %v3665_v54 = vshll.u32 %v3527_v59, 16  ;;  %v3671_v16 = vshll.u32 %v17189_v40, 16  ;;  %v3533_v51 = vld [vmem:[#allocation2 + $0x54] sm:$0xf] }
 0x33e   : > { %v3578_v44 = vsel %vm16062_vm14, %v3573_v42, %v3577_v29  ;;  %v3530_v42 = vld [vmem:[#allocation2 + $0x48] sm:$0xf]  ;;  %v14901_v29 = vld [vmem:[#allocation2 + $0x6c] sm:$0xff]   ;;  %v3699_v4 = vshrl.u32 %v17201_v50, 16  ;;  %v3644_v59 = vor.u32 %v3643_v7, %v3640_v19  ;;  %v3710_v27 = vshrl.u32 %v3533_v51, 16 }
 0x33f   : > { %v17477_v60 = vrot.slane %v3596_v52, 4  ;;  %v17487_v52 = vrot.slane %v3647_v25, 5  ;;  %v17490_v3 = vcombine.low %v3578_v44, %v3588_v63  ;;  %v3686_v24 = vshrl.u32 %v3530_v42, 16  ;;  %v14903_v19 = vld [vmem:[#allocation2 + $0x84] sm:$0xff]  }
 0x340   : > { %13770 = vmatmul.mubr.msk.bf16.gmra.mrb[4].mxu0 %vm641_vm5, %v14896_v38  ;;  %v17462_v38 = vld [vmem:[#allocation2 + $0x20] sm:$0x1]  ;;  %v17506_v44 = vrot.slane %v3633_v6, 5  ;;  %v3664_v63 = vrot.slane %v3662_v23, 4  ;;  %v3719_v23 = vshll.u32 %v17204_v26, 16  ;;  %v3723_v6 = vshrl.u32 %v17204_v26, 16 }
 0x341   : > { %13773 = vmatprep.mubr.msk.bf16.mxu0 %vm641_vm5, %v14897_v48  ;;  %21844 = vst [vmem:[#allocation42_spill] sm:$0xff] %v17462_v38  ;;  %v3617_v48 = vshll.u32 %v3521_v35, 16  ;;  %v3609_v0 = vshll.u32 %v17462_v38, 16  ;;  %v3713_v38 = vshll.u32 %v3533_v51, 16 }
 0x343   : > { %v3619_v35 = vrot.slane %v3617_v48, 5  ;;  %v17479_v5 = vrot.slane %v3609_v0, 5  ;;  %v14900_v48 = vld [vmem:[#allocation2 + $0x60] sm:$0xff]   ;;  %v3653_v0 = vrot.slane %v3651_v30, 4 }
 0x345   : > { %v3654_v40 = vor.u32 %v3653_v0, %v17487_v52 }
 0x348   : > { %13774 = vmatmul.mubr.msk.bf16.gmra.mrb[8].mxu0 %vm641_vm5, %v14898_v49  ;;  %v17484_v49 = vrot.slane %v3623_v12, 5  ;;  %v3689_v12 = vshll.u32 %v3530_v42, 16  ;;  %v3677_v42 = vrot.slane %v3675_v47, 4  ;;  %v3655_v47 = vrot.slane %v3654_v40, 4 }
 0x349   : > { %13777 = vmatprep.mubr.msk.bf16.mxu0 %vm641_vm5, %v14899_v56  ;;  %v3620_v56 = vor.u32 %v3619_v35, %v3616_v18  ;;  %v3695_v18 = vshll.u32 %v17201_v50, 16  ;;  %v17501_v35 = vrot.slane %v3606_v20, 4  ;;  %v3688_v50 = vrot.slane %v3686_v24, 4 }
 0x34a   : > { %v3630_v30 = vor.u32 %v3629_v32, %v17484_v49  ;;  %v3691_v10 = vrot.slane %v3689_v12, 5  ;;  %v3536_v32 = vld [vmem:[#allocation2 + $0x60] sm:$0xf]  ;;  %v3657_v24 = vshll.u32 %v17192_v13, 16  ;;  %v3725_v13 = vrot.slane %v3723_v6, 4  ;;  %v14904_v6 = vld [vmem:[#allocation2 + $0x90] sm:$0xff]  }
 0x34b   : > { %v17503_v25 = vrot.slane %v3620_v56, 4  ;;  %v17511_v20 = vrot.slane %v3695_v18, 5  ;;  %v3701_v56 = vrot.slane %v3699_v4, 4  ;;  %v3612_v7 = vsel %vm16062_vm14, %v17501_v35, %v17479_v5 }
 0x34c   : > { %v3631_v0 = vrot.slane %v3630_v30, 4  ;;  %v3712_v18 = vrot.slane %v3710_v27, 4  ;;  %v3715_v4 = vrot.slane %v3713_v38, 5  ;;  %v3734_v26 = vshrl.u32 %v3536_v32, 16 }
 0x34d   : > { %v3702_v51 = vor.u32 %v3701_v56, %v17511_v20  ;;  %v3737_v35 = vshll.u32 %v3536_v32, 16  ;;  %v3705_v30 = vshll.u32 %v17215_v21, 16  ;;  %v3659_v27 = vrot.slane %v3657_v24, 5  ;;  %v3539_v21 = vld [vmem:[#allocation2 + $0x6c] sm:$0xf] }
 0x34e   : > { %v3743_v38 = vshll.u32 %v17228_v39, 16  ;;  %v3736_v56 = vrot.slane %v3734_v26, 4 }
 0x350   : > { %13778 = vmatmul.mubr.msk.bf16.gmra.mrb[12].mxu0 %vm641_vm5, %v14900_v48  ;;  %v3667_v48 = vrot.slane %v3665_v54, 5  ;;  %v3626_v54 = vsel %vm16062_vm14, %v17503_v25, %v17484_v49  ;;  %v3692_v49 = vor.u32 %v3691_v10, %v3688_v50  ;;  %v3681_v25 = vshll.u32 %v17194_v31, 16 }
 0x351   : > { %13781 = vmatprep.mubr.msk.bf16.mxu0 %vm641_vm5, %v14901_v29  ;;  %v17509_v29 = vrot.slane %v3671_v16, 5  ;;  %v3645_v16 = vrot.slane %v3644_v59, 4  ;;  %v17530_v59 = vrot.slane %v3719_v23, 5  ;;  %v3747_v10 = vshrl.u32 %v17228_v39, 16 }
 0x352   : > { %v3668_v12 = vor.u32 %v3667_v48, %v3664_v63  ;;  %v3716_v48 = vor.u32 %v3715_v4, %v3712_v18  ;;  %v3703_v50 = vrot.slane %v3702_v51, 4  ;;  %v3739_v23 = vrot.slane %v3737_v35, 5 }
 0x353   : > { %v3678_v5 = vor.u32 %v3677_v42, %v17509_v29  ;;  %v3650_v40 = vsel %vm16062_vm14, %v3645_v16, %v17487_v52  ;;  %v3693_v42 = vrot.slane %v3692_v49, 4  ;;  %v3683_v32 = vrot.slane %v3681_v25, 5 }
 0x354   : > { %v3669_v63 = vrot.slane %v3668_v12, 4  ;;  %v3726_v39 = vor.u32 %v3725_v13, %v17530_v59  ;;  %v17543_v24 = vrot.slane %v3743_v38, 5  ;;  %v3749_v52 = vrot.slane %v3747_v10, 4 }
 0x355   : > { %v3679_v31 = vrot.slane %v3678_v5, 4  ;;  %v3758_v16 = vshrl.u32 %v3539_v21, 16  ;;  %v3761_v12 = vshll.u32 %v3539_v21, 16  ;;  %v3729_v4 = vshll.u32 %v17224_v11, 16 }
 0x356   : > { %v3674_v5 = vsel %vm16062_vm14, %v3669_v63, %v17509_v29  ;;  %v3698_v49 = vsel %vm16062_vm14, %v3693_v42, %v17511_v20  ;;  %v3740_v26 = vor.u32 %v3739_v23, %v3736_v56  ;;  %v3753_v35 = vshll.u32 %v17248_v46, 16  ;;  %v3542_v20 = vld [vmem:[#allocation2 + $0x78] sm:$0xf]  ;;  %v5797_v56 = vld [vmem:[#allocation2 + $0x24] sm:$0xe]  ;;  %v14906_v23 = vld [vmem:[#allocation2 + $0xa8] sm:$0xff]  }
 0x357   : > { %v3684_v18 = vsel %vm16062_vm14, %v3679_v31, %v3683_v32  ;;  %v21845_v29 = vsel %vm16062_vm14, %v17477_v60, %v17467_v1  ;;  %v17572_v13 = vrot.slane %v3726_v39, 4  ;;  %v3750_v38 = vor.u32 %v3749_v52, %v17543_v24  ;;  %v5796_v1 = vld [vmem:[#allocation2 + $0x18] sm:$0xe]  ;;  %v17594_v31 = vld [vmem:[#allocation2 + $0x28] sm:$0xf] }
 0x358   : > { %13782 = vmatmul.mubr.msk.bf16.gmra.mrb[16].mxu0 %vm641_vm5, %v14902_v28  ;;  %v3636_v28 = vsel %vm16062_vm14, %v3631_v0, %v17506_v44  ;;  %v3660_v44 = vsel %vm16062_vm14, %v3655_v47, %v3659_v27  ;;  %v14905_v0 = vld [vmem:[#allocation2 + $0x9c] sm:$0xff]   ;;  %v17551_v47 = vrot.slane %v3716_v48, 4  ;;  %v17566_v25 = vcombine.low %v21845_v29, %v3612_v7  ;;  %21848 = vst [vmem:[#allocation45_spill] sm:$0xff] %v17594_v31  ;;  %v17606_v32 = vld [vmem:[#allocation2 + $0x2c] sm:$0x1]  ;;  %v14907_v52 = vld [vmem:[#allocation2 + $0xb4] sm:$0xff]  }
 0x359   : > { %13785 = vmatprep.mubr.msk.bf16.mxu0 %vm641_vm5, %v14903_v19  ;;  %v3707_v19 = vrot.slane %v3705_v30, 5  ;;  %v17568_v11 = vcombine.low %v3626_v54, %v3636_v28  ;;  %v17570_v30 = vcombine.low %v3650_v40, %v3660_v44  ;;  %v17574_v27 = vld [vmem:[#allocation2 + $0x1c] sm:$0xf]  ;;  %v17577_v10 = vrot.slane %v3758_v16, 4  ;;  %v17592_v40 = vld [vmem:[#allocation2 + $0x20] sm:$0x1] }
 0x35a   : > { %21846 = vst [vmem:[#allocation43_spill] sm:$0xff] %v17574_v27  ;;  %v17579_v46 = vrot.slane %v3761_v12, 5  ;;  %v3767_v63 = vshll.u32 %v17239_v17, 16  ;;  %v17582_v60 = vcombine.low %v3674_v5, %v3684_v18  ;;  %v17590_v28 = vrot.slane %v3729_v4, 5  ;;  %21847 = vst [vmem:[#allocation44_spill] sm:$0xff] %v17592_v40 }
 0x35b   : > { %v3708_v51 = vsel %vm16062_vm14, %v3703_v50, %v3707_v19  ;;  %v17596_v48 = vrot.slane %v3740_v26, 4  ;;  %v17598_v21 = vrot.slane %v3753_v35, 5  ;;  %v3771_v42 = vshrl.u32 %v17239_v17, 16  ;;  %21849 = vst [vmem:[#allocation46_spill] sm:$0xff] %v17606_v32  ;;  %v17608_v19 = vld [vmem:[#allocation2 + $0x34] sm:$0xf] }
 0x35c   : > { %v17584_v7 = vcombine.low %v3698_v49, %v3708_v51  ;;  %v3782_v50 = vshrl.u32 %v3542_v20, 16  ;;  %21850 = vst [vmem:[#allocation47_spill] sm:$0xff] %v17608_v19  ;;  %v12794_v39 = vrot.slane %v5796_v1, 9  ;;  %v17611_v16 = vrot.slane %v3750_v38, 4  ;;  %v5798_v18 = vld [vmem:[#allocation2 + $0x30] sm:$0xe] }
 0x35d   : > { %v17615_v12 = vrot.slane %v3767_v63, 5  ;;  %v3785_v5 = vshll.u32 %v3542_v20, 16  ;;  %v3791_v4 = vshll.u32 %v17263_v33, 16  ;;  %v17619_v49 = vld [vmem:[#allocation2 + $0x38] sm:$0x1]  ;;  %v5867_v26 = vrot.slane %v17592_v40, 5 }
 0x35e   : > { %21851 = vst [vmem:[#allocation48_spill] sm:$0xff] %v17619_v49  ;;  %v12795_v35 = vrot.slane %v5797_v56, 9  ;;  %v17623_v29 = vrot.slane %v3771_v42, 4  ;;  %v17625_v38 = vrot.slane %v3782_v50, 4  ;;  %v17628_v20 = vld [vmem:[#allocation2 + $0x40] sm:$0xf] }
 0x35f   : > { %v5871_v1 = vrot.slane %v17594_v31, 5  ;;  %v17633_v44 = vld [vmem:[#allocation2 + $0x4c] sm:$0xf]  ;;  %v12796_v50 = vrot.slane %v5798_v18, 9  ;;  %v5878_v56 = vrot.slane %v17608_v19, 5  ;;  %v17644_v54 = vrot.slane %v3785_v5, 5 }
 0x360   : > { %13786 = vmatmul.mubr.msk.bf16.gmra.mrb[20].mxu0 %vm641_vm5, %v14904_v6  ;;  %21853 = vst [vmem:[#allocation50_spill] sm:$0xff] %v17633_v44  ;;  %v5874_v40 = vrot.slane %v17606_v32, 5  ;;  %v5800_v31 = vld [vmem:[#allocation2 + $0x48] sm:$0xe]  ;;  %v5881_v5 = vrot.slane %v17619_v49, 5 }
 0x361   : > { %13789 = vmatprep.mubr.msk.bf16.mxu0 %vm641_vm5, %v14905_v0  ;;  %v5864_v0 = vrot.slane %v17574_v27, 5  ;;  %v5873_v63 = vrot.slane %v5871_v1, 4  ;;  %v14908_v27 = vld [vmem:[#allocation2 + $0xc0] sm:$0xff]   ;;  %v17655_v18 = vsel %vm16900_vm7, %v12795_v35, %v5871_v1  ;;  %v5801_v32 = vld [vmem:[#allocation2 + $0x54] sm:$0xe]  ;;  %v12798_v49 = vrot.slane %v5800_v31, 9 }
 0x362   : > { %21857 = vst [vmem:[#allocation54_spill] sm:$0xff] %v17655_v18  ;;  %v17669_v19 = vld [vmem:[#allocation2 + $0x64] sm:$0xf] }
 0x363   : > { %v5866_v51 = vrot.slane %v5864_v0, 4  ;;  %v17637_v17 = vsel %vm16900_vm7, %v12794_v39, %v5864_v0  ;;  %v17649_v39 = vrot.slane %v3791_v4, 5  ;;  %v17651_v0 = vld [vmem:[#allocation2 + $0x50] sm:$0x1]  ;;  %v17662_v6 = vsel %vm16900_vm7, %v5873_v63, %v5874_v40  ;;  %21861 = vst [vmem:[#allocation58_spill] sm:$0xff] %v17669_v19 }
 0x364   : > { %21854 = vst [vmem:[#allocation51_spill] sm:$0xff] %v17637_v17  ;;  %21856 = vst [vmem:[#allocation53_spill] sm:$0xff] %v17651_v0  ;;  %v5885_v17 = vrot.slane %v17628_v20, 5  ;;  %v5892_v40 = vrot.slane %v17633_v44, 5  ;;  %v5802_v63 = vld [vmem:[#allocation2 + $0x60] sm:$0xe] }
 0x365   : > { %v17641_v42 = vsel %vm16900_vm7, %v5866_v51, %v5867_v26  ;;  %v5880_v51 = vrot.slane %v5878_v56, 4  ;;  %v17658_v26 = vld [vmem:[#allocation2 + $0x58] sm:$0xf]  ;;  %21859 = vst [vmem:[#allocation56_spill] sm:$0xff] %v17662_v6  ;;  %v12799_v6 = vrot.slane %v5801_v32, 9 }
 0x366   : > { %21855 = vst [vmem:[#allocation52_spill] sm:$0xff] %v17641_v42  ;;  %21858 = vst [vmem:[#allocation55_spill] sm:$0xff] %v17658_v26  ;;  %v17666_v42 = vsel %vm16900_vm7, %v12796_v50, %v5878_v56  ;;  %v5894_v31 = vrot.slane %v5892_v40, 4  ;;  %v5899_v18 = vrot.slane %v17658_v26, 5  ;;  %v17694_v50 = vld [vmem:[#allocation2 + $0x70] sm:$0xf] }
 0x367   : > { %21860 = vst [vmem:[#allocation57_spill] sm:$0xff] %v17666_v42  ;;  %v17675_v1 = vsel %vm16900_vm7, %v5880_v51, %v5881_v5  ;;  %v17688_v51 = vld [vmem:[#allocation2 + $0x68] sm:$0x1]  ;;  %v5895_v5 = vrot.slane %v17651_v0, 5  ;;  %21866 = vst [vmem:[#allocation63_spill] sm:$0xff] %v17694_v50 }
 0x368   : > { %13790 = vmatmul.mubr.msk.bf16.gmra.mrb[24].mxu0 %vm641_vm5, %v14906_v23  ;;  %v17631_v23 = vld [vmem:[#allocation2 + $0x44] sm:$0x1]  ;;  %21862 = vst [vmem:[#allocation59_spill] sm:$0xff] %v17675_v1  ;;  %21865 = vst [vmem:[#allocation62_spill] sm:$0xff] %v17688_v51  ;;  %v5906_v1 = vrot.slane %v17669_v19, 5 }
 0x369   : > { %13793 = vmatprep.mubr.msk.bf16.mxu0 %vm641_vm5, %v14907_v52  ;;  %21852 = vst [vmem:[#allocation49_spill] sm:$0xff] %v17631_v23  ;;  %v5799_v52 = vld [vmem:[#allocation2 + $0x3c] sm:$0xe]  ;;  %v5888_v35 = vrot.slane %v17631_v23, 5  ;;  %v5803_v42 = vld [vmem:[#allocation2 + $0x6c] sm:$0xe] }
 0x36a   : > { %v12797_v4 = vrot.slane %v5799_v52, 9  ;;  %v5887_v52 = vrot.slane %v5885_v17, 4  ;;  %v17705_v32 = vld [vmem:[#allocation2 + $0x7c] sm:$0xf]  ;;  %v5901_v23 = vrot.slane %v5899_v18, 4  ;;  %v5908_v0 = vrot.slane %v5906_v1, 4 }
 0x36b   : > { %v17714_v26 = vld [vmem:[#allocation2 + $0x74] sm:$0x1]  ;;  %v5806_v44 = vld [vmem:[#allocation2 + $0x90] sm:$0xe] }
 0x36c   : > { %v17684_v56 = vsel %vm16900_vm7, %v12797_v4, %v5885_v17  ;;  %v17698_v17 = vsel %vm16900_vm7, %v5887_v52, %v5888_v35  ;;  %v12800_v4 = vrot.slane %v5802_v63, 9  ;;  %v5902_v35 = vrot.slane %v17678_v62, 5  ;;  %v5804_v52 = vld [vmem:[#allocation2 + $0x78] sm:$0xe]  ;;  %21870 = vst [vmem:[#allocation67_spill] sm:$0xff] %v17714_v26 }
 0x36d   : > { %21864 = vst [vmem:[#allocation61_spill] sm:$0xff] %v17684_v56  ;;  %21867 = vst [vmem:[#allocation64_spill] sm:$0xff] %v17698_v17  ;;  %v17722_v63 = vsel %vm16900_vm7, %v12799_v6, %v5899_v18  ;;  %v5909_v17 = vrot.slane %v17688_v51, 5  ;;  %v12801_v62 = vrot.slane %v5803_v42, 9  ;;  %v17736_v6 = vld [vmem:[#allocation2 + $0x94] sm:$0xf] }
 0x36e   : > { %21872 = vst [vmem:[#allocation69_spill] sm:$0xff] %v17722_v63  ;;  %v17733_v56 = vsel %vm16900_vm7, %v12800_v4, %v5906_v1  ;;  %21876 = vst [vmem:[#allocation73_spill] sm:$0xff] %v17736_v6  ;;  %v4516_v1 = vsel %vm2243_vm11, %v17445_v15, 0  ;;  %v17747_v42 = vld [vmem:[#allocation2 + $0xa0] sm:$0xf]  ;;  %v5916_v19 = vrot.slane %v17714_v26, 5 }
 0x36f   : > { %21875 = vst [vmem:[#allocation72_spill] sm:$0xff] %v17733_v56  ;;  %v17742_v51 = vsel %vm16900_vm7, %v5908_v0, %v5909_v17  ;;  %21878 = vst [vmem:[#allocation75_spill] sm:$0xff] %v17747_v42  ;;  %v17755_v0 = vld [vmem:[%s21465_s3 + $0xc] sm:$0x3]  ;;  %v17757_v17 = vld [vmem:[#allocation2 + $0x98] sm:$0x1] }
 0x370   : > { %13794 = vmatmul.mubr.msk.bf16.gmra.mrb[28].mxu0 %vm641_vm5, %v14908_v27  ;;  %v17702_v27 = vsel %vm16900_vm7, %v12798_v49, %v5892_v40  ;;  %v17716_v49 = vld [vmem:[#allocation2 + $0x80] sm:$0x1]  ;;  %v5913_v40 = vrot.slane %v17694_v50, 5  ;;  %21877 = vst [vmem:[#allocation74_spill] sm:$0xff] %v17742_v51  ;;  %21879 = vst [vmem:[#allocation76_spill] sm:$0xff] %v17757_v17 }
 0x371   : > { %13799 = vmatprep.mubr.msk.bf16.mxu0 %vm641_vm5, %v17490_v3  ;;  %21868 = vst [vmem:[#allocation65_spill] sm:$0xff] %v17702_v27  ;;  %v17711_v3 = vsel %vm16900_vm7, %v5894_v31, %v5895_v5  ;;  %21871 = vst [vmem:[#allocation68_spill] sm:$0xff] %v17716_v49  ;;  %v17725_v31 = vld [vmem:[#allocation2 + $0x88] sm:$0xf]  ;;  %v17729_v5 = vsel %vm16900_vm7, %v5901_v23, %v5902_v35  ;;  %v5099_v27 = vld [vmem:[#allocation2 + $0x8c] sm:$0x1] }
 0x372   : > { %21869 = vst [vmem:[#allocation66_spill] sm:$0xff] %v17711_v3  ;;  %21873 = vst [vmem:[#allocation70_spill] sm:$0xff] %v17725_v31  ;;  %v5805_v3 = vld [vmem:[#allocation2 + $0x84] sm:$0xe]  ;;  %v12802_v23 = vrot.slane %v5804_v52, 9  ;;  %v5920_v35 = vrot.slane %v17705_v32, 5  ;;  %v17765_v4 = vsel %vm16900_vm7, %v12801_v62, %v5913_v40 }
 0x373   : > { %21874 = vst [vmem:[#allocation71_spill] sm:$0xff] %v17729_v5  ;;  %v5915_v50 = vrot.slane %v5913_v40, 4  ;;  %v5923_v18 = vrot.slane %v17716_v49, 5  ;;  %v12803_v15 = vrot.slane %v5805_v3, 9  ;;  %v5927_v5 = vrot.slane %v17725_v31, 5  ;;  %21880 = vst [vmem:[#allocation77_spill] sm:$0xff] %v17765_v4 }
 0x374   : > { %v5922_v52 = vrot.slane %v5920_v35, 4  ;;  %v17773_v56 = vsel %vm16900_vm7, %v12802_v23, %v5920_v35  ;;  %v5930_v63 = vrot.slane %v5099_v27, 5  ;;  %v5807_v49 = vld [vmem:[#allocation2 + $0x9c] sm:$0xe]  ;;  %v5808_v3 = vld [vmem:[#allocation2 + $0xa8] sm:$0xe] }
 0x375   : > { %v17769_v51 = vsel %vm16900_vm7, %v5915_v50, %v5916_v19  ;;  %21882 = vst [vmem:[#allocation79_spill] sm:$0xff] %v17773_v56  ;;  %v17777_v31 = vld [vmem:[#allocation2 + $0xac] sm:$0xf]  ;;  %v5929_v50 = vrot.slane %v5927_v5, 4  ;;  %v12804_v40 = vrot.slane %v5806_v44, 9  ;;  %v21885_v27 = vshrl.u32 %v17263_v33, 16 }
 0x376   : > { %21881 = vst [vmem:[#allocation78_spill] sm:$0xff] %v17769_v51  ;;  %21883 = vst [vmem:[#allocation80_spill] sm:$0xff] %v17777_v31  ;;  %v17783_v19 = vsel %vm16900_vm7, %v5922_v52, %v5923_v18  ;;  %v5110_v35 = vld [vmem:[#allocation2 + $0xb8] sm:$0xf]  ;;  %v17795_v62 = vsel %vm16900_vm7, %v12803_v15, %v5927_v5  ;;  %v5934_v18 = vrot.slane %v17736_v6, 5  ;;  %v12805_v33 = vrot.slane %v5807_v49, 9 }
 0x377   : > { %21884 = vst [vmem:[#allocation81_spill] sm:$0xff] %v17783_v19  ;;  %v17787_v23 = vrot.slane %v21885_v27, 4  ;;  %21886 = vst [vmem:[#allocation82_spill] sm:$0xff] %v17795_v62  ;;  %v17800_v44 = vsel %vm16900_vm7, %v5929_v50, %v5930_v63  ;;  %v5941_v52 = vrot.slane %v17747_v42, 5  ;;  %v12806_v27 = vrot.slane %v5808_v3, 9 }
 0x378   : > { %13800 = vmatmul.mubr.msk.bf16.vlgmr.msra.gmra.mrb[0].mxu0 %vm641_vm5, %v17566_v25  ;;  %v5105_v25 = vld [vmem:[#allocation2 + $0xa4] sm:$0x1]  ;;  %21887 = vst [vmem:[#allocation83_spill] sm:$0xff] %v17800_v44  ;;  %v5809_v51 = vld [vmem:[#allocation2 + $0xb4] sm:$0xe]  ;;  %v5936_v19 = vrot.slane %v5934_v18, 4  ;;  %v17811_v63 = vsel %vm16900_vm7, %v12804_v40, %v5934_v18 }
 0x379   : > { %13832 = vmatpush3.bf16.msra.mxu0 %v4516_v1  ;;  %13803 = vmatprep.mubr.msk.bf16.mxu0 %vm641_vm5, %v17568_v11  ;;  %v5108_v11 = vld [vmem:[#allocation2 + $0xb0] sm:$0x1]  ;;  %v3545_v4 = vld [vmem:[#allocation2 + $0x84] sm:$0xf]  ;;  %v5111_v26 = vld [vmem:[#allocation2 + $0xbc] sm:$0x1] }
 0x37a   : > { %14859 = vmatprep.subr.msk.bf16.mxu0 %vm2243_vm11, %v17755_v0  ;;  %v5937_v5 = vrot.slane %v17757_v17, 5  ;;  %v5948_v15 = vrot.slane %v17777_v31, 5  ;;  %v17807_v56 = vld [vmem:[#allocation2 + $0xc4] sm:$0xf]  ;;  %v5943_v49 = vrot.slane %v5941_v52, 4  ;;  %v5944_v50 = vrot.slane %v5105_v25, 5 }
 0x37b   : > { %v5951_v3 = vrot.slane %v5108_v11, 5  ;;  %v12807_v1 = vrot.slane %v5809_v51, 9  ;;  %v5955_v44 = vrot.slane %v5110_v35, 5  ;;  %v5810_v62 = vld [vmem:[#allocation2 + $0xc0] sm:$0xe]  ;;  %v17821_v31 = vsel %vm16900_vm7, %v12805_v33, %v5941_v52 }
 0x37c   : > { %v17815_v42 = vsel %vm16900_vm7, %v5936_v19, %v5937_v5  ;;  %v5950_v6 = vrot.slane %v5948_v15, 4  ;;  %v17825_v40 = vsel %vm16900_vm7, %v5943_v49, %v5944_v50  ;;  %v17829_v25 = vsel %vm16900_vm7, %v12806_v27, %v5948_v15  ;;  %v5114_v51 = vld [vmem:[#allocation2 + $0xc8] sm:$0x1] }
 0x37d   : > { %v12820_v17 = vcombine.low %v17811_v63, %v17815_v42  ;;  %v12821_v19 = vcombine.low %v17821_v31, %v17825_v40  ;;  %v5957_v35 = vrot.slane %v5955_v44, 4  ;;  %v5958_v18 = vrot.slane %v5111_v26, 5  ;;  %v498_v31 = vld [vmem:[#allocation4 + $0xc] sm:$0x1]  ;;  %v504_v40 = vld [vmem:[#allocation4 + $0x24] sm:$0x1] }
 0x37e   : > { %v17837_v11 = vsel %vm16900_vm7, %v5950_v6, %v5951_v3  ;;  %v3806_v33 = vshrl.u32 %v3545_v4, 16  ;;  %v12808_v27 = vrot.slane %v5810_v62, 9  ;;  %v3809_v5 = vshll.u32 %v3545_v4, 16 }
 0x37f   : > { %v12822_v52 = vcombine.low %v17829_v25, %v17837_v11  ;;  %v3815_v15 = vshll.u32 %v17278_v22, 16  ;;  %v17847_v49 = vsel %vm16900_vm7, %v12807_v1, %v5955_v44  ;;  %v17851_v26 = vsel %vm16900_vm7, %v5957_v35, %v5958_v18 }
 0x380   : > { %13804 = vmatmul.mubr.msk.bf16.gmra.mrb[4].mxu0 %vm641_vm5, %v17570_v30  ;;  %v5962_v30 = vrot.slane %v17807_v56, 5  ;;  %v12823_v6 = vcombine.low %v17847_v49, %v17851_v26  ;;  %v5965_v62 = vrot.slane %v5114_v51, 5  ;;  %v3774_v4 = vor.u32 %v17623_v29, %v17615_v12  ;;  %v516_v26 = vld [vmem:[#allocation4 + $0x54] sm:$0x1] }
 0x381   : > { %13807 = vmatprep.mubr.msk.bf16.mxu0 %vm641_vm5, %v17582_v60  ;;  %v3819_v60 = vshrl.u32 %v17278_v22, 16  ;;  %v3788_v3 = vor.u32 %v17644_v54, %v17625_v38  ;;  %v3798_v1 = vor.u32 %v17787_v23, %v17649_v39  ;;  %v3801_v44 = vshll.u32 %v17287_v55, 16 }
 0x382   : > { %v5964_v50 = vrot.slane %v5962_v30, 4  ;;  %v21888_v22 = vsel %vm16062_vm14, %v17572_v13, %v17590_v28  ;;  %v21889_v51 = vsel %vm16062_vm14, %v17551_v47, %v17530_v59  ;;  %v3746_v54 = vsel %vm16062_vm14, %v17596_v48, %v17543_v24  ;;  %v3548_v48 = vld [vmem:[#allocation2 + $0x90] sm:$0xf] }
 0x383   : > { %v12652_v35 = vcombine.low %v21889_v51, %v21888_v22  ;;  %v17879_v29 = vsel %vm16900_vm7, %v12808_v27, %v5962_v30  ;;  %v3756_v13 = vsel %vm16062_vm14, %v17611_v16, %v17598_v21  ;;  %v21890_v59 = vor.u32 %v17579_v46, %v17577_v10 }
 0x384   : > { %v17883_v55 = vsel %vm16900_vm7, %v5964_v50, %v5965_v62  ;;  %v21891_v28 = vshll.u32 %v17250_v34, 16  ;;  %v3808_v23 = vrot.slane %v3806_v33, 4  ;;  %v3811_v18 = vrot.slane %v3809_v5, 5  ;;  %v3551_v50 = vld [vmem:[#allocation2 + $0x9c] sm:$0xf] }
 0x385   : > { %v3765_v47 = vrot.slane %v21890_v59, 4  ;;  %v12824_v38 = vcombine.low %v17879_v29, %v17883_v55  ;;  %v17896_v27 = vrot.slane %v3815_v15, 5  ;;  %v3821_v30 = vrot.slane %v3819_v60, 4  ;;  %v522_v29 = vld [vmem:[#allocation4 + $0x6c] sm:$0x1] }
 0x386   : > { %v3779_v24 = vrot.slane %v21891_v28, 5  ;;  %v3775_v21 = vrot.slane %v3774_v4, 4  ;;  %v3789_v16 = vrot.slane %v3788_v3, 4  ;;  %v3799_v10 = vrot.slane %v3798_v1, 4 }
 0x387   : > { %v3803_v46 = vrot.slane %v3801_v44, 5  ;;  %v3830_v34 = vshrl.u32 %v3548_v48, 16  ;;  %v3833_v62 = vshll.u32 %v3548_v48, 16  ;;  %v3839_v22 = vshll.u32 %v17300_v61, 16 }
 0x388   : > { %13808 = vmatmul.mubr.msk.bf16.gmra.mrb[8].mxu0 %vm641_vm5, %v17584_v7  ;;  %v3843_v33 = vshrl.u32 %v17300_v61, 16  ;;  %v3854_v5 = vshrl.u32 %v3551_v50, 16  ;;  %v3857_v15 = vshll.u32 %v3551_v50, 16  ;;  %v3863_v60 = vshll.u32 %v17311_v41, 16 }
 0x389   : > { %13811 = vmatprep.mubr.msk.bf16.mxu0 %vm641_vm5, %v12652_v35  ;;  %v3867_v51 = vshrl.u32 %v17311_v41, 16  ;;  %v12653_v59 = vcombine.low %v3746_v54, %v3756_v13  ;;  %v3770_v7 = vsel %vm16062_vm14, %v3765_v47, %v17615_v12  ;;  %v3812_v4 = vor.u32 %v3811_v18, %v3808_v23  ;;  %v3554_v18 = vld [vmem:[#allocation2 + $0xa8] sm:$0xf] }
 0x38a   : > { %v3822_v3 = vor.u32 %v3821_v30, %v17896_v27  ;;  %v3780_v1 = vsel %vm16062_vm14, %v3775_v21, %v3779_v24  ;;  %v3794_v61 = vsel %vm16062_vm14, %v3789_v16, %v17649_v39  ;;  %v3804_v44 = vsel %vm16062_vm14, %v3799_v10, %v3803_v46 }
 0x38b   : > { %v3825_v41 = vshll.u32 %v17296_v45, 16  ;;  %v3832_v35 = vrot.slane %v3830_v34, 4  ;;  %v3835_v54 = vrot.slane %v3833_v62, 5  ;;  %v3841_v13 = vrot.slane %v3839_v22, 5  ;;  %v3557_v34 = vld [vmem:[#allocation2 + $0xb4] sm:$0xf] }
 0x38c   : > { %v3845_v28 = vrot.slane %v3843_v33, 4  ;;  %v3856_v12 = vrot.slane %v3854_v5, 4  ;;  %v3859_v47 = vrot.slane %v3857_v15, 5  ;;  %v3865_v48 = vrot.slane %v3863_v60, 5 }
 0x38d   : > { %v3869_v23 = vrot.slane %v3867_v51, 4  ;;  %v12654_v30 = vcombine.low %v3770_v7, %v3780_v1  ;;  %v3813_v24 = vrot.slane %v3812_v4, 4  ;;  %v3823_v50 = vrot.slane %v3822_v3, 4 }
 0x38e   : > { %v12655_v39 = vcombine.low %v3794_v61, %v3804_v44  ;;  %v3827_v21 = vrot.slane %v3825_v41, 5  ;;  %v3836_v16 = vor.u32 %v3835_v54, %v3832_v35  ;;  %v3846_v45 = vor.u32 %v3845_v28, %v3841_v13 }
 0x38f   : > { %v3878_v10 = vshrl.u32 %v3554_v18, 16  ;;  %v3881_v46 = vshll.u32 %v3554_v18, 16  ;;  %v3860_v62 = vor.u32 %v3859_v47, %v3856_v12  ;;  %v3870_v22 = vor.u32 %v3869_v23, %v3865_v48 }
 0x390   : > { %13812 = vmatmul.mubr.msk.bf16.gmra.mrb[12].mxu0 %vm641_vm5, %v12653_v59  ;;  %v3887_v33 = vshll.u32 %v17331_v2, 16  ;;  %v3891_v5 = vshrl.u32 %v17331_v2, 16  ;;  %v3818_v15 = vsel %vm16062_vm14, %v3813_v24, %v17896_v27  ;;  %v3828_v60 = vsel %vm16062_vm14, %v3823_v50, %v3827_v21  ;;  %v3560_v24 = vld [vmem:[#allocation2 + $0xc0] sm:$0xf] }
 0x391   : > { %13815 = vmatprep.mubr.msk.bf16.mxu0 %vm641_vm5, %v12654_v30  ;;  %v3849_v51 = vshll.u32 %v17320_v53, 16  ;;  %v3873_v59 = vshll.u32 %v17322_v8, 16  ;;  %v3902_v7 = vshrl.u32 %v3557_v34, 16  ;;  %v3905_v4 = vshll.u32 %v3557_v34, 16 }
 0x392   : > { %v3911_v3 = vshll.u32 %v17346_v36, 16  ;;  %v3915_v1 = vshrl.u32 %v17346_v36, 16  ;;  %v3837_v61 = vrot.slane %v3836_v16, 4  ;;  %v3847_v44 = vrot.slane %v3846_v45, 4 }
 0x393   : > { %v3880_v2 = vrot.slane %v3878_v10, 4  ;;  %v3883_v41 = vrot.slane %v3881_v46, 5  ;;  %v3861_v35 = vrot.slane %v3860_v62, 4  ;;  %v3871_v54 = vrot.slane %v3870_v22, 4 }
 0x394   : > { %v3889_v27 = vrot.slane %v3887_v33, 5  ;;  %v3893_v28 = vrot.slane %v3891_v5, 4  ;;  %v12656_v12 = vcombine.low %v3818_v15, %v3828_v60  ;;  %v3851_v47 = vrot.slane %v3849_v51, 5 }
 0x395   : > { %v3875_v23 = vrot.slane %v3873_v59, 5  ;;  %v3904_v53 = vrot.slane %v3902_v7, 4  ;;  %v3907_v8 = vrot.slane %v3905_v4, 5  ;;  %v3913_v18 = vrot.slane %v3911_v3, 5 }
 0x396   : > { %v3917_v30 = vrot.slane %v3915_v1, 4  ;;  %v3842_v36 = vsel %vm16062_vm14, %v3837_v61, %v3841_v13  ;;  %v3852_v50 = vsel %vm16062_vm14, %v3847_v44, %v3851_v47  ;;  %v3866_v21 = vsel %vm16062_vm14, %v3861_v35, %v3865_v48 }
 0x397   : > { %v3876_v16 = vsel %vm16062_vm14, %v3871_v54, %v3875_v23  ;;  %v3894_v45 = vor.u32 %v3893_v28, %v3889_v27  ;;  %v3926_v10 = vshrl.u32 %v3560_v24, 16  ;;  %v3929_v46 = vshll.u32 %v3560_v24, 16 }
 0x398   : > { %13816 = vmatmul.mubr.msk.bf16.gmra.mrb[16].mxu0 %vm641_vm5, %v12655_v39  ;;  %v3884_v39 = vor.u32 %v3883_v41, %v3880_v2  ;;  %v3935_v34 = vshll.u32 %v17372_v9, 16  ;;  %v3939_v62 = vshrl.u32 %v17372_v9, 16  ;;  %v3908_v22 = vor.u32 %v3907_v8, %v3904_v53 }
 0x399   : > { %13819 = vmatprep.mubr.msk.bf16.mxu0 %vm641_vm5, %v12656_v12  ;;  %v3918_v33 = vor.u32 %v3917_v30, %v3913_v18  ;;  %v12657_v13 = vcombine.low %v3842_v36, %v3852_v50  ;;  %v3897_v5 = vshll.u32 %v17359_v57, 16  ;;  %v12658_v15 = vcombine.low %v3866_v21, %v3876_v16  ;;  %v21892_v12 = vld [vmem:[#allocation33_spill] sm:$0xff] }
 0x39a   : > { %v3885_v60 = vrot.slane %v3884_v39, 4  ;;  %v3895_v51 = vrot.slane %v3894_v45, 4  ;;  %v3921_v48 = vshll.u32 %v17368_v14, 16  ;;  %v3928_v59 = vrot.slane %v3926_v10, 4  ;;  %v21894_v39 = vld [vmem:[#allocation40_spill] sm:$0xff] }
 0x39b   : > { %v3931_v7 = vrot.slane %v3929_v46, 5  ;;  %v3937_v4 = vrot.slane %v3935_v34, 5  ;;  %v3941_v3 = vrot.slane %v3939_v62, 4  ;;  %v3909_v1 = vrot.slane %v3908_v22, 4  ;;  %v4242_v62 = vld [vmem:[#allocation2 + $0x18] sm:$0xe] }
 0x39c   : > { %v3919_v61 = vrot.slane %v3918_v33, 4  ;;  %v3899_v9 = vrot.slane %v3897_v5, 5  ;;  %v3923_v44 = vrot.slane %v3921_v48, 5  ;;  %v3890_v57 = vsel %vm16062_vm14, %v3885_v60, %v3889_v27  ;;  %v4241_v27 = vld [vmem:[#allocation2 + $0xc] sm:$0xe]  ;;  %v21895_v5 = vld [vmem:[#allocation42_spill] sm:$0xff] }
 0x39d   : > { %v3932_v41 = vor.u32 %v3931_v7, %v3928_v59  ;;  %v3942_v14 = vor.u32 %v3941_v3, %v3937_v4  ;;  %v3914_v35 = vsel %vm16062_vm14, %v3909_v1, %v3913_v18  ;;  %v4309_v28 = vrot.slane %v17449_v37, 5  ;;  %v21893_v18 = vld [vmem:[#allocation41_spill] sm:$0xff]  ;;  %v12760_v7 = vld [vmem:[%s21465_s3 + $0xe] sm:$0x3] }
 0x39e   : > { %v3900_v2 = vsel %vm16062_vm14, %v3895_v51, %v3899_v9  ;;  %v3924_v54 = vsel %vm16062_vm14, %v3919_v61, %v3923_v44  ;;  %v3945_v47 = vshll.u32 %v21892_v12, 16  ;;  %v12679_v50 = vrot.slane %v4241_v27, 9  ;;  %v21897_v3 = vld [vmem:[#allocation20_spill] sm:$0xff]  ;;  %v21899_v61 = vld [vmem:[#allocation15_spill] sm:$0xff]  ;;  %v21900_v9 = vld [vmem:[#allocation17_spill] sm:$0xff] }
 0x39f   : > { %v12659_v23 = vcombine.low %v3890_v57, %v3900_v2  ;;  %v12660_v53 = vcombine.low %v3914_v35, %v3924_v54  ;;  %v3933_v8 = vrot.slane %v3932_v41, 4  ;;  %v3943_v30 = vrot.slane %v3942_v14, 4  ;;  %v21903_v57 = vld [vmem:[#allocation18_spill] sm:$0xff]  ;;  %v21905_v41 = vld [vmem:[#allocation19_spill] sm:$0xff]  ;;  %v21906_v14 = vld [vmem:[#allocation9_spill] sm:$0xff] }
 0x3a0   : > { %13820 = vmatmul.mubr.msk.bf16.gmra.mrb[20].mxu0 %vm641_vm5, %v12657_v13  ;;  %v4311_v24 = vrot.slane %v4309_v28, 4  ;;  %v3947_v36 = vrot.slane %v3945_v47, 5  ;;  %v4312_v21 = vrot.slane %v21893_v18, 5  ;;  %v4316_v45 = vrot.slane %v21894_v39, 5  ;;  %v21908_v54 = vld [vmem:[#allocation10_spill] sm:$0xff]  ;;  %v21911_v47 = vld [vmem:[#allocation11_spill] sm:$0xff] }
 0x3a1   : > { %13823 = vmatprep.mubr.msk.bf16.mxu0 %vm641_vm5, %v12658_v15  ;;  %v3938_v16 = vsel %vm16062_vm14, %v3933_v8, %v3937_v4  ;;  %v4310_v34 = vsel %vm16900_vm7, %v12679_v50, %v4309_v28  ;;  %v12680_v13 = vrot.slane %v4242_v62, 9  ;;  %v4319_v15 = vrot.slane %v21895_v5, 5  ;;  %v21896_v4 = vld [vmem:[#allocation12_spill] sm:$0xff]  ;;  %v21909_v28 = vld [vmem:[#allocation14_spill] sm:$0xff]  ;;  %v21914_v8 = vld [vmem:[#allocation23_spill] sm:$0xff] }
 0x3a2   : > { %v3948_v37 = vsel %vm16062_vm14, %v3943_v30, %v3947_v36  ;;  %v4313_v10 = vsel %vm16900_vm7, %v4311_v24, %v4312_v21  ;;  %v4318_v33 = vrot.slane %v4316_v45, 4  ;;  %v4875_v59 = vsel %vm2243_vm11, %v17755_v0, 0  ;;  %v21902_v0 = vld [vmem:[#allocation21_spill] sm:$0xff]  ;;  %v21915_v30 = vld [vmem:[#allocation24_spill] sm:$0xff]  ;;  %v21918_v36 = vld [vmem:[#allocation26_spill] sm:$0xff] }
 0x3a3   : > { %v12661_v46 = vcombine.low %v3938_v16, %v3948_v37  ;;  %v12695_v22 = vcombine.low %v4310_v34, %v4313_v10  ;;  %v4317_v51 = vsel %vm16900_vm7, %v12680_v13, %v4316_v45  ;;  %v21898_v1 = vcombine.low %v21896_v4, %v21897_v3  ;;  %v21917_v24 = vld [vmem:[#allocation25_spill] sm:$0xff]  ;;  %v21920_v18 = vld [vmem:[#allocation27_spill] sm:$0xff]  ;;  %v21921_v21 = vld [vmem:[#allocation28_spill] sm:$0xff] }
 0x3a4   : > { %v4320_v60 = vsel %vm16900_vm7, %v4318_v33, %v4319_v15  ;;  %v21901_v44 = vcombine.low %v21899_v61, %v21900_v9  ;;  %v21904_v2 = vcombine.low %v21902_v0, %v21903_v57  ;;  %v21907_v35 = vcombine.low %v21905_v41, %v21906_v14  ;;  %v21923_v37 = vld [vmem:[#allocation29_spill] sm:$0xff]  ;;  %v21924_v39 = vld [vmem:[#allocation30_spill] sm:$0xff]  ;;  %v21926_v10 = vld [vmem:[#allocation31_spill] sm:$0xff] }
 0x3a5   : > { %v12696_v48 = vcombine.low %v4317_v51, %v4320_v60  ;;  %v21910_v12 = vcombine.low %v21908_v54, %v21909_v28  ;;  %v21916_v27 = vcombine.low %v21914_v8, %v21915_v30  ;;  %v21919_v50 = vcombine.low %v21917_v24, %v21918_v36  ;;  %v21929_v62 = vld [vmem:[#allocation34_spill] sm:$0xff]  ;;  %v21932_v13 = vld [vmem:[#allocation36_spill] sm:$0xff]  ;;  %v21933_v5 = vld [vmem:[#allocation37_spill] sm:$0xff] }
 0x3a6   : > { %v21922_v16 = vcombine.low %v21920_v18, %v21921_v21  ;;  %v21925_v45 = vcombine.low %v21923_v37, %v21924_v39  ;;  %v21934_v15 = vcombine.low %v21932_v13, %v21933_v5  ;;  %v14909_v60 = vld [vmem:[#allocation2 + $0x18] sm:$0xff]   ;;  %v14910_v4 = vld [vmem:[#allocation2 + $0x24] sm:$0xff]   ;;  %v5601_v3 = vsel %vm2243_vm11, %v12760_v7, 0  ;;  %v18043_v61 = vld [vmem:[%s21465_s3 + $0x10] sm:$0x3] }
 0x3a7   : > { %v21935_v51 = vld [vmem:[#allocation38_spill] sm:$0xff]  ;;  %v14915_v0 = vld [vmem:[#allocation2 + $0x60] sm:$0xff]   ;;  %v14916_v57 = vld [vmem:[#allocation2 + $0x6c] sm:$0xff]   ;;  %v499_v42 = vsel %vm18135_vm10, 0, %v498_v31  ;;  %v505_v25 = vsel %vm18135_vm10, 0, %v504_v40  ;;  %v517_v55 = vsel %vm18135_vm10, 0, %v516_v26 }
 0x3a8   : > { %13824 = vmatmul.mubr.msk.bf16.gmra.mrb[24].mxu0 %vm641_vm5, %v12659_v23  ;;  %v21912_v23 = vld [vmem:[#allocation5_spill] sm:$0xff]  ;;  %v14912_v9 = vld [vmem:[#allocation2 + $0x3c] sm:$0xff]   ;;  %v14918_v8 = vld [vmem:[#allocation2 + $0x84] sm:$0xff]   ;;  %500 = vst [vmem:[#allocation4 + $0xc] sm:$0x1] %v499_v42 }
 0x3a9   : > { %13827 = vmatprep.mubr.msk.bf16.mxu0 %vm641_vm5, %v12660_v53  ;;  %v21913_v53 = vcombine.low %v21911_v47, %v21912_v23  ;;  %v14917_v41 = vld [vmem:[#allocation2 + $0x78] sm:$0xff]   ;;  %v21938_v54 = vld [vmem:[#allocation43_spill] sm:$0xff]  ;;  %v14919_v24 = vld [vmem:[#allocation2 + $0x90] sm:$0xff]   ;;  %506 = vst [vmem:[#allocation4 + $0x24] sm:$0x1] %v505_v25 }
 0x3aa   : > { %v5130_v28 = vshll.u32 %v21938_v54, 16  ;;  %v5073_v47 = vld [vmem:[#allocation2 + $0x24] sm:$0xf]  ;;  %v21939_v37 = vld [vmem:[#allocation45_spill] sm:$0xff]  ;;  %518 = vst [vmem:[#allocation4 + $0x54] sm:$0x1] %v517_v55 }
 0x3ab   : > { %v5145_v30 = vshrl.u32 %v5073_v47, 16  ;;  %v5154_v39 = vshll.u32 %v21939_v37, 16 }
 0x3ac   : > { %v5132_v36 = vrot.slane %v5130_v28, 5 }
 0x3ad   : > { %v5147_v21 = vrot.slane %v5145_v30, 4  ;;  %v18062_v5 = vrot.slane %v5154_v39, 5 }
 0x3b0   : > { %13828 = vmatmul.mubr.msk.bf16.gmra.mrb[28].mxu0 %vm641_vm5, %v12661_v46  ;;  %v21927_v46 = vld [vmem:[#allocation32_spill] sm:$0xff] }
 0x3b1   : > { %13833 = vmatprep.mubr.msk.bf16.mxu0 %vm641_vm5, %v12695_v22  ;;  %v21928_v34 = vcombine.low %v21926_v10, %v21927_v46  ;;  %v21930_v22 = vld [vmem:[#allocation35_spill] sm:$0xff]  ;;  %v5076_v46 = vld [vmem:[#allocation2 + $0x30] sm:$0xf] }
 0x3b2   : > { %v21931_v33 = vcombine.low %v21929_v62, %v21930_v22  ;;  %v21940_v62 = vld [vmem:[#allocation44_spill] sm:$0xff] }
 0x3b3   : > { %v5140_v22 = vshll.u32 %v21940_v62, 16 }
 0x3b8   : > { %13834 = vmatmul.mubr.msk.bf16.vlgmr.msra.gmra.mrb[0].mxu0 %vm641_vm5, %v12696_v48  ;;  %v21936_v48 = vld [vmem:[#allocation39_spill] sm:$0xff] }
 0x3b9   : > { %13866 = vmatpush3.bf16.msra.mxu0 %v4875_v59  ;;  %13837 = vmatprep.mubr.msk.bf16.mxu0 %vm641_vm5, %v21898_v1  ;;  %v21937_v59 = vcombine.low %v21935_v51, %v21936_v48  ;;  %v14911_v1 = vld [vmem:[#allocation2 + $0x30] sm:$0xff]   ;;  %v14921_v51 = vld [vmem:[#allocation2 + $0xa8] sm:$0xff]  }
 0x3ba   : > { %14860 = vmatprep.subr.msk.bf16.mxu0 %vm2243_vm11, %v12760_v7  ;;  %v14914_v7 = vld [vmem:[#allocation2 + $0x54] sm:$0xff]  }
 0x3c0   : > { %13838 = vmatmul.mubr.msk.bf16.gmra.mrb[4].mxu0 %vm641_vm5, %v21901_v44  ;;  %v14913_v44 = vld [vmem:[#allocation2 + $0x48] sm:$0xff]  }
 0x3c1   : > { %13841 = vmatprep.mubr.msk.bf16.mxu0 %vm641_vm5, %v21904_v2  ;;  %v5070_v2 = vld [vmem:[#allocation2 + $0x18] sm:$0xf] }
 0x3c2   : > { %v5121_v14 = vshrl.u32 %v5070_v2, 16 }
 0x3c4   : > { %v5123_v23 = vrot.slane %v5121_v14, 4 }
 0x3c8   : > { %13842 = vmatmul.mubr.msk.bf16.gmra.mrb[8].mxu0 %vm641_vm5, %v21907_v35  ;;  %v5124_v35 = vshll.u32 %v5070_v2, 16 }
 0x3c9   : > { %13845 = vmatprep.mubr.msk.bf16.mxu0 %vm641_vm5, %v21910_v12  ;;  %v5134_v12 = vshrl.u32 %v21938_v54, 16 }
 0x3d0   : > { %13846 = vmatmul.mubr.msk.bf16.gmra.mrb[12].mxu0 %vm641_vm5, %v21913_v53  ;;  %v5126_v53 = vrot.slane %v5124_v35, 5  ;;  %v5082_v35 = vld [vmem:[#allocation2 + $0x48] sm:$0xf] }
 0x3d1   : > { %13849 = vmatprep.mubr.msk.bf16.mxu0 %vm641_vm5, %v21916_v27  ;;  %v5148_v27 = vshll.u32 %v5073_v47, 16 }
 0x3d2   : > { %v5127_v18 = vor.u32 %v5126_v53, %v5123_v23 }
 0x3d8   : > { %13850 = vmatmul.mubr.msk.bf16.gmra.mrb[16].mxu0 %vm641_vm5, %v21919_v50  ;;  %v5136_v50 = vrot.slane %v5134_v12, 4  ;;  %v21943_v12 = vld [vmem:[#allocation48_spill] sm:$0xff] }
 0x3d9   : > { %13853 = vmatprep.mubr.msk.bf16.mxu0 %vm641_vm5, %v21922_v16  ;;  %v5150_v16 = vrot.slane %v5148_v27, 5  ;;  %v5188_v47 = vshll.u32 %v21943_v12, 16  ;;  %v5202_v27 = vshll.u32 %v17628_v20, 16 }
 0x3da   : > { %v5137_v10 = vor.u32 %v5136_v50, %v5132_v36  ;;  %v5217_v50 = vshrl.u32 %v5082_v35, 16 }
 0x3db   : > { %v5151_v13 = vor.u32 %v5150_v16, %v5147_v21  ;;  %v5220_v16 = vshll.u32 %v5082_v35, 16  ;;  %v18087_v62 = vrot.slane %v5188_v47, 5 }
 0x3dc   : > { %v5138_v48 = vrot.slane %v5137_v10, 4  ;;  %v14923_v10 = vld [vmem:[#allocation2 + $0xc0] sm:$0xff]  }
 0x3dd   : > { %v18071_v2 = vrot.slane %v5151_v13, 4 }
 0x3e0   : > { %13854 = vmatmul.mubr.msk.bf16.gmra.mrb[20].mxu0 %vm641_vm5, %v21925_v45  ;;  %v5158_v45 = vshrl.u32 %v21939_v37, 16  ;;  %v21944_v37 = vld [vmem:[#allocation50_spill] sm:$0xff] }
 0x3e1   : > { %13857 = vmatprep.mubr.msk.bf16.mxu0 %vm641_vm5, %v21928_v34  ;;  %v5128_v34 = vrot.slane %v5127_v18, 4  ;;  %v14922_v18 = vld [vmem:[#allocation2 + $0xb4] sm:$0xff]   ;;  %v5226_v39 = vshll.u32 %v21944_v37, 16 }
 0x3e8   : > { %13858 = vmatmul.mubr.msk.bf16.gmra.mrb[24].mxu0 %vm641_vm5, %v21931_v33  ;;  %v14920_v33 = vld [vmem:[#allocation2 + $0x9c] sm:$0xff]  }
 0x3e9   : > { %13861 = vmatprep.mubr.msk.bf16.mxu0 %vm641_vm5, %v21934_v15  ;;  %v5160_v15 = vrot.slane %v5158_v45, 4  ;;  %v5230_v45 = vshrl.u32 %v21944_v37, 16  ;;  %v21947_v37 = vld [vmem:[#allocation53_spill] sm:$0xff] }
 0x3f0   : > { %13862 = vmatmul.mubr.msk.bf16.gmra.mrb[28].mxu0 %vm641_vm5, %v21937_v59  ;;  %v5172_v59 = vshll.u32 %v5076_v46, 16 }
 0x3f1   : > { %13867 = vmatprep.mubr.msk.bf16.mxu0 %vm641_vm5, %v14909_v60  ;;  %v5169_v60 = vshrl.u32 %v5076_v46, 16  ;;  %v5157_v46 = vsel %vm16062_vm14, %v18071_v2, %v18062_v5 }
 0x3f2   : > { %v5174_v28 = vrot.slane %v5172_v59, 5  ;;  %v5219_v59 = vrot.slane %v5217_v50, 4  ;;  %v5088_v50 = vld [vmem:[#allocation2 + $0x60] sm:$0xf] }
 0x3f3   : > { %v5171_v14 = vrot.slane %v5169_v60, 4  ;;  %v18093_v60 = vrot.slane %v5202_v27, 5  ;;  %v21946_v27 = vld [vmem:[#allocation49_spill] sm:$0xff] }
 0x3f8   : > { %13868 = vmatmul.mubr.msk.bf16.vlgmr.msra.gmra.mrb[0].mxu0 %vm641_vm5, %v14910_v4  ;;  %v21941_v4 = vld [vmem:[#allocation47_spill] sm:$0xff] }
 0x3f9   : > { %13900 = vmatpush3.bf16.msra.mxu0 %v5601_v3  ;;  %13871 = vmatprep.mubr.msk.bf16.mxu0 %vm641_vm5, %v14911_v1  ;;  %v5178_v3 = vshll.u32 %v21941_v4, 16  ;;  %v5182_v1 = vshrl.u32 %v21941_v4, 16  ;;  %v5811_v4 = vld [vmem:[#allocation2 + $0xcc] sm:$0xe] }
 0x3fa   : > { %14861 = vmatprep.subr.msk.bf16.mxu0 %vm2243_vm11, %v18043_v61 }
 0x3fb   : > { %v18077_v53 = vrot.slane %v5178_v3, 5 }
 0x400   : > { %13872 = vmatmul.mubr.msk.bf16.gmra.mrb[4].mxu0 %vm641_vm5, %v14912_v9  ;;  %v5079_v9 = vld [vmem:[#allocation2 + $0x3c] sm:$0xf] }
 0x401   : > { %13875 = vmatprep.mubr.msk.bf16.mxu0 %vm641_vm5, %v14913_v44  ;;  %v5142_v44 = vrot.slane %v5140_v22, 5  ;;  %v5193_v23 = vshrl.u32 %v5079_v9, 16  ;;  %v5196_v30 = vshll.u32 %v5079_v9, 16  ;;  %v5222_v9 = vrot.slane %v5220_v16, 5 }
 0x403   : > { %v5143_v54 = vsel %vm16062_vm14, %v5138_v48, %v5142_v44  ;;  %v18089_v22 = vrot.slane %v5193_v23, 4  ;;  %v18097_v48 = vld [vmem:[#allocation2 + $0xd4] sm:$0x1]  ;;  %v18102_v44 = vrot.slane %v5226_v39, 5  ;;  %v5236_v39 = vshll.u32 %v21947_v37, 16 }
 0x404   : > { %v6071_v37 = vsel %vm2243_vm11, %v18043_v61, 0 }
 0x408   : > { %13876 = vmatmul.mubr.msk.bf16.gmra.mrb[8].mxu0 %vm641_vm5, %v14914_v7  ;;  %v21942_v7 = vld [vmem:[#allocation46_spill] sm:$0xff] }
 0x409   : > { %13879 = vmatprep.mubr.msk.bf16.mxu0 %vm641_vm5, %v14915_v0  ;;  %v5164_v0 = vshll.u32 %v21942_v7, 16  ;;  %v5232_v7 = vrot.slane %v5230_v45, 4 }
 0x410   : > { %13880 = vmatmul.mubr.msk.bf16.gmra.mrb[12].mxu0 %vm641_vm5, %v14916_v57  ;;  %v5133_v57 = vsel %vm16062_vm14, %v5128_v34, %v5132_v36  ;;  %v5206_v36 = vshrl.u32 %v17628_v20, 16  ;;  %v5085_v20 = vld [vmem:[#allocation2 + $0x54] sm:$0xf] }
 0x411   : > { %13883 = vmatprep.mubr.msk.bf16.mxu0 %vm641_vm5, %v14917_v41  ;;  %v5161_v41 = vor.u32 %v5160_v15, %v18062_v5  ;;  %v12761_v21 = vcombine.low %v5133_v57, %v5143_v54  ;;  %v5198_v15 = vrot.slane %v5196_v30, 5  ;;  %v5241_v57 = vshrl.u32 %v5085_v20, 16  ;;  %v14924_v54 = vld [vmem:[#allocation2 + $0xcc] sm:$0xff]  }
 0x412   : > { %v5208_v5 = vrot.slane %v5206_v36, 4  ;;  %v5244_v2 = vshll.u32 %v5085_v20, 16  ;;  %v5212_v36 = vshll.u32 %v21946_v27, 16  ;;  %v21953_v27 = vld [vmem:[#allocation63_spill] sm:$0xff] }
 0x413   : > { %v5162_v34 = vrot.slane %v5161_v41, 4  ;;  %v21945_v41 = vld [vmem:[#allocation55_spill] sm:$0xff]  ;;  %v5199_v30 = vor.u32 %v5198_v15, %v18089_v22  ;;  %v501_v15 = vld [vmem:[#allocation4 + $0x18] sm:$0x1] }
 0x414   : > { %v5254_v47 = vshrl.u32 %v21945_v41, 16  ;;  %v5209_v16 = vor.u32 %v5208_v5, %v18093_v60  ;;  %v5246_v20 = vrot.slane %v5244_v2, 5 }
 0x416   : > { %v5210_v2 = vrot.slane %v5209_v16, 4 }
 0x418   : > { %13884 = vmatmul.mubr.msk.bf16.gmra.mrb[16].mxu0 %vm641_vm5, %v14918_v8  ;;  %v5184_v8 = vrot.slane %v5182_v1, 4  ;;  %v5972_v1 = vrot.slane %v18097_v48, 5 }
 0x419   : > { %13887 = vmatprep.mubr.msk.bf16.mxu0 %vm641_vm5, %v14919_v24  ;;  %v5166_v24 = vrot.slane %v5164_v0, 5  ;;  %v12809_v0 = vrot.slane %v5811_v4, 9 }
 0x41a   : > { %v5185_v13 = vor.u32 %v5184_v8, %v18077_v53 }
 0x41c   : > { %v5186_v8 = vrot.slane %v5185_v13, 4  ;;  %v5265_v13 = vshrl.u32 %v5088_v50, 16 }
 0x41e   : > { %v5191_v4 = vsel %vm16062_vm14, %v5186_v8, %v18087_v62 }
 0x420   : > { %13888 = vmatmul.mubr.msk.bf16.gmra.mrb[20].mxu0 %vm641_vm5, %v14920_v33  ;;  %v5175_v33 = vor.u32 %v5174_v28, %v5171_v14  ;;  %v5250_v14 = vshll.u32 %v21945_v41, 16  ;;  %v5167_v28 = vsel %vm16062_vm14, %v5162_v34, %v5166_v24  ;;  %v5223_v24 = vor.u32 %v5222_v9, %v5219_v59 }
 0x421   : > { %13891 = vmatprep.mubr.msk.bf16.mxu0 %vm641_vm5, %v14921_v51  ;;  %v18095_v51 = vld [vmem:[#allocation2 + $0xd0] sm:$0xf]  ;;  %v5243_v34 = vrot.slane %v5241_v57, 4  ;;  %v12762_v5 = vcombine.low %v5157_v46, %v5167_v28  ;;  %v21951_v9 = vmov 0   ;;  %v5200_v57 = vrot.slane %v5199_v30, 4 }
 0x422   : > { %v5969_v3 = vrot.slane %v18095_v51, 5  ;;  %v5176_v12 = vrot.slane %v5175_v33, 4  ;;  %v18123_v22 = vrot.slane %v5250_v14, 5  ;;  %v5256_v33 = vrot.slane %v5254_v47, 4  ;;  %487 = vst.msk [vmem:[#allocation4] sm:$0xf] %vm486_vm8, %v21951_v9 }
 0x423   : > { %488 = vst.msk [vmem:[#allocation4 + $0x4] sm:$0xf] %vm486_vm8, %v21951_v9  ;;  %492 = vst.msk [vmem:[#allocation4 + $0xcc] sm:$0xf] %vm486_vm8, %v21951_v9  ;;  %v5224_v41 = vrot.slane %v5223_v24, 4  ;;  %v5238_v14 = vrot.slane %v5236_v39, 5  ;;  %v5205_v39 = vsel %vm16062_vm14, %v5200_v57, %v18093_v60 }
 0x424   : > { %v5971_v35 = vrot.slane %v5969_v3, 4  ;;  %v18110_v23 = vsel %vm16900_vm7, %v12809_v0, %v5969_v3  ;;  %v5181_v59 = vsel %vm16062_vm14, %v5176_v12, %v18077_v53  ;;  %v5214_v3 = vrot.slane %v5212_v36, 5  ;;  %490 = vst.msk [vmem:[#allocation4 + $0x8] sm:$0x1] %vm489_vm9, %v21951_v9  ;;  %494 = vst.msk [vmem:[#allocation4 + $0xd4] sm:$0x1] %vm489_vm9, %v21951_v9 }
 0x425   : > { %493 = vst.msk [vmem:[#allocation4 + $0xd0] sm:$0xf] %vm486_vm8, %v21951_v9  ;;  %v5268_v53 = vshll.u32 %v5088_v50, 16  ;;  %v502_v0 = vsel %vm18135_vm10, 0, %v501_v15  ;;  %v5257_v28 = vor.u32 %v5256_v33, %v18123_v22  ;;  %v5267_v12 = vrot.slane %v5265_v13, 4  ;;  %vm19412_vm9 = vmand %vm486_vm8, %vm436_vm3 }
 0x426   : > { %503 = vst [vmem:[#allocation4 + $0x18] sm:$0x1] %v502_v0  ;;  %v5298_v36 = vshll.u32 %v21953_v27, 16  ;;  %v5302_v50 = vshrl.u32 %v21953_v27, 16  ;;  %v12763_v24 = vcombine.low %v5181_v59, %v5191_v4  ;;  %v5094_v33 = vld [vmem:[#allocation2 + $0x78] sm:$0xf]  ;;  %v5229_v61 = vsel %vm16062_vm14, %v5224_v41, %v18102_v44 }
 0x427   : > { %v5270_v15 = vrot.slane %v5268_v53, 5  ;;  %v21955_v4 = vld [vmem:[#allocation62_spill] sm:$0xff]  ;;  %v5316_v0 = vshll.u32 %v5094_v33, 16 }
 0x428   : > { %13892 = vmatmul.mubr.msk.bf16.gmra.mrb[24].mxu0 %vm641_vm5, %v14922_v18  ;;  %v18116_v18 = vsel %vm16900_vm7, %v5971_v35, %v5972_v1  ;;  %v21948_v1 = vmov 0  ;;  %v5284_v9 = vshll.u32 %v21955_v4, 16  ;;  %v5300_v53 = vrot.slane %v5298_v36, 5 }
 0x429   : > { %13895 = vmatprep.mubr.msk.bf16.mxu0 %vm641_vm5, %v14923_v10  ;;  %v12825_v45 = vcombine.low %v18110_v23, %v18116_v18  ;;  %v5233_v10 = vor.u32 %v5232_v7, %v18102_v44  ;;  %v21949_v1 = vsel %vm18135_vm10, 4294967295, %v21948_v1  ;;  %v5091_v7 = vld [vmem:[#allocation2 + $0x6c] sm:$0xf]  ;;  %v5322_v44 = vshll.u32 %v17705_v32, 16  ;;  %v525_v18 = vld [vmem:[#allocation4 + $0x78] sm:$0x1] }
 0x42a   : > { %21950 = vst [vmem:[#allocation33_spill] sm:$0xff] %v21949_v1  ;;  %v5289_v47 = vshrl.u32 %v5091_v7, 16  ;;  %v5292_v8 = vshll.u32 %v5091_v7, 16  ;;  %v5313_v7 = vshrl.u32 %v5094_v33, 16  ;;  %v523_v23 = vsel %vm18135_vm10, 0, %v522_v29 }
 0x42b   : > { %v5234_v35 = vrot.slane %v5233_v10, 4  ;;  %v5215_v10 = vsel %vm16062_vm14, %v5210_v2, %v5214_v3  ;;  %524 = vst [vmem:[#allocation4 + $0x6c] sm:$0x1] %v523_v23 }
 0x42c   : > { %v5291_v60 = vrot.slane %v5289_v47, 4  ;;  %v5294_v3 = vrot.slane %v5292_v8, 5  ;;  %v12764_v57 = vcombine.low %v5205_v39, %v5215_v10  ;;  %v5286_v47 = vrot.slane %v5284_v9, 5 }
 0x42d   : > { %v5239_v13 = vsel %vm16062_vm14, %v5234_v35, %v5238_v14  ;;  %v5326_v14 = vshrl.u32 %v17705_v32, 16  ;;  %v5097_v35 = vld [vmem:[#allocation2 + $0x84] sm:$0xf]  ;;  %v18185_v39 = vrot.slane %v5322_v44, 5 }
 0x42e   : > { %v12765_v2 = vcombine.low %v5229_v61, %v5239_v13  ;;  %v5295_v8 = vor.u32 %v5294_v3, %v5291_v60  ;;  %v5337_v32 = vshrl.u32 %v5097_v35, 16  ;;  %v21958_v3 = vld [vmem:[#allocation73_spill] sm:$0xff] }
 0x42f   : > { %v5328_v10 = vrot.slane %v5326_v14, 4 }
 0x430   : > { %13896 = vmatmul.mubr.msk.bf16.gmra.mrb[28].mxu0 %vm641_vm5, %v14924_v54  ;;  %v5247_v54 = vor.u32 %v5246_v20, %v5243_v34  ;;  %v21954_v34 = vld [vmem:[#allocation60_spill] sm:$0xff]  ;;  %v5296_v61 = vrot.slane %v5295_v8, 4  ;;  %v5339_v44 = vrot.slane %v5337_v32, 4 }
 0x431   : > { %13901 = vmatprep.mubr.msk.bf16.mxu0 %vm641_vm5, %v12761_v21  ;;  %v21952_v21 = vld [vmem:[#allocation58_spill] sm:$0xff]  ;;  %v5260_v20 = vshll.u32 %v21954_v34, 16 }
 0x432   : > { %v5274_v46 = vshll.u32 %v21952_v21, 16  ;;  %v5278_v62 = vshrl.u32 %v21952_v21, 16  ;;  %v5248_v59 = vrot.slane %v5247_v54, 4  ;;  %v5304_v21 = vrot.slane %v5302_v50, 4  ;;  %v21956_v50 = vld [vmem:[#allocation67_spill] sm:$0xff]  ;;  %v21957_v34 = vld [vmem:[#allocation70_spill] sm:$0xff] }
 0x433   : > { %v5262_v41 = vrot.slane %v5260_v20, 5  ;;  %v5346_v20 = vshll.u32 %v21957_v34, 16  ;;  %v5350_v33 = vshrl.u32 %v21957_v34, 16 }
 0x434   : > { %v18160_v30 = vrot.slane %v5274_v46, 5  ;;  %v5280_v16 = vrot.slane %v5278_v62, 4  ;;  %v5258_v46 = vrot.slane %v5257_v28, 4  ;;  %v5271_v62 = vor.u32 %v5270_v15, %v5267_v12  ;;  %v5100_v15 = vld [vmem:[#allocation2 + $0x90] sm:$0xf] }
 0x435   : > { %v5253_v54 = vsel %vm16062_vm14, %v5248_v59, %v18123_v22  ;;  %v5305_v28 = vor.u32 %v5304_v21, %v5300_v53  ;;  %v5340_v22 = vshll.u32 %v5097_v35, 16  ;;  %v5361_v59 = vshrl.u32 %v5100_v15, 16 }
 0x436   : > { %v5263_v12 = vsel %vm16062_vm14, %v5258_v46, %v5262_v41  ;;  %v5272_v27 = vrot.slane %v5271_v62, 4  ;;  %v5364_v4 = vshll.u32 %v5100_v15, 16  ;;  %v5370_v21 = vshll.u32 %v21958_v3, 16 }
 0x437   : > { %v5306_v13 = vrot.slane %v5305_v28, 4  ;;  %v5374_v46 = vshrl.u32 %v21958_v3, 16  ;;  %v18200_v41 = vrot.slane %v5346_v20, 5  ;;  %v5352_v14 = vrot.slane %v5350_v33, 4 }
 0x438   : > { %13902 = vmatmul.mubr.msk.bf16.vlgmr.msra.gmra.mrb[0].mxu0 %vm641_vm5, %v12762_v5  ;;  %v5281_v5 = vor.u32 %v5280_v16, %v18160_v30  ;;  %v5315_v16 = vrot.slane %v5313_v7, 4  ;;  %v5277_v9 = vsel %vm16062_vm14, %v5272_v27, %v18160_v30  ;;  %v21959_v7 = vld [vmem:[#allocation68_spill] sm:$0xff]  ;;  %v5301_v30 = vsel %vm16062_vm14, %v5296_v61, %v5300_v53 }
 0x439   : > { %13934 = vmatpush3.bf16.msra.mxu0 %v6071_v37  ;;  %13905 = vmatprep.mubr.msk.bf16.mxu0 %vm641_vm5, %v12763_v24  ;;  %v5308_v37 = vshll.u32 %v21956_v50, 16  ;;  %v5318_v24 = vrot.slane %v5316_v0, 5  ;;  %v5332_v0 = vshll.u32 %v21959_v7, 16  ;;  %v5366_v8 = vrot.slane %v5364_v4, 5  ;;  %v5103_v50 = vld [vmem:[#allocation2 + $0x9c] sm:$0xf] }
 0x43a   : > { %v5282_v36 = vrot.slane %v5281_v5, 4  ;;  %v12766_v28 = vcombine.low %v5253_v54, %v5263_v12  ;;  %v18206_v27 = vrot.slane %v5370_v21, 5  ;;  %v5353_v53 = vor.u32 %v5352_v14, %v18200_v41  ;;  %v21960_v12 = vld [vmem:[#allocation75_spill] sm:$0xff]  ;;  %v21961_v21 = vld [vmem:[#allocation80_spill] sm:$0xff] }
 0x43b   : > { %v5310_v62 = vrot.slane %v5308_v37, 5  ;;  %v5319_v5 = vor.u32 %v5318_v24, %v5315_v16  ;;  %v5334_v16 = vrot.slane %v5332_v0, 5  ;;  %v5106_v24 = vld [vmem:[#allocation2 + $0xa8] sm:$0xf]  ;;  %v5385_v20 = vshrl.u32 %v5103_v50, 16 }
 0x43c   : > { %v5287_v60 = vsel %vm16062_vm14, %v5282_v36, %v5286_v47  ;;  %v5363_v47 = vrot.slane %v5361_v59, 4  ;;  %v5376_v36 = vrot.slane %v5374_v46, 4  ;;  %v5388_v54 = vshll.u32 %v5103_v50, 16 }
 0x43d   : > { %v5311_v35 = vsel %vm16062_vm14, %v5306_v13, %v5310_v62  ;;  %v12767_v37 = vcombine.low %v5277_v9, %v5287_v60  ;;  %v5320_v15 = vrot.slane %v5319_v5, 4  ;;  %v5394_v33 = vshll.u32 %v21960_v12, 16  ;;  %v15229_v60 = vld [vmem:[#allocation2 + $0x8c] sm:$0x1] }
 0x43e   : > { %v12768_v32 = vcombine.low %v5301_v30, %v5311_v35  ;;  %v5367_v34 = vor.u32 %v5366_v8, %v5363_v47  ;;  %v5377_v61 = vor.u32 %v5376_v36, %v18206_v27  ;;  %v5398_v13 = vshrl.u32 %v21960_v12, 16  ;;  %v5112_v12 = vld [vmem:[#allocation2 + $0xc0] sm:$0xf] }
 0x43f   : > { %v5409_v59 = vshrl.u32 %v5106_v24, 16  ;;  %v5412_v4 = vshll.u32 %v5106_v24, 16  ;;  %v5325_v9 = vsel %vm16062_vm14, %v5320_v15, %v18185_v39  ;;  %v5356_v3 = vshll.u32 %v15229_v60, 16  ;;  %v5109_v24 = vld [vmem:[#allocation2 + $0xb4] sm:$0xf] }
 0x440   : > { %13906 = vmatmul.mubr.msk.bf16.gmra.mrb[4].mxu0 %vm641_vm5, %v12764_v57  ;;  %v5329_v57 = vor.u32 %v5328_v10, %v18185_v39  ;;  %v5418_v46 = vshll.u32 %v21961_v21, 16  ;;  %v5422_v62 = vshrl.u32 %v21961_v21, 16  ;;  %v5354_v0 = vrot.slane %v5353_v53, 4 }
 0x441   : > { %13909 = vmatprep.mubr.msk.bf16.mxu0 %vm641_vm5, %v12765_v2  ;;  %v5342_v2 = vrot.slane %v5340_v22, 5  ;;  %v5387_v14 = vrot.slane %v5385_v20, 4  ;;  %v5390_v30 = vrot.slane %v5388_v54, 5  ;;  %v18222_v35 = vrot.slane %v5394_v33, 5  ;;  %v15230_v20 = vld [vmem:[#allocation2 + $0xa4] sm:$0x1] }
 0x442   : > { %v5330_v10 = vrot.slane %v5329_v57, 4  ;;  %v5378_v47 = vrot.slane %v5377_v61, 4  ;;  %v5400_v39 = vrot.slane %v5398_v13, 4  ;;  %v5411_v8 = vrot.slane %v5409_v59, 4 }
 0x443   : > { %v5343_v22 = vor.u32 %v5342_v2, %v5339_v44  ;;  %v21962_v44 = vld [vmem:[#allocation76_spill] sm:$0xff]  ;;  %v5368_v2 = vrot.slane %v5367_v34, 4  ;;  %v5358_v50 = vrot.slane %v5356_v3, 5  ;;  %v5424_v15 = vrot.slane %v5422_v62, 4 }
 0x444   : > { %v5335_v5 = vsel %vm16062_vm14, %v5330_v10, %v5334_v16  ;;  %v5380_v57 = vshll.u32 %v21962_v44, 16  ;;  %v5391_v34 = vor.u32 %v5390_v30, %v5387_v14  ;;  %v5404_v54 = vshll.u32 %v15230_v20, 16 }
 0x445   : > { %v5344_v7 = vrot.slane %v5343_v22, 4  ;;  %v12769_v36 = vcombine.low %v5325_v9, %v5335_v5  ;;  %v5359_v22 = vsel %vm16062_vm14, %v5354_v0, %v5358_v50  ;;  %v5373_v53 = vsel %vm16062_vm14, %v5368_v2, %v18206_v27  ;;  %v15232_v2 = vld [vmem:[#allocation2 + $0xb0] sm:$0x1] }
 0x446   : > { %v5382_v10 = vrot.slane %v5380_v57, 5  ;;  %v5401_v33 = vor.u32 %v5400_v39, %v18222_v35  ;;  %v5433_v61 = vshrl.u32 %v5109_v24, 16  ;;  %v5436_v59 = vshll.u32 %v5109_v24, 16 }
 0x447   : > { %v5349_v16 = vsel %vm16062_vm14, %v5344_v7, %v18200_v41  ;;  %v5457_v3 = vshrl.u32 %v5112_v12, 16  ;;  %v5460_v21 = vshll.u32 %v5112_v12, 16  ;;  %v5466_v27 = vshll.u32 %v17807_v56, 16 }
 0x448   : > { %13910 = vmatmul.mubr.msk.bf16.gmra.mrb[8].mxu0 %vm641_vm5, %v12766_v28  ;;  %v5414_v28 = vrot.slane %v5412_v4, 5  ;;  %v15231_v4 = vld [vmem:[#allocation2 + $0xb8] sm:$0xf]  ;;  %v12770_v62 = vcombine.low %v5349_v16, %v5359_v22  ;;  %v5392_v7 = vrot.slane %v5391_v34, 4  ;;  %v5406_v0 = vrot.slane %v5404_v54, 5 }
 0x449   : > { %13913 = vmatprep.mubr.msk.bf16.mxu0 %vm641_vm5, %v12767_v37  ;;  %v18224_v37 = vrot.slane %v5418_v46, 5  ;;  %v5442_v9 = vshll.u32 %v15231_v4, 16  ;;  %v5446_v60 = vshrl.u32 %v15231_v4, 16  ;;  %v5470_v46 = vshrl.u32 %v17807_v56, 16 }
 0x44a   : > { %v5415_v41 = vor.u32 %v5414_v28, %v5411_v8  ;;  %v5402_v44 = vrot.slane %v5401_v33, 4  ;;  %v5428_v14 = vshll.u32 %v15232_v2, 16  ;;  %v5435_v30 = vrot.slane %v5433_v61, 4  ;;  %v15233_v61 = vld [vmem:[#allocation2 + $0xbc] sm:$0x1] }
 0x44b   : > { %v5425_v13 = vor.u32 %v5424_v15, %v18224_v37  ;;  %v5438_v8 = vrot.slane %v5436_v59, 5  ;;  %v5444_v28 = vrot.slane %v5442_v9, 5  ;;  %v5459_v50 = vrot.slane %v5457_v3, 4 }
 0x44c   : > { %v5416_v57 = vrot.slane %v5415_v41, 4  ;;  %v5462_v15 = vrot.slane %v5460_v21, 5  ;;  %v5468_v24 = vrot.slane %v5466_v27, 5  ;;  %v5472_v56 = vrot.slane %v5470_v46, 4  ;;  %v15234_v21 = vld [vmem:[#allocation2 + $0xc8] sm:$0x1] }
 0x44d   : > { %v5426_v39 = vrot.slane %v5425_v13, 4  ;;  %v5490_v22 = vshll.u32 %v18095_v51, 16  ;;  %v5397_v34 = vsel %vm16062_vm14, %v5392_v7, %v18222_v35  ;;  %v5430_v20 = vrot.slane %v5428_v14, 5 }
 0x44e   : > { %v5407_v54 = vsel %vm16062_vm14, %v5402_v44, %v5406_v0  ;;  %v5421_v12 = vsel %vm16062_vm14, %v5416_v57, %v18224_v37  ;;  %v5452_v13 = vshll.u32 %v15233_v61, 16  ;;  %v5473_v59 = vor.u32 %v5472_v56, %v5468_v24  ;;  %v21973_v61 = vld [vmem:[#allocation64_spill] sm:$0xff] }
 0x44f   : > { %v5431_v41 = vsel %vm16062_vm14, %v5426_v39, %v5430_v20  ;;  %v5492_v35 = vrot.slane %v5490_v22, 5  ;;  %v12772_v3 = vcombine.low %v5397_v34, %v5407_v54  ;;  %v5476_v27 = vshll.u32 %v15234_v21, 16  ;;  %v21964_v22 = vld [vmem:[#allocation52_spill] sm:$0xff]  ;;  %v21966_v34 = vld [vmem:[#allocation54_spill] sm:$0xff] }
 0x450   : > { %13914 = vmatmul.mubr.msk.bf16.gmra.mrb[12].mxu0 %vm641_vm5, %v12768_v32  ;;  %v5383_v32 = vsel %vm16062_vm14, %v5378_v47, %v5382_v10  ;;  %v5115_v47 = vld [vmem:[#allocation2 + $0xcc] sm:$0xf]  ;;  %v12773_v46 = vcombine.low %v5421_v12, %v5431_v41  ;;  %v5474_v7 = vrot.slane %v5473_v59, 4  ;;  %v5454_v0 = vrot.slane %v5452_v13, 5  ;;  %v21969_v12 = vld [vmem:[#allocation57_spill] sm:$0xff]  ;;  %v21976_v59 = vld [vmem:[#allocation66_spill] sm:$0xff] }
 0x451   : > { %13917 = vmatprep.mubr.msk.bf16.mxu0 %vm641_vm5, %v12769_v36  ;;  %v12771_v5 = vcombine.low %v5373_v53, %v5383_v32  ;;  %v5448_v36 = vrot.slane %v5446_v60, 4  ;;  %v5481_v16 = vshrl.u32 %v5115_v47, 16  ;;  %v5484_v10 = vshll.u32 %v5115_v47, 16  ;;  %v21967_v20 = vld [vmem:[#allocation56_spill] sm:$0xff]  ;;  %v21972_v41 = vld [vmem:[#allocation61_spill] sm:$0xff]  ;;  %v21982_v21 = vld [vmem:[#allocation74_spill] sm:$0xff] }
 0x452   : > { %v5494_v53 = vshrl.u32 %v18095_v51, 16  ;;  %v5439_v32 = vor.u32 %v5438_v8, %v5435_v30  ;;  %v5463_v51 = vor.u32 %v5462_v15, %v5459_v50  ;;  %v5500_v2 = vshll.u32 %v18097_v48, 16 }
 0x453   : > { %v5449_v33 = vor.u32 %v5448_v36, %v5444_v28  ;;  %v5483_v4 = vrot.slane %v5481_v16, 4  ;;  %v5486_v9 = vrot.slane %v5484_v10, 5  ;;  %v5478_v14 = vrot.slane %v5476_v27, 5 }
 0x454   : > { %v5496_v60 = vrot.slane %v5494_v53, 4  ;;  %v5464_v37 = vrot.slane %v5463_v51, 4  ;;  %v5502_v15 = vrot.slane %v5500_v2, 5  ;;  %v21968_v54 = vcombine.low %v21966_v34, %v21967_v20  ;;  %v21975_v51 = vld [vmem:[#allocation65_spill] sm:$0xff]  ;;  %v574_v20 = vld [vmem:[#allocation4 + $0x80] sm:$0x1] }
 0x455   : > { %v5487_v44 = vor.u32 %v5486_v9, %v5483_v4  ;;  %v5479_v8 = vsel %vm16062_vm14, %v5474_v7, %v5478_v14  ;;  %v21974_v13 = vcombine.low %v21972_v41, %v21973_v61  ;;  %v21977_v4 = vcombine.low %v21975_v51, %v21976_v59  ;;  %v21978_v9 = vld [vmem:[#allocation69_spill] sm:$0xff]  ;;  %v528_v14 = vld [vmem:[#allocation4 + $0x84] sm:$0x1]  ;;  %v586_v51 = vld [vmem:[#allocation4 + $0xb0] sm:$0x1] }
 0x456   : > { %v5497_v57 = vor.u32 %v5496_v60, %v5492_v35  ;;  %v5469_v39 = vsel %vm16062_vm14, %v5464_v37, %v5468_v24  ;;  %v21963_v24 = vld [vmem:[#allocation51_spill] sm:$0xff]  ;;  %v21988_v7 = vld [vmem:[#allocation81_spill] sm:$0xff]  ;;  %v583_v41 = vld [vmem:[#allocation4 + $0xa4] sm:$0x1] }
 0x457   : > { %v5488_v36 = vrot.slane %v5487_v44, 4  ;;  %v12775_v16 = vcombine.low %v5469_v39, %v5479_v8  ;;  %v21965_v53 = vcombine.low %v21963_v24, %v21964_v22  ;;  %v21987_v37 = vld [vmem:[#allocation79_spill] sm:$0xff]  ;;  %v21990_v44 = vld [vmem:[#allocation82_spill] sm:$0xff]  ;;  %v534_v8 = vld [vmem:[#allocation4 + $0x9c] sm:$0x1] }
 0x458   : > { %13918 = vmatmul.mubr.msk.bf16.gmra.mrb[16].mxu0 %vm641_vm5, %v12770_v62  ;;  %v5440_v62 = vrot.slane %v5439_v32, 4  ;;  %v5498_v50 = vrot.slane %v5497_v57, 4  ;;  %v21970_v32 = vld [vmem:[#allocation59_spill] sm:$0xff]  ;;  %v565_v24 = vld [vmem:[#allocation4 + $0x5c] sm:$0x1] }
 0x459   : > { %13921 = vmatprep.mubr.msk.bf16.mxu0 %vm641_vm5, %v12771_v5  ;;  %v5450_v5 = vrot.slane %v5449_v33, 4  ;;  %v5493_v48 = vsel %vm16062_vm14, %v5488_v36, %v5492_v35  ;;  %v21971_v33 = vcombine.low %v21969_v12, %v21970_v32  ;;  %v21979_v35 = vld [vmem:[#allocation71_spill] sm:$0xff]  ;;  %v571_v22 = vld [vmem:[#allocation4 + $0x74] sm:$0x1]  ;;  %v575_v12 = vsel %vm18362_vm1, 0, %v574_v20 }
 0x45a   : > { %v5445_v30 = vsel %vm16062_vm14, %v5440_v62, %v5444_v28  ;;  %v5503_v28 = vsel %vm16062_vm14, %v5498_v50, %v5502_v15  ;;  %v21980_v60 = vcombine.low %v21978_v9, %v21979_v35  ;;  %v21985_v62 = vld [vmem:[#allocation78_spill] sm:$0xff]  ;;  %v21991_v57 = vld [vmem:[#allocation83_spill] sm:$0xff]  ;;  %v535_v15 = vsel %vm18135_vm10, 0, %v534_v8  ;;  %576 = vst [vmem:[#allocation4 + $0x80] sm:$0x1] %v575_v12 }
 0x45b   : > { %v5455_v47 = vsel %vm16062_vm14, %v5450_v5, %v5454_v0  ;;  %v12776_v10 = vcombine.low %v5493_v48, %v5503_v28  ;;  %v21989_v0 = vcombine.low %v21987_v37, %v21988_v7  ;;  %v21992_v2 = vcombine.low %v21990_v44, %v21991_v57  ;;  %v537_v36 = vld [vmem:[#allocation4 + $0xa8] sm:$0x1]  ;;  %v543_v48 = vld [vmem:[#allocation4 + $0xc0] sm:$0x1]  ;;  %536 = vst [vmem:[#allocation4 + $0x9c] sm:$0x1] %v535_v15 }
 0x45c   : > { %v12774_v56 = vcombine.low %v5445_v30, %v5455_v47  ;;  %v531_v30 = vld [vmem:[#allocation4 + $0x90] sm:$0x1]  ;;  %v529_v47 = vsel %vm18135_vm10, 0, %v528_v14  ;;  %v572_v34 = vsel %vm18362_vm1, 0, %v571_v22  ;;  %v589_v59 = vld [vmem:[#allocation4 + $0xbc] sm:$0x1] }
 0x45d   : > { %v532_v39 = vsel %vm18135_vm10, 0, %v531_v30  ;;  %530 = vst [vmem:[#allocation4 + $0x84] sm:$0x1] %v529_v47  ;;  %573 = vst [vmem:[#allocation4 + $0x74] sm:$0x1] %v572_v34  ;;  %v590_v9 = vsel %vm18362_vm1, 0, %v589_v59 }
 0x45e   : > { %533 = vst [vmem:[#allocation4 + $0x90] sm:$0x1] %v532_v39  ;;  %v592_v35 = vld [vmem:[#allocation4 + $0xc8] sm:$0x1]  ;;  %591 = vst [vmem:[#allocation4 + $0xbc] sm:$0x1] %v590_v9 }
 0x460   : > { %13922 = vmatmul.mubr.msk.bf16.gmra.mrb[20].mxu0 %vm641_vm5, %v12772_v3  ;;  %v21981_v3 = vld [vmem:[#allocation72_spill] sm:$0xff] }
 0x461   : > { %13925 = vmatprep.mubr.msk.bf16.mxu0 %vm641_vm5, %v12773_v46  ;;  %v21983_v27 = vcombine.low %v21981_v3, %v21982_v21  ;;  %v21984_v46 = vld [vmem:[#allocation77_spill] sm:$0xff]  ;;  %v18396_v3 = vld [vmem:[%s368_s29] ss:$0 sm:$0xff] }
 0x462   : > { %v21986_v5 = vcombine.low %v21984_v46, %v21985_v62 }
 0x468   : > { %13926 = vmatmul.mubr.msk.bf16.gmra.mrb[24].mxu0 %vm641_vm5, %v12774_v56  ;;  %v538_v56 = vsel %vm18135_vm10, 0, %v537_v36 }
 0x469   : > { %13929 = vmatprep.mubr.msk.bf16.mxu0 %vm641_vm5, %v12775_v16  ;;  %v540_v16 = vld [vmem:[#allocation4 + $0xb4] sm:$0x1]  ;;  %539 = vst [vmem:[#allocation4 + $0xa8] sm:$0x1] %v538_v56 }
 0x46a   : > { %v541_v28 = vsel %vm18135_vm10, 0, %v540_v16 }
 0x46b   : > { %542 = vst [vmem:[#allocation4 + $0xb4] sm:$0x1] %v541_v28 }
 0x470   : > { %13930 = vmatmul.mubr.msk.bf16.gmra.mrb[28].mxu0 %vm641_vm5, %v12776_v10  ;;  %v544_v10 = vsel %vm18135_vm10, 0, %v543_v48 }
 0x471   : > { %13935 = vmatprep.mubr.msk.bf16.mxu0 %vm641_vm5, %v21965_v53  ;;  %545 = vst [vmem:[#allocation4 + $0xc0] sm:$0x1] %v544_v10  ;;  %v566_v53 = vsel %vm18362_vm1, 0, %v565_v24 }
 0x472   : > { %567 = vst [vmem:[#allocation4 + $0x5c] sm:$0x1] %v566_v53 }
 0x478   : > { %13936 = vmatmul.mubr.msk.bf16.vlgmr.msra.gmra.mrb[0].mxu0 %vm641_vm5, %v21968_v54  ;;  %v577_v54 = vld [vmem:[#allocation4 + $0x8c] sm:$0x1] }
 0x479   : > { %13939 = vmatprep.mubr.msk.bf16.mxu0 %vm641_vm5, %v21971_v33  ;;  %v578_v32 = vsel %vm18362_vm1, 0, %v577_v54  ;;  %v580_v33 = vld [vmem:[#allocation4 + $0x98] sm:$0x1] }
 0x47a   : > { %579 = vst [vmem:[#allocation4 + $0x8c] sm:$0x1] %v578_v32  ;;  %v581_v61 = vsel %vm18362_vm1, 0, %v580_v33 }
 0x47b   : > { %582 = vst [vmem:[#allocation4 + $0x98] sm:$0x1] %v581_v61 }
 0x480   : > { %13940 = vmatmul.mubr.msk.bf16.gmra.mrb[4].mxu0 %vm641_vm5, %v21974_v13  ;;  %v584_v13 = vsel %vm18362_vm1, 0, %v583_v41 }
 0x481   : > { %13943 = vmatprep.mubr.msk.bf16.mxu0 %vm641_vm5, %v21977_v4  ;;  %585 = vst [vmem:[#allocation4 + $0xa4] sm:$0x1] %v584_v13  ;;  %v587_v4 = vsel %vm18362_vm1, 0, %v586_v51 }
 0x482   : > { %588 = vst [vmem:[#allocation4 + $0xb0] sm:$0x1] %v587_v4 }
 0x488   : > { %13944 = vmatmul.mubr.msk.bf16.gmra.mrb[8].mxu0 %vm641_vm5, %v21980_v60  ;;  %v593_v60 = vsel %vm18362_vm1, 0, %v592_v35 }
 0x489   : > { %13947 = vmatprep.mubr.msk.bf16.mxu0 %vm641_vm5, %v21983_v27  ;;  %594 = vst [vmem:[#allocation4 + $0xc8] sm:$0x1] %v593_v60 }
 0x490   : > { %13948 = vmatmul.mubr.msk.bf16.gmra.mrb[12].mxu0 %vm641_vm5, %v21986_v5 }
 0x491   : > { %13951 = vmatprep.mubr.msk.bf16.mxu0 %vm641_vm5, %v21989_v0 }
 0x498   : > { %13952 = vmatmul.mubr.msk.bf16.gmra.mrb[16].mxu0 %vm641_vm5, %v21992_v2 }
 0x499   : > { %13955 = vmatprep.mubr.msk.bf16.mxu0 %vm641_vm5, %v12820_v17  ;;  %v507_v17 = vld [vmem:[#allocation4 + $0x30] sm:$0x1] }
 0x49a   : > { %v508_v63 = vsel %vm18135_vm10, 0, %v507_v17 }
 0x49b   : > { %509 = vst [vmem:[#allocation4 + $0x30] sm:$0x1] %v508_v63 }
 0x4a0   : > { %13956 = vmatmul.mubr.msk.bf16.gmra.mrb[20].mxu0 %vm641_vm5, %v12821_v19  ;;  %v513_v19 = vld [vmem:[#allocation4 + $0x48] sm:$0x1] }
 0x4a1   : > { %13959 = vmatprep.mubr.msk.bf16.mxu0 %vm641_vm5, %v12822_v52  ;;  %v514_v11 = vsel %vm18135_vm10, 0, %v513_v19  ;;  %v510_v52 = vld [vmem:[#allocation4 + $0x3c] sm:$0x1] }
 0x4a2   : > { %515 = vst [vmem:[#allocation4 + $0x48] sm:$0x1] %v514_v11  ;;  %v511_v49 = vsel %vm18135_vm10, 0, %v510_v52 }
 0x4a3   : > { %512 = vst [vmem:[#allocation4 + $0x3c] sm:$0x1] %v511_v49 }
 0x4a8   : > { %13960 = vmatmul.mubr.msk.bf16.gmra.mrb[24].mxu0 %vm641_vm5, %v12823_v6  ;;  %v519_v6 = vld [vmem:[#allocation4 + $0x60] sm:$0x1] }
 0x4a9   : > { %13963 = vmatprep.mubr.msk.bf16.mxu0 %vm641_vm5, %v12824_v38  ;;  %v520_v38 = vsel %vm18135_vm10, 0, %v519_v6 }
 0x4aa   : > { %521 = vst [vmem:[#allocation4 + $0x60] sm:$0x1] %v520_v38 }
 0x4b0   : > { %13964 = vmatmul.mubr.msk.bf16.gmra.mrb[28].mxu0 %vm641_vm5, %v12825_v45  ;;  %v526_v45 = vsel %vm18135_vm10, 0, %v525_v18 }
 0x4b1   : > { %527 = vst [vmem:[#allocation4 + $0x78] sm:$0x1] %v526_v45 }
 0x54b   : > { %v13937_v21 = vpop.f32.mrb[0].mxu0 }
 0x54c   : > { %v6275_v27 = vadd.f32 %v13937_v21, %v18396_v3  ;;  %v6107_v46 = vpop.f32.mrb[1].mxu0 }
 0x54d   : > { %v6273_v62 = vadd.f32 %v18396_v3, %v6107_v46  ;;  %v13938_v5 = vpop.f32.mrb[2].mxu0 }
 0x54e   : > { %6308 = vst.msk [vmem:[#allocation3 + $0x10] sm:$0xff] %vm6305_vm12, %v6275_v27  ;;  %v6276_v37 = vadd.f32 %v13938_v5, %v18396_v3  ;;  %v6110_v7 = vpop.f32.mrb[3].mxu0 }
 0x54f   : > { %6306 = vst.msk [vmem:[#allocation3] sm:$0xff] %vm6305_vm12, %v6273_v62  ;;  %v6274_v0 = vadd.f32 %v18396_v3, %v6110_v7 }
 0x550   : > { %6309 = vst.msk [vmem:[#allocation3 + $0x18] sm:$0xff] %vm6305_vm12, %v6276_v37 }
 0x551   : > { %6307 = vst.msk [vmem:[#allocation3 + $0x8] sm:$0xff] %vm6305_vm12, %v6274_v0 }
 0x553   : > { %v13941_v44 = vpop.f32.mrb[4].mxu0 }
 0x554   : > { %v6279_v57 = vadd.f32 %v13941_v44, %v18396_v3  ;;  %v6123_v2 = vpop.f32.mrb[5].mxu0 }
 0x555   : > { %v6277_v31 = vadd.f32 %v18396_v3, %v6123_v2  ;;  %v13942_v42 = vpop.f32.mrb[6].mxu0  ;;  %v18422_v38 = vld [vmem:[#allocation3 + $0x10] sm:$0xff] }
 0x556   : > { %6312 = vst.msk [vmem:[#allocation3 + $0x30] sm:$0xff] %vm6305_vm12, %v6279_v57  ;;  %v6280_v17 = vadd.f32 %v13942_v42, %v18396_v3  ;;  %v6126_v63 = vpop.f32.mrb[7].mxu0  ;;  %v18424_v23 = vld [vmem:[#allocation3] sm:$0xff]  ;;  %v6380_v56 = vsel %vm6305_vm12, %v18422_v38, 0.0 }
 0x557   : > { %6310 = vst.msk [vmem:[#allocation3 + $0x20] sm:$0xff] %vm6305_vm12, %v6277_v31  ;;  %v6278_v40 = vadd.f32 %v18396_v3, %v6126_v63  ;;  %v18428_v47 = vld [vmem:[#allocation3 + $0x18] sm:$0xff]  ;;  %v6379_v16 = vsel %vm6305_vm12, %v18424_v23, 0.0 }
 0x558   : > { %6313 = vst.msk [vmem:[#allocation3 + $0x38] sm:$0xff] %vm6305_vm12, %v6280_v17  ;;  %v18430_v39 = vld [vmem:[#allocation3 + $0x8] sm:$0xff]  ;;  %v6411_v10 = vsel %vm6305_vm12, %v18428_v47, 0.0  ;;  %v6381_v53 = vadd.f32 %v6380_v56, %v6379_v16 }
 0x559   : > { %6311 = vst.msk [vmem:[#allocation3 + $0x28] sm:$0xff] %vm6305_vm12, %v6278_v40  ;;  %v6410_v24 = vsel %vm6305_vm12, %v18430_v39, 0.0 }
 0x55a   : > { %v6412_v54 = vadd.f32 %v6411_v10, %v6410_v24 }
 0x55b   : > { %v13945_v25 = vpop.f32.mrb[8].mxu0 }
 0x55c   : > { %v6283_v19 = vadd.f32 %v13945_v25, %v18396_v3  ;;  %v6139_v11 = vpop.f32.mrb[9].mxu0 }
 0x55d   : > { %v6281_v52 = vadd.f32 %v18396_v3, %v6139_v11  ;;  %v13946_v49 = vpop.f32.mrb[10].mxu0  ;;  %v18454_v12 = vld [vmem:[#allocation3 + $0x30] sm:$0xff] }
 0x55e   : > { %6316 = vst.msk [vmem:[#allocation3 + $0x50] sm:$0xff] %vm6305_vm12, %v6283_v19  ;;  %v6284_v26 = vadd.f32 %v13946_v49, %v18396_v3  ;;  %v6142_v6 = vpop.f32.mrb[11].mxu0  ;;  %v18432_v8 = vld [vmem:[#allocation3 + $0x20] sm:$0xff]  ;;  %v6384_v21 = vsel %vm6305_vm12, %v18454_v12, 0.0 }
 0x55f   : > { %6314 = vst.msk [vmem:[#allocation3 + $0x40] sm:$0xff] %vm6305_vm12, %v6281_v52  ;;  %v6282_v29 = vadd.f32 %v18396_v3, %v6142_v6  ;;  %v6382_v22 = vsel %vm6305_vm12, %v18432_v8, 0.0  ;;  %v18460_v59 = vld [vmem:[#allocation3 + $0x38] sm:$0xff] }
 0x560   : > { %6317 = vst.msk [vmem:[#allocation3 + $0x58] sm:$0xff] %vm6305_vm12, %v6284_v26  ;;  %v18442_v28 = vld [vmem:[#allocation3 + $0x28] sm:$0xff]  ;;  %v6383_v32 = vadd.f32 %v6382_v22, %v6381_v53  ;;  %v6415_v5 = vsel %vm6305_vm12, %v18460_v59, 0.0 }
 0x561   : > { %6315 = vst.msk [vmem:[#allocation3 + $0x48] sm:$0xff] %vm6305_vm12, %v6282_v29  ;;  %v6413_v34 = vsel %vm6305_vm12, %v18442_v28, 0.0 }
 0x562   : > { %v6414_v4 = vadd.f32 %v6413_v34, %v6412_v54  ;;  %v6385_v62 = vadd.f32 %v6384_v21, %v6383_v32 }
 0x563   : > { %v13949_v55 = vpop.f32.mrb[12].mxu0 }
 0x564   : > { %v6287_v18 = vadd.f32 %v13949_v55, %v18396_v3  ;;  %v6155_v45 = vpop.f32.mrb[13].mxu0  ;;  %v6416_v57 = vadd.f32 %v6415_v5, %v6414_v4 }
 0x565   : > { %v6285_v14 = vadd.f32 %v18396_v3, %v6155_v45  ;;  %v13950_v30 = vpop.f32.mrb[14].mxu0  ;;  %v18478_v7 = vld [vmem:[#allocation3 + $0x50] sm:$0xff] }
 0x566   : > { %6320 = vst.msk [vmem:[#allocation3 + $0x70] sm:$0xff] %vm6305_vm12, %v6287_v18  ;;  %v6288_v36 = vadd.f32 %v13950_v30, %v18396_v3  ;;  %v6158_v15 = vpop.f32.mrb[15].mxu0  ;;  %v18456_v33 = vld [vmem:[#allocation3 + $0x40] sm:$0xff]  ;;  %v6388_v11 = vsel %vm6305_vm12, %v18478_v7, 0.0 }
 0x567   : > { %6318 = vst.msk [vmem:[#allocation3 + $0x60] sm:$0xff] %vm6305_vm12, %v6285_v14  ;;  %v6286_v48 = vadd.f32 %v18396_v3, %v6158_v15  ;;  %v6386_v27 = vsel %vm6305_vm12, %v18456_v33, 0.0  ;;  %v18482_v31 = vld [vmem:[#allocation3 + $0x58] sm:$0xff] }
 0x568   : > { %6321 = vst.msk [vmem:[#allocation3 + $0x78] sm:$0xff] %vm6305_vm12, %v6288_v36  ;;  %v18462_v9 = vld [vmem:[#allocation3 + $0x48] sm:$0xff]  ;;  %v6387_v44 = vadd.f32 %v6386_v27, %v6385_v62  ;;  %v6419_v55 = vsel %vm6305_vm12, %v18482_v31, 0.0 }
 0x569   : > { %6319 = vst.msk [vmem:[#allocation3 + $0x68] sm:$0xff] %vm6305_vm12, %v6286_v48  ;;  %v6417_v37 = vsel %vm6305_vm12, %v18462_v9, 0.0 }
 0x56a   : > { %v6418_v40 = vadd.f32 %v6417_v37, %v6416_v57  ;;  %v6389_v6 = vadd.f32 %v6388_v11, %v6387_v44 }
 0x56b   : > { %v13953_v20 = vpop.f32.mrb[16].mxu0 }
 0x56c   : > { %v6291_v41 = vadd.f32 %v13953_v20, %v18396_v3  ;;  %v6171_v61 = vpop.f32.mrb[17].mxu0  ;;  %v6420_v36 = vadd.f32 %v6419_v55, %v6418_v40 }
 0x56d   : > { %v6289_v13 = vadd.f32 %v18396_v3, %v6171_v61  ;;  %v13954_v51 = vpop.f32.mrb[18].mxu0  ;;  %v18501_v45 = vld [vmem:[#allocation3 + $0x70] sm:$0xff] }
 0x56e   : > { %6324 = vst.msk [vmem:[#allocation3 + $0x90] sm:$0xff] %vm6305_vm12, %v6291_v41  ;;  %v6292_v35 = vadd.f32 %v13954_v51, %v18396_v3  ;;  %v6174_v60 = vpop.f32.mrb[19].mxu0  ;;  %v18480_v0 = vld [vmem:[#allocation3 + $0x60] sm:$0xff]  ;;  %v6392_v10 = vsel %vm6305_vm12, %v18501_v45, 0.0 }
 0x56f   : > { %6322 = vst.msk [vmem:[#allocation3 + $0x80] sm:$0xff] %vm6305_vm12, %v6289_v13  ;;  %v6290_v46 = vadd.f32 %v18396_v3, %v6174_v60  ;;  %v6390_v52 = vsel %vm6305_vm12, %v18480_v0, 0.0  ;;  %v18506_v15 = vld [vmem:[#allocation3 + $0x78] sm:$0xff] }
 0x570   : > { %6325 = vst.msk [vmem:[#allocation3 + $0x98] sm:$0xff] %vm6305_vm12, %v6292_v35  ;;  %v18485_v63 = vld [vmem:[#allocation3 + $0x68] sm:$0xff]  ;;  %v6391_v30 = vadd.f32 %v6390_v52, %v6389_v6  ;;  %v6423_v32 = vsel %vm6305_vm12, %v18506_v15, 0.0 }
 0x571   : > { %6323 = vst.msk [vmem:[#allocation3 + $0x88] sm:$0xff] %vm6305_vm12, %v6290_v46  ;;  %v6421_v18 = vsel %vm6305_vm12, %v18485_v63, 0.0 }
 0x572   : > { %v6422_v16 = vadd.f32 %v6421_v18, %v6420_v36  ;;  %v6393_v34 = vadd.f32 %v6392_v10, %v6391_v30 }
 0x573   : > { %v13957_v2 = vpop.f32.mrb[20].mxu0 }
 0x574   : > { %v6295_v42 = vadd.f32 %v13957_v2, %v18396_v3  ;;  %v6187_v17 = vpop.f32.mrb[21].mxu0  ;;  %v6424_v60 = vadd.f32 %v6423_v32, %v6422_v16 }
 0x575   : > { %v6293_v25 = vadd.f32 %v18396_v3, %v6187_v17  ;;  %v13958_v19 = vpop.f32.mrb[22].mxu0  ;;  %v18522_v51 = vld [vmem:[#allocation3 + $0x90] sm:$0xff] }
 0x576   : > { %6328 = vst.msk [vmem:[#allocation3 + $0xb0] sm:$0xff] %vm6305_vm12, %v6295_v42  ;;  %v6296_v49 = vadd.f32 %v13958_v19, %v18396_v3  ;;  %v6190_v26 = vpop.f32.mrb[23].mxu0  ;;  %v18503_v14 = vld [vmem:[#allocation3 + $0x80] sm:$0xff]  ;;  %v6396_v5 = vsel %vm6305_vm12, %v18522_v51, 0.0 }
 0x577   : > { %6326 = vst.msk [vmem:[#allocation3 + $0xa0] sm:$0xff] %vm6305_vm12, %v6293_v25  ;;  %v6294_v29 = vadd.f32 %v18396_v3, %v6190_v26  ;;  %v6394_v24 = vsel %vm6305_vm12, %v18503_v14, 0.0  ;;  %v18529_v27 = vld [vmem:[#allocation3 + $0x98] sm:$0xff] }
 0x578   : > { %6329 = vst.msk [vmem:[#allocation3 + $0xb8] sm:$0xff] %vm6305_vm12, %v6296_v49  ;;  %v18508_v56 = vld [vmem:[#allocation3 + $0x88] sm:$0xff]  ;;  %v6395_v35 = vadd.f32 %v6394_v24, %v6393_v34  ;;  %v6427_v2 = vsel %vm6305_vm12, %v18529_v27, 0.0 }
 0x579   : > { %6327 = vst.msk [vmem:[#allocation3 + $0xa8] sm:$0xff] %vm6305_vm12, %v6294_v29  ;;  %v6425_v41 = vsel %vm6305_vm12, %v18508_v56, 0.0 }
 0x57a   : > { %v6426_v62 = vadd.f32 %v6425_v41, %v6424_v60  ;;  %v6397_v44 = vadd.f32 %v6396_v5, %v6395_v35 }
 0x57b   : > { %v13961_v48 = vpop.f32.mrb[24].mxu0 }
 0x57c   : > { %v6299_v22 = vadd.f32 %v13961_v48, %v18396_v3  ;;  %v6203_v53 = vpop.f32.mrb[25].mxu0  ;;  %v6428_v11 = vadd.f32 %v6427_v2, %v6426_v62 }
 0x57d   : > { %v6297_v20 = vadd.f32 %v18396_v3, %v6203_v53  ;;  %v13962_v54 = vpop.f32.mrb[26].mxu0  ;;  %v18543_v25 = vld [vmem:[#allocation3 + $0xb0] sm:$0xff] }
 0x57e   : > { %6332 = vst.msk [vmem:[#allocation3 + $0xd0] sm:$0xff] %vm6305_vm12, %v6299_v22  ;;  %v6300_v61 = vadd.f32 %v13962_v54, %v18396_v3  ;;  %v6206_v13 = vpop.f32.mrb[27].mxu0  ;;  %v18524_v4 = vld [vmem:[#allocation3 + $0xa0] sm:$0xff]  ;;  %v6400_v36 = vsel %vm6305_vm12, %v18543_v25, 0.0 }
 0x57f   : > { %6330 = vst.msk [vmem:[#allocation3 + $0xc0] sm:$0xff] %vm6305_vm12, %v6297_v20  ;;  %v6298_v21 = vadd.f32 %v18396_v3, %v6206_v13  ;;  %v6398_v37 = vsel %vm6305_vm12, %v18524_v4, 0.0  ;;  %v18548_v29 = vld [vmem:[#allocation3 + $0xb8] sm:$0xff] }
 0x580   : > { %6333 = vst.msk [vmem:[#allocation3 + $0xd8] sm:$0xff] %vm6305_vm12, %v6300_v61  ;;  %v18531_v46 = vld [vmem:[#allocation3 + $0xa8] sm:$0xff]  ;;  %v6399_v19 = vadd.f32 %v6398_v37, %v6397_v44  ;;  %v6431_v24 = vsel %vm6305_vm12, %v18548_v29, 0.0 }
 0x581   : > { %6331 = vst.msk [vmem:[#allocation3 + $0xc8] sm:$0xff] %vm6305_vm12, %v6298_v21  ;;  %v6429_v42 = vsel %vm6305_vm12, %v18531_v46, 0.0 }
 0x582   : > { %v6430_v18 = vadd.f32 %v6429_v42, %v6428_v11  ;;  %v6401_v10 = vadd.f32 %v6400_v36, %v6399_v19 }
 0x583   : > { %v13965_v57 = vpop.f32.mrb[28].mxu0 }
 0x584   : > { %v6303_v17 = vadd.f32 %v13965_v57, %v18396_v3  ;;  %v6219_v40 = vpop.f32.mrb[29].mxu0  ;;  %v6432_v34 = vadd.f32 %v6431_v24, %v6430_v18 }
 0x585   : > { %v6301_v52 = vadd.f32 %v18396_v3, %v6219_v40  ;;  %v13966_v49 = vpop.f32.mrb[30].mxu0 }
 0x586   : > { %6336 = vst.msk [vmem:[#allocation3 + $0xf0] sm:$0xff] %vm6305_vm12, %v6303_v17  ;;  %v6304_v26 = vadd.f32 %v13966_v49, %v18396_v3  ;;  %v6222_v6 = vpop.f32.mrb[31].mxu0  ;;  %v18550_v55 = vld [vmem:[#allocation3 + $0xc0] sm:$0xff] }
 0x587   : > { %6334 = vst.msk [vmem:[#allocation3 + $0xe0] sm:$0xff] %vm6305_vm12, %v6301_v52  ;;  %v6302_v30 = vadd.f32 %v18396_v3, %v6222_v6  ;;  %v6402_v16 = vsel %vm6305_vm12, %v18550_v55, 0.0  ;;  %v18566_v3 = vld [vmem:[#allocation3 + $0xd0] sm:$0xff]  ;;  %v18568_v20 = vld [vmem:[#allocation3 + $0xd8] sm:$0xff]  ;;  %v21995_v49 = vld [vmem:[#allocation6_spill] sm:$0xff] }
 0x588   : > { %6337 = vst.msk [vmem:[#allocation3 + $0xf8] sm:$0xff] %vm6305_vm12, %v6304_v26  ;;  %v18559_v48 = vld [vmem:[#allocation3 + $0xc8] sm:$0xff]  ;;  %v6403_v53 = vadd.f32 %v6402_v16, %v6401_v10  ;;  %v6404_v32 = vsel %vm6305_vm12, %v18566_v3, 0.0  ;;  %v6435_v60 = vsel %vm6305_vm12, %v18568_v20, 0.0  ;;  %v6372_v26 = vmul.u32 4, %v21995_v49  ;;  %v21997_v16 = vld [vmem:[#allocation8_spill] sm:$0xff] }
 0x589   : > { %6335 = vst.msk [vmem:[#allocation3 + $0xe8] sm:$0xff] %vm6305_vm12, %v6302_v30  ;;  %v6433_v22 = vsel %vm6305_vm12, %v18559_v48, 0.0  ;;  %v21996_v6 = vld [vmem:[#allocation7_spill] sm:$0xff] }
 0x58a   : > { %v6434_v54 = vadd.f32 %v6433_v22, %v6432_v34  ;;  %v6405_v13 = vadd.f32 %v6404_v32, %v6403_v53  ;;  %v6374_v18 = vmul.u32 4, %v21996_v6  ;;  %vm6373_vm13 = vcmp.ge.s32.totalorder %v21997_v16, %v6372_v26 }
 0x58b   : > { %v21998_v53 = vmov 0.0  }
 0x58c   : > { %v6436_v37 = vadd.f32 %v6435_v60, %v6434_v54  ;;  %vm6375_vm15 = vcmp.lt.s32.totalorder %v21997_v16, %v6374_v18 }
 0x58d   : > { %v18574_v61 = vld [vmem:[#allocation3 + $0xf0] sm:$0xff]  ;;  %vm6376_vm4 = vmand %vm6373_vm13, %vm6375_vm15 }
 0x58e   : > { %v18572_v41 = vld [vmem:[#allocation3 + $0xe0] sm:$0xff]  ;;  %v6408_v44 = vsel %vm6305_vm12, %v18574_v61, 0.0  ;;  %v18597_v34 = vsel %vm6376_vm4, 1.0, %v21998_v53 }
 0x58f   : > { %v6406_v35 = vsel %vm6305_vm12, %v18572_v41, 0.0  ;;  %v18582_v62 = vld [vmem:[#allocation3 + $0xf8] sm:$0xff] }
 0x590   : > { %v18580_v21 = vld [vmem:[#allocation3 + $0xe8] sm:$0xff]  ;;  %v6407_v5 = vadd.f32 %v6406_v35, %v6405_v13  ;;  %v6439_v17 = vsel %vm6305_vm12, %v18582_v62, 0.0 }
 0x591   : > { %v6437_v57 = vsel %vm6305_vm12, %v18580_v21, 0.0 }
 0x592   : > { %v6409_v2 = vadd.f32 %v6408_v44, %v6407_v5  ;;  %v6438_v42 = vadd.f32 %v6437_v57, %v6436_v37 }
 0x594   : > { %v6440_v40 = vadd.f32 %v6439_v17, %v6438_v42  ;;  %v6441_v19 = vsel %vm6305_vm12, %v6409_v2, 0.0 }
 0x596   : > { %v6442_v11 = vsel %vm6305_vm12, %v6440_v40, 0.0 }
 0x597   : > { %v6443_v52 = vadd.f32 %v6442_v11, %v6441_v19 }
 0x599   : > { %v6444_v30 = vrot.slane %v6443_v52, 4 }
 0x59b   : > { %v6445_v36 = vadd.f32 %v6444_v30, %v6443_v52 }
 0x59d   : > { %v6446_v10 = vrot.slane %v6445_v36, 2 }
 0x59f   : > { %v6447_v24 = vadd.f32 %v6446_v10, %v6445_v36 }
 0x5a1   : > { %v6448_v22 = vrot.slane %v6447_v24, 1 }
 0x5a3   : > { %v6449_v54 = vadd.f32 %v6448_v22, %v6447_v24 }
 0x5a5   : > { %v6450_v32 = vmul.f32 %v18597_v34, %v6449_v54 }
 0x5a7   : > { %v6452_v13 = vsel %vm6451_vm2, %v6450_v32, 0.0 }
 0x5a8   : > { %6453 = vadd.xlane.f32.xlu1 %v6452_v13 }
 0x635   : > { %v6454_v35 = vpop.xlane.xlu1 %6453 }
 0x636   : > { %v6456_v60 = vmul.f32 0.0009765625, %v6454_v35 }
 0x638   : > { %v6457_v5 = vmul.f32 %v18597_v34, %v6456_v60 }
 0x63a   : > { %v6458_v37 = vsel %vm6451_vm2, %v6457_v5, 0.0 }
 0x63b   : > { %v6459_v44 = vrot.slane %v6458_v37, 4 }
 0x63d   : > { %v6460_v57 = vadd.f32 %v6459_v44, %v6458_v37 }
 0x63f   : > { %v6461_v2 = vrot.slane %v6460_v57, 2 }
 0x641   : > { %v6462_v42 = vadd.f32 %v6461_v2, %v6460_v57 }
 0x643   : > { %v6463_v17 = vrot.slane %v6462_v42, 1 }
 0x645   : > { %v18603_v40 = vadd.f32 %v6463_v17, %v6462_v42 }
 0x647   : > { %v18607_v19 = vsub.f32 %v18424_v23, %v18603_v40  ;;  %v18611_v11 = vsub.f32 %v18422_v38, %v18603_v40  ;;  %v18615_v52 = vsub.f32 %v18432_v8, %v18603_v40  ;;  %v18619_v26 = vsub.f32 %v18430_v39, %v18603_v40 }
 0x648   : > { %v18623_v6 = vsub.f32 %v18428_v47, %v18603_v40  ;;  %v18627_v23 = vsub.f32 %v18454_v12, %v18603_v40  ;;  %v18635_v8 = vsub.f32 %v18442_v28, %v18603_v40  ;;  %v18639_v39 = vsub.f32 %v18456_v33, %v18603_v40 }
 0x649   : > { %v6497_v38 = vmul.f32 %v18607_v19, %v18607_v19  ;;  %v6499_v18 = vmul.f32 %v18611_v11, %v18611_v11  ;;  %v6501_v47 = vmul.f32 %v18615_v52, %v18615_v52  ;;  %v18645_v12 = vsub.f32 %v18460_v59, %v18603_v40 }
 0x64a   : > { %v18649_v30 = vsub.f32 %v18478_v7, %v18603_v40  ;;  %v6498_v36 = vmul.f32 %v18619_v26, %v18619_v26  ;;  %v6500_v28 = vmul.f32 %v18623_v6, %v18623_v6  ;;  %v6503_v33 = vmul.f32 %v18627_v23, %v18627_v23 }
 0x64b   : > { %v6529_v16 = vsel %vm6305_vm12, %v6497_v38, 0.0  ;;  %v6530_v10 = vsel %vm6305_vm12, %v6499_v18, 0.0  ;;  %v18661_v59 = vsub.f32 %v18462_v9, %v18603_v40  ;;  %v18665_v7 = vsub.f32 %v18480_v0, %v18603_v40 }
 0x64c   : > { %v6531_v24 = vadd.f32 %v6530_v10, %v6529_v16  ;;  %v6502_v22 = vmul.f32 %v18635_v8, %v18635_v8  ;;  %v6505_v53 = vmul.f32 %v18639_v39, %v18639_v39  ;;  %v6532_v54 = vsel %vm6305_vm12, %v6501_v47, 0.0 }
 0x64d   : > { %v18674_v32 = vsub.f32 %v18482_v31, %v18603_v40  ;;  %v18678_v9 = vsub.f32 %v18501_v45, %v18603_v40  ;;  %v6504_v0 = vmul.f32 %v18645_v12, %v18645_v12  ;;  %v6507_v35 = vmul.f32 %v18649_v30, %v18649_v30 }
 0x64e   : > { %v6533_v13 = vadd.f32 %v6532_v54, %v6531_v24  ;;  %v6534_v60 = vsel %vm6305_vm12, %v6503_v33, 0.0  ;;  %v6560_v5 = vsel %vm6305_vm12, %v6498_v36, 0.0  ;;  %v6561_v37 = vsel %vm6305_vm12, %v6500_v28, 0.0 }
 0x64f   : > { %v18689_v31 = vsub.f32 %v18485_v63, %v18603_v40  ;;  %v18693_v45 = vsub.f32 %v18503_v14, %v18603_v40  ;;  %v6562_v57 = vadd.f32 %v6561_v37, %v6560_v5  ;;  %v6506_v2 = vmul.f32 %v18661_v59, %v18661_v59 }
 0x650   : > { %v6535_v44 = vadd.f32 %v6534_v60, %v6533_v13  ;;  %v6509_v42 = vmul.f32 %v18665_v7, %v18665_v7  ;;  %v6536_v17 = vsel %vm6305_vm12, %v6505_v53, 0.0  ;;  %v6563_v38 = vsel %vm6305_vm12, %v6502_v22, 0.0 }
 0x651   : > { %v18703_v63 = vsub.f32 %v18506_v15, %v18603_v40  ;;  %v18707_v14 = vsub.f32 %v18522_v51, %v18603_v40  ;;  %v6564_v47 = vadd.f32 %v6563_v38, %v6562_v57  ;;  %v6508_v36 = vmul.f32 %v18674_v32, %v18674_v32 }
 0x652   : > { %v6537_v18 = vadd.f32 %v6536_v17, %v6535_v44  ;;  %v6511_v28 = vmul.f32 %v18678_v9, %v18678_v9  ;;  %v6538_v33 = vsel %vm6305_vm12, %v6507_v35, 0.0  ;;  %v6565_v16 = vsel %vm6305_vm12, %v6504_v0, 0.0 }
 0x653   : > { %v18717_v15 = vsub.f32 %v18508_v56, %v18603_v40  ;;  %v18721_v51 = vsub.f32 %v18524_v4, %v18603_v40  ;;  %v6566_v24 = vadd.f32 %v6565_v16, %v6564_v47  ;;  %v6510_v22 = vmul.f32 %v18689_v31, %v18689_v31 }
 0x654   : > { %v6539_v10 = vadd.f32 %v6538_v33, %v6537_v18  ;;  %v6513_v53 = vmul.f32 %v18693_v45, %v18693_v45  ;;  %v6540_v54 = vsel %vm6305_vm12, %v6509_v42, 0.0  ;;  %v6567_v0 = vsel %vm6305_vm12, %v6506_v2, 0.0 }
 0x655   : > { %v18731_v56 = vsub.f32 %v18529_v27, %v18603_v40  ;;  %v18735_v4 = vsub.f32 %v18543_v25, %v18603_v40  ;;  %v6568_v35 = vadd.f32 %v6567_v0, %v6566_v24  ;;  %v6512_v60 = vmul.f32 %v18703_v63, %v18703_v63 }
 0x656   : > { %v6541_v13 = vadd.f32 %v6540_v54, %v6539_v10  ;;  %v6515_v5 = vmul.f32 %v18707_v14, %v18707_v14  ;;  %v6542_v37 = vsel %vm6305_vm12, %v6511_v28, 0.0  ;;  %v6569_v44 = vsel %vm6305_vm12, %v6508_v36, 0.0 }
 0x657   : > { %v18745_v27 = vsub.f32 %v18531_v46, %v18603_v40  ;;  %v18749_v25 = vsub.f32 %v18550_v55, %v18603_v40  ;;  %v6570_v2 = vadd.f32 %v6569_v44, %v6568_v35  ;;  %v6514_v42 = vmul.f32 %v18717_v15, %v18717_v15 }
 0x658   : > { %v6543_v57 = vadd.f32 %v6542_v37, %v6541_v13  ;;  %v6517_v17 = vmul.f32 %v18721_v51, %v18721_v51  ;;  %v6544_v38 = vsel %vm6305_vm12, %v6513_v53, 0.0  ;;  %v6571_v18 = vsel %vm6305_vm12, %v6510_v22, 0.0 }
 0x659   : > { %v18759_v46 = vsub.f32 %v18548_v29, %v18603_v40  ;;  %v18763_v55 = vsub.f32 %v18566_v3, %v18603_v40  ;;  %v6572_v36 = vadd.f32 %v6571_v18, %v6570_v2  ;;  %v6516_v28 = vmul.f32 %v18731_v56, %v18731_v56 }
 0x65a   : > { %v6545_v47 = vadd.f32 %v6544_v38, %v6543_v57  ;;  %v6519_v33 = vmul.f32 %v18735_v4, %v18735_v4  ;;  %v6546_v16 = vsel %vm6305_vm12, %v6515_v5, 0.0  ;;  %v6573_v10 = vsel %vm6305_vm12, %v6512_v60, 0.0 }
 0x65b   : > { %v18773_v29 = vsub.f32 %v18559_v48, %v18603_v40  ;;  %v18777_v3 = vsub.f32 %v18572_v41, %v18603_v40  ;;  %v6574_v22 = vadd.f32 %v6573_v10, %v6572_v36  ;;  %v6518_v53 = vmul.f32 %v18745_v27, %v18745_v27 }
 0x65c   : > { %v6547_v24 = vadd.f32 %v6546_v16, %v6545_v47  ;;  %v6521_v54 = vmul.f32 %v18749_v25, %v18749_v25  ;;  %v6548_v0 = vsel %vm6305_vm12, %v6517_v17, 0.0  ;;  %v6575_v13 = vsel %vm6305_vm12, %v6514_v42, 0.0 }
 0x65d   : > { %v18787_v48 = vsub.f32 %v18568_v20, %v18603_v40  ;;  %v18791_v41 = vsub.f32 %v18574_v61, %v18603_v40  ;;  %v6576_v60 = vadd.f32 %v6575_v13, %v6574_v22  ;;  %v6520_v5 = vmul.f32 %v18759_v46, %v18759_v46 }
 0x65e   : > { %v6549_v35 = vadd.f32 %v6548_v0, %v6547_v24  ;;  %v6523_v37 = vmul.f32 %v18763_v55, %v18763_v55  ;;  %v6550_v44 = vsel %vm6305_vm12, %v6519_v33, 0.0  ;;  %v6577_v57 = vsel %vm6305_vm12, %v6516_v28, 0.0 }
 0x65f   : > { %v18801_v20 = vsub.f32 %v18580_v21, %v18603_v40  ;;  %v6578_v42 = vadd.f32 %v6577_v57, %v6576_v60  ;;  %v6522_v61 = vmul.f32 %v18773_v29, %v18773_v29  ;;  %v6525_v17 = vmul.f32 %v18777_v3, %v18777_v3 }
 0x660   : > { %v6551_v2 = vadd.f32 %v6550_v44, %v6549_v35  ;;  %v6552_v38 = vsel %vm6305_vm12, %v6521_v54, 0.0  ;;  %v6579_v18 = vsel %vm6305_vm12, %v6518_v53, 0.0  ;;  %v18811_v47 = vsub.f32 %v18582_v62, %v18603_v40 }
 0x661   : > { %v6580_v28 = vadd.f32 %v6579_v18, %v6578_v42  ;;  %v6524_v21 = vmul.f32 %v18787_v48, %v18787_v48  ;;  %v6527_v33 = vmul.f32 %v18791_v41, %v18791_v41  ;;  %v6554_v16 = vsel %vm6305_vm12, %v6523_v37, 0.0 }
 0x662   : > { %v6553_v36 = vadd.f32 %v6552_v38, %v6551_v2  ;;  %v6581_v10 = vsel %vm6305_vm12, %v6520_v5, 0.0  ;;  %v6526_v53 = vmul.f32 %v18801_v20, %v18801_v20  ;;  %v6556_v62 = vsel %vm6305_vm12, %v6525_v17, 0.0 }
 0x663   : > { %v6582_v22 = vadd.f32 %v6581_v10, %v6580_v28  ;;  %v6583_v40 = vsel %vm6305_vm12, %v6522_v61, 0.0  ;;  %v6528_v13 = vmul.f32 %v18811_v47, %v18811_v47  ;;  %v6558_v35 = vsel %vm6305_vm12, %v6527_v33, 0.0 }
 0x664   : > { %v6555_v24 = vadd.f32 %v6554_v16, %v6553_v36  ;;  %v6585_v60 = vsel %vm6305_vm12, %v6524_v21, 0.0  ;;  %v6587_v44 = vsel %vm6305_vm12, %v6526_v53, 0.0 }
 0x665   : > { %v6584_v0 = vadd.f32 %v6583_v40, %v6582_v22  ;;  %v6589_v2 = vsel %vm6305_vm12, %v6528_v13, 0.0 }
 0x666   : > { %v6557_v54 = vadd.f32 %v6556_v62, %v6555_v24 }
 0x667   : > { %v6586_v5 = vadd.f32 %v6585_v60, %v6584_v0 }
 0x668   : > { %v6559_v37 = vadd.f32 %v6558_v35, %v6557_v54 }
 0x669   : > { %v6588_v57 = vadd.f32 %v6587_v44, %v6586_v5  ;;  %v6370_v44 = vld [vmem:[%s21467_s5] sm:$0x1] }
 0x66a   : > { %v6591_v17 = vsel %vm6305_vm12, %v6559_v37, 0.0 }
 0x66b   : > { %v6590_v42 = vadd.f32 %v6589_v2, %v6588_v57 }
 0x66d   : > { %v6592_v61 = vsel %vm6305_vm12, %v6590_v42, 0.0  ;;  %v21999_v42 = vsub.s32 0, %v21995_v49 }
 0x66e   : > { %v6593_v38 = vadd.f32 %v6592_v61, %v6591_v17 }
 0x670   : > { %v6594_v18 = vrot.slane %v6593_v38, 4 }
 0x672   : > { %v6595_v36 = vadd.f32 %v6594_v18, %v6593_v38 }
 0x674   : > { %v6596_v28 = vrot.slane %v6595_v36, 2 }
 0x676   : > { %v6597_v16 = vadd.f32 %v6596_v28, %v6595_v36 }
 0x678   : > { %v6598_v33 = vrot.slane %v6597_v16, 1 }
 0x67a   : > { %v6599_v10 = vadd.f32 %v6598_v33, %v6597_v16 }
 0x67c   : > { %v6600_v21 = vmul.f32 %v18597_v34, %v6599_v10 }
 0x67e   : > { %v6601_v24 = vsel %vm6451_vm2, %v6600_v21, 0.0 }
 0x67f   : > { %6602 = vadd.xlane.f32.xlu1 %v6601_v24 }
 0x70c   : > { %v6603_v22 = vpop.xlane.xlu1 %6602 }
 0x70d   : > { %v6604_v53 = vmul.f32 0.0009765625, %v6603_v22 }
 0x70f   : > { %v6605_v62 = vadd.f32 1e-05, %v6604_v53 }
 0x711   : > { %15092 = vrsqrt.f32 %v6605_v62 }
 0x71b   : > { %v15093_v40 = vpop.eup %15092 }
 0x71c   : > { %v6607_v54 = vmul.f32 %v15093_v40, %v18597_v34  ;;  %v18844_v34 = vld [vmem:[%s21468_s6] ss:$0 sm:$0xff] }
 0x71e   : > { %v6608_v0 = vsel %vm6451_vm2, %v6607_v54, 0.0 }
 0x71f   : > { %v6609_v13 = vrot.slane %v6608_v0, 4 }
 0x721   : > { %v6610_v35 = vadd.f32 %v6609_v13, %v6608_v0 }
 0x723   : > { %v6611_v60 = vrot.slane %v6610_v35, 2 }
 0x725   : > { %v6612_v37 = vadd.f32 %v6611_v60, %v6610_v35 }
 0x727   : > { %v6613_v5 = vrot.slane %v6612_v37, 1 }
 0x729   : > { %v6614_v57 = vadd.f32 %v6613_v5, %v6612_v37 }
 0x72b   : > { %v6615_v2 = vmul.f32 %v6614_v57, %v6370_v44 }
 0x72d   : > { %v6619_v17 = vrot.slane %v6615_v2, %v21999_v42 }
 0x72f   : > { %v6627_v61 = vmul.f32 %v6619_v17, %v18645_v12  ;;  %v6629_v38 = vmul.f32 %v6619_v17, %v18661_v59  ;;  %v6631_v18 = vmul.f32 %v6619_v17, %v18674_v32  ;;  %v6620_v36 = vmul.f32 %v6619_v17, %v18607_v19 }
 0x730   : > { %v6621_v28 = vmul.f32 %v6619_v17, %v18619_v26  ;;  %v6622_v16 = vmul.f32 %v6619_v17, %v18611_v11  ;;  %v6623_v49 = vmul.f32 %v6619_v17, %v18623_v6  ;;  %v6624_v33 = vmul.f32 %v6619_v17, %v18615_v52 }
 0x731   : > { %v6625_v12 = vmul.f32 %v6619_v17, %v18635_v8  ;;  %v6626_v10 = vmul.f32 %v6619_v17, %v18627_v23  ;;  %v6628_v21 = vmul.f32 %v6619_v17, %v18639_v39  ;;  %v6630_v59 = vmul.f32 %v6619_v17, %v18649_v30 }
 0x732   : > { %v6632_v32 = vmul.f32 %v6619_v17, %v18665_v7  ;;  %v6633_v19 = vmul.f32 %v6619_v17, %v18689_v31  ;;  %v18860_v26 = vadd.f32 %v18844_v34, %v6627_v61  ;;  %v6634_v11 = vmul.f32 %v6619_v17, %v18678_v9 }
 0x733   : > { %v6635_v6 = vmul.f32 %v6619_v17, %v18703_v63  ;;  %v18865_v52 = vadd.f32 %v18844_v34, %v6629_v38  ;;  %v18868_v23 = vadd.f32 %v18844_v34, %v6631_v18  ;;  %v6636_v8 = vmul.f32 %v6619_v17, %v18693_v45 }
 0x734   : > { %v6637_v39 = vmul.f32 %v6619_v17, %v18717_v15  ;;  %v6638_v30 = vmul.f32 %v6619_v17, %v18707_v14  ;;  %v6639_v7 = vmul.f32 %v6619_v17, %v18731_v56  ;;  %v6640_v31 = vmul.f32 %v6619_v17, %v18721_v51 }
 0x735   : > { %v18876_v9 = vadd.f32 %v18844_v34, %v6620_v36  ;;  %v18879_v63 = vadd.f32 %v18844_v34, %v6621_v28  ;;  %v18882_v24 = vadd.f32 %v18844_v34, %v6622_v16  ;;  %v6641_v22 = vmul.f32 %v6619_v17, %v18745_v27 }
 0x736   : > { %v6642_v45 = vmul.f32 %v6619_v17, %v18735_v4  ;;  %v6643_v15 = vmul.f32 %v6619_v17, %v18759_v46  ;;  %v18888_v14 = vadd.f32 %v18844_v34, %v6623_v49  ;;  %v6644_v51 = vmul.f32 %v6619_v17, %v18749_v25  ;;  %v12909_v49 = vld [vmem:[%s21469_s7 + $0x4] sm:$0xf] }
 0x737   : > { %v6645_v56 = vmul.f32 %v6619_v17, %v18773_v29  ;;  %v18893_v53 = vmul.f32 %v6619_v17, %v18763_v55  ;;  %v18896_v62 = vadd.f32 %v18844_v34, %v6624_v33  ;;  %v18899_v40 = vmul.f32 %v6619_v17, %v18787_v48  ;;  %14862 = vmatprep.subr.msk.bf16.mxu0 %vm7975_vm6, %v12909_v49 }
 0x738   : > { %v18902_v4 = vmul.f32 %v6619_v17, %v18777_v3  ;;  %v18905_v27 = vmul.f32 %v6619_v17, %v18801_v20  ;;  %v18908_v46 = vadd.f32 %v18844_v34, %v6625_v12  ;;  %v18911_v25 = vadd.f32 %v18844_v34, %v6626_v10  ;;  %14863 = vmatprep.subr.msk.bf16.mxu1 %vm7975_vm6, %v12909_v49 }
 0x739   : > { %v12845_v55 = vmul.f32 -1.442695, %v18876_v9  ;;  %v12846_v29 = vmul.f32 -1.442695, %v18879_v63  ;;  %v12847_v54 = vmul.f32 -1.442695, %v18882_v24  ;;  %v18917_v48 = vmul.f32 %v6619_v17, %v18791_v41 }
 0x73a   : > { %v18920_v3 = vmul.f32 %v6619_v17, %v18811_v47  ;;  %v18923_v20 = vadd.f32 %v18844_v34, %v6628_v21  ;;  %v12848_v0 = vmul.f32 -1.442695, %v18888_v14  ;;  %v18927_v13 = vadd.f32 %v18844_v34, %v6630_v59  ;;  %v7444_v21 = vld [vmem:[#allocation4] sm:$0xf]  ;;  %v7445_v59 = vld [vmem:[#allocation4 + $0x4] sm:$0xf] }
 0x73b   : > { %v18930_v35 = vadd.f32 %v18844_v34, %v6632_v32  ;;  %15094 = vpow2.f32 %v12845_v55  ;;  %v12849_v60 = vmul.f32 -1.442695, %v18896_v62  ;;  %v18934_v41 = vadd.f32 %v18844_v34, %v6633_v19 }
 0x73c   : > { %v18937_v47 = vadd.f32 %v18844_v34, %v6634_v11  ;;  %15096 = vpow2.f32 %v12846_v29  ;;  %v12850_v37 = vmul.f32 -1.442695, %v18908_v46  ;;  %v18941_v5 = vadd.f32 %v18844_v34, %v6635_v6  ;;  %v7477_v6 = vld [vmem:[#allocation4 + $0x8] sm:$0x1] }
 0x73d   : > { %v18944_v44 = vadd.f32 %v18844_v34, %v6636_v8  ;;  %15098 = vpow2.f32 %v12847_v54  ;;  %v12851_v57 = vmul.f32 -1.442695, %v18911_v25  ;;  %v18948_v2 = vadd.f32 %v18844_v34, %v6637_v39 }
 0x73e   : > { %v18951_v42 = vadd.f32 %v18844_v34, %v6638_v30  ;;  %15100 = vpow2.f32 %v12848_v0  ;;  %v12852_v17 = vmul.f32 -1.442695, %v18860_v26  ;;  %v18955_v61 = vadd.f32 %v18844_v34, %v6639_v7 }
 0x73f   : > { %v18958_v38 = vadd.f32 %v18844_v34, %v6640_v31  ;;  %15102 = vpow2.f32 %v12849_v60  ;;  %v12853_v18 = vmul.f32 -1.442695, %v18923_v20  ;;  %v18962_v36 = vadd.f32 %v18844_v34, %v6641_v22  ;;  %v547_v60 = vld [vmem:[#allocation4 + $0x14] sm:$0x1] }
 0x740   : > { %v18965_v28 = vadd.f32 %v18844_v34, %v6642_v45  ;;  %15104 = vpow2.f32 %v12850_v37  ;;  %v12854_v16 = vmul.f32 -1.442695, %v18865_v52  ;;  %v18972_v33 = vadd.f32 %v18844_v34, %v6643_v15 }
 0x741   : > { %v18975_v12 = vadd.f32 %v18844_v34, %v6644_v51  ;;  %15106 = vpow2.f32 %v12851_v57  ;;  %v12855_v10 = vmul.f32 -1.442695, %v18927_v13  ;;  %v18979_v32 = vadd.f32 %v18844_v34, %v6645_v56  ;;  %v18993_v56 = vld [vmem:[%s21469_s7] sm:$0xf] }
 0x742   : > { %15108 = vpow2.f32 %v12852_v17  ;;  %v12856_v19 = vmul.f32 -1.442695, %v18868_v23  ;;  %v12857_v11 = vmul.f32 -1.442695, %v18930_v35  ;;  %v12858_v8 = vmul.f32 -1.442695, %v18934_v41 }
 0x743   : > { %22000 = vst [vmem:[#allocation41_spill] sm:$0xff] %v18979_v32  ;;  %15110 = vpow2.f32 %v12853_v18  ;;  %v12859_v39 = vmul.f32 -1.442695, %v18937_v47  ;;  %v7977_v30 = vsel %vm7975_vm6, %v12909_v49, 0  ;;  %v7496_v7 = vshrl.u32 %v7444_v21, 16 }
 0x744   : > { %15112 = vpow2.f32 %v12854_v16  ;;  %v7499_v31 = vshll.u32 %v7444_v21, 16  ;;  %13968 = vmatpush3.bf16.msra.mxu0 %v7977_v30  ;;  %14308 = vmatpush3.bf16.msra.mxu1 %v7977_v30  ;;  %v7505_v45 = vshll.u32 %v7445_v59, 16  ;;  %v7509_v15 = vshrl.u32 %v7445_v59, 16  ;;  %v568_v16 = vld [vmem:[#allocation4 + $0x68] sm:$0x1] }
 0x745   : > { %v18988_v22 = vpop.eup %15094  ;;  %15114 = vpow2.f32 %v12855_v10  ;;  %v7515_v51 = vshll.u32 %v7477_v6, 16  ;;  %v12860_v29 = vmul.f32 -1.442695, %v18941_v5  ;;  %v7498_v54 = vrot.slane %v7496_v7, 4  ;;  %14864 = vmatprep.subr.msk.bf16.mxu1 %vm7975_vm6, %v18993_v56 }
 0x746   : > { %v18995_v55 = vpop.eup %15096  ;;  %15116 = vpow2.f32 %v12856_v19  ;;  %v7501_v0 = vrot.slane %v7499_v31, 5  ;;  %v12861_v57 = vmul.f32 -1.442695, %v18944_v44  ;;  %v7507_v17 = vrot.slane %v7505_v45, 5  ;;  %v550_v19 = vld [vmem:[#allocation4 + $0x20] sm:$0x1] }
 0x747   : > { %v19000_v37 = vpop.eup %15098  ;;  %15118 = vpow2.f32 %v12857_v11  ;;  %v7511_v18 = vrot.slane %v7509_v15, 4  ;;  %v12862_v10 = vmul.f32 -1.442695, %v18948_v2  ;;  %v12863_v21 = vmul.f32 -1.442695, %v18951_v42 }
 0x748   : > { %v19003_v49 = vpop.eup %15100  ;;  %15120 = vpow2.f32 %v12858_v8  ;;  %v7502_v59 = vor.u32 %v7501_v0, %v7498_v54  ;;  %v7517_v7 = vrot.slane %v7515_v51, 5  ;;  %v548_v11 = vsel %vm18362_vm1, 0, %v547_v60 }
 0x749   : > { %v19007_v6 = vpop.eup %15102  ;;  %15122 = vpow2.f32 %v12859_v39  ;;  %v7512_v30 = vor.u32 %v7511_v18, %v7507_v17  ;;  %v12864_v45 = vmul.f32 -1.442695, %v18955_v61  ;;  %549 = vst [vmem:[#allocation4 + $0x14] sm:$0x1] %v548_v11  ;;  %v569_v15 = vsel %vm18362_vm1, 0, %v568_v16 }
 0x74a   : > { %v19011_v31 = vpop.eup %15104  ;;  %15124 = vpow2.f32 %v12860_v29  ;;  %v7503_v8 = vrot.slane %v7502_v59, 4  ;;  %v12865_v39 = vmul.f32 -1.442695, %v18958_v38  ;;  %570 = vst [vmem:[#allocation4 + $0x68] sm:$0x1] %v569_v15  ;;  %v551_v51 = vsel %vm18362_vm1, 0, %v550_v19 }
 0x74b   : > { %v19016_v54 = vpop.eup %15106  ;;  %15126 = vpow2.f32 %v12861_v57  ;;  %v7513_v0 = vrot.slane %v7512_v30, 4  ;;  %v19025_v29 = vadd.f32 %v18844_v34, %v18893_v53  ;;  %v12866_v18 = vmul.f32 -1.442695, %v18962_v36  ;;  %552 = vst [vmem:[#allocation4 + $0x20] sm:$0x1] %v551_v51 }
 0x74c   : > { %v19021_v60 = vpop.eup %15108  ;;  %15128 = vpow2.f32 %v12862_v10  ;;  %v7508_v16 = vsel %vm16062_vm14, %v7503_v8, %v7507_v17  ;;  %v553_v57 = vld [vmem:[#allocation4 + $0x2c] sm:$0x1]  ;;  %v12867_v30 = vmul.f32 -1.442695, %v18965_v28  ;;  %v19041_v10 = vadd.f32 %v18844_v34, %v18899_v40  ;;  %v556_v51 = vld [vmem:[#allocation4 + $0x38] sm:$0x1] }
 0x74d   : > { %22001 = vst [vmem:[#allocation40_spill] sm:$0xff] %v19025_v29  ;;  %v19030_v59 = vpop.eup %15110  ;;  %15130 = vpow2.f32 %v12863_v21  ;;  %v7518_v19 = vsel %vm16062_vm14, %v7513_v0, %v7517_v7  ;;  %v554_v53 = vsel %vm18362_vm1, 0, %v553_v57  ;;  %v12868_v17 = vmul.f32 -1.442695, %v18972_v33 }
 0x74e   : > { %v19037_v11 = vpop.eup %15112  ;;  %22002 = vst [vmem:[#allocation42_spill] sm:$0xff] %v19041_v10  ;;  %15132 = vpow2.f32 %v12864_v45  ;;  %v12910_v8 = vcombine.low %v7508_v16, %v7518_v19  ;;  %555 = vst [vmem:[#allocation4 + $0x2c] sm:$0x1] %v554_v53  ;;  %v19048_v15 = vadd.f32 %v18844_v34, %v18902_v4  ;;  %v12869_v7 = vmul.f32 -1.442695, %v18975_v12 }
 0x74f   : > { %v19044_v21 = vpop.eup %15114  ;;  %15134 = vpow2.f32 %v12865_v39  ;;  %v19055_v40 = vadd.f32 %v18844_v34, %v18905_v27  ;;  %v12870_v45 = vmul.f32 -1.442695, %v18979_v32  ;;  %v19061_v4 = vadd.f32 %v18844_v34, %v18917_v48 }
 0x750   : > { %22003 = vst [vmem:[#allocation12_spill] sm:$0xff] %v19048_v15  ;;  %v19051_v0 = vpop.eup %15116  ;;  %15136 = vpow2.f32 %v12866_v18  ;;  %13969 = vmatprep.mubr.msk.bf16.mxu0 %vm6305_vm12, %v12910_v8  ;;  %v12871_v39 = vmul.f32 -1.442695, %v19025_v29  ;;  %v557_v57 = vsel %vm18362_vm1, 0, %v556_v51  ;;  %v19068_v27 = vadd.f32 %v18844_v34, %v18920_v3 }
 0x751   : > { %22004 = vst [vmem:[#allocation20_spill] sm:$0xff] %v19055_v40  ;;  %v15119_v16 = vpop.eup %15118  ;;  %22005 = vst [vmem:[#allocation15_spill] sm:$0xff] %v19061_v4  ;;  %15138 = vpow2.f32 %v12867_v30  ;;  %v12872_v18 = vmul.f32 -1.442695, %v19041_v10  ;;  %v12873_v48 = vmul.f32 -1.442695, %v19048_v15 }
 0x752   : > { %v15121_v19 = vpop.eup %15120  ;;  %22006 = vst [vmem:[#allocation17_spill] sm:$0xff] %v19068_v27  ;;  %15140 = vpow2.f32 %v12868_v17  ;;  %558 = vst [vmem:[#allocation4 + $0x38] sm:$0x1] %v557_v57  ;;  %v12874_v30 = vmul.f32 -1.442695, %v19055_v40  ;;  %v6786_v17 = vadd.f32 1.0, %v18988_v22 }
 0x753   : > { %v15123_v53 = vpop.eup %15122  ;;  %15142 = vpow2.f32 %v12869_v7  ;;  %v12875_v51 = vmul.f32 -1.442695, %v19061_v4  ;;  %v12876_v34 = vmul.f32 -1.442695, %v19068_v27  ;;  %v6787_v7 = vadd.f32 1.0, %v18995_v55 }
 0x754   : > { %v15125_v8 = vpop.eup %15124  ;;  %15144 = vpow2.f32 %v12870_v45  ;;  %v6788_v45 = vadd.f32 1.0, %v19000_v37  ;;  %v559_v22 = vld [vmem:[#allocation4 + $0x44] sm:$0x1]  ;;  %v6792_v55 = vadd.f32 1.0, %v19016_v54  ;;  %v19090_v54 = vsel %vm7975_vm6, %v18993_v56, 0 }
 0x755   : > { %v15127_v58 = vpop.eup %15126  ;;  %15146 = vpow2.f32 %v12871_v39  ;;  %v6789_v39 = vadd.f32 1.0, %v19003_v49  ;;  %v560_v37 = vsel %vm18362_vm1, 0, %v559_v22  ;;  %22007 = vst [vmem:[#allocation21_spill] sm:$0xff] %v19090_v54  ;;  %v6797_v22 = vadd.f32 1.0, %v19051_v0 }
 0x756   : > { %v15129_v43 = vpop.eup %15128  ;;  %15148 = vpow2.f32 %v12872_v18  ;;  %v6790_v18 = vadd.f32 1.0, %v19007_v6  ;;  %561 = vst [vmem:[#allocation4 + $0x44] sm:$0x1] %v560_v37  ;;  %v6794_v6 = vadd.f32 1.0, %v19030_v59  ;;  %v6800_v15 = vadd.f32 1.0, %v15123_v53 }
 0x757   : > { %v15131_v3 = vpop.eup %15130  ;;  %15150 = vpow2.f32 %v12873_v48  ;;  %v6791_v48 = vadd.f32 1.0, %v19011_v31  ;;  %v6795_v31 = vadd.f32 1.0, %v19037_v11  ;;  %v6801_v59 = vadd.f32 1.0, %v15125_v8 }
 0x758   : > { %v15133_v57 = vpop.eup %15132  ;;  %15152 = vpow2.f32 %v12874_v30  ;;  %v6803_v11 = vadd.f32 1.0, %v15129_v43  ;;  %v6804_v29 = vadd.f32 1.0, %v15131_v3 }
 0x759   : > { %v15135_v1 = vpop.eup %15134  ;;  %15154 = vpow2.f32 %v12875_v51 }
 0x75a   : > { %v15137_v40 = vpop.eup %15136  ;;  %15156 = vpow2.f32 %v12876_v34  ;;  %v6793_v34 = vadd.f32 1.0, %v19021_v60  ;;  %v6798_v60 = vadd.f32 1.0, %v15119_v16  ;;  %v6806_v32 = vadd.f32 1.0, %v15135_v1 }
 0x75b   : > { %v15139_v4 = vpop.eup %15138  ;;  %15158 = vrcp.f32 %v6786_v17  ;;  %v6807_v56 = vadd.f32 1.0, %v15137_v40  ;;  %v562_v40 = vld [vmem:[#allocation4 + $0x50] sm:$0x1] }
 0x75c   : > { %v15141_v27 = vpop.eup %15140  ;;  %15160 = vrcp.f32 %v6787_v7  ;;  %v6796_v7 = vadd.f32 1.0, %v19044_v21  ;;  %v6805_v21 = vadd.f32 1.0, %v15133_v57  ;;  %v19093_v54 = vadd.f32 1.0, %v15139_v4 }
 0x75d   : > { %v15143_v30 = vpop.eup %15142  ;;  %15162 = vrcp.f32 %v6788_v45  ;;  %v19095_v16 = vadd.f32 1.0, %v15141_v27  ;;  %v563_v57 = vsel %vm18362_vm1, 0, %v562_v40 }
 0x75e   : > { %v15145_v51 = vpop.eup %15144  ;;  %15164 = vrcp.f32 %v6789_v39  ;;  %v6799_v39 = vadd.f32 1.0, %v15121_v19  ;;  %v19097_v19 = vadd.f32 1.0, %v15143_v30  ;;  %564 = vst [vmem:[#allocation4 + $0x50] sm:$0x1] %v563_v57 }
 0x75f   : > { %v15147_v49 = vpop.eup %15146  ;;  %15166 = vrcp.f32 %v6790_v18  ;;  %v6802_v18 = vadd.f32 1.0, %v15127_v58  ;;  %v19099_v53 = vadd.f32 1.0, %v15145_v51 }
 0x760   : > { %v15149_v17 = vpop.eup %15148  ;;  %15168 = vrcp.f32 %v6791_v48  ;;  %v19101_v8 = vadd.f32 1.0, %v15147_v49 }
 0x761   : > { %v15151_v45 = vpop.eup %15150  ;;  %15170 = vrcp.f32 %v6792_v55  ;;  %v19103_v43 = vadd.f32 1.0, %v15149_v17 }
 0x762   : > { %v15153_v37 = vpop.eup %15152  ;;  %15172 = vrcp.f32 %v6793_v34  ;;  %v19106_v3 = vadd.f32 1.0, %v15151_v45 }
 0x763   : > { %v15155_v10 = vpop.eup %15154  ;;  %15174 = vrcp.f32 %v6794_v6  ;;  %v19111_v55 = vadd.f32 1.0, %v15153_v37 }
 0x764   : > { %v15157_v48 = vpop.eup %15156  ;;  %15176 = vrcp.f32 %v6795_v31 }
 0x765   : > { %v15159_v0 = vpop.eup %15158  ;;  %15178 = vrcp.f32 %v6796_v7 }
 0x766   : > { %v15161_v58 = vpop.eup %15160  ;;  %15180 = vrcp.f32 %v6797_v22  ;;  %v6882_v1 = vmul.f32 %v15159_v0, %v18876_v9  ;;  %v19114_v9 = vadd.f32 1.0, %v15155_v10 }
 0x767   : > { %v15163_v4 = vpop.eup %15162  ;;  %15182 = vrcp.f32 %v6798_v60  ;;  %v6883_v27 = vmul.f32 %v15161_v58, %v18879_v63  ;;  %v19117_v63 = vadd.f32 1.0, %v15157_v48 }
 0x768   : > { %v15165_v30 = vpop.eup %15164  ;;  %15184 = vrcp.f32 %v6799_v39  ;;  %v6884_v51 = vmul.f32 %v15163_v4, %v18882_v24  ;;  %v13306_v34 = vpack.c.bf16 %v6882_v1, %v6882_v1 }
 0x769   : > { %v15167_v49 = vpop.eup %15166  ;;  %15186 = vrcp.f32 %v6800_v15  ;;  %v6885_v6 = vmul.f32 %v15165_v30, %v18888_v14  ;;  %v13307_v17 = vpack.c.bf16 %v6883_v27, %v6883_v27 }
 0x76a   : > { %v15169_v31 = vpop.eup %15168  ;;  %15188 = vrcp.f32 %v6801_v59  ;;  %v6886_v50 = vmul.f32 %v15167_v49, %v18896_v62  ;;  %v7011_v7 = vshrl.u32 %v13306_v34, 16  ;;  %v19121_v22 = vpack.c.bf16 %v6884_v51, %v6884_v51 }
 0x76b   : > { %v15171_v45 = vpop.eup %15170  ;;  %15190 = vrcp.f32 %v6802_v18  ;;  %v6887_v24 = vmul.f32 %v15169_v31, %v18908_v46  ;;  %v19123_v60 = vpack.c.bf16 %v6885_v6, %v6885_v6  ;;  %v7014_v39 = vshll.u32 %v13306_v34, 16 }
 0x76c   : > { %v15173_v10 = vpop.eup %15172  ;;  %15192 = vrcp.f32 %v6803_v11  ;;  %v6888_v14 = vmul.f32 %v15171_v45, %v18911_v25  ;;  %v7013_v15 = vrot.slane %v7011_v7, 7  ;;  %v19127_v62 = vpack.c.bf16 %v6886_v50, %v6886_v50 }
 0x76d   : > { %v15175_v37 = vpop.eup %15174  ;;  %15194 = vrcp.f32 %v6804_v29  ;;  %v6889_v59 = vmul.f32 %v15173_v10, %v18860_v26  ;;  %v7019_v48 = vshrl.u32 %v13307_v17, 16  ;;  %v19130_v0 = vpack.c.bf16 %v6887_v24, %v6887_v24 }
 0x76e   : > { %v15177_v18 = vpop.eup %15176  ;;  %15196 = vrcp.f32 %v6805_v21  ;;  %v6890_v46 = vmul.f32 %v15175_v37, %v18923_v20  ;;  %v19132_v58 = vpack.c.bf16 %v6888_v14, %v6888_v14  ;;  %v19137_v29 = vor.u32 %v7014_v39, %v7013_v15 }
 0x76f   : > { %v15179_v11 = vpop.eup %15178  ;;  %15198 = vrcp.f32 %v6806_v32  ;;  %v6891_v25 = vmul.f32 %v15177_v18, %v18865_v52  ;;  %v19135_v1 = vpack.c.bf16 %v6889_v59, %v6889_v59  ;;  %v7017_v4 = vrot.slane %v7013_v15, 4 }
 0x770   : > { %v15181_v26 = vpop.eup %15180  ;;  %15200 = vrcp.f32 %v6807_v56  ;;  %v6892_v40 = vmul.f32 %v15179_v11, %v18927_v13  ;;  %v19140_v21 = vrot.slane %v7019_v48, 7  ;;  %v19144_v57 = vpack.c.bf16 %v6890_v46, %v6890_v46 }
 0x771   : > { %v15183_v20 = vpop.eup %15182  ;;  %15202 = vrcp.f32 %v19093_v54  ;;  %v6893_v27 = vmul.f32 %v15181_v26, %v18868_v23  ;;  %v7022_v32 = vshll.u32 %v13307_v17, 16  ;;  %v19148_v51 = vpack.c.bf16 %v6891_v25, %v6891_v25 }
 0x772   : > { %v15185_v52 = vpop.eup %15184  ;;  %15204 = vrcp.f32 %v19095_v16  ;;  %v6894_v30 = vmul.f32 %v15183_v20, %v18930_v35  ;;  %v19150_v56 = vpack.c.bf16 %v6892_v40, %v6892_v40  ;;  %v7028_v35 = vshrl.u32 %v19121_v22, 16 }
 0x773   : > { %v15187_v13 = vpop.eup %15186  ;;  %15206 = vrcp.f32 %v19097_v19  ;;  %v6895_v34 = vmul.f32 %v15185_v52, %v18934_v41  ;;  %v7024_v54 = vor.u32 %v7022_v32, %v19140_v21  ;;  %v19158_v6 = vpack.c.bf16 %v6893_v27, %v6893_v27 }
 0x774   : > { %v15189_v49 = vpop.eup %15188  ;;  %15208 = vrcp.f32 %v19099_v53  ;;  %v6896_v16 = vmul.f32 %v15187_v13, %v18937_v47  ;;  %v19163_v31 = vpack.c.bf16 %v6894_v30, %v6894_v30  ;;  %v19171_v45 = vrot.slane %v7028_v35, 7  ;;  %v22011_v35 = vld [vmem:[#allocation40_spill] sm:$0xff] }
 0x775   : > { %v15191_v17 = vpop.eup %15190  ;;  %15210 = vrcp.f32 %v19101_v8  ;;  %v6897_v19 = vmul.f32 %v15189_v49, %v18941_v5  ;;  %v7025_v50 = vsel %vm16309_vm0, %v7017_v4, %v7024_v54  ;;  %v19169_v47 = vpack.c.bf16 %v6895_v34, %v6895_v34  ;;  %v22010_v34 = vld [vmem:[#allocation41_spill] sm:$0xff] }
 0x776   : > { %v15193_v7 = vpop.eup %15192  ;;  %15212 = vrcp.f32 %v19103_v43  ;;  %v6898_v53 = vmul.f32 %v15191_v17, %v18944_v44  ;;  %7335 = vst.msk [vmem:[#allocation4 + $0x10] sm:$0xf] %vm486_vm8, %v7025_v50  ;;  %v19176_v8 = vpack.c.bf16 %v6896_v16, %v6896_v16  ;;  %v7031_v15 = vshll.u32 %v19121_v22, 16 }
 0x777   : > { %v15195_v24 = vpop.eup %15194  ;;  %15214 = vrcp.f32 %v19106_v3  ;;  %v6899_v5 = vmul.f32 %v15193_v7, %v18948_v2  ;;  %v19178_v10 = vpack.c.bf16 %v6897_v19, %v6897_v19  ;;  %v7036_v48 = vshrl.u32 %v19123_v60, 16 }
 0x778   : > { %v15197_v14 = vpop.eup %15196  ;;  %15216 = vrcp.f32 %v19111_v55  ;;  %v6900_v44 = vmul.f32 %v15195_v24, %v18951_v42  ;;  %v19182_v43 = vpack.c.bf16 %v6898_v53, %v6898_v53  ;;  %v19193_v42 = vor.u32 %v7031_v15, %v19171_v45  ;;  %v22013_v53 = vld [vmem:[#allocation42_spill] sm:$0xff] }
 0x779   : > { %v15199_v39 = vpop.eup %15198  ;;  %15218 = vrcp.f32 %v19114_v9  ;;  %v6901_v3 = vmul.f32 %v15197_v14, %v18955_v61  ;;  %v19187_v37 = vpack.c.bf16 %v6899_v5, %v6899_v5  ;;  %v7045_v46 = vshrl.u32 %v19127_v62, 16 }
 0x77a   : > { %v15201_v59 = vpop.eup %15200  ;;  %15220 = vrcp.f32 %v19117_v63  ;;  %v6902_v55 = vmul.f32 %v15199_v39, %v18958_v38  ;;  %v19197_v9 = vpack.c.bf16 %v6900_v44, %v6900_v44  ;;  %v19205_v38 = vrot.slane %v7036_v48, 7  ;;  %v22014_v39 = vld [vmem:[#allocation12_spill] sm:$0xff] }
 0x77b   : > { %v15203_v22 = vpop.eup %15202  ;;  %v6903_v18 = vmul.f32 %v15201_v59, %v18962_v36  ;;  %v19199_v61 = vpack.c.bf16 %v6901_v3, %v6901_v3  ;;  %v7039_v26 = vshll.u32 %v19123_v60, 16  ;;  %v19209_v20 = vrot.slane %v7045_v46, 7 }
 0x77c   : > { %v15205_v11 = vpop.eup %15204  ;;  %v6904_v25 = vmul.f32 %v15203_v22, %v18965_v28  ;;  %v19203_v63 = vpack.c.bf16 %v6902_v55, %v6902_v55  ;;  %v7048_v36 = vshll.u32 %v19127_v62, 16  ;;  %v7053_v27 = vshrl.u32 %v19130_v0, 16  ;;  %v22016_v22 = vld [vmem:[#allocation20_spill] sm:$0xff] }
 0x77d   : > { %v15207_v40 = vpop.eup %15206  ;;  %v6905_v4 = vmul.f32 %v15205_v11, %v18972_v33  ;;  %22009 = vst [vmem:[#allocation18_spill] sm:$0xff] %v19209_v20  ;;  %v19214_v30 = vpack.c.bf16 %v6903_v18, %v6903_v18  ;;  %v19219_v13 = vor.u32 %v7039_v26, %v19205_v38  ;;  %v7056_v50 = vshll.u32 %v19130_v0, 16 }
 0x77e   : > { %v15209_v32 = vpop.eup %15208  ;;  %v6906_v52 = vmul.f32 %v15207_v40, %v18975_v12  ;;  %v19216_v28 = vpack.c.bf16 %v6904_v25, %v6904_v25  ;;  %v19226_v62 = vor.u32 %v7048_v36, %v19209_v20  ;;  %v19230_v19 = vrot.slane %v7053_v27, 7  ;;  %v22018_v40 = vld [vmem:[#allocation15_spill] sm:$0xff] }
 0x77f   : > { %v15211_v60 = vpop.eup %15210  ;;  %v6907_v54 = vmul.f32 %v15209_v32, %v22010_v34  ;;  %v19222_v33 = vpack.c.bf16 %v6905_v4, %v6905_v4  ;;  %v7062_v44 = vshrl.u32 %v19132_v58, 16  ;;  %v7065_v48 = vshll.u32 %v19132_v58, 16 }
 0x780   : > { %v15213_v16 = vpop.eup %15212  ;;  %v6908_v12 = vmul.f32 %v15211_v60, %v22011_v35  ;;  %22012 = vst [vmem:[#allocation19_spill] sm:$0xff] %v19230_v19  ;;  %v19234_v5 = vpack.c.bf16 %v6906_v52, %v6906_v52  ;;  %v19243_v55 = vor.u32 %v7056_v50, %v19230_v19  ;;  %v7070_v25 = vshrl.u32 %v19135_v1, 16  ;;  %v22019_v52 = vld [vmem:[#allocation17_spill] sm:$0xff]  ;;  %v7423_v19 = vld [vmem:[#allocation4 + $0xa8] sm:$0xf] }
 0x781   : > { %v15215_v7 = vpop.eup %15214  ;;  %v6909_v24 = vmul.f32 %v15213_v16, %v22013_v53  ;;  %v19236_v14 = vpack.c.bf16 %v6907_v54, %v6907_v54  ;;  %v19248_v11 = vrot.slane %v7062_v44, 7  ;;  %v7079_v32 = vshrl.u32 %v19144_v57, 16 }
 0x782   : > { %v15217_v15 = vpop.eup %15216  ;;  %v6910_v3 = vmul.f32 %v15215_v7, %v22014_v39  ;;  %v19240_v59 = vpack.c.bf16 %v6908_v12, %v6908_v12  ;;  %22015 = vst [vmem:[#allocation9_spill] sm:$0xff] %v19243_v55  ;;  %v7073_v54 = vshll.u32 %v19135_v1, 16  ;;  %v19265_v35 = vrot.slane %v7070_v25, 7 }
 0x783   : > { %v15219_v0 = vpop.eup %15218  ;;  %v6911_v18 = vmul.f32 %v15217_v15, %v22016_v22  ;;  %22017 = vst [vmem:[#allocation10_spill] sm:$0xff] %v19248_v11  ;;  %v19252_v36 = vpack.c.bf16 %v6909_v24, %v6909_v24  ;;  %v19261_v34 = vor.u32 %v7065_v48, %v19248_v11  ;;  %v19267_v12 = vrot.slane %v7079_v32, 7  ;;  %v7395_v11 = vld [vmem:[#allocation4 + $0x78] sm:$0xf] }
 0x784   : > { %v15221_v26 = vpop.eup %15220  ;;  %v6912_v4 = vmul.f32 %v15219_v0, %v22018_v40  ;;  %v19254_v27 = vpack.c.bf16 %v6910_v3, %v6910_v3  ;;  %22020 = vst [vmem:[#allocation14_spill] sm:$0xff] %v19265_v35  ;;  %v7082_v50 = vshll.u32 %v19144_v57, 16  ;;  %v7087_v24 = vshrl.u32 %v19148_v51, 16 }
 0x785   : > { %v6913_v58 = vmul.f32 %v15221_v26, %v22019_v52  ;;  %v19258_v60 = vpack.c.bf16 %v6911_v18, %v6911_v18  ;;  %22021 = vst [vmem:[#allocation11_spill] sm:$0xff] %v19267_v12  ;;  %v7096_v44 = vshrl.u32 %v19150_v56, 16  ;;  %v19277_v15 = vor.u32 %v7073_v54, %v19265_v35 }
 0x786   : > { %v19270_v7 = vpack.c.bf16 %v6912_v4, %v6912_v4  ;;  %v19281_v39 = vor.u32 %v7082_v50, %v19267_v12  ;;  %v7090_v3 = vshll.u32 %v19148_v51, 16  ;;  %v19284_v48 = vrot.slane %v7087_v24, 7  ;;  %v7388_v12 = vld [vmem:[#allocation4 + $0x6c] sm:$0xf] }
 0x787   : > { %v19272_v53 = vpack.c.bf16 %v6913_v58, %v6913_v58  ;;  %22022 = vst [vmem:[#allocation5_spill] sm:$0xff] %v19277_v15  ;;  %v19286_v57 = vrot.slane %v7096_v44, 7  ;;  %v7099_v0 = vshll.u32 %v19150_v56, 16  ;;  %v7104_v22 = vshrl.u32 %v19158_v6, 16  ;;  %v7399_v15 = vld [vmem:[#allocation4 + $0x80] sm:$0x1] }
 0x788   : > { %22023 = vst [vmem:[#allocation23_spill] sm:$0xff] %v19284_v48  ;;  %v7107_v25 = vshll.u32 %v19158_v6, 16  ;;  %v7113_v26 = vshrl.u32 %v19163_v31, 16  ;;  %v7121_v40 = vshrl.u32 %v19169_v47, 16  ;;  %v19295_v4 = vor.u32 %v7090_v3, %v19284_v48 }
 0x789   : > { %22024 = vst [vmem:[#allocation24_spill] sm:$0xff] %v19286_v57  ;;  %v19299_v32 = vor.u32 %v7099_v0, %v19286_v57  ;;  %v7116_v56 = vshll.u32 %v19163_v31, 16  ;;  %v19303_v58 = vrot.slane %v7104_v22, 7  ;;  %v7124_v50 = vshll.u32 %v19169_v47, 16 }
 0x78a   : > { %22025 = vst [vmem:[#allocation25_spill] sm:$0xff] %v19295_v4  ;;  %v7115_v54 = vrot.slane %v7113_v26, 7  ;;  %v19305_v6 = vrot.slane %v7121_v40, 7  ;;  %v7130_v24 = vshrl.u32 %v19176_v8, 16  ;;  %v7133_v44 = vshll.u32 %v19176_v8, 16 }
 0x78b   : > { %22026 = vst [vmem:[#allocation26_spill] sm:$0xff] %v19303_v58  ;;  %v7138_v3 = vshrl.u32 %v19178_v10, 16  ;;  %v19312_v0 = vor.u32 %v7107_v25, %v19303_v58  ;;  %v7141_v22 = vshll.u32 %v19178_v10, 16  ;;  %v7147_v8 = vshrl.u32 %v19182_v43, 16  ;;  %v7406_v58 = vld [vmem:[#allocation4 + $0x8c] sm:$0x1] }
 0x78c   : > { %v19314_v51 = vor.u32 %v7116_v56, %v7115_v54  ;;  %v7119_v31 = vrot.slane %v7115_v54, 4  ;;  %v7126_v26 = vor.u32 %v7124_v50, %v19305_v6  ;;  %v19319_v52 = vrot.slane %v7130_v24, 7 }
 0x78d   : > { %22027 = vst [vmem:[#allocation27_spill] sm:$0xff] %v19312_v0  ;;  %v19321_v47 = vrot.slane %v7138_v3, 7  ;;  %v7150_v18 = vshll.u32 %v19182_v43, 16  ;;  %v7155_v25 = vshrl.u32 %v19187_v37, 16  ;;  %v7158_v56 = vshll.u32 %v19187_v37, 16 }
 0x78e   : > { %v7127_v54 = vsel %vm16309_vm0, %v7119_v31, %v7126_v26  ;;  %v19330_v10 = vor.u32 %v7133_v44, %v19319_v52  ;;  %v7149_v1 = vrot.slane %v7147_v8, 7  ;;  %v7164_v43 = vshrl.u32 %v19197_v9, 16  ;;  %v7374_v8 = vld [vmem:[#allocation4 + $0x54] sm:$0xf] }
 0x78f   : > { %v19334_v24 = vor.u32 %v7141_v22, %v19321_v47  ;;  %v19337_v16 = vrot.slane %v7155_v25, 7  ;;  %7377 = vst.msk [vmem:[#allocation4 + $0x58] sm:$0xf] %vm486_vm8, %v7127_v54  ;;  %v7167_v37 = vshll.u32 %v19197_v9, 16  ;;  %v7172_v31 = vshrl.u32 %v19199_v61, 16 }
 0x790   : > { %v7175_v44 = vshll.u32 %v19199_v61, 16  ;;  %v7181_v26 = vshrl.u32 %v19203_v63, 16  ;;  %v19345_v46 = vor.u32 %v7150_v18, %v7149_v1  ;;  %v7153_v22 = vrot.slane %v7149_v1, 4 }
 0x791   : > { %v7160_v17 = vor.u32 %v7158_v56, %v19337_v16  ;;  %v7166_v25 = vrot.slane %v7164_v43, 7  ;;  %v19349_v49 = vrot.slane %v7172_v31, 7  ;;  %v7184_v54 = vshll.u32 %v19203_v63, 16 }
 0x792   : > { %v7183_v2 = vrot.slane %v7181_v26, 7  ;;  %v7189_v61 = vshrl.u32 %v19214_v30, 16  ;;  %v7192_v3 = vshll.u32 %v19214_v30, 16  ;;  %v7198_v18 = vshrl.u32 %v19216_v28, 16 }
 0x793   : > { %v7161_v9 = vsel %vm16309_vm0, %v7153_v22, %v7160_v17  ;;  %v19357_v1 = vor.u32 %v7167_v37, %v7166_v25  ;;  %v7170_v56 = vrot.slane %v7166_v25, 4  ;;  %v7177_v50 = vor.u32 %v7175_v44, %v19349_v49 }
 0x794   : > { %7391 = vst.msk [vmem:[#allocation4 + $0x70] sm:$0xf] %vm486_vm8, %v7161_v9  ;;  %v19362_v31 = vor.u32 %v7184_v54, %v7183_v2  ;;  %v7187_v63 = vrot.slane %v7183_v2, 4  ;;  %v19364_v26 = vrot.slane %v7189_v61, 7  ;;  %v7200_v17 = vrot.slane %v7198_v18, 7 }
 0x795   : > { %v7178_v30 = vsel %vm16309_vm0, %v7170_v56, %v7177_v50  ;;  %v7201_v22 = vshll.u32 %v19216_v28, 16  ;;  %v7206_v37 = vshrl.u32 %v19222_v33, 16  ;;  %v7209_v25 = vshll.u32 %v19222_v33, 16 }
 0x796   : > { %v7194_v44 = vor.u32 %v7192_v3, %v19364_v26  ;;  %v7204_v9 = vrot.slane %v7200_v17, 4  ;;  %v7215_v54 = vshrl.u32 %v19234_v5, 16  ;;  %7398 = vst.msk [vmem:[#allocation4 + $0x7c] sm:$0xf] %vm486_vm8, %v7178_v30  ;;  %v7218_v50 = vshll.u32 %v19234_v5, 16 }
 0x797   : > { %v19375_v2 = vor.u32 %v7201_v22, %v7200_v17  ;;  %v19377_v61 = vrot.slane %v7206_v37, 7  ;;  %v7223_v28 = vshrl.u32 %v19236_v14, 16  ;;  %v7226_v3 = vshll.u32 %v19236_v14, 16 }
 0x798   : > { %v7195_v33 = vsel %vm16309_vm0, %v7187_v63, %v7194_v44  ;;  %v7217_v18 = vrot.slane %v7215_v54, 7  ;;  %v7232_v56 = vshrl.u32 %v19240_v59, 16  ;;  %v7235_v22 = vshll.u32 %v19240_v59, 16 }
 0x799   : > { %v7211_v23 = vor.u32 %v7209_v25, %v19377_v61  ;;  %v19387_v17 = vrot.slane %v7223_v28, 7  ;;  %7405 = vst.msk [vmem:[#allocation4 + $0x88] sm:$0xf] %vm486_vm8, %v7195_v33  ;;  %v7240_v63 = vshrl.u32 %v19252_v36, 16  ;;  %v7243_v54 = vshll.u32 %v19252_v36, 16 }
 0x79a   : > { %v19391_v5 = vor.u32 %v7218_v50, %v7217_v18  ;;  %v7221_v37 = vrot.slane %v7217_v18, 4  ;;  %v7234_v43 = vrot.slane %v7232_v56, 7  ;;  %v7332_v28 = vld [vmem:[#allocation4 + $0xc] sm:$0xf]  ;;  %v7249_v50 = vshrl.u32 %v19254_v27, 16 }
 0x79b   : > { %v7212_v14 = vsel %vm16309_vm0, %v7204_v9, %v7211_v23  ;;  %v7228_v44 = vor.u32 %v7226_v3, %v19387_v17  ;;  %v19401_v33 = vrot.slane %v7240_v63, 7  ;;  %v7339_v18 = vld [vmem:[#allocation4 + $0x18] sm:$0xf]  ;;  %v7346_v56 = vld [vmem:[#allocation4 + $0x24] sm:$0xf]  ;;  %v7252_v9 = vshll.u32 %v19254_v27, 16 }
 0x79c   : > { %v19399_v30 = vor.u32 %v7235_v22, %v7234_v43  ;;  %v7238_v59 = vrot.slane %v7234_v43, 4  ;;  %7412 = vst.msk [vmem:[#allocation4 + $0x94] sm:$0xf] %vm486_vm8, %v7212_v14  ;;  %v7257_v3 = vshrl.u32 %v19258_v60, 16  ;;  %v7260_v36 = vshll.u32 %v19258_v60, 16 }
 0x79d   : > { %v7229_v23 = vsel %vm16309_vm0, %v7221_v37, %v7228_v44  ;;  %v7353_v22 = vld [vmem:[#allocation4 + $0x30] sm:$0xf]  ;;  %v7245_v63 = vor.u32 %v7243_v54, %v19401_v33  ;;  %v7251_v25 = vrot.slane %v7249_v50, 7  ;;  %v7266_v37 = vshrl.u32 %v19270_v7, 16  ;;  %v7367_v27 = vld [vmem:[#allocation4 + $0x48] sm:$0xf] }
 0x79e   : > { %7419 = vst.msk [vmem:[#allocation4 + $0xa0] sm:$0xf] %vm486_vm8, %v7229_v23  ;;  %v7360_v44 = vld [vmem:[#allocation4 + $0x3c] sm:$0xf]  ;;  %v19420_v40 = vrot.slane %v7257_v3, 7  ;;  %v7269_v57 = vshll.u32 %v19270_v7, 16 }
 0x79f   : > { %v7378_v60 = vld [vmem:[#allocation4 + $0x5c] sm:$0x1]  ;;  %v7274_v0 = vshrl.u32 %v19272_v53, 16  ;;  %v7277_v48 = vshll.u32 %v19272_v53, 16  ;;  %v7381_v54 = vld [vmem:[#allocation4 + $0x60] sm:$0xf]  ;;  %v7246_v50 = vsel %vm16309_vm0, %v7238_v59, %v7245_v63  ;;  %v19427_v4 = vor.u32 %v7252_v9, %v7251_v25 }
 0x7a0   : > { %v7392_v14 = vld [vmem:[#allocation4 + $0x74] sm:$0x1]  ;;  %v7255_v23 = vrot.slane %v7251_v25, 4  ;;  %v7268_v35 = vrot.slane %v7266_v37, 7  ;;  %v7402_v3 = vld [vmem:[#allocation4 + $0x84] sm:$0xf]  ;;  %v7262_v7 = vor.u32 %v7260_v36, %v19420_v40  ;;  %v7333_v53 = vsel %vm19412_vm9, %v19137_v29, %v7332_v28 }
 0x7a1   : > { %v19431_v20 = vrot.slane %v7274_v0, 7  ;;  %7426 = vst.msk [vmem:[#allocation4 + $0xac] sm:$0xf] %vm486_vm8, %v7246_v50  ;;  %v7409_v59 = vld [vmem:[#allocation4 + $0x90] sm:$0xf]  ;;  %v7340_v36 = vsel %vm19412_vm9, %v19193_v42, %v7339_v18  ;;  %v7347_v0 = vsel %vm19412_vm9, %v19226_v62, %v7346_v56  ;;  %v7361_v62 = vsel %vm19412_vm9, %v19281_v39, %v7360_v44 }
 0x7a2   : > { %v7413_v9 = vld [vmem:[#allocation4 + $0x98] sm:$0x1]  ;;  %v7416_v25 = vld [vmem:[#allocation4 + $0x9c] sm:$0xf]  ;;  %v7420_v63 = vld [vmem:[#allocation4 + $0xa4] sm:$0x1]  ;;  %v19437_v37 = vor.u32 %v7269_v57, %v7268_v35  ;;  %v7263_v28 = vsel %vm16309_vm0, %v7255_v23, %v7262_v7  ;;  %v7368_v56 = vsel %vm19412_vm9, %v19299_v32, %v7367_v27  ;;  %v7382_v32 = vsel %vm19412_vm9, %v19330_v10, %v7381_v54 }
 0x7a3   : > { %v7272_v55 = vrot.slane %v7268_v35, 4  ;;  %7334 = vst [vmem:[#allocation4 + $0xc] sm:$0xf] %v7333_v53  ;;  %v7427_v29 = vld [vmem:[#allocation4 + $0xb0] sm:$0x1]  ;;  %v7279_v50 = vor.u32 %v7277_v48, %v19431_v20  ;;  %v7281_v57 = vrot.slane %v19431_v20, 4  ;;  %v7354_v35 = vsel %vm19412_vm9, %v19261_v34, %v7353_v22 }
 0x7a4   : > { %7341 = vst [vmem:[#allocation4 + $0x18] sm:$0xf] %v7340_v36  ;;  %7348 = vst [vmem:[#allocation4 + $0x24] sm:$0xf] %v7347_v0  ;;  %v7430_v42 = vld [vmem:[#allocation4 + $0xb4] sm:$0xf]  ;;  %v7375_v20 = vsel %vm19412_vm9, %v19314_v51, %v7374_v8  ;;  %v7389_v51 = vsel %vm19412_vm9, %v19345_v46, %v7388_v12 }
 0x7a5   : > { %v7434_v18 = vld [vmem:[#allocation4 + $0xbc] sm:$0x1]  ;;  %v22030_v48 = vrot.slane %v19305_v6, 4  ;;  %7433 = vst.msk [vmem:[#allocation4 + $0xb8] sm:$0xf] %vm486_vm8, %v7263_v28  ;;  %v7280_v39 = vsel %vm16309_vm0, %v7272_v55, %v7279_v50  ;;  %v22032_v6 = vrot.slane %v19337_v16, 4  ;;  %v7396_v55 = vsel %vm19412_vm9, %v19357_v1, %v7395_v11 }
 0x7a6   : > { %7355 = vst [vmem:[#allocation4 + $0x30] sm:$0xf] %v7354_v35  ;;  %v7437_v22 = vld [vmem:[#allocation4 + $0xc0] sm:$0xf]  ;;  %7362 = vst [vmem:[#allocation4 + $0x3c] sm:$0xf] %v7361_v62  ;;  %v7403_v16 = vsel %vm19412_vm9, %v19362_v31, %v7402_v3 }
 0x7a7   : > { %v7379_v34 = vsel %vm18135_vm10, %v22030_v48, %v7378_v60  ;;  %v7393_v8 = vsel %vm18135_vm10, %v22032_v6, %v7392_v14  ;;  %7369 = vst [vmem:[#allocation4 + $0x48] sm:$0xf] %v7368_v56  ;;  %7376 = vst [vmem:[#allocation4 + $0x54] sm:$0xf] %v7375_v20  ;;  %v7441_v27 = vld [vmem:[#allocation4 + $0xc8] sm:$0x1] }
 0x7a8   : > { %7380 = vst [vmem:[#allocation4 + $0x5c] sm:$0x1] %v7379_v34  ;;  %7390 = vst [vmem:[#allocation4 + $0x6c] sm:$0xf] %v7389_v51  ;;  %v22033_v10 = vrot.slane %v19349_v49, 4  ;;  %v22034_v12 = vrot.slane %v19364_v26, 4  ;;  %v7410_v49 = vsel %vm19412_vm9, %v19375_v2, %v7409_v59  ;;  %v7424_v2 = vsel %vm19412_vm9, %v19399_v30, %v7423_v19 }
 0x7a9   : > { %7440 = vst.msk [vmem:[#allocation4 + $0xc4] sm:$0xf] %vm486_vm8, %v7280_v39  ;;  %7383 = vst [vmem:[#allocation4 + $0x60] sm:$0xf] %v7382_v32  ;;  %v7336_v44 = vld [vmem:[#allocation4 + $0x14] sm:$0x1]  ;;  %v7438_v19 = vsel %vm19412_vm9, %v19437_v37, %v7437_v22  ;;  %v7442_v30 = vsel %vm18135_vm10, %v7281_v57, %v7441_v27 }
 0x7aa   : > { %v7400_v46 = vsel %vm18135_vm10, %v22033_v10, %v7399_v15  ;;  %v7407_v14 = vsel %vm18135_vm10, %v22034_v12, %v7406_v58  ;;  %7394 = vst [vmem:[#allocation4 + $0x74] sm:$0x1] %v7393_v8  ;;  %v19493_v11 = vld [vmem:[#allocation4 + $0x10] sm:$0xf]  ;;  %7397 = vst [vmem:[#allocation4 + $0x78] sm:$0xf] %v7396_v55  ;;  %v7417_v58 = vsel %vm19412_vm9, %v19391_v5, %v7416_v25 }
 0x7ab   : > { %7404 = vst [vmem:[#allocation4 + $0x84] sm:$0xf] %v7403_v16  ;;  %7408 = vst [vmem:[#allocation4 + $0x8c] sm:$0x1] %v7407_v14  ;;  %v22035_v15 = vrot.slane %v19377_v61, 4  ;;  %v22036_v31 = vrot.slane %v19387_v17, 4  ;;  %v7431_v17 = vsel %vm19412_vm9, %v19427_v4, %v7430_v42 }
 0x7ac   : > { %7401 = vst [vmem:[#allocation4 + $0x80] sm:$0x1] %v7400_v46  ;;  %v7385_v60 = vld [vmem:[#allocation4 + $0x68] sm:$0x1]  ;;  %v7343_v54 = vld [vmem:[#allocation4 + $0x20] sm:$0x1] }
 0x7ad   : > { %v7414_v1 = vsel %vm18135_vm10, %v22035_v15, %v7413_v9  ;;  %v7421_v26 = vsel %vm18135_vm10, %v22036_v31, %v7420_v63  ;;  %7411 = vst [vmem:[#allocation4 + $0x90] sm:$0xf] %v7410_v49  ;;  %7418 = vst [vmem:[#allocation4 + $0x9c] sm:$0xf] %v7417_v58  ;;  %v22037_v61 = vrot.slane %v19401_v33, 4  ;;  %v22038_v3 = vrot.slane %v19420_v40, 4 }
 0x7ae   : > { %7415 = vst [vmem:[#allocation4 + $0x98] sm:$0x1] %v7414_v1  ;;  %7422 = vst [vmem:[#allocation4 + $0xa4] sm:$0x1] %v7421_v26  ;;  %v19523_v53 = vld [vmem:[#allocation4 + $0x70] sm:$0xf] }
 0x7af   : > { %v7428_v5 = vsel %vm18135_vm10, %v22037_v61, %v7427_v29  ;;  %v7435_v7 = vsel %vm18135_vm10, %v22038_v3, %v7434_v18  ;;  %v7350_v59 = vld [vmem:[#allocation4 + $0x2c] sm:$0x1]  ;;  %7425 = vst [vmem:[#allocation4 + $0xa8] sm:$0xf] %v7424_v2  ;;  %7432 = vst [vmem:[#allocation4 + $0xb4] sm:$0xf] %v7431_v17 }
 0x7b0   : > { %7429 = vst [vmem:[#allocation4 + $0xb0] sm:$0x1] %v7428_v5  ;;  %7436 = vst [vmem:[#allocation4 + $0xbc] sm:$0x1] %v7435_v7  ;;  %v22039_v4 = vrot.slane %v19140_v21, 4  ;;  %v7529_v9 = vshll.u32 %v19493_v11, 16 }
 0x7b1   : > { %v19534_v33 = vld [vmem:[#allocation4 + $0xc] sm:$0xf]  ;;  %7439 = vst [vmem:[#allocation4 + $0xc0] sm:$0xf] %v7438_v19  ;;  %7443 = vst [vmem:[#allocation4 + $0xc8] sm:$0x1] %v7442_v30 }
 0x7b2   : > { %v7337_v40 = vsel %vm18135_vm10, %v22039_v4, %v7336_v44  ;;  %v7520_v25 = vshrl.u32 %v19534_v33, 16  ;;  %v7523_v43 = vshll.u32 %v19534_v33, 16  ;;  %v7533_v63 = vshrl.u32 %v19493_v11, 16  ;;  %v19545_v36 = vld [vmem:[#allocation4 + $0x18] sm:$0xf]  ;;  %v22045_v20 = vld [vmem:[#allocation18_spill] sm:$0xff] }
 0x7b3   : > { %7338 = vst [vmem:[#allocation4 + $0x14] sm:$0x1] %v7337_v40  ;;  %v22040_v37 = vrot.slane %v19319_v52, 4  ;;  %v19547_v0 = vrot.slane %v7529_v9, 5  ;;  %v22041_v29 = vrot.slane %v19321_v47, 4  ;;  %v22042_v50 = vrot.slane %v19171_v45, 4 }
 0x7b4   : > { %v22043_v57 = vrot.slane %v19205_v38, 4  ;;  %v7522_v35 = vrot.slane %v7520_v25, 4  ;;  %v7525_v42 = vrot.slane %v7523_v43, 5  ;;  %v7535_v18 = vrot.slane %v7533_v63, 4  ;;  %v19565_v62 = vld [vmem:[#allocation4 + $0x60] sm:$0xf] }
 0x7b5   : > { %v7144_v21 = vsel %vm16309_vm0, %v22040_v37, %v19334_v24  ;;  %v7386_v28 = vsel %vm18135_vm10, %v22041_v29, %v7385_v60  ;;  %v7042_v52 = vsel %vm16309_vm0, %v22042_v50, %v19219_v13  ;;  %v7544_v47 = vshrl.u32 %v19545_v36, 16  ;;  %v19568_v56 = vld [vmem:[#allocation4 + $0x6c] sm:$0xf]  ;;  %v22044_v13 = vld [vmem:[#allocation9_spill] sm:$0xff]  ;;  %v22049_v12 = vld [vmem:[#allocation26_spill] sm:$0xff] }
 0x7b6   : > { %7384 = vst.msk [vmem:[#allocation4 + $0x64] sm:$0xf] %vm486_vm8, %v7144_v21  ;;  %v7344_v24 = vsel %vm18135_vm10, %v22043_v57, %v7343_v54  ;;  %7387 = vst [vmem:[#allocation4 + $0x68] sm:$0x1] %v7386_v28  ;;  %v7547_v45 = vshll.u32 %v19545_v36, 16  ;;  %v7721_v38 = vshll.u32 %v19523_v53, 16  ;;  %v7526_v51 = vor.u32 %v7525_v42, %v7522_v35 }
 0x7b7   : > { %7342 = vst.msk [vmem:[#allocation4 + $0x1c] sm:$0xf] %vm486_vm8, %v7042_v52  ;;  %7345 = vst [vmem:[#allocation4 + $0x20] sm:$0x1] %v7344_v24  ;;  %v22046_v48 = vrot.slane %v22045_v20, 4  ;;  %v22047_v22 = vld [vmem:[#allocation19_spill] sm:$0xff]  ;;  %v7536_v6 = vor.u32 %v7535_v18, %v19547_v0 }
 0x7b8   : > { %v22048_v39 = vrot.slane %v22047_v22, 4  ;;  %v7688_v8 = vshrl.u32 %v19565_v62, 16  ;;  %v7691_v27 = vshll.u32 %v19565_v62, 16  ;;  %v7546_v55 = vrot.slane %v7544_v47, 4  ;;  %v22053_v40 = vld [vmem:[#allocation5_spill] sm:$0xff]  ;;  %v22054_v9 = vld [vmem:[#allocation10_spill] sm:$0xff] }
 0x7b9   : > { %v7059_v34 = vsel %vm16309_vm0, %v22046_v48, %v22044_v13  ;;  %v7549_v10 = vrot.slane %v7547_v45, 5  ;;  %v7712_v46 = vshrl.u32 %v19568_v56, 16  ;;  %v7715_v16 = vshll.u32 %v19568_v56, 16  ;;  %v19614_v57 = vld [vmem:[#allocation4 + $0x74] sm:$0x1] }
 0x7ba   : > { %v7351_v32 = vsel %vm18135_vm10, %v22048_v39, %v7350_v59  ;;  %7349 = vst.msk [vmem:[#allocation4 + $0x28] sm:$0xf] %vm486_vm8, %v7059_v34  ;;  %v7111_v14 = vrot.slane %v22049_v12, 4  ;;  %v7527_v44 = vrot.slane %v7526_v51, 4  ;;  %v7690_v49 = vrot.slane %v7688_v8, 4  ;;  %22056 = vst [vmem:[#allocation30_spill] sm:$0xff] %v19614_v57 }
 0x7bb   : > { %7352 = vst [vmem:[#allocation4 + $0x2c] sm:$0x1] %v7351_v32  ;;  %v7693_v15 = vrot.slane %v7691_v27, 5  ;;  %v19587_v1 = vld [vmem:[#allocation4 + $0x14] sm:$0x1]  ;;  %v7537_v58 = vrot.slane %v7536_v6, 4  ;;  %v7550_v31 = vor.u32 %v7549_v10, %v7546_v55 }
 0x7bc   : > { %22050 = vst [vmem:[#allocation28_spill] sm:$0xff] %v19587_v1  ;;  %v7714_v26 = vrot.slane %v7712_v46, 4  ;;  %v7717_v60 = vrot.slane %v7715_v16, 5  ;;  %v7539_v54 = vshll.u32 %v19587_v1, 16  ;;  %v19592_v5 = vrot.slane %v7721_v38, 5 }
 0x7bd   : > { %v19590_v2 = vld [vmem:[#allocation4 + $0x64] sm:$0xf]  ;;  %v7694_v61 = vor.u32 %v7693_v15, %v7690_v49  ;;  %v7725_v17 = vshrl.u32 %v19523_v53, 16  ;;  %v7532_v7 = vsel %vm16062_vm14, %v7527_v44, %v19547_v0  ;;  %v19598_v59 = vld [vmem:[#allocation4 + $0x68] sm:$0x1]  ;;  %v22055_v25 = vrot.slane %v22054_v9, 4 }
 0x7be   : > { %22052 = vst [vmem:[#allocation29_spill] sm:$0xff] %v19598_v59  ;;  %v7697_v19 = vshll.u32 %v19590_v2, 16  ;;  %v7701_v30 = vshrl.u32 %v19590_v2, 16  ;;  %v19602_v4 = vld [vmem:[#allocation4 + $0x1c] sm:$0xf]  ;;  %v7541_v63 = vrot.slane %v7539_v54, 5  ;;  %v7718_v0 = vor.u32 %v7717_v60, %v7714_v26 }
 0x7bf   : > { %v7076_v43 = vsel %vm16309_vm0, %v22055_v25, %v22053_v40  ;;  %v7695_v53 = vrot.slane %v7694_v61, 4  ;;  %v7707_v37 = vshll.u32 %v19598_v59, 16  ;;  %v19610_v21 = vld [vmem:[#allocation4 + $0x20] sm:$0x1]  ;;  %v7551_v50 = vrot.slane %v7550_v31, 4 }
 0x7c0   : > { %7356 = vst.msk [vmem:[#allocation4 + $0x34] sm:$0xf] %vm486_vm8, %v7076_v43  ;;  %v7699_v29 = vrot.slane %v7697_v19, 5  ;;  %v7703_v28 = vrot.slane %v7701_v30, 4  ;;  %v7553_v52 = vshll.u32 %v19602_v4, 16  ;;  %v7542_v24 = vsel %vm16062_vm14, %v7537_v58, %v7541_v63 }
 0x7c1   : > { %v7709_v35 = vrot.slane %v7707_v37, 5  ;;  %v7557_v42 = vshrl.u32 %v19602_v4, 16  ;;  %v7563_v18 = vshll.u32 %v19610_v21, 16  ;;  %v19620_v47 = vld [vmem:[#allocation4 + $0x78] sm:$0xf]  ;;  %v12911_v45 = vcombine.low %v7532_v7, %v7542_v24 }
 0x7c2   : > { %22057 = vst [vmem:[#allocation31_spill] sm:$0xff] %v19620_v47  ;;  %v7700_v38 = vsel %vm16062_vm14, %v7695_v53, %v7699_v29  ;;  %v7704_v13 = vor.u32 %v7703_v28, %v7699_v29  ;;  %v7555_v20 = vrot.slane %v7553_v52, 5  ;;  %v7719_v22 = vrot.slane %v7718_v0, 4  ;;  %v19624_v32 = vld [vmem:[#allocation4 + $0x7c] sm:$0xf] }
 0x7c3   : > { %v7559_v48 = vrot.slane %v7557_v42, 4  ;;  %v7565_v34 = vrot.slane %v7563_v18, 5  ;;  %v7727_v39 = vrot.slane %v7725_v17, 4  ;;  %13970 = vmatmul.mubr.msk.bf16.vlgmr.msra.gmra.mrb[32].mxu0 %vm6305_vm12, %v12911_v45  ;;  %v7731_v8 = vshll.u32 %v19614_v57, 16  ;;  %v19635_v16 = vld [vmem:[#allocation4 + $0x80] sm:$0x1] }
 0x7c4   : > { %v7705_v51 = vrot.slane %v7704_v13, 4  ;;  %v7556_v6 = vsel %vm16062_vm14, %v7551_v50, %v7555_v20  ;;  %v7736_v27 = vshrl.u32 %v19620_v47, 16  ;;  %v7724_v10 = vsel %vm16062_vm14, %v7719_v22, %v19592_v5  ;;  %22058 = vst [vmem:[#allocation32_spill] sm:$0xff] %v19635_v16  ;;  %v19638_v49 = vld [vmem:[#allocation4 + $0x24] sm:$0xf] }
 0x7c5   : > { %v7560_v55 = vor.u32 %v7559_v48, %v7555_v20  ;;  %v7728_v46 = vor.u32 %v7727_v39, %v19592_v5  ;;  %v7739_v44 = vshll.u32 %v19620_v47, 16  ;;  %v7733_v58 = vrot.slane %v7731_v8, 5  ;;  %v19645_v30 = vld [vmem:[#allocation4 + $0x28] sm:$0xf]  ;;  %v19653_v63 = vld [vmem:[#allocation4 + $0x2c] sm:$0x1] }
 0x7c6   : > { %v7710_v15 = vsel %vm16062_vm14, %v7705_v51, %v7709_v35  ;;  %v7738_v31 = vrot.slane %v7736_v27, 4  ;;  %v7745_v26 = vshll.u32 %v19624_v32, 16  ;;  %v7749_v5 = vshrl.u32 %v19624_v32, 16  ;;  %v7357_v37 = vld [vmem:[#allocation4 + $0x38] sm:$0x1]  ;;  %v22059_v48 = vld [vmem:[#allocation14_spill] sm:$0xff] }
 0x7c7   : > { %v12918_v60 = vcombine.low %v7700_v38, %v7710_v15  ;;  %v7561_v54 = vrot.slane %v7560_v55, 4  ;;  %v7729_v61 = vrot.slane %v7728_v46, 4  ;;  %v7741_v17 = vrot.slane %v7739_v44, 5  ;;  %v19656_v52 = vld [vmem:[#allocation4 + $0x30] sm:$0xf]  ;;  %v22061_v51 = vld [vmem:[#allocation21_spill] sm:$0xff] }
 0x7c8   : > { %v7747_v7 = vrot.slane %v7745_v26, 5  ;;  %v7755_v19 = vshll.u32 %v19635_v16, 16  ;;  %v7568_v40 = vshrl.u32 %v19638_v49, 16  ;;  %v7571_v53 = vshll.u32 %v19638_v49, 16  ;;  %v19662_v45 = vld [vmem:[%s21469_s7 + $0x8] sm:$0xf] }
 0x7c9   : > { %13985 = vmatprep.mubr.msk.bf16.mxu1 %vm6305_vm12, %v12918_v60  ;;  %v7566_v9 = vsel %vm16062_vm14, %v7561_v54, %v7565_v34  ;;  %v7734_v25 = vsel %vm16062_vm14, %v7729_v61, %v7733_v58  ;;  %v7742_v43 = vor.u32 %v7741_v17, %v7738_v31  ;;  %v7751_v28 = vrot.slane %v7749_v5, 4  ;;  %v19672_v39 = vld [vmem:[#allocation4 + $0x34] sm:$0xf]  ;;  %v19681_v31 = vld [vmem:[#allocation4 + $0x88] sm:$0xf] }
 0x7ca   : > { %v12912_v0 = vcombine.low %v7556_v6, %v7566_v9  ;;  %v12919_v29 = vcombine.low %v7724_v10, %v7734_v25  ;;  %v7757_v50 = vrot.slane %v7755_v19, 5  ;;  %v7570_v35 = vrot.slane %v7568_v40, 4  ;;  %v19678_v10 = vld [vmem:[#allocation4 + $0x84] sm:$0xf]  ;;  %v19683_v26 = vld [vmem:[#allocation4 + $0x8c] sm:$0x1] }
 0x7cb   : > { %v7743_v24 = vrot.slane %v7742_v43, 4  ;;  %v7573_v42 = vrot.slane %v7571_v53, 5  ;;  %v7577_v18 = vshll.u32 %v19645_v30, 16  ;;  %v7752_v38 = vor.u32 %v7751_v28, %v7747_v7 }
 0x7cc   : > { %13973 = vmatprep.mubr.msk.bf16.mxu0 %vm6305_vm12, %v12912_v0  ;;  %13986 = vmatmul.mubr.msk.bf16.vlgmr.msra.gmra.mrb[0].mxu1 %vm6305_vm12, %v12919_v29  ;;  %v7581_v13 = vshrl.u32 %v19645_v30, 16  ;;  %v7587_v20 = vshll.u32 %v19653_v63, 16  ;;  %v22060_v34 = vrot.slane %v22059_v48, 4  ;;  %v7592_v55 = vshrl.u32 %v19656_v52, 16 }
 0x7cd   : > { %14002 = vmatpush3.bf16.msra.mxu1 %v22061_v51  ;;  %v7748_v6 = vsel %vm16062_vm14, %v7743_v24, %v7747_v7  ;;  %v7574_v8 = vor.u32 %v7573_v42, %v7570_v35  ;;  %v7579_v27 = vrot.slane %v7577_v18, 5  ;;  %v7753_v46 = vrot.slane %v7752_v38, 4  ;;  %v19689_v7 = vld [vmem:[#allocation4 + $0x90] sm:$0xf]  ;;  %v19697_v35 = vld [vmem:[#allocation4 + $0x94] sm:$0xf] }
 0x7ce   : > { %v7358_v22 = vsel %vm18135_vm10, %v22060_v34, %v7357_v37  ;;  %v7583_v44 = vrot.slane %v7581_v13, 4  ;;  %v7589_v15 = vrot.slane %v7587_v20, 5  ;;  %v7595_v58 = vshll.u32 %v19656_v52, 16  ;;  %14865 = vmatprep.subr.msk.bf16.mxu1 %vm7975_vm6, %v19662_v45  ;;  %v19703_v13 = vld [vmem:[#allocation4 + $0x98] sm:$0x1] }
 0x7cf   : > { %7359 = vst [vmem:[#allocation4 + $0x38] sm:$0x1] %v7358_v22  ;;  %v7575_v60 = vrot.slane %v7574_v8, 4  ;;  %v7594_v54 = vrot.slane %v7592_v55, 4  ;;  %v7601_v61 = vshll.u32 %v19672_v39, 16  ;;  %v7605_v17 = vshrl.u32 %v19672_v39, 16 }
 0x7d0   : > { %v7758_v5 = vsel %vm16062_vm14, %v7753_v46, %v7757_v50  ;;  %v7584_v19 = vor.u32 %v7583_v44, %v7579_v27  ;;  %v7597_v40 = vrot.slane %v7595_v58, 5  ;;  %v7760_v9 = vshrl.u32 %v19678_v10, 16 }
 0x7d1   : > { %v12920_v25 = vcombine.low %v7748_v6, %v7758_v5  ;;  %v7580_v43 = vsel %vm16062_vm14, %v7575_v60, %v7579_v27  ;;  %v7603_v53 = vrot.slane %v7601_v61, 5  ;;  %v7607_v37 = vrot.slane %v7605_v17, 4 }
 0x7d2   : > { %v7585_v0 = vrot.slane %v7584_v19, 4  ;;  %v7598_v29 = vor.u32 %v7597_v40, %v7594_v54  ;;  %v7762_v28 = vrot.slane %v7760_v9, 4  ;;  %v7763_v24 = vshll.u32 %v19678_v10, 16  ;;  %v7364_v54 = vld [vmem:[#allocation4 + $0x44] sm:$0x1] }
 0x7d3   : > { %13989 = vmatprep.mubr.msk.bf16.mxu1 %vm6305_vm12, %v12920_v25  ;;  %v7608_v50 = vor.u32 %v7607_v37, %v7603_v53  ;;  %v7769_v42 = vshll.u32 %v19681_v31, 16  ;;  %v7773_v18 = vshrl.u32 %v19681_v31, 16  ;;  %v7779_v38 = vshll.u32 %v19683_v26, 16  ;;  %v19716_v19 = vld [vmem:[#allocation4 + $0x3c] sm:$0xf] }
 0x7d4   : > { %v7590_v20 = vsel %vm16062_vm14, %v7585_v0, %v7589_v15  ;;  %v7599_v34 = vrot.slane %v7598_v29, 4  ;;  %v7765_v22 = vrot.slane %v7763_v24, 5  ;;  %v7784_v51 = vshrl.u32 %v19689_v7, 16  ;;  %v22063_v24 = vld [vmem:[#allocation11_spill] sm:$0xff] }
 0x7d5   : > { %v12913_v6 = vcombine.low %v7580_v43, %v7590_v20  ;;  %v7609_v8 = vrot.slane %v7608_v50, 4  ;;  %v7771_v55 = vrot.slane %v7769_v42, 5  ;;  %v7775_v58 = vrot.slane %v7773_v18, 4  ;;  %v19727_v18 = vld [vmem:[#allocation4 + $0x48] sm:$0xf] }
 0x7d6   : > { %v19707_v48 = vld [vmem:[#allocation4 + $0x38] sm:$0x1]  ;;  %v7604_v46 = vsel %vm16062_vm14, %v7599_v34, %v7603_v53  ;;  %v7766_v44 = vor.u32 %v7765_v22, %v7762_v28  ;;  %v7781_v60 = vrot.slane %v7779_v38, 5  ;;  %v7786_v61 = vrot.slane %v7784_v51, 4  ;;  %v7371_v53 = vld [vmem:[#allocation4 + $0x50] sm:$0x1] }
 0x7d7   : > { %v7611_v27 = vshll.u32 %v19707_v48, 16  ;;  %13974 = vmatmul.mubr.msk.bf16.gmra.mrb[36].mxu0 %vm6305_vm12, %v12913_v6  ;;  %v7787_v17 = vshll.u32 %v19689_v7, 16  ;;  %v7793_v5 = vshll.u32 %v19697_v35, 16  ;;  %v7776_v9 = vor.u32 %v7775_v58, %v7771_v55  ;;  %v22062_v28 = vld [vmem:[#allocation25_spill] sm:$0xff]  ;;  %v19734_v6 = vld [vmem:[#allocation4 + $0xa0] sm:$0xf] }
 0x7d8   : > { %v7767_v40 = vrot.slane %v7766_v44, 4  ;;  %v7797_v25 = vshrl.u32 %v19697_v35, 16  ;;  %v7803_v43 = vshll.u32 %v19703_v13, 16  ;;  %v22064_v50 = vrot.slane %v22063_v24, 4  ;;  %v19732_v51 = vld [vmem:[#allocation4 + $0x9c] sm:$0xf] }
 0x7d9   : > { %v7613_v15 = vrot.slane %v7611_v27, 5  ;;  %v7789_v0 = vrot.slane %v7787_v17, 5  ;;  %v7795_v29 = vrot.slane %v7793_v5, 5  ;;  %v7777_v34 = vrot.slane %v7776_v9, 4  ;;  %v22065_v44 = vld [vmem:[#allocation23_spill] sm:$0xff]  ;;  %v22068_v9 = vld [vmem:[#allocation24_spill] sm:$0xff] }
 0x7da   : > { %v7093_v42 = vsel %vm16309_vm0, %v22064_v50, %v22062_v28  ;;  %v7772_v20 = vsel %vm16062_vm14, %v7767_v40, %v7771_v55  ;;  %v7799_v22 = vrot.slane %v7797_v25, 4  ;;  %v7805_v27 = vrot.slane %v7803_v43, 5  ;;  %v22067_v40 = vld [vmem:[#allocation27_spill] sm:$0xff] }
 0x7db   : > { %v7614_v37 = vsel %vm16062_vm14, %v7609_v8, %v7613_v15  ;;  %7363 = vst.msk [vmem:[#allocation4 + $0x40] sm:$0xf] %vm486_vm8, %v7093_v42  ;;  %v7790_v8 = vor.u32 %v7789_v0, %v7786_v61  ;;  %v22066_v58 = vrot.slane %v22065_v44, 4  ;;  %v7782_v55 = vsel %vm16062_vm14, %v7777_v34, %v7781_v60  ;;  %v19757_v42 = vld [vmem:[#allocation4 + $0xa4] sm:$0x1] }
 0x7dc   : > { %v12914_v38 = vcombine.low %v7604_v46, %v7614_v37  ;;  %v7616_v46 = vshrl.u32 %v19716_v19, 16  ;;  %v7800_v17 = vor.u32 %v7799_v22, %v7795_v29  ;;  %v7619_v5 = vshll.u32 %v19716_v19, 16 }
 0x7dd   : > { %v7365_v15 = vsel %vm18135_vm10, %v22066_v58, %v7364_v54  ;;  %v22069_v61 = vrot.slane %v22068_v9, 4  ;;  %v12921_v43 = vcombine.low %v7772_v20, %v7782_v55  ;;  %v7791_v37 = vrot.slane %v7790_v8, 4 }
 0x7de   : > { %13977 = vmatprep.mubr.msk.bf16.mxu0 %vm6305_vm12, %v12914_v38  ;;  %7366 = vst [vmem:[#allocation4 + $0x44] sm:$0x1] %v7365_v15  ;;  %v7618_v54 = vrot.slane %v7616_v46, 4  ;;  %v7372_v60 = vsel %vm18135_vm10, %v7111_v14, %v7371_v53  ;;  %v7801_v0 = vrot.slane %v7800_v17, 4  ;;  %v7621_v28 = vrot.slane %v7619_v5, 5 }
 0x7df   : > { %v7110_v25 = vsel %vm16309_vm0, %v22069_v61, %v22067_v40  ;;  %7373 = vst [vmem:[#allocation4 + $0x50] sm:$0x1] %v7372_v60  ;;  %v7640_v24 = vshrl.u32 %v19727_v18, 16  ;;  %v7643_v50 = vshll.u32 %v19727_v18, 16  ;;  %13990 = vmatmul.mubr.msk.bf16.gmra.mrb[4].mxu1 %vm6305_vm12, %v12921_v43  ;;  %v7796_v41 = vsel %vm16062_vm14, %v7791_v37, %v7795_v29  ;;  %v19765_v14 = vld [vmem:[#allocation4 + $0xa8] sm:$0xf] }
 0x7e0   : > { %7370 = vst.msk [vmem:[#allocation4 + $0x4c] sm:$0xf] %vm486_vm8, %v7110_v25  ;;  %v7808_v38 = vshrl.u32 %v19732_v51, 16  ;;  %v7811_v12 = vshll.u32 %v19732_v51, 16  ;;  %v7817_v23 = vshll.u32 %v19734_v6, 16  ;;  %v7806_v53 = vsel %vm16062_vm14, %v7801_v0, %v7805_v27 }
 0x7e1   : > { %v7622_v20 = vor.u32 %v7621_v28, %v7618_v54  ;;  %v7642_v34 = vrot.slane %v7640_v24, 4  ;;  %v7645_v22 = vrot.slane %v7643_v50, 5  ;;  %v12922_v8 = vcombine.low %v7796_v41, %v7806_v53 }
 0x7e2   : > { %v19769_v44 = vld [vmem:[#allocation4 + $0x40] sm:$0xf]  ;;  %v7810_v58 = vrot.slane %v7808_v38, 4  ;;  %v7813_v15 = vrot.slane %v7811_v12, 5  ;;  %v7819_v29 = vrot.slane %v7817_v23, 5  ;;  %v7821_v9 = vshrl.u32 %v19734_v6, 16 }
 0x7e3   : > { %v7623_v46 = vrot.slane %v7622_v20, 4  ;;  %v7625_v55 = vshll.u32 %v19769_v44, 16  ;;  %v7629_v17 = vshrl.u32 %v19769_v44, 16  ;;  %v7646_v5 = vor.u32 %v7645_v22, %v7642_v34  ;;  %13993 = vmatprep.mubr.msk.bf16.mxu1 %vm6305_vm12, %v12922_v8 }
 0x7e4   : > { %v7814_v27 = vor.u32 %v7813_v15, %v7810_v58  ;;  %v7827_v61 = vshll.u32 %v19757_v42, 16  ;;  %v7832_v25 = vshrl.u32 %v19765_v14, 16  ;;  %v7823_v38 = vrot.slane %v7821_v9, 4  ;;  %v19791_v15 = vld [vmem:[#allocation4 + $0xac] sm:$0xf] }
 0x7e5   : > { %v19774_v40 = vld [vmem:[#allocation4 + $0x44] sm:$0x1]  ;;  %v7627_v43 = vrot.slane %v7625_v55, 5  ;;  %v7631_v37 = vrot.slane %v7629_v17, 4  ;;  %v7647_v0 = vrot.slane %v7646_v5, 4 }
 0x7e6   : > { %v7635_v54 = vshll.u32 %v19774_v40, 16  ;;  %v19782_v28 = vld [vmem:[#allocation4 + $0x50] sm:$0x1]  ;;  %v7815_v41 = vrot.slane %v7814_v27, 4  ;;  %v7824_v58 = vor.u32 %v7823_v38, %v7819_v29  ;;  %v7829_v27 = vrot.slane %v7827_v61, 5 }
 0x7e7   : > { %v19780_v60 = vld [vmem:[#allocation4 + $0x4c] sm:$0xf]  ;;  %v7628_v12 = vsel %vm16062_vm14, %v7623_v46, %v7627_v43  ;;  %v7632_v23 = vor.u32 %v7631_v37, %v7627_v43  ;;  %v7659_v20 = vshll.u32 %v19782_v28, 16  ;;  %v19793_v55 = vld [vmem:[#allocation4 + $0xb0] sm:$0x1]  ;;  %v7834_v9 = vrot.slane %v7832_v25, 4 }
 0x7e8   : > { %v7649_v24 = vshll.u32 %v19780_v60, 16  ;;  %v7653_v50 = vshrl.u32 %v19780_v60, 16  ;;  %v7637_v53 = vrot.slane %v7635_v54, 5  ;;  %v7820_v8 = vsel %vm16062_vm14, %v7815_v41, %v7819_v29  ;;  %v19803_v38 = vld [vmem:[#allocation4 + $0x54] sm:$0xf] }
 0x7e9   : > { %v7633_v17 = vrot.slane %v7632_v23, 4  ;;  %v7661_v5 = vrot.slane %v7659_v20, 5  ;;  %v7825_v37 = vrot.slane %v7824_v58, 4  ;;  %v7835_v54 = vshll.u32 %v19765_v14, 16  ;;  %v19807_v20 = vld [vmem:[#allocation4 + $0x58] sm:$0xf] }
 0x7ea   : > { %v7651_v34 = vrot.slane %v7649_v24, 5  ;;  %v7655_v22 = vrot.slane %v7653_v50, 4  ;;  %v7841_v29 = vshll.u32 %v19791_v15, 16  ;;  %v7845_v50 = vshrl.u32 %v19791_v15, 16 }
 0x7eb   : > { %v7638_v24 = vsel %vm16062_vm14, %v7633_v17, %v7637_v53  ;;  %v7851_v41 = vshll.u32 %v19793_v55, 16  ;;  %v7837_v23 = vrot.slane %v7835_v54, 5  ;;  %v19809_v17 = vld [vmem:[#allocation4 + $0x5c] sm:$0x1]  ;;  %v7673_v54 = vshll.u32 %v19807_v20, 16 }
 0x7ec   : > { %v7652_v46 = vsel %vm16062_vm14, %v7647_v0, %v7651_v34  ;;  %v7656_v43 = vor.u32 %v7655_v22, %v7651_v34  ;;  %v12915_v61 = vcombine.low %v7628_v12, %v7638_v24  ;;  %v7830_v0 = vsel %vm16062_vm14, %v7825_v37, %v7829_v27  ;;  %v19816_v27 = vld [vmem:[#allocation4 + $0xb4] sm:$0xf] }
 0x7ed   : > { %v12923_v34 = vcombine.low %v7820_v8, %v7830_v0  ;;  %v7843_v22 = vrot.slane %v7841_v29, 5  ;;  %v7847_v58 = vrot.slane %v7845_v50, 4  ;;  %v7853_v53 = vrot.slane %v7851_v41, 5 }
 0x7ee   : > { %v7657_v25 = vrot.slane %v7656_v43, 4  ;;  %13978 = vmatmul.mubr.msk.bf16.gmra.mrb[40].mxu0 %vm6305_vm12, %v12915_v61  ;;  %v7838_v57 = vor.u32 %v7837_v23, %v7834_v9  ;;  %v7664_v12 = vshrl.u32 %v19803_v38, 16  ;;  %v7667_v43 = vshll.u32 %v19803_v38, 16  ;;  %v19822_v9 = vld [vmem:[#allocation4 + $0xb8] sm:$0xf] }
 0x7ef   : > { %13994 = vmatmul.mubr.msk.bf16.gmra.mrb[8].mxu1 %vm6305_vm12, %v12923_v34  ;;  %v7848_v8 = vor.u32 %v7847_v58, %v7843_v22  ;;  %v7677_v24 = vshrl.u32 %v19807_v20, 16  ;;  %v7859_v34 = vshll.u32 %v19816_v27, 16  ;;  %v7869_v59 = vshrl.u32 %v19822_v9, 16 }
 0x7f0   : > { %v7662_v16 = vsel %vm16062_vm14, %v7657_v25, %v7661_v5  ;;  %v7839_v29 = vrot.slane %v7838_v57, 4  ;;  %v7666_v50 = vrot.slane %v7664_v12, 4  ;;  %v7669_v41 = vrot.slane %v7667_v43, 5  ;;  %v19831_v12 = vld [vmem:[#allocation4 + $0xbc] sm:$0x1] }
 0x7f1   : > { %v12916_v37 = vcombine.low %v7652_v46, %v7662_v16  ;;  %v7683_v5 = vshll.u32 %v19809_v17, 16  ;;  %v7849_v61 = vrot.slane %v7848_v8, 4  ;;  %v7675_v25 = vrot.slane %v7673_v54, 5 }
 0x7f2   : > { %v7679_v0 = vrot.slane %v7677_v24, 4  ;;  %v7856_v16 = vshrl.u32 %v19816_v27, 16  ;;  %v7844_v46 = vsel %vm16062_vm14, %v7839_v29, %v7843_v22  ;;  %v7670_v23 = vor.u32 %v7669_v41, %v7666_v50 }
 0x7f3   : > { %13981 = vmatprep.mubr.msk.bf16.mxu0 %vm6305_vm12, %v12916_v37  ;;  %v7854_v57 = vsel %vm16062_vm14, %v7849_v61, %v7853_v53  ;;  %v7865_v37 = vshll.u32 %v19822_v9, 16  ;;  %v7861_v24 = vrot.slane %v7859_v34, 5  ;;  %v7685_v47 = vrot.slane %v7683_v5, 5 }
 0x7f4   : > { %v7680_v58 = vor.u32 %v7679_v0, %v7675_v25  ;;  %v7858_v43 = vrot.slane %v7856_v16, 4  ;;  %v12924_v8 = vcombine.low %v7844_v46, %v7854_v57  ;;  %v7671_v54 = vrot.slane %v7670_v23, 4 }
 0x7f5   : > { %v7867_v22 = vrot.slane %v7865_v37, 5  ;;  %v7871_v50 = vrot.slane %v7869_v59, 4  ;;  %v7875_v41 = vshll.u32 %v19831_v12, 16  ;;  %v12944_v0 = vcombine.low %v19545_v36, %v19602_v4 }
 0x7f6   : > { %v7681_v1 = vrot.slane %v7680_v58, 4  ;;  %13997 = vmatprep.mubr.msk.bf16.mxu1 %vm6305_vm12, %v12924_v8  ;;  %v7676_v29 = vsel %vm16062_vm14, %v7671_v54, %v7675_v25  ;;  %v7862_v53 = vor.u32 %v7861_v24, %v7858_v43  ;;  %v12945_v5 = vcombine.low %v19638_v49, %v19645_v30  ;;  %v15235_v58 = vld [vmem:[#allocation4] sm:$0xf]  ;;  %v19856_v43 = vld [vmem:[#allocation4 + $0x4] sm:$0xf] }
 0x7f7   : > { %v7872_v23 = vor.u32 %v7871_v50, %v7867_v22  ;;  %v7877_v34 = vrot.slane %v7875_v41, 5  ;;  %v12953_v57 = vcombine.low %v19678_v10, %v19681_v31  ;;  %v12955_v36 = vcombine.low %v19732_v51, %v19734_v6  ;;  %v8434_v24 = vld [vmem:[#allocation4 + $0x18] sm:$0xe] }
 0x7f8   : > { %v7686_v61 = vsel %vm16062_vm14, %v7681_v1, %v7685_v47  ;;  %v7863_v46 = vrot.slane %v7862_v53, 4  ;;  %v12954_v1 = vcombine.low %v19689_v7, %v19697_v35  ;;  %v12942_v37 = vcombine.low %v15235_v58, %v19856_v43  ;;  %v8437_v58 = vld [vmem:[#allocation4 + $0x3c] sm:$0xe]  ;;  %v15239_v7 = vld [vmem:[#allocation4 + $0x10] sm:$0xf] }
 0x7f9   : > { %v12917_v16 = vcombine.low %v7676_v29, %v7686_v61  ;;  %v7873_v59 = vrot.slane %v7872_v23, 4  ;;  %v12956_v8 = vcombine.low %v19765_v14, %v19791_v15  ;;  %v8435_v29 = vld [vmem:[#allocation4 + $0x24] sm:$0xe]  ;;  %v12977_v53 = vrot.slane %v8434_v24, 9  ;;  %v22073_v14 = vld [vmem:[#allocation28_spill] sm:$0xff] }
 0x7fa   : > { %v7868_v25 = vsel %vm16062_vm14, %v7863_v46, %v7867_v22  ;;  %v8498_v50 = vrot.slane %v19602_v4, 5  ;;  %v12978_v41 = vrot.slane %v8435_v29, 9  ;;  %v8505_v61 = vrot.slane %v19645_v30, 5  ;;  %v8438_v29 = vld [vmem:[#allocation4 + $0x48] sm:$0xe] }
 0x7fb   : > { %13982 = vmatmul.mubr.msk.bf16.gmra.mrb[44].mxu0 %vm6305_vm12, %v12917_v16  ;;  %v7878_v47 = vsel %vm16062_vm14, %v7873_v59, %v7877_v34  ;;  %v8436_v16 = vld [vmem:[#allocation4 + $0x30] sm:$0xe]  ;;  %v8501_v23 = vrot.slane %v19610_v21, 5  ;;  %v12943_v59 = vcombine.low %v19534_v33, %v19493_v11  ;;  %v8512_v21 = vrot.slane %v19672_v39, 5  ;;  %v19899_v11 = vld [vmem:[%s21469_s7 + $0xc] sm:$0xf] }
 0x7fc   : > { %v12925_v22 = vcombine.low %v7868_v25, %v7878_v47  ;;  %v8500_v46 = vrot.slane %v8498_v50, 4  ;;  %v8691_v25 = vsel %vm7975_vm6, %v19662_v45, 0  ;;  %v8507_v34 = vrot.slane %v8505_v61, 4 }
 0x7fd   : > { %v8508_v47 = vrot.slane %v19653_v63, 5  ;;  %v19886_v33 = vsel %vm16900_vm7, %v12978_v41, %v8505_v61  ;;  %v8515_v45 = vrot.slane %v19707_v48, 5  ;;  %v12981_v61 = vrot.slane %v8438_v29, 9 }
 0x7fe   : > { %13998 = vmatmul.mubr.msk.bf16.gmra.mrb[12].mxu1 %vm6305_vm12, %v12925_v22  ;;  %v19879_v24 = vsel %vm16900_vm7, %v8500_v46, %v8501_v23  ;;  %v12979_v22 = vrot.slane %v8436_v16, 9  ;;  %v12980_v16 = vrot.slane %v8437_v58, 9  ;;  %v8519_v46 = vrot.slane %v19769_v44, 5  ;;  %v8439_v23 = vld [vmem:[#allocation4 + $0x54] sm:$0xe] }
 0x7ff   : > { %14003 = vmatprep.mubr.msk.bf16.mxu1 %vm6305_vm12, %v12942_v37  ;;  %v19875_v37 = vsel %vm16900_vm7, %v12977_v53, %v8498_v50  ;;  %v19890_v63 = vsel %vm16900_vm7, %v8507_v34, %v8508_v47  ;;  %v8514_v50 = vrot.slane %v8512_v21, 4  ;;  %v8526_v48 = vrot.slane %v19780_v60, 5 }
 0x800   : > { %v19903_v41 = vsel %vm16900_vm7, %v12979_v22, %v8512_v21  ;;  %v8521_v47 = vrot.slane %v8519_v46, 4  ;;  %v8522_v58 = vrot.slane %v19774_v40, 5  ;;  %v8529_v53 = vrot.slane %v19782_v28, 5 }
 0x801   : > { %v19909_v34 = vsel %vm16900_vm7, %v8514_v50, %v8515_v45  ;;  %v8528_v21 = vrot.slane %v8526_v48, 4  ;;  %v12982_v29 = vrot.slane %v8439_v23, 9  ;;  %v8533_v54 = vrot.slane %v19807_v20, 5 }
 0x802   : > { %v12995_v22 = vcombine.low %v19903_v41, %v19909_v34  ;;  %v19925_v40 = vsel %vm16900_vm7, %v8521_v47, %v8522_v58  ;;  %v19929_v28 = vsel %vm16900_vm7, %v12981_v61, %v8526_v48  ;;  %v8536_v50 = vrot.slane %v19809_v17, 5  ;;  %v22077_v41 = vld [vmem:[#allocation29_spill] sm:$0xff] }
 0x803   : > { %v8535_v45 = vrot.slane %v8533_v54, 4  ;;  %v19942_v23 = vsel %vm16900_vm7, %v12982_v29, %v8533_v54  ;;  %v12946_v47 = vcombine.low %v19656_v52, %v19672_v39  ;;  %v8561_v54 = vrot.slane %v19681_v31, 5  ;;  %v8445_v29 = vld [vmem:[#allocation4 + $0x9c] sm:$0xe] }
 0x804   : > { %v8564_v48 = vrot.slane %v19683_v26, 5  ;;  %v12947_v52 = vcombine.low %v19716_v19, %v19769_v44  ;;  %v8571_v39 = vrot.slane %v19703_v13, 5  ;;  %v8582_v13 = vrot.slane %v19791_v15, 5 }
 0x805   : > { %v19946_v61 = vsel %vm16900_vm7, %v8535_v45, %v8536_v50  ;;  %v8446_v45 = vld [vmem:[#allocation4 + $0xa8] sm:$0xe]  ;;  %v8563_v50 = vrot.slane %v8561_v54, 4  ;;  %v22072_v51 = vcombine.low %v19816_v27, %v19822_v9  ;;  %v8494_v15 = vrot.slane %v22073_v14, 5  ;;  %v20073_v27 = vld [vmem:[%s21469_s7 + $0x10] sm:$0xf] }
 0x806   : > { %14004 = vmatmul.mubr.msk.bf16.vlgmr.msra.gmra.mrb[16].mxu1 %vm6305_vm12, %v12943_v59  ;;  %v19921_v59 = vsel %vm16900_vm7, %v12980_v16, %v8519_v46  ;;  %v8443_v46 = vld [vmem:[#allocation4 + $0x84] sm:$0xe]  ;;  %v8447_v16 = vld [vmem:[#allocation4 + $0xb4] sm:$0xe]  ;;  %v8543_v34 = vrot.slane %v22077_v41, 5 }
 0x807   : > { %14036 = vmatpush3.bf16.msra.mxu1 %v8691_v25  ;;  %14007 = vmatprep.mubr.msk.bf16.mxu1 %vm6305_vm12, %v12944_v0  ;;  %v12996_v0 = vcombine.low %v19921_v59, %v19925_v40  ;;  %v19935_v25 = vsel %vm16900_vm7, %v8528_v21, %v8529_v53  ;;  %v8444_v53 = vld [vmem:[#allocation4 + $0x90] sm:$0xe]  ;;  %v12986_v17 = vrot.slane %v8443_v46, 9  ;;  %v8568_v21 = vrot.slane %v19697_v35, 5  ;;  %v20132_v14 = vld [vmem:[#allocation4 + $0x4c] sm:$0xf] }
 0x808   : > { %14866 = vmatprep.subr.msk.bf16.mxu1 %vm7975_vm6, %v19899_v11  ;;  %v12987_v58 = vrot.slane %v8444_v53, 9  ;;  %v12988_v46 = vrot.slane %v8445_v29, 9  ;;  %v8575_v53 = vrot.slane %v19734_v6, 5  ;;  %v8578_v29 = vrot.slane %v19757_v42, 5  ;;  %v20146_v41 = vld [vmem:[#allocation4 + $0x58] sm:$0xf] }
 0x809   : > { %v19964_v49 = vsel %vm16900_vm7, %v12986_v17, %v8561_v54  ;;  %v8570_v30 = vrot.slane %v8568_v21, 4  ;;  %v8491_v35 = vrot.slane %v15239_v7, 5  ;;  %v20120_v7 = vld [vmem:[#allocation4 + $0x2c] sm:$0x1]  ;;  %v9982_v42 = vld [vmem:[#allocation4 + $0x9c] sm:$0xe] }
 0x80a   : > { %v19976_v19 = vsel %vm16900_vm7, %v12987_v58, %v8568_v21  ;;  %v8577_v54 = vrot.slane %v8575_v53, 4  ;;  %v12990_v58 = vrot.slane %v8447_v16, 9  ;;  %v8589_v21 = vrot.slane %v19822_v9, 5 }
 0x80b   : > { %v19980_v44 = vsel %vm16900_vm7, %v8570_v30, %v8571_v39  ;;  %v19993_v30 = vsel %vm16900_vm7, %v12988_v46, %v8575_v53  ;;  %v22074_v9 = vcombine.low %v19875_v37, %v19879_v24 }
 0x80c   : > { %v13003_v17 = vcombine.low %v19976_v19, %v19980_v44  ;;  %v8591_v16 = vrot.slane %v8589_v21, 4  ;;  %v20015_v46 = vsel %vm16900_vm7, %v12990_v58, %v8589_v21  ;;  %v20279_v44 = vld [vmem:[#allocation4 + $0xb8] sm:$0xf] }
 0x80e   : > { %14008 = vmatmul.mubr.msk.bf16.gmra.mrb[20].mxu1 %vm6305_vm12, %v12945_v5  ;;  %v19969_v5 = vsel %vm16900_vm7, %v8563_v50, %v8564_v48  ;;  %v12948_v48 = vcombine.low %v19727_v18, %v19780_v60  ;;  %v8585_v50 = vrot.slane %v19793_v55, 5  ;;  %v19997_v18 = vsel %vm16900_vm7, %v8577_v54, %v8578_v29  ;;  %v22071_v29 = vld [vmem:[#allocation31_spill] sm:$0xff] }
 0x80f   : > { %14011 = vmatprep.mubr.msk.bf16.mxu1 %vm6305_vm12, %v12946_v47  ;;  %v12989_v47 = vrot.slane %v8446_v45, 9  ;;  %v13002_v26 = vcombine.low %v19964_v49, %v19969_v5  ;;  %v8584_v45 = vrot.slane %v8582_v13, 4  ;;  %v20269_v49 = vld [vmem:[#allocation4 + $0xa4] sm:$0x1] }
 0x811   : > { %v20001_v60 = vsel %vm16900_vm7, %v12989_v47, %v8582_v13  ;;  %v20008_v55 = vsel %vm16900_vm7, %v8584_v45, %v8585_v50  ;;  %v12949_v13 = vcombine.low %v19803_v38, %v19807_v20  ;;  %v12952_v45 = vcombine.low %v22071_v29, %v19624_v32  ;;  %v15238_v50 = vld [vmem:[#allocation4 + $0x8] sm:$0x1]  ;;  %v20241_v47 = vld [vmem:[#allocation4 + $0xa0] sm:$0xf] }
 0x812   : > { %v8487_v58 = vrot.slane %v15238_v50, 5  ;;  %v20112_v50 = vld [vmem:[#allocation4 + $0x34] sm:$0xf]  ;;  %v10122_v19 = vrot.slane %v20241_v47, 5 }
 0x816   : > { %14012 = vmatmul.mubr.msk.bf16.gmra.mrb[24].mxu1 %vm6305_vm12, %v12947_v52  ;;  %v8592_v52 = vrot.slane %v19831_v12, 5  ;;  %v12950_v12 = vcombine.low %v19565_v62, %v19590_v2  ;;  %v8484_v62 = vrot.slane %v19856_v43, 5  ;;  %v8493_v43 = vrot.slane %v8491_v35, 4 }
 0x817   : > { %14015 = vmatprep.mubr.msk.bf16.mxu1 %vm6305_vm12, %v12948_v48  ;;  %v20029_v48 = vld [vmem:[#allocation4 + $0x70] sm:$0xf] }
 0x818   : > { %v20019_v53 = vsel %vm16900_vm7, %v8591_v16, %v8592_v52  ;;  %v12951_v54 = vcombine.low %v19568_v56, %v20029_v48  ;;  %v8432_v56 = vld [vmem:[#allocation4] sm:$0xe]  ;;  %v8486_v20 = vrot.slane %v8484_v62, 4  ;;  %v9049_v16 = vsel %vm7975_vm6, %v19899_v11, 0 }
 0x819   : > { %v12975_v38 = vrot.slane %v8432_v56, 9  ;;  %v22075_v52 = vcombine.low %v19886_v33, %v19890_v63  ;;  %v8540_v11 = vrot.slane %v19590_v2, 5  ;;  %v8547_v37 = vrot.slane %v20029_v48, 5  ;;  %v8441_v2 = vld [vmem:[#allocation4 + $0x6c] sm:$0xe] }
 0x81a   : > { %v8488_v31 = vsel %vm16900_vm7, %v8486_v20, %v8487_v58  ;;  %v8554_v33 = vrot.slane %v19624_v32, 5  ;;  %v22076_v63 = vcombine.low %v19929_v28, %v19935_v25  ;;  %v12984_v40 = vrot.slane %v8441_v2, 9  ;;  %v22079_v25 = vld [vmem:[#allocation32_spill] sm:$0xff]  ;;  %v20108_v56 = vld [vmem:[#allocation4 + $0x28] sm:$0xf] }
 0x81b   : > { %v8485_v10 = vsel %vm16900_vm7, %v12975_v38, %v8484_v62  ;;  %v8542_v24 = vrot.slane %v8540_v11, 4  ;;  %v8557_v62 = vrot.slane %v22079_v25, 5  ;;  %v9973_v58 = vld [vmem:[#allocation4 + $0x30] sm:$0xe]  ;;  %v20232_v25 = vld [vmem:[#allocation4 + $0x8c] sm:$0x1] }
 0x81c   : > { %v8556_v59 = vrot.slane %v8554_v33, 4 }
 0x81d   : > { %v8544_v48 = vsel %vm16900_vm7, %v8542_v24, %v8543_v34 }
 0x81e   : > { %14016 = vmatmul.mubr.msk.bf16.gmra.mrb[28].mxu1 %vm6305_vm12, %v12949_v13  ;;  %v8440_v13 = vld [vmem:[#allocation4 + $0x60] sm:$0xe] }
 0x81f   : > { %14019 = vmatprep.mubr.msk.bf16.mxu1 %vm6305_vm12, %v12950_v12  ;;  %v8549_v12 = vrot.slane %v8547_v37, 4 }
 0x826   : > { %14020 = vmatmul.mubr.msk.bf16.gmra.mrb[0].mxu1 %vm6305_vm12, %v12951_v54  ;;  %v8442_v54 = vld [vmem:[#allocation4 + $0x78] sm:$0xe] }
 0x827   : > { %14023 = vmatprep.mubr.msk.bf16.mxu1 %vm6305_vm12, %v12952_v45  ;;  %v9972_v45 = vld [vmem:[#allocation4 + $0x24] sm:$0xe]  ;;  %v12985_v28 = vrot.slane %v8442_v54, 9  ;;  %v9976_v54 = vld [vmem:[#allocation4 + $0x54] sm:$0xe] }
 0x82e   : > { %14024 = vmatmul.mubr.msk.bf16.gmra.mrb[4].mxu1 %vm6305_vm12, %v12953_v57  ;;  %v12991_v57 = vcombine.low %v8485_v10, %v8488_v31  ;;  %v22080_v10 = vcombine.low %v19942_v23, %v19946_v61  ;;  %v8558_v31 = vsel %vm16900_vm7, %v8556_v59, %v8557_v62  ;;  %v9974_v23 = vld [vmem:[#allocation4 + $0x3c] sm:$0xe] }
 0x82f   : > { %14027 = vmatprep.mubr.msk.bf16.mxu1 %vm6305_vm12, %v12954_v1  ;;  %v8433_v1 = vld [vmem:[#allocation4 + $0xc] sm:$0xe] }
 0x830   : > { %v12976_v6 = vrot.slane %v8433_v1, 9  ;;  %v8548_v1 = vsel %vm16900_vm7, %v12984_v40, %v8547_v37 }
 0x836   : > { %14028 = vmatmul.mubr.msk.bf16.gmra.mrb[8].mxu1 %vm6305_vm12, %v12955_v36  ;;  %v8495_v36 = vsel %vm16900_vm7, %v8493_v43, %v8494_v15  ;;  %v20127_v43 = vld [vmem:[#allocation4 + $0x40] sm:$0xf]  ;;  %v13093_v15 = vrot.slane %v9973_v58, 9  ;;  %v20178_v58 = vld [vmem:[#allocation4 + $0x70] sm:$0xf] }
 0x837   : > { %14031 = vmatprep.mubr.msk.bf16.mxu1 %vm6305_vm12, %v12956_v8  ;;  %v8492_v8 = vsel %vm16900_vm7, %v12976_v6, %v8491_v35  ;;  %v20122_v35 = vld [vmem:[#allocation4 + $0x38] sm:$0x1]  ;;  %v8555_v6 = vsel %vm16900_vm7, %v12985_v28, %v8554_v33  ;;  %v13094_v33 = vrot.slane %v9974_v23, 9  ;;  %v20168_v28 = vld [vmem:[#allocation4 + $0x68] sm:$0x1] }
 0x838   : > { %v12992_v21 = vcombine.low %v8492_v8, %v8495_v36  ;;  %v10059_v36 = vrot.slane %v20112_v50, 5  ;;  %v9975_v8 = vld [vmem:[#allocation4 + $0x48] sm:$0xe]  ;;  %v10062_v24 = vrot.slane %v20122_v35, 5  ;;  %v20190_v23 = vld [vmem:[#allocation4 + $0x7c] sm:$0xf] }
 0x839   : > { %v13095_v2 = vrot.slane %v9975_v8, 9  ;;  %v9979_v8 = vld [vmem:[#allocation4 + $0x78] sm:$0xe] }
 0x83a   : > { %v10061_v37 = vrot.slane %v10059_v36, 4 }
 0x83c   : > { %v20163_v40 = vsel %vm16900_vm7, %v10061_v37, %v10062_v24 }
 0x83d   : > { %22082 = vst [vmem:[#allocation35_spill] sm:$0xff] %v20163_v40 }
 0x83e   : > { %14032 = vmatmul.mubr.msk.bf16.gmra.mrb[12].mxu1 %vm6305_vm12, %v22072_v51  ;;  %v10052_v51 = vrot.slane %v20108_v56, 5 }
 0x83f   : > { %14037 = vmatprep.mubr.msk.bf16.mxu1 %vm6305_vm12, %v12991_v57  ;;  %v13092_v57 = vrot.slane %v9972_v45, 9  ;;  %v9977_v45 = vld [vmem:[#allocation4 + $0x60] sm:$0xe] }
 0x846   : > { %14038 = vmatmul.mubr.msk.bf16.vlgmr.msra.gmra.mrb[16].mxu1 %vm6305_vm12, %v12992_v21  ;;  %v13001_v21 = vcombine.low %v8555_v6, %v8558_v31 }
 0x847   : > { %14070 = vmatpush3.bf16.msra.mxu1 %v9049_v16  ;;  %14041 = vmatprep.mubr.msk.bf16.mxu1 %vm6305_vm12, %v22074_v9  ;;  %v20135_v16 = vld [vmem:[#allocation4 + $0x44] sm:$0x1]  ;;  %v20139_v9 = vsel %vm16900_vm7, %v13092_v57, %v10052_v51  ;;  %v13096_v57 = vrot.slane %v9976_v54, 9  ;;  %v10094_v54 = vrot.slane %v20178_v58, 5 }
 0x848   : > { %14867 = vmatprep.subr.msk.bf16.mxu1 %vm7975_vm6, %v20073_v27 }
 0x84e   : > { %14042 = vmatmul.mubr.msk.bf16.gmra.mrb[20].mxu1 %vm6305_vm12, %v22075_v52  ;;  %v10054_v52 = vrot.slane %v10052_v51, 4  ;;  %v9978_v51 = vld [vmem:[#allocation4 + $0x6c] sm:$0xe] }
 0x84f   : > { %14045 = vmatprep.mubr.msk.bf16.mxu1 %vm6305_vm12, %v12995_v22  ;;  %v12983_v22 = vrot.slane %v8440_v13, 9  ;;  %v20142_v13 = vld [vmem:[#allocation4 + $0x50] sm:$0x1] }
 0x850   : > { %v9434_v40 = vshll.u32 %v20142_v13, 16 }
 0x851   : > { %v8541_v32 = vsel %vm16900_vm7, %v12983_v22, %v8540_v11  ;;  %v10055_v11 = vrot.slane %v20120_v7, 5  ;;  %v20154_v22 = vsel %vm16900_vm7, %v13093_v15, %v10059_v36  ;;  %v13097_v15 = vrot.slane %v9977_v45, 9 }
 0x852   : > { %v12999_v38 = vcombine.low %v8541_v32, %v8544_v48  ;;  %22081 = vst [vmem:[#allocation34_spill] sm:$0xff] %v20154_v22  ;;  %v20157_v48 = vld [vmem:[#allocation4 + $0x64] sm:$0xf]  ;;  %v20166_v32 = vld [vmem:[#allocation4 + $0x5c] sm:$0x1] }
 0x853   : > { %v20150_v34 = vsel %vm16900_vm7, %v10054_v52, %v10055_v11  ;;  %v10087_v36 = vrot.slane %v20157_v48, 5  ;;  %v20199_v52 = vld [vmem:[#allocation4 + $0x74] sm:$0x1]  ;;  %v10083_v24 = vrot.slane %v20166_v32, 5 }
 0x855   : > { %v20220_v45 = vsel %vm16900_vm7, %v13097_v15, %v10087_v36  ;;  %v9279_v15 = vld [vmem:[#allocation4 + $0x98] sm:$0x1] }
 0x856   : > { %14046 = vmatmul.mubr.msk.bf16.gmra.mrb[24].mxu1 %vm6305_vm12, %v12996_v0  ;;  %v22078_v0 = vld [vmem:[#allocation30_spill] sm:$0xff]  ;;  %22089 = vst [vmem:[#allocation44_spill] sm:$0xff] %v20220_v45 }
 0x857   : > { %14049 = vmatprep.mubr.msk.bf16.mxu1 %vm6305_vm12, %v22076_v63  ;;  %v8550_v29 = vrot.slane %v22078_v0, 5  ;;  %v10066_v63 = vrot.slane %v20127_v43, 5 }
 0x859   : > { %v8551_v20 = vsel %vm16900_vm7, %v8549_v12, %v8550_v29  ;;  %v10073_v12 = vrot.slane %v20132_v14, 5  ;;  %v10068_v0 = vrot.slane %v10066_v63, 4  ;;  %v10069_v29 = vrot.slane %v20135_v16, 5 }
 0x85a   : > { %v13000_v61 = vcombine.low %v8548_v1, %v8551_v20  ;;  %v20174_v62 = vsel %vm16900_vm7, %v13094_v33, %v10066_v63  ;;  %v10076_v20 = vrot.slane %v20142_v13, 5  ;;  %v10080_v1 = vrot.slane %v20146_v41, 5  ;;  %v20208_v33 = vld [vmem:[#allocation4 + $0x80] sm:$0x1] }
 0x85b   : > { %22083 = vst [vmem:[#allocation36_spill] sm:$0xff] %v20174_v62  ;;  %v20186_v31 = vsel %vm16900_vm7, %v13095_v2, %v10073_v12  ;;  %v10089_v63 = vrot.slane %v10087_v36, 4  ;;  %v10090_v2 = vrot.slane %v20168_v28, 5  ;;  %v14940_v62 = vld [vmem:[#allocation4 + $0x84] sm:$0xff]  }
 0x85c   : > { %22085 = vst [vmem:[#allocation38_spill] sm:$0xff] %v20186_v31  ;;  %v10082_v37 = vrot.slane %v10080_v1, 4 }
 0x85d   : > { %v20229_v11 = vsel %vm16900_vm7, %v10089_v63, %v10090_v2 }
 0x85e   : > { %14050 = vmatmul.mubr.msk.bf16.gmra.mrb[28].mxu1 %vm6305_vm12, %v22080_v10  ;;  %v20182_v10 = vsel %vm16900_vm7, %v10068_v0, %v10069_v29  ;;  %v20212_v0 = vld [vmem:[#allocation4 + $0x88] sm:$0xf]  ;;  %v20216_v29 = vsel %vm16900_vm7, %v10082_v37, %v10083_v24  ;;  %22090 = vst [vmem:[#allocation47_spill] sm:$0xff] %v20229_v11  ;;  %v10097_v37 = vrot.slane %v20199_v52, 5  ;;  %v9981_v24 = vld [vmem:[#allocation4 + $0x90] sm:$0xe] }
 0x85f   : > { %14053 = vmatprep.mubr.msk.bf16.mxu1 %vm6305_vm12, %v12999_v38  ;;  %v10075_v38 = vrot.slane %v10073_v12, 4  ;;  %22084 = vst [vmem:[#allocation37_spill] sm:$0xff] %v20182_v10  ;;  %v13098_v12 = vrot.slane %v9978_v51, 9  ;;  %22088 = vst [vmem:[#allocation45_spill] sm:$0xff] %v20216_v29  ;;  %v10104_v51 = vrot.slane %v20208_v33, 5  ;;  %v10108_v36 = vrot.slane %v20212_v0, 5 }
 0x860   : > { %v9288_v11 = vld [vmem:[#allocation4 + $0xbc] sm:$0x1]  ;;  %v9291_v29 = vld [vmem:[#allocation4 + $0xc8] sm:$0x1] }
 0x861   : > { %v20196_v6 = vsel %vm16900_vm7, %v10075_v38, %v10076_v20  ;;  %v13099_v38 = vrot.slane %v9979_v8, 9  ;;  %v10101_v20 = vrot.slane %v20190_v23, 5  ;;  %v20238_v8 = vsel %vm16900_vm7, %v13098_v12, %v10094_v54  ;;  %v20256_v12 = vld [vmem:[#allocation4 + $0xac] sm:$0xf] }
 0x862   : > { %22086 = vst [vmem:[#allocation39_spill] sm:$0xff] %v20196_v6  ;;  %22091 = vst [vmem:[#allocation46_spill] sm:$0xff] %v20238_v8  ;;  %v10124_v8 = vrot.slane %v10122_v19, 4  ;;  %v14939_v6 = vld [vmem:[#allocation4 + $0x78] sm:$0xff]  }
 0x863   : > { %v10103_v59 = vrot.slane %v10101_v20, 4  ;;  %v20249_v2 = vsel %vm16900_vm7, %v13099_v38, %v10101_v20  ;;  %v13101_v38 = vrot.slane %v9981_v24, 9 }
 0x864   : > { %22093 = vst [vmem:[#allocation50_spill] sm:$0xff] %v20249_v2  ;;  %v20290_v2 = vld [vmem:[#allocation4 + $0xc4] sm:$0xf] }
 0x866   : > { %14054 = vmatmul.mubr.msk.bf16.gmra.mrb[0].mxu1 %vm6305_vm12, %v13000_v61  ;;  %v10096_v61 = vrot.slane %v10094_v54, 4  ;;  %v10118_v54 = vrot.slane %v9279_v15, 5 }
 0x867   : > { %14057 = vmatprep.mubr.msk.bf16.mxu1 %vm6305_vm12, %v13001_v21  ;;  %v20205_v21 = vsel %vm16900_vm7, %v13096_v57, %v10080_v1  ;;  %v9980_v57 = vld [vmem:[#allocation4 + $0x84] sm:$0xe]  ;;  %v20223_v1 = vld [vmem:[#allocation4 + $0x94] sm:$0xf] }
 0x868   : > { %22087 = vst [vmem:[#allocation43_spill] sm:$0xff] %v20205_v21  ;;  %v20245_v63 = vsel %vm16900_vm7, %v10096_v61, %v10097_v37  ;;  %v13100_v39 = vrot.slane %v9980_v57, 9  ;;  %v20262_v61 = vsel %vm16900_vm7, %v10103_v59, %v10104_v51  ;;  %v10115_v20 = vrot.slane %v20223_v1, 5  ;;  %v9983_v57 = vld [vmem:[#allocation4 + $0xa8] sm:$0xe] }
 0x869   : > { %22092 = vst [vmem:[#allocation48_spill] sm:$0xff] %v20245_v63  ;;  %22094 = vst [vmem:[#allocation55_spill] sm:$0xff] %v20262_v61  ;;  %v10110_v59 = vrot.slane %v10108_v36, 4  ;;  %v10111_v51 = vrot.slane %v20232_v25, 5  ;;  %v9285_v37 = vld [vmem:[#allocation4 + $0xb0] sm:$0x1] }
 0x86a   : > { %v10117_v24 = vrot.slane %v10115_v20, 4  ;;  %v13102_v63 = vrot.slane %v9982_v42, 9  ;;  %v20287_v5 = vsel %vm16900_vm7, %v13101_v38, %v10115_v20  ;;  %v9984_v61 = vld [vmem:[#allocation4 + $0xb4] sm:$0xe]  ;;  %v10132_v45 = vrot.slane %v9285_v37, 5 }
 0x86b   : > { %22097 = vst [vmem:[#allocation58_spill] sm:$0xff] %v20287_v5 }
 0x86c   : > { %v20296_v15 = vsel %vm16900_vm7, %v10117_v24, %v10118_v54  ;;  %v20303_v20 = vsel %vm16900_vm7, %v13102_v63, %v10122_v19  ;;  %v13104_v24 = vrot.slane %v9984_v61, 9  ;;  %v10143_v19 = vrot.slane %v20290_v2, 5  ;;  %v9250_v61 = vld [vmem:[#allocation4 + $0x24] sm:$0xf] }
 0x86d   : > { %22098 = vst [vmem:[#allocation63_spill] sm:$0xff] %v20296_v15  ;;  %22099 = vst [vmem:[#allocation60_spill] sm:$0xff] %v20303_v20 }
 0x86e   : > { %14058 = vmatmul.mubr.msk.bf16.gmra.mrb[4].mxu1 %vm6305_vm12, %v13002_v26  ;;  %v20275_v26 = vsel %vm16900_vm7, %v13100_v39, %v10108_v36  ;;  %v13103_v39 = vrot.slane %v9983_v57, 9  ;;  %v10129_v36 = vrot.slane %v20256_v12, 5 }
 0x86f   : > { %14061 = vmatprep.mubr.msk.bf16.mxu1 %vm6305_vm12, %v13003_v17  ;;  %22095 = vst [vmem:[#allocation49_spill] sm:$0xff] %v20275_v26  ;;  %v20283_v17 = vsel %vm16900_vm7, %v10110_v59, %v10111_v51  ;;  %v10125_v59 = vrot.slane %v20269_v49, 5  ;;  %v9985_v51 = vld [vmem:[#allocation4 + $0xc0] sm:$0xe]  ;;  %v14936_v26 = vld [vmem:[#allocation4 + $0x54] sm:$0xff]  }
 0x870   : > { %22096 = vst [vmem:[#allocation53_spill] sm:$0xff] %v20283_v17  ;;  %v10131_v57 = vrot.slane %v10129_v36, 4  ;;  %v20311_v54 = vsel %vm16900_vm7, %v13103_v39, %v10129_v36  ;;  %v10136_v17 = vrot.slane %v20279_v44, 5  ;;  %v13105_v37 = vrot.slane %v9985_v51, 9 }
 0x871   : > { %v20307_v42 = vsel %vm16900_vm7, %v10124_v8, %v10125_v59  ;;  %22101 = vst [vmem:[#allocation67_spill] sm:$0xff] %v20311_v54  ;;  %v22103_v8 = vcombine.low %v19993_v30, %v19997_v18  ;;  %v10139_v36 = vrot.slane %v9288_v11, 5  ;;  %v22104_v59 = vcombine.low %v20001_v60, %v20008_v55  ;;  %v14933_v55 = vld [vmem:[#allocation4 + $0x30] sm:$0xff]  }
 0x872   : > { %22100 = vst [vmem:[#allocation62_spill] sm:$0xff] %v20307_v42  ;;  %v20318_v63 = vsel %vm16900_vm7, %v10131_v57, %v10132_v45  ;;  %v10138_v39 = vrot.slane %v10136_v17, 4  ;;  %v10145_v45 = vrot.slane %v10143_v19, 4  ;;  %v10146_v57 = vrot.slane %v9291_v29, 5  ;;  %v14930_v29 = vld [vmem:[#allocation4 + $0xc] sm:$0xff]  }
 0x873   : > { %22102 = vst [vmem:[#allocation70_spill] sm:$0xff] %v20318_v63  ;;  %v20333_v51 = vsel %vm16900_vm7, %v13104_v24, %v10136_v17  ;;  %v20343_v11 = vsel %vm16900_vm7, %v13105_v37, %v10143_v19  ;;  %v22109_v17 = vcombine.low %v20015_v46, %v20019_v53  ;;  %v14931_v24 = vld [vmem:[#allocation4 + $0x18] sm:$0xff]   ;;  %v9775_v37 = vsel %vm7975_vm6, %v20073_v27, 0  ;;  %v14932_v19 = vld [vmem:[#allocation4 + $0x24] sm:$0xff]   ;;  %v20377_v42 = vld [vmem:[#allocation4 + $0x14] sm:$0x1] }
 0x874   : > { %22105 = vst [vmem:[#allocation73_spill] sm:$0xff] %v20333_v51  ;;  %v20337_v30 = vsel %vm16900_vm7, %v10138_v39, %v10139_v36  ;;  %22107 = vst [vmem:[#allocation75_spill] sm:$0xff] %v20343_v11  ;;  %v20347_v60 = vsel %vm16900_vm7, %v10145_v45, %v10146_v57  ;;  %v20361_v39 = vld [vmem:[%s21469_s7 + $0x14] sm:$0xf]  ;;  %v20364_v36 = vld [vmem:[#allocation4 + $0x10] sm:$0xf] }
 0x875   : > { %22106 = vst [vmem:[#allocation68_spill] sm:$0xff] %v20337_v30  ;;  %22108 = vst [vmem:[#allocation80_spill] sm:$0xff] %v20347_v60  ;;  %v9247_v46 = vld [vmem:[#allocation4 + $0x18] sm:$0xf]  ;;  %v20369_v27 = vld [vmem:[#allocation4 + $0x1c] sm:$0xf] }
 0x876   : > { %14062 = vmatmul.mubr.msk.bf16.gmra.mrb[8].mxu1 %vm6305_vm12, %v22103_v8  ;;  %v9244_v8 = vld [vmem:[#allocation4 + $0xc] sm:$0xf]  ;;  %v9304_v45 = vshll.u32 %v20364_v36, 16  ;;  %v9308_v57 = vshrl.u32 %v20364_v36, 16  ;;  %v9346_v54 = vshll.u32 %v9250_v61, 16 }
 0x877   : > { %14065 = vmatprep.mubr.msk.bf16.mxu1 %vm6305_vm12, %v22104_v59  ;;  %v9295_v53 = vshrl.u32 %v9244_v8, 16  ;;  %v9298_v59 = vshll.u32 %v9244_v8, 16  ;;  %v14934_v8 = vld [vmem:[#allocation4 + $0x3c] sm:$0xff]  }
 0x878   : > { %v9306_v38 = vrot.slane %v9304_v45, 5  ;;  %v9310_v60 = vrot.slane %v9308_v57, 4  ;;  %v9314_v45 = vshll.u32 %v20377_v42, 16 }
 0x879   : > { %v9300_v18 = vrot.slane %v9298_v59, 5 }
 0x87a   : > { %v9311_v15 = vor.u32 %v9310_v60, %v9306_v38  ;;  %v9356_v60 = vshrl.u32 %v20108_v56, 16 }
 0x87e   : > { %14066 = vmatmul.mubr.msk.bf16.gmra.mrb[12].mxu1 %vm6305_vm12, %v22109_v17  ;;  %v9322_v17 = vshll.u32 %v9247_v46, 16 }
 0x87f   : > { %14071 = vmatprep.mubr.msk.bf16.mxu1 %vm6305_vm12, %v14930_v29  ;;  %v9319_v29 = vshrl.u32 %v9247_v46, 16  ;;  %v9343_v46 = vshrl.u32 %v9250_v61, 16 }
 0x880   : > { %v9324_v30 = vrot.slane %v9322_v17, 5 }
 0x881   : > { %v9321_v11 = vrot.slane %v9319_v29, 4  ;;  %v9345_v5 = vrot.slane %v9343_v46, 4  ;;  %v14935_v29 = vld [vmem:[#allocation4 + $0x48] sm:$0xff]  }
 0x883   : > { %v9325_v59 = vor.u32 %v9324_v30, %v9321_v11 }
 0x885   : > { %v9326_v61 = vrot.slane %v9325_v59, 4 }
 0x886   : > { %14072 = vmatmul.mubr.msk.bf16.vlgmr.msra.gmra.mrb[16].mxu1 %vm6305_vm12, %v14931_v24  ;;  %v9328_v24 = vshll.u32 %v20369_v27, 16 }
 0x887   : > { %14104 = vmatpush3.bf16.msra.mxu1 %v9775_v37  ;;  %14075 = vmatprep.mubr.msk.bf16.mxu1 %vm6305_vm12, %v14932_v19  ;;  %v9332_v37 = vshrl.u32 %v20369_v27, 16  ;;  %v9297_v19 = vrot.slane %v9295_v53, 4  ;;  %v20379_v53 = vld [vmem:[#allocation4 + $0x20] sm:$0x1] }
 0x888   : > { %14868 = vmatprep.subr.msk.bf16.mxu1 %vm7975_vm6, %v20361_v39  ;;  %v9330_v51 = vrot.slane %v9328_v24, 5  ;;  %v9338_v24 = vshll.u32 %v20379_v53, 16 }
 0x889   : > { %v9334_v63 = vrot.slane %v9332_v37, 4  ;;  %v9301_v20 = vor.u32 %v9300_v18, %v9297_v19  ;;  %v9352_v18 = vshll.u32 %v20108_v56, 16  ;;  %v9253_v37 = vld [vmem:[#allocation4 + $0x30] sm:$0xf]  ;;  %v9362_v56 = vshll.u32 %v20120_v7, 16  ;;  %v14937_v7 = vld [vmem:[#allocation4 + $0x60] sm:$0xff]  }
 0x88a   : > { %v9340_v59 = vrot.slane %v9338_v24, 5  ;;  %v9380_v24 = vshrl.u32 %v20112_v50, 16 }
 0x88b   : > { %v9335_v57 = vor.u32 %v9334_v63, %v9330_v51  ;;  %v9302_v17 = vrot.slane %v9301_v20, 4  ;;  %v9316_v63 = vrot.slane %v9314_v45, 5  ;;  %v9331_v45 = vsel %vm16062_vm14, %v9326_v61, %v9330_v51  ;;  %v9259_v61 = vld [vmem:[#allocation4 + $0x48] sm:$0xf] }
 0x88e   : > { %14076 = vmatmul.mubr.msk.bf16.gmra.mrb[20].mxu1 %vm6305_vm12, %v14933_v55  ;;  %v9348_v55 = vrot.slane %v9346_v54, 5  ;;  %v9336_v54 = vrot.slane %v9335_v57, 4  ;;  %v9358_v57 = vrot.slane %v9356_v60, 4 }
 0x88f   : > { %14079 = vmatprep.mubr.msk.bf16.mxu1 %vm6305_vm12, %v14934_v8  ;;  %v9312_v8 = vrot.slane %v9311_v15, 4  ;;  %v9307_v15 = vsel %vm16062_vm14, %v9302_v17, %v9306_v38 }
 0x890   : > { %v9349_v11 = vor.u32 %v9348_v55, %v9345_v5  ;;  %v20402_v5 = vrot.slane %v9352_v18, 5  ;;  %v9370_v55 = vshll.u32 %v9253_v37, 16  ;;  %v9341_v38 = vsel %vm16062_vm14, %v9336_v54, %v9340_v59 }
 0x891   : > { %v9317_v46 = vsel %vm16062_vm14, %v9312_v8, %v9316_v63  ;;  %v9376_v8 = vshll.u32 %v20112_v50, 16  ;;  %v9256_v63 = vld [vmem:[#allocation4 + $0x3c] sm:$0xf]  ;;  %v20415_v18 = vcombine.low %v9331_v45, %v9341_v38  ;;  %v9386_v54 = vshll.u32 %v20122_v35, 16 }
 0x892   : > { %v20406_v17 = vrot.slane %v9349_v11, 4  ;;  %v9359_v60 = vor.u32 %v9358_v57, %v20402_v5  ;;  %v9262_v11 = vld [vmem:[#allocation4 + $0x54] sm:$0xf]  ;;  %v9391_v59 = vshrl.u32 %v9256_v63, 16  ;;  %v9404_v45 = vshrl.u32 %v20127_v43, 16 }
 0x893   : > { %v9415_v57 = vshrl.u32 %v9259_v61, 16  ;;  %v9424_v35 = vshll.u32 %v20132_v14, 16  ;;  %v9439_v38 = vshrl.u32 %v9262_v11, 16  ;;  %v20430_v21 = vrot.slane %v9386_v54, 5 }
 0x894   : > { %v9355_v50 = vsel %vm16062_vm14, %v20406_v17, %v20402_v5  ;;  %v9442_v5 = vshll.u32 %v9262_v11, 16  ;;  %v9406_v10 = vrot.slane %v9404_v45, 4 }
 0x895   : > { %v9441_v54 = vrot.slane %v9439_v38, 4  ;;  %v9268_v38 = vld [vmem:[#allocation4 + $0x6c] sm:$0xf] }
 0x896   : > { %14080 = vmatmul.mubr.msk.bf16.gmra.mrb[24].mxu1 %vm6305_vm12, %v14935_v29  ;;  %v20387_v30 = vpop.f32.mrb[32].mxu0  ;;  %v9367_v29 = vshrl.u32 %v9253_v37, 16  ;;  %v9372_v37 = vrot.slane %v9370_v55, 5  ;;  %v9418_v55 = vshll.u32 %v9259_v61, 16  ;;  %v9444_v11 = vrot.slane %v9442_v5, 5 }
 0x897   : > { %14083 = vmatprep.mubr.msk.bf16.mxu1 %vm6305_vm12, %v14936_v26  ;;  %22110 = vst [vmem:[#allocation76_spill] sm:$0xff] %v20387_v30  ;;  %v20389_v20 = vpop.f32.mrb[33].mxu0  ;;  %v9410_v5 = vshll.u32 %v20135_v16, 16  ;;  %v14941_v16 = vld [vmem:[#allocation4 + $0x90] sm:$0xff]  }
 0x898   : > { %22111 = vst [vmem:[#allocation51_spill] sm:$0xff] %v20389_v20  ;;  %v20393_v19 = vpop.f32.mrb[34].mxu0  ;;  %v20412_v20 = vrot.slane %v9362_v56, 5  ;;  %v9369_v51 = vrot.slane %v9367_v29, 4  ;;  %v9394_v56 = vshll.u32 %v9256_v63, 16  ;;  %v9400_v29 = vshll.u32 %v20127_v43, 16 }
 0x899   : > { %22112 = vst [vmem:[#allocation52_spill] sm:$0xff] %v20393_v19  ;;  %v20398_v26 = vpop.f32.mrb[35].mxu0  ;;  %v14938_v19 = vld [vmem:[#allocation4 + $0x6c] sm:$0xff]   ;;  %v9452_v63 = vshrl.u32 %v20146_v41, 16  ;;  %v9265_v43 = vld [vmem:[#allocation4 + $0x60] sm:$0xf] }
 0x89a   : > { %22113 = vst [vmem:[#allocation54_spill] sm:$0xff] %v20398_v26  ;;  %v20410_v26 = vcombine.low %v9307_v15, %v9317_v46  ;;  %v20424_v15 = vrot.slane %v9376_v8, 5  ;;  %v9382_v46 = vrot.slane %v9380_v24, 4  ;;  %v9373_v30 = vor.u32 %v9372_v37, %v9369_v51 }
 0x89b   : > { %v9393_v8 = vrot.slane %v9391_v59, 4  ;;  %v9448_v24 = vshll.u32 %v20146_v41, 16  ;;  %v9396_v61 = vrot.slane %v9394_v56, 5  ;;  %v20435_v31 = vrot.slane %v9400_v29, 5 }
 0x89c   : > { %v9383_v17 = vor.u32 %v9382_v46, %v20424_v15  ;;  %v20437_v51 = vrot.slane %v9424_v35, 5  ;;  %v9463_v46 = vshrl.u32 %v9265_v43, 16  ;;  %v9466_v59 = vshll.u32 %v9265_v43, 16 }
 0x89d   : > { %v9472_v41 = vshll.u32 %v20157_v48, 16  ;;  %v20445_v29 = vrot.slane %v9448_v24, 5  ;;  %v9454_v45 = vrot.slane %v9452_v63, 4 }
 0x89e   : > { %14084 = vmatmul.mubr.msk.bf16.gmra.mrb[28].mxu1 %vm6305_vm12, %v14937_v7  ;;  %v9360_v7 = vrot.slane %v9359_v60, 4  ;;  %v9420_v60 = vrot.slane %v9418_v55, 5  ;;  %v9374_v55 = vrot.slane %v9373_v30, 4  ;;  %v9384_v35 = vrot.slane %v9383_v17, 4 }
 0x89f   : > { %14087 = vmatprep.mubr.msk.bf16.mxu1 %vm6305_vm12, %v14938_v19  ;;  %v9428_v19 = vshrl.u32 %v20132_v14, 16  ;;  %v9417_v14 = vrot.slane %v9415_v57, 4  ;;  %v9476_v57 = vshrl.u32 %v20157_v48, 16  ;;  %v9468_v24 = vrot.slane %v9466_v59, 5 }
 0x8a0   : > { %v9365_v56 = vsel %vm16062_vm14, %v9360_v7, %v20412_v20  ;;  %v9445_v20 = vor.u32 %v9444_v11, %v9441_v54  ;;  %v9465_v7 = vrot.slane %v9463_v46, 4  ;;  %v20454_v63 = vrot.slane %v9472_v41, 5  ;;  %v14942_v54 = vld [vmem:[#allocation4 + $0x9c] sm:$0xff]  }
 0x8a1   : > { %v9430_v37 = vrot.slane %v9428_v19, 4  ;;  %v9397_v19 = vor.u32 %v9396_v61, %v9393_v8  ;;  %v9421_v43 = vor.u32 %v9420_v60, %v9417_v14  ;;  %v9455_v30 = vor.u32 %v9454_v45, %v20445_v29 }
 0x8a2   : > { %v9487_v17 = vshrl.u32 %v9268_v38, 16  ;;  %v9490_v8 = vshll.u32 %v9268_v38, 16  ;;  %v20461_v14 = vcombine.low %v9355_v50, %v9365_v56  ;;  %v9379_v13 = vsel %vm16062_vm14, %v9374_v55, %v20424_v15 }
 0x8a3   : > { %v9398_v60 = vrot.slane %v9397_v19, 4  ;;  %v9389_v46 = vsel %vm16062_vm14, %v9384_v35, %v20430_v21  ;;  %v9422_v59 = vrot.slane %v9421_v43, 4  ;;  %v9458_v45 = vshll.u32 %v20166_v32, 16 }
 0x8a4   : > { %v9412_v50 = vrot.slane %v9410_v5, 5  ;;  %v9436_v56 = vrot.slane %v9434_v40, 5  ;;  %v9469_v38 = vor.u32 %v9468_v24, %v9465_v7  ;;  %v9456_v15 = vrot.slane %v9455_v30, 4  ;;  %v9271_v5 = vld [vmem:[#allocation4 + $0x78] sm:$0xf] }
 0x8a5   : > { %v9489_v19 = vrot.slane %v9487_v17, 4  ;;  %v9403_v21 = vsel %vm16062_vm14, %v9398_v60, %v20435_v31  ;;  %v9482_v35 = vshll.u32 %v20168_v28, 16  ;;  %v9496_v40 = vshll.u32 %v20178_v58, 16  ;;  %v14943_v17 = vld [vmem:[#allocation4 + $0xa8] sm:$0xff]  }
 0x8a6   : > { %14088 = vmatmul.mubr.msk.bf16.gmra.mrb[0].mxu1 %vm6305_vm12, %v14939_v6  ;;  %v9407_v6 = vor.u32 %v9406_v10, %v20435_v31  ;;  %v9478_v10 = vrot.slane %v9476_v57, 4  ;;  %v9446_v57 = vrot.slane %v9445_v20, 4  ;;  %v9427_v43 = vsel %vm16062_vm14, %v9422_v59, %v20437_v51  ;;  %v20512_v59 = vld [vmem:[#allocation4 + $0x28] sm:$0xf] }
 0x8a7   : > { %14091 = vmatprep.mubr.msk.bf16.mxu1 %vm6305_vm12, %v14940_v62  ;;  %v9431_v62 = vor.u32 %v9430_v37, %v20437_v51  ;;  %v9460_v20 = vrot.slane %v9458_v45, 5  ;;  %v9500_v7 = vshrl.u32 %v20178_v58, 16  ;;  %v20488_v24 = vcombine.low %v9379_v13, %v9389_v46  ;;  %v20500_v13 = vld [vmem:[#allocation4 + $0x1c] sm:$0xf]  ;;  %22119 = vst [vmem:[#allocation65_spill] sm:$0xff] %v20512_v59 }
 0x8a8   : > { %v9408_v37 = vrot.slane %v9407_v6, 4  ;;  %v9479_v55 = vor.u32 %v9478_v10, %v20454_v63  ;;  %v9492_v6 = vrot.slane %v9490_v8, 5  ;;  %v9451_v31 = vsel %vm16062_vm14, %v9446_v57, %v20445_v29  ;;  %v11525_v10 = vld [vmem:[#allocation4 + $0x18] sm:$0xe]  ;;  %v11526_v57 = vld [vmem:[#allocation4 + $0x24] sm:$0xe] }
 0x8a9   : > { %v9432_v41 = vrot.slane %v9431_v62, 4  ;;  %v20493_v28 = vrot.slane %v9469_v38, 4  ;;  %v9506_v30 = vshll.u32 %v20199_v52, 16  ;;  %v14944_v8 = vld [vmem:[#allocation4 + $0xb4] sm:$0xff]   ;;  %v9461_v51 = vsel %vm16062_vm14, %v9456_v15, %v9460_v20  ;;  %v20510_v52 = vld [vmem:[#allocation4 + $0x20] sm:$0x1] }
 0x8aa   : > { %v20452_v22 = vpop.f32.mrb[36].mxu0  ;;  %v9413_v32 = vsel %vm16062_vm14, %v9408_v37, %v9412_v50  ;;  %v9493_v60 = vor.u32 %v9492_v6, %v9489_v19  ;;  %v9511_v58 = vshrl.u32 %v9271_v5, 16  ;;  %v20506_v29 = vrot.slane %v9482_v35, 5  ;;  %22118 = vst [vmem:[#allocation64_spill] sm:$0xff] %v20510_v52  ;;  %v20526_v19 = vld [vmem:[#allocation4 + $0x84] sm:$0xf] }
 0x8ab   : > { %22114 = vst [vmem:[#allocation56_spill] sm:$0xff] %v20452_v22  ;;  %v20456_v48 = vpop.f32.mrb[37].mxu0  ;;  %v9437_v62 = vsel %vm16062_vm14, %v9432_v41, %v9436_v56  ;;  %v20502_v37 = vcombine.low %v9403_v21, %v9413_v32  ;;  %v20508_v46 = vrot.slane %v9496_v40, 5  ;;  %v20514_v41 = vrot.slane %v9500_v7, 4  ;;  %v20528_v6 = vld [vmem:[#allocation4 + $0x2c] sm:$0x1] }
 0x8ac   : > { %22115 = vst [vmem:[#allocation57_spill] sm:$0xff] %v20456_v48  ;;  %v20459_v61 = vpop.f32.mrb[38].mxu0  ;;  %v9514_v45 = vshll.u32 %v9271_v5, 16  ;;  %v9520_v50 = vshll.u32 %v20190_v23, 16  ;;  %v13205_v56 = vrot.slane %v11525_v10, 9  ;;  %v20518_v38 = vcombine.low %v9451_v31, %v9461_v51  ;;  %22120 = vst [vmem:[#allocation66_spill] sm:$0xff] %v20528_v6 }
 0x8ad   : > { %22116 = vst [vmem:[#allocation59_spill] sm:$0xff] %v20459_v61  ;;  %v20466_v11 = vpop.f32.mrb[39].mxu0  ;;  %v20530_v21 = vld [vmem:[#allocation4 + $0x34] sm:$0xf]  ;;  %v11593_v32 = vrot.slane %v20500_v13, 5  ;;  %v20538_v40 = vrot.slane %v9493_v60, 4 }
 0x8ae   : > { %22117 = vst [vmem:[#allocation61_spill] sm:$0xff] %v20466_v11  ;;  %14092 = vmatmul.mubr.msk.bf16.gmra.mrb[4].mxu1 %vm6305_vm12, %v14941_v16  ;;  %v20498_v16 = vrot.slane %v9479_v55, 4  ;;  %v20524_v55 = vrot.slane %v9506_v30, 5  ;;  %22121 = vst [vmem:[#allocation69_spill] sm:$0xff] %v20530_v21  ;;  %v20540_v5 = vrot.slane %v9511_v58, 4  ;;  %v11596_v30 = vrot.slane %v20510_v52, 5 }
 0x8af   : > { %14095 = vmatprep.mubr.msk.bf16.mxu1 %vm6305_vm12, %v14942_v54  ;;  %v20504_v54 = vcombine.low %v9427_v43, %v9437_v62  ;;  %v9524_v43 = vshrl.u32 %v20190_v23, 16  ;;  %v11527_v62 = vld [vmem:[#allocation4 + $0x30] sm:$0xe]  ;;  %v20543_v20 = vld [vmem:[#allocation4 + $0x38] sm:$0x1]  ;;  %v11595_v31 = vrot.slane %v11593_v32, 4  ;;  %v20559_v23 = vsel %vm16900_vm7, %v13205_v56, %v11593_v32 }
 0x8b0   : > { %22122 = vst [vmem:[#allocation71_spill] sm:$0xff] %v20543_v20  ;;  %v20545_v7 = vld [vmem:[#allocation4 + $0x40] sm:$0xf]  ;;  %v13206_v10 = vrot.slane %v11526_v57, 9  ;;  %v20551_v51 = vrot.slane %v9514_v45, 5  ;;  %v20553_v60 = vrot.slane %v9520_v50, 5 }
 0x8b1   : > { %22123 = vst [vmem:[#allocation72_spill] sm:$0xff] %v20545_v7  ;;  %v20555_v58 = vld [vmem:[#allocation4 + $0x44] sm:$0x1]  ;;  %22125 = vst [vmem:[#allocation77_spill] sm:$0xff] %v20559_v23  ;;  %v11528_v15 = vld [vmem:[#allocation4 + $0x3c] sm:$0xe]  ;;  %v20565_v57 = vsel %vm16900_vm7, %v11595_v31, %v11596_v30 }
 0x8b2   : > { %22124 = vst [vmem:[#allocation74_spill] sm:$0xff] %v20555_v58  ;;  %v20561_v35 = vld [vmem:[#allocation4 + $0x4c] sm:$0xf]  ;;  %22127 = vst [vmem:[#allocation79_spill] sm:$0xff] %v20565_v57  ;;  %v13207_v45 = vrot.slane %v11527_v62, 9  ;;  %v14945_v61 = vld [vmem:[#allocation4 + $0xc0] sm:$0xff]  }
 0x8b3   : > { %22126 = vst [vmem:[#allocation78_spill] sm:$0xff] %v20561_v35  ;;  %v20568_v50 = vrot.slane %v9524_v43, 4  ;;  %v11607_v32 = vrot.slane %v20530_v21, 5  ;;  %v11529_v22 = vld [vmem:[#allocation4 + $0x48] sm:$0xe]  ;;  %v13208_v43 = vrot.slane %v11528_v15, 9 }
 0x8b4   : > { %v20574_v52 = vld [vmem:[#allocation4 + $0x58] sm:$0xf]  ;;  %v11614_v30 = vrot.slane %v20545_v7, 5  ;;  %v11530_v48 = vld [vmem:[#allocation4 + $0x54] sm:$0xe]  ;;  %v13209_v7 = vrot.slane %v11529_v22, 9 }
 0x8b5   : > { %22128 = vst [vmem:[#allocation81_spill] sm:$0xff] %v20574_v52  ;;  %v20587_v56 = vld [vmem:[#allocation4 + $0x5c] sm:$0x1]  ;;  %v20593_v23 = vsel %vm16900_vm7, %v13207_v45, %v11607_v32  ;;  %v11621_v21 = vrot.slane %v20561_v35, 5  ;;  %v20603_v57 = vld [vmem:[#allocation4 + $0x68] sm:$0x1] }
 0x8b6   : > { %14096 = vmatmul.mubr.msk.bf16.gmra.mrb[8].mxu1 %vm6305_vm12, %v14943_v17  ;;  %v11600_v17 = vrot.slane %v20512_v59, 5  ;;  %22131 = vst [vmem:[#allocation6_spill] sm:$0xff] %v20587_v56  ;;  %22132 = vst [vmem:[#allocation7_spill] sm:$0xff] %v20593_v23  ;;  %v11616_v15 = vrot.slane %v11614_v30, 4  ;;  %v20605_v45 = vld [vmem:[#allocation4 + $0x70] sm:$0xf] }
 0x8b7   : > { %14099 = vmatprep.mubr.msk.bf16.mxu1 %vm6305_vm12, %v14944_v8  ;;  %v11603_v8 = vrot.slane %v20528_v6, 5  ;;  %v20585_v6 = vld [vmem:[#allocation4 + $0x50] sm:$0x1]  ;;  %v11628_v22 = vrot.slane %v20574_v52, 5  ;;  %v20618_v35 = vld [vmem:[#allocation4 + $0x74] sm:$0x1]  ;;  %v20637_v59 = vsel %vm16900_vm7, %v13209_v7, %v11621_v21 }
 0x8b8   : > { %v11602_v11 = vrot.slane %v11600_v17, 4  ;;  %v20578_v31 = vsel %vm16900_vm7, %v13206_v10, %v11600_v17  ;;  %v11609_v10 = vrot.slane %v11607_v32, 4  ;;  %v11610_v17 = vrot.slane %v20543_v20, 5  ;;  %22137 = vst [vmem:[#allocation42_spill] sm:$0xff] %v20618_v35  ;;  %v20631_v52 = vld [vmem:[#allocation4 + $0x80] sm:$0x1] }
 0x8b9   : > { %22129 = vst [vmem:[#allocation82_spill] sm:$0xff] %v20578_v31  ;;  %v11531_v31 = vld [vmem:[#allocation4 + $0x60] sm:$0xe]  ;;  %22141 = vst [vmem:[#allocation17_spill] sm:$0xff] %v20631_v52  ;;  %v11630_v20 = vrot.slane %v11628_v22, 4  ;;  %v11645_v7 = vrot.slane %v20618_v35, 5 }
 0x8ba   : > { %v20582_v62 = vsel %vm16900_vm7, %v11602_v11, %v11603_v8  ;;  %v20597_v11 = vld [vmem:[#allocation4 + $0x64] sm:$0xf]  ;;  %v11617_v8 = vrot.slane %v20555_v58, 5  ;;  %v20609_v32 = vsel %vm16900_vm7, %v11609_v10, %v11610_v17  ;;  %v11623_v17 = vrot.slane %v11621_v21, 4  ;;  %22142 = vst [vmem:[#allocation33_spill] sm:$0xff] %v20637_v59 }
 0x8bb   : > { %22130 = vst [vmem:[#allocation83_spill] sm:$0xff] %v20582_v62  ;;  %22133 = vst [vmem:[#allocation8_spill] sm:$0xff] %v20597_v11  ;;  %v13210_v62 = vrot.slane %v11530_v48, 9  ;;  %v11532_v48 = vld [vmem:[#allocation4 + $0x6c] sm:$0xe]  ;;  %v13211_v23 = vrot.slane %v11531_v31, 9 }
 0x8bc   : > { %22134 = vst [vmem:[#allocation22_spill] sm:$0xff] %v20609_v32  ;;  %v20626_v10 = vsel %vm16900_vm7, %v11616_v15, %v11617_v8  ;;  %v11631_v32 = vrot.slane %v20587_v56, 5  ;;  %v20653_v21 = vld [vmem:[#allocation4 + $0x88] sm:$0xf]  ;;  %v10245_v31 = vsel %vm7975_vm6, %v20361_v39, 0  ;;  %v11638_v56 = vrot.slane %v20603_v57, 5 }
 0x8bd   : > { %22139 = vst [vmem:[#allocation20_spill] sm:$0xff] %v20626_v10  ;;  %v11533_v10 = vld [vmem:[#allocation4 + $0x78] sm:$0xe]  ;;  %22147 = vst [vmem:[#allocation16_spill] sm:$0xff] %v20653_v21  ;;  %v11652_v59 = vrot.slane %v20631_v52, 5  ;;  %v22241_v3 = vld [vmem:[#allocation7_spill] sm:$0xff] }
 0x8be   : > { %14100 = vmatmul.mubr.msk.bf16.gmra.mrb[12].mxu1 %vm6305_vm12, %v14945_v61  ;;  %v20613_v61 = vsel %vm16900_vm7, %v13208_v43, %v11614_v30  ;;  %v11624_v43 = vrot.slane %v20585_v6, 5  ;;  %v13213_v39 = vrot.slane %v11533_v10, 9  ;;  %v11535_v10 = vld [vmem:[#allocation4 + $0x90] sm:$0xe]  ;;  %v11536_v35 = vld [vmem:[#allocation4 + $0x9c] sm:$0xe] }
 0x8bf   : > { %14105 = vmatprep.mubr.msk.bf16.mxu1 %vm6305_vm12, %v20410_v26  ;;  %22135 = vst [vmem:[#allocation41_spill] sm:$0xff] %v20613_v61  ;;  %v20620_v26 = vld [vmem:[#allocation4 + $0x7c] sm:$0xf] }
 0x8c0   : > { %22138 = vst [vmem:[#allocation12_spill] sm:$0xff] %v20620_v26  ;;  %v20644_v8 = vsel %vm16900_vm7, %v11623_v17, %v11624_v43  ;;  %v13212_v17 = vrot.slane %v11532_v48, 9  ;;  %v11642_v43 = vrot.slane %v20605_v45, 5 }
 0x8c1   : > { %v20616_v58 = vpop.f32.mrb[40].mxu0  ;;  %22144 = vst [vmem:[#allocation18_spill] sm:$0xff] %v20644_v8  ;;  %v11649_v8 = vrot.slane %v20620_v26, 5  ;;  %v20724_v26 = vld [vmem:[#allocation4 + $0xb0] sm:$0x1] }
 0x8c2   : > { %22136 = vst [vmem:[#allocation40_spill] sm:$0xff] %v20616_v58  ;;  %v20629_v30 = vpop.f32.mrb[41].mxu0  ;;  %v11635_v58 = vrot.slane %v20597_v11, 5  ;;  %v11534_v11 = vld [vmem:[#allocation4 + $0x84] sm:$0xe]  ;;  %v11644_v48 = vrot.slane %v11642_v43, 4 }
 0x8c3   : > { %22140 = vst [vmem:[#allocation15_spill] sm:$0xff] %v20629_v30  ;;  %v20640_v15 = vpop.f32.mrb[42].mxu0  ;;  %v20648_v30 = vsel %vm16900_vm7, %v13210_v62, %v11628_v22  ;;  %v20664_v62 = vld [vmem:[#allocation4 + $0x94] sm:$0xf] }
 0x8c4   : > { %22143 = vst [vmem:[#allocation9_spill] sm:$0xff] %v20640_v15  ;;  %22145 = vst [vmem:[#allocation19_spill] sm:$0xff] %v20648_v30  ;;  %v20651_v61 = vpop.f32.mrb[43].mxu0  ;;  %v20659_v15 = vsel %vm16900_vm7, %v11630_v20, %v11631_v32  ;;  %v20672_v20 = vld [vmem:[%s21469_s7 + $0x18] sm:$0xf]  ;;  %v20682_v22 = vsel %vm16900_vm7, %v13211_v23, %v11635_v58  ;;  %v20690_v30 = vsel %vm16900_vm7, %v13212_v17, %v11642_v43  ;;  %v13214_v17 = vrot.slane %v11534_v11, 9 }
 0x8c5   : > { %22146 = vst [vmem:[#allocation26_spill] sm:$0xff] %v20651_v61  ;;  %22148 = vst [vmem:[#allocation5_spill] sm:$0xff] %v20659_v15  ;;  %v11637_v61 = vrot.slane %v11635_v58, 4  ;;  %v20674_v32 = vld [vmem:[#allocation4 + $0x8c] sm:$0x1]  ;;  %v20716_v23 = vsel %vm16900_vm7, %v13213_v39, %v11649_v8  ;;  %v11663_v43 = vrot.slane %v20664_v62, 5 }
 0x8c6   : > { %22149 = vst [vmem:[#allocation10_spill] sm:$0xff] %v20664_v62  ;;  %22150 = vst [vmem:[#allocation14_spill] sm:$0xff] %v20674_v32  ;;  %14106 = vmatmul.mubr.msk.bf16.vlgmr.msra.gmra.mrb[16].mxu1 %vm6305_vm12, %v20415_v18  ;;  %v20695_v18 = vld [vmem:[#allocation4 + $0x98] sm:$0x1]  ;;  %v20697_v58 = vld [vmem:[#allocation4 + $0xa0] sm:$0xf] }
 0x8c7   : > { %22151 = vst [vmem:[#allocation21_spill] sm:$0xff] %v20682_v22  ;;  %v20686_v15 = vsel %vm16900_vm7, %v11637_v61, %v11638_v56  ;;  %22153 = vst [vmem:[#allocation11_spill] sm:$0xff] %v20690_v30  ;;  %14138 = vmatpush3.bf16.msra.mxu1 %v10245_v31  ;;  %14109 = vmatprep.mubr.msk.bf16.mxu1 %vm6305_vm12, %v20461_v14  ;;  %v20703_v56 = vsel %vm16900_vm7, %v11644_v48, %v11645_v7  ;;  %v11651_v61 = vrot.slane %v11649_v8, 4  ;;  %v20708_v31 = vld [vmem:[#allocation4 + $0xa4] sm:$0x1] }
 0x8c8   : > { %22152 = vst [vmem:[#allocation25_spill] sm:$0xff] %v20686_v15  ;;  %22154 = vst [vmem:[#allocation23_spill] sm:$0xff] %v20697_v58  ;;  %14869 = vmatprep.subr.msk.bf16.mxu1 %vm7975_vm6, %v20672_v20  ;;  %v20710_v14 = vld [vmem:[#allocation4 + $0xac] sm:$0xf]  ;;  %v11656_v7 = vrot.slane %v20653_v21, 5  ;;  %v13215_v48 = vrot.slane %v11535_v10, 9 }
 0x8c9   : > { %22155 = vst [vmem:[#allocation27_spill] sm:$0xff] %v20703_v56  ;;  %22156 = vst [vmem:[#allocation24_spill] sm:$0xff] %v20708_v31  ;;  %v20721_v11 = vsel %vm16900_vm7, %v11651_v61, %v11652_v59  ;;  %v13216_v15 = vrot.slane %v11536_v35, 9  ;;  %v11537_v22 = vld [vmem:[#allocation4 + $0xa8] sm:$0xe]  ;;  %v11659_v8 = vrot.slane %v20674_v32, 5 }
 0x8ca   : > { %22157 = vst [vmem:[#allocation13_spill] sm:$0xff] %v20716_v23  ;;  %22158 = vst [vmem:[#allocation31_spill] sm:$0xff] %v20721_v11  ;;  %v11658_v56 = vrot.slane %v11656_v7, 4  ;;  %v11670_v39 = vrot.slane %v20697_v58, 5  ;;  %v20730_v30 = vld [vmem:[#allocation4 + $0xb8] sm:$0xf]  ;;  %v20734_v59 = vsel %vm16900_vm7, %v13214_v17, %v11656_v7 }
 0x8cb   : > { %v11665_v10 = vrot.slane %v11663_v43, 4  ;;  %v11666_v35 = vrot.slane %v20695_v18, 5  ;;  %v11673_v61 = vrot.slane %v20708_v31, 5  ;;  %v13217_v23 = vrot.slane %v11537_v22, 9  ;;  %v11538_v58 = vld [vmem:[#allocation4 + $0xb4] sm:$0xe] }
 0x8cc   : > { %v20742_v52 = vsel %vm16900_vm7, %v11658_v56, %v11659_v8  ;;  %v11672_v11 = vrot.slane %v11670_v39, 4  ;;  %v11677_v32 = vrot.slane %v20710_v14, 5  ;;  %v20747_v17 = vld [vmem:[#allocation4 + $0xc4] sm:$0xf]  ;;  %v20753_v31 = vsel %vm16900_vm7, %v13215_v48, %v11663_v43  ;;  %v11539_v8 = vld [vmem:[#allocation4 + $0xc0] sm:$0xe] }
 0x8cd   : > { %22161 = vst [vmem:[#allocation30_spill] sm:$0xff] %v20753_v31  ;;  %v20757_v56 = vsel %vm16900_vm7, %v11665_v10, %v11666_v35  ;;  %v20761_v22 = vsel %vm16900_vm7, %v13216_v15, %v11670_v39  ;;  %v11680_v35 = vrot.slane %v20724_v26, 5  ;;  %v20781_v39 = vld [vmem:[#allocation4 + $0xc8] sm:$0x1]  ;;  %v13218_v43 = vrot.slane %v11538_v58, 9 }
 0x8ce   : > { %v20738_v62 = vpop.f32.mrb[44].mxu0  ;;  %22162 = vst [vmem:[#allocation32_spill] sm:$0xff] %v20757_v56  ;;  %22163 = vst [vmem:[#allocation84_spill] sm:$0xff] %v20761_v22  ;;  %14110 = vmatmul.mubr.msk.bf16.gmra.mrb[20].mxu1 %vm6305_vm12, %v20488_v24  ;;  %v20773_v48 = vsel %vm16900_vm7, %v11672_v11, %v11673_v61  ;;  %v11679_v10 = vrot.slane %v11677_v32, 4  ;;  %v9544_v24 = vshll.u32 %v20212_v0, 16  ;;  %v20788_v11 = vsel %vm16900_vm7, %v13217_v23, %v11677_v32 }
 0x8cf   : > { %22159 = vst [vmem:[#allocation28_spill] sm:$0xff] %v20738_v62  ;;  %v20745_v21 = vpop.f32.mrb[45].mxu0  ;;  %v20767_v62 = vld [vmem:[#allocation4 + $0xbc] sm:$0x1]  ;;  %22165 = vst [vmem:[#allocation86_spill] sm:$0xff] %v20773_v48  ;;  %14113 = vmatprep.mubr.msk.bf16.mxu1 %vm6305_vm12, %v20502_v37  ;;  %v13219_v37 = vrot.slane %v11539_v8, 9  ;;  %v9517_v48 = vor.u32 %v20551_v51, %v20540_v5  ;;  %v9527_v32 = vor.u32 %v20568_v50, %v20553_v60 }
 0x8d0   : > { %22160 = vst [vmem:[#allocation29_spill] sm:$0xff] %v20745_v21  ;;  %v20765_v21 = vpop.f32.mrb[46].mxu0  ;;  %22167 = vst [vmem:[#allocation88_spill] sm:$0xff] %v20788_v11  ;;  %v20792_v61 = vsel %vm16900_vm7, %v11679_v10, %v11680_v35  ;;  %v9548_v56 = vshrl.u32 %v20212_v0, 16  ;;  %v11687_v58 = vrot.slane %v20767_v62, 5  ;;  %v11694_v10 = vrot.slane %v20781_v39, 5 }
 0x8d1   : > { %22164 = vst [vmem:[#allocation85_spill] sm:$0xff] %v20765_v21  ;;  %v20778_v15 = vpop.f32.mrb[47].mxu0  ;;  %v11684_v21 = vrot.slane %v20730_v30, 5  ;;  %22168 = vst [vmem:[#allocation89_spill] sm:$0xff] %v20792_v61  ;;  %v22169_v8 = vor.u32 %v20514_v41, %v20508_v46  ;;  %v9530_v0 = vshll.u32 %v20208_v33, 16  ;;  %v22170_v51 = vshrl.u32 %v20526_v19, 16 }
 0x8d2   : > { %22166 = vst [vmem:[#allocation87_spill] sm:$0xff] %v20778_v15  ;;  %v11691_v15 = vrot.slane %v20747_v17, 5  ;;  %v9277_v22 = vld [vmem:[#allocation4 + $0x90] sm:$0xf]  ;;  %v9280_v61 = vld [vmem:[#allocation4 + $0x9c] sm:$0xf] }
 0x8d3   : > { %v11686_v7 = vrot.slane %v11684_v21, 4  ;;  %v9504_v35 = vrot.slane %v22169_v8, 4  ;;  %v20810_v31 = vsel %vm16900_vm7, %v13218_v43, %v11684_v21  ;;  %v9537_v50 = vrot.slane %v22170_v51, 4 }
 0x8d4   : > { %v11693_v23 = vrot.slane %v11691_v15, 4  ;;  %v20822_v41 = vsel %vm16900_vm7, %v13219_v37, %v11691_v15  ;;  %v22173_v21 = vshll.u32 %v20526_v19, 16  ;;  %v9518_v51 = vrot.slane %v9517_v48, 4 }
 0x8d5   : > { %v20814_v5 = vsel %vm16900_vm7, %v11686_v7, %v11687_v58  ;;  %22171 = vst [vmem:[#allocation90_spill] sm:$0xff] %v20822_v41  ;;  %v20830_v7 = vrot.slane %v9544_v24, 5  ;;  %v9550_v58 = vrot.slane %v9548_v56, 4  ;;  %v9528_v11 = vrot.slane %v9527_v32, 4 }
 0x8d6   : > { %v20826_v33 = vsel %vm16900_vm7, %v11693_v23, %v11694_v10  ;;  %v9540_v43 = vrot.slane %v22173_v21, 5  ;;  %14114 = vmatmul.mubr.msk.bf16.gmra.mrb[24].mxu1 %vm6305_vm12, %v20504_v54  ;;  %v9559_v15 = vshrl.u32 %v9277_v22, 16  ;;  %v9562_v37 = vshll.u32 %v9277_v22, 16 }
 0x8d7   : > { %22172 = vst [vmem:[#allocation91_spill] sm:$0xff] %v20826_v33  ;;  %14117 = vmatprep.mubr.msk.bf16.mxu1 %vm6305_vm12, %v20518_v38  ;;  %v9568_v23 = vshll.u32 %v20223_v1, 16  ;;  %v9572_v19 = vshrl.u32 %v20223_v1, 16  ;;  %v9583_v24 = vshrl.u32 %v9280_v61, 16  ;;  %v9586_v10 = vshll.u32 %v9280_v61, 16 }
 0x8d8   : > { %v9499_v56 = vsel %vm16062_vm14, %v20538_v40, %v20508_v46  ;;  %v9532_v21 = vrot.slane %v9530_v0, 5  ;;  %v9592_v54 = vshll.u32 %v20241_v47, 16  ;;  %v9596_v48 = vshrl.u32 %v20241_v47, 16 }
 0x8d9   : > { %v9509_v38 = vsel %vm16062_vm14, %v9504_v35, %v20524_v55  ;;  %v9541_v22 = vor.u32 %v9540_v43, %v9537_v50  ;;  %v9551_v32 = vor.u32 %v9550_v58, %v20830_v7  ;;  %v9554_v1 = vshll.u32 %v20232_v25, 16  ;;  %v9283_v50 = vld [vmem:[#allocation4 + $0xa8] sm:$0xf] }
 0x8da   : > { %v9523_v61 = vsel %vm16062_vm14, %v9518_v51, %v20553_v60  ;;  %v9533_v46 = vsel %vm16062_vm14, %v9528_v11, %v9532_v21  ;;  %v9561_v40 = vrot.slane %v9559_v15, 4  ;;  %v9564_v0 = vrot.slane %v9562_v37, 5 }
 0x8db   : > { %v20856_v8 = vrot.slane %v9568_v23, 5  ;;  %v9574_v47 = vrot.slane %v9572_v19, 4  ;;  %v9585_v33 = vrot.slane %v9583_v24, 4  ;;  %v9588_v41 = vrot.slane %v9586_v10, 5  ;;  %v9286_v24 = vld [vmem:[#allocation4 + $0xb4] sm:$0xf] }
 0x8dc   : > { %v22174_v55 = vsel %vm16062_vm14, %v20498_v16, %v20506_v29  ;;  %v22175_v25 = vsel %vm16062_vm14, %v20493_v28, %v20454_v63  ;;  %v9594_v35 = vrot.slane %v9592_v54, 5  ;;  %v9598_v11 = vrot.slane %v9596_v48, 4  ;;  %v15240_v48 = vld [vmem:[#allocation4 + $0x98] sm:$0x1] }
 0x8dd   : > { %v13064_v60 = vcombine.low %v22175_v25, %v22174_v55  ;;  %v13065_v43 = vcombine.low %v9499_v56, %v9509_v38  ;;  %v9542_v58 = vrot.slane %v9541_v22, 4  ;;  %v9552_v51 = vrot.slane %v9551_v32, 4 }
 0x8de   : > { %v13066_v15 = vcombine.low %v9523_v61, %v9533_v46  ;;  %v9556_v37 = vrot.slane %v9554_v1, 5  ;;  %v9565_v23 = vor.u32 %v9564_v0, %v9561_v40  ;;  %v9575_v16 = vor.u32 %v9574_v47, %v20856_v8 }
 0x8df   : > { %14118 = vmatmul.mubr.msk.bf16.gmra.mrb[28].mxu1 %vm6305_vm12, %v13064_v60  ;;  %v9589_v29 = vor.u32 %v9588_v41, %v9585_v33  ;;  %v9607_v19 = vshrl.u32 %v9283_v50, 16  ;;  %v9599_v63 = vor.u32 %v9598_v11, %v9594_v35  ;;  %v9610_v28 = vshll.u32 %v9283_v50, 16 }
 0x8e0   : > { %14121 = vmatprep.mubr.msk.bf16.mxu1 %vm6305_vm12, %v13065_v43  ;;  %v9616_v10 = vshll.u32 %v20256_v12, 16  ;;  %v9620_v56 = vshrl.u32 %v20256_v12, 16  ;;  %v9547_v21 = vsel %vm16062_vm14, %v9542_v58, %v20830_v7  ;;  %v9557_v54 = vsel %vm16062_vm14, %v9552_v51, %v9556_v37  ;;  %v9289_v51 = vld [vmem:[#allocation4 + $0xc0] sm:$0xf] }
 0x8e1   : > { %v9578_v38 = vshll.u32 %v15240_v48, 16  ;;  %v9602_v22 = vshll.u32 %v20269_v49, 16  ;;  %v9631_v41 = vshrl.u32 %v9286_v24, 16  ;;  %v9634_v33 = vshll.u32 %v9286_v24, 16 }
 0x8e2   : > { %v9640_v32 = vshll.u32 %v20279_v44, 16  ;;  %v9644_v1 = vshrl.u32 %v20279_v44, 16  ;;  %v9566_v61 = vrot.slane %v9565_v23, 4  ;;  %v9576_v46 = vrot.slane %v9575_v16, 4 }
 0x8e3   : > { %v9590_v12 = vrot.slane %v9589_v29, 4  ;;  %v9609_v40 = vrot.slane %v9607_v19, 4  ;;  %v9600_v0 = vrot.slane %v9599_v63, 4  ;;  %v9612_v47 = vrot.slane %v9610_v28, 5 }
 0x8e4   : > { %v9618_v7 = vrot.slane %v9616_v10, 5  ;;  %v9622_v55 = vrot.slane %v9620_v56, 4  ;;  %v13067_v25 = vcombine.low %v9547_v21, %v9557_v54  ;;  %v9580_v60 = vrot.slane %v9578_v38, 5  ;;  %v15241_v21 = vld [vmem:[#allocation4 + $0xb0] sm:$0x1] }
 0x8e5   : > { %v9604_v11 = vrot.slane %v9602_v22, 5  ;;  %v9633_v49 = vrot.slane %v9631_v41, 4  ;;  %v9636_v50 = vrot.slane %v9634_v33, 5  ;;  %v9642_v43 = vrot.slane %v9640_v32, 5 }
 0x8e6   : > { %v9646_v58 = vrot.slane %v9644_v1, 4  ;;  %v9571_v44 = vsel %vm16062_vm14, %v9566_v61, %v20856_v8  ;;  %v9581_v37 = vsel %vm16062_vm14, %v9576_v46, %v9580_v60  ;;  %v9595_v23 = vsel %vm16062_vm14, %v9590_v12, %v9594_v35  ;;  %v15242_v35 = vld [vmem:[#allocation4 + $0xbc] sm:$0x1] }
 0x8e7   : > { %14122 = vmatmul.mubr.msk.bf16.gmra.mrb[0].mxu1 %vm6305_vm12, %v13066_v15  ;;  %v9605_v15 = vsel %vm16062_vm14, %v9600_v0, %v9604_v11  ;;  %v9613_v16 = vor.u32 %v9612_v47, %v9609_v40  ;;  %v9623_v29 = vor.u32 %v9622_v55, %v9618_v7  ;;  %v9655_v19 = vshrl.u32 %v9289_v51, 16 }
 0x8e8   : > { %14125 = vmatprep.mubr.msk.bf16.mxu1 %vm6305_vm12, %v13067_v25  ;;  %v9658_v24 = vshll.u32 %v9289_v51, 16  ;;  %v9664_v63 = vshll.u32 %v20290_v2, 16  ;;  %v9668_v28 = vshrl.u32 %v20290_v2, 16  ;;  %v9637_v10 = vor.u32 %v9636_v50, %v9633_v49  ;;  %v15243_v50 = vld [vmem:[#allocation4 + $0xc8] sm:$0x1] }
 0x8e9   : > { %v9647_v56 = vor.u32 %v9646_v58, %v9642_v43  ;;  %v13068_v8 = vcombine.low %v9571_v44, %v9581_v37  ;;  %v9626_v54 = vshll.u32 %v15241_v21, 16  ;;  %v13069_v48 = vcombine.low %v9595_v23, %v9605_v15 }
 0x8ea   : > { %v9614_v38 = vrot.slane %v9613_v16, 4  ;;  %v9624_v22 = vrot.slane %v9623_v29, 4  ;;  %v9650_v41 = vshll.u32 %v15242_v35, 16  ;;  %v9657_v33 = vrot.slane %v9655_v19, 4  ;;  %v13171_v35 = vld [vmem:[%s21469_s7 + $0x1c] sm:$0xf] }
 0x8eb   : > { %v9660_v32 = vrot.slane %v9658_v24, 5  ;;  %v9666_v1 = vrot.slane %v9664_v63, 5  ;;  %v9670_v61 = vrot.slane %v9668_v28, 4  ;;  %v9638_v46 = vrot.slane %v9637_v10, 4 }
 0x8ec   : > { %v9648_v12 = vrot.slane %v9647_v56, 4  ;;  %v9628_v2 = vrot.slane %v9626_v54, 5  ;;  %v9652_v40 = vrot.slane %v9650_v41, 5  ;;  %v9619_v0 = vsel %vm16062_vm14, %v9614_v38, %v9618_v7  ;;  %v9970_v7 = vld [vmem:[#allocation4 + $0xc] sm:$0xe]  ;;  %v22177_v41 = vld [vmem:[#allocation34_spill] sm:$0xff] }
 0x8ed   : > { %v9661_v55 = vor.u32 %v9660_v32, %v9657_v33  ;;  %v9671_v25 = vor.u32 %v9670_v61, %v9666_v1  ;;  %v9643_v60 = vsel %vm16062_vm14, %v9638_v46, %v9642_v43  ;;  %v10038_v49 = vrot.slane %v20364_v36, 5  ;;  %v9971_v56 = vld [vmem:[#allocation4 + $0x18] sm:$0xe]  ;;  %v22178_v33 = vld [vmem:[#allocation35_spill] sm:$0xff]  ;;  %v22183_v46 = vld [vmem:[#allocation38_spill] sm:$0xff] }
 0x8ee   : > { %v9629_v47 = vsel %vm16062_vm14, %v9624_v22, %v9628_v2  ;;  %v9653_v11 = vsel %vm16062_vm14, %v9648_v12, %v9652_v40  ;;  %v9674_v58 = vshll.u32 %v15243_v50, 16  ;;  %v13090_v29 = vrot.slane %v9970_v7, 9  ;;  %v22184_v12 = vld [vmem:[#allocation39_spill] sm:$0xff] }
 0x8ef   : > { %14126 = vmatmul.mubr.msk.bf16.gmra.mrb[4].mxu1 %vm6305_vm12, %v13068_v8  ;;  %v13070_v51 = vcombine.low %v9619_v0, %v9629_v47  ;;  %v13071_v44 = vcombine.low %v9643_v60, %v9653_v11  ;;  %v9662_v37 = vrot.slane %v9661_v55, 4  ;;  %v9672_v23 = vrot.slane %v9671_v25, 4  ;;  %v22189_v0 = vld [vmem:[#allocation44_spill] sm:$0xff]  ;;  %v22190_v47 = vld [vmem:[#allocation47_spill] sm:$0xff]  ;;  %v22192_v25 = vld [vmem:[#allocation46_spill] sm:$0xff] }
 0x8f0   : > { %14129 = vmatprep.mubr.msk.bf16.mxu1 %vm6305_vm12, %v13069_v48  ;;  %v10040_v15 = vrot.slane %v10038_v49, 4  ;;  %v9676_v16 = vrot.slane %v9674_v58, 5  ;;  %v10041_v43 = vrot.slane %v20377_v42, 5  ;;  %v10045_v24 = vrot.slane %v20369_v27, 5  ;;  %v22193_v60 = vld [vmem:[#allocation48_spill] sm:$0xff]  ;;  %v22196_v50 = vld [vmem:[#allocation55_spill] sm:$0xff] }
 0x8f1   : > { %v9667_v19 = vsel %vm16062_vm14, %v9662_v37, %v9666_v1  ;;  %v10039_v10 = vsel %vm16900_vm7, %v13090_v29, %v10038_v49  ;;  %v13091_v42 = vrot.slane %v9971_v56, 9  ;;  %v10048_v54 = vrot.slane %v20379_v53, 5  ;;  %v22181_v1 = vld [vmem:[#allocation37_spill] sm:$0xff]  ;;  %v22195_v49 = vld [vmem:[#allocation50_spill] sm:$0xff]  ;;  %v22202_v7 = vld [vmem:[#allocation63_spill] sm:$0xff] }
 0x8f2   : > { %v9677_v36 = vsel %vm16062_vm14, %v9672_v23, %v9676_v16  ;;  %v10042_v63 = vsel %vm16900_vm7, %v10040_v15, %v10041_v43  ;;  %v10047_v21 = vrot.slane %v10045_v24, 4  ;;  %v10604_v22 = vsel %vm7975_vm6, %v20672_v20, 0  ;;  %v22180_v20 = vld [vmem:[#allocation36_spill] sm:$0xff]  ;;  %v22201_v23 = vld [vmem:[#allocation58_spill] sm:$0xff]  ;;  %v14946_v56 = vld [vmem:[#allocation4 + $0x18] sm:$0xff]  }
 0x8f3   : > { %v13072_v28 = vcombine.low %v9667_v19, %v9677_v36  ;;  %v13106_v8 = vcombine.low %v10039_v10, %v10042_v63  ;;  %v10046_v48 = vsel %vm16900_vm7, %v13091_v42, %v10045_v24  ;;  %v22176_v53 = vcombine.low %v20139_v9, %v20150_v34  ;;  %v22186_v9 = vld [vmem:[#allocation43_spill] sm:$0xff]  ;;  %v22187_v34 = vld [vmem:[#allocation45_spill] sm:$0xff]  ;;  %v22204_v16 = vld [vmem:[#allocation60_spill] sm:$0xff] }
 0x8f4   : > { %v10049_v27 = vsel %vm16900_vm7, %v10047_v21, %v10048_v54  ;;  %v22179_v32 = vcombine.low %v22177_v41, %v22178_v33  ;;  %v22182_v61 = vcombine.low %v22180_v20, %v22181_v1  ;;  %v22185_v2 = vcombine.low %v22183_v46, %v22184_v12  ;;  %v22205_v29 = vld [vmem:[#allocation62_spill] sm:$0xff]  ;;  %v22207_v19 = vld [vmem:[#allocation67_spill] sm:$0xff]  ;;  %v22210_v63 = vld [vmem:[#allocation73_spill] sm:$0xff] }
 0x8f5   : > { %v13107_v38 = vcombine.low %v10046_v48, %v10049_v27  ;;  %v22188_v40 = vcombine.low %v22186_v9, %v22187_v34  ;;  %v22191_v55 = vcombine.low %v22189_v0, %v22190_v47  ;;  %v22194_v11 = vcombine.low %v22192_v25, %v22193_v60  ;;  %v22208_v36 = vld [vmem:[#allocation70_spill] sm:$0xff]  ;;  %v22214_v21 = vld [vmem:[#allocation80_spill] sm:$0xff]  ;;  %v10799_v20 = vld [vmem:[#allocation4 + $0x18] sm:$0xf] }
 0x8f6   : > { %v22197_v58 = vcombine.low %v22195_v49, %v22196_v50  ;;  %v22203_v15 = vcombine.low %v22201_v23, %v22202_v7  ;;  %v22206_v43 = vcombine.low %v22204_v16, %v22205_v29  ;;  %v22209_v24 = vcombine.low %v22207_v19, %v22208_v36  ;;  %v14947_v54 = vld [vmem:[#allocation4 + $0x24] sm:$0xff]   ;;  %v14948_v48 = vld [vmem:[#allocation4 + $0x30] sm:$0xff]   ;;  %v14957_v29 = vld [vmem:[#allocation4 + $0x9c] sm:$0xff]  }
 0x8f7   : > { %14130 = vmatmul.mubr.msk.bf16.gmra.mrb[8].mxu1 %vm6305_vm12, %v13070_v51  ;;  %v22198_v51 = vld [vmem:[#allocation49_spill] sm:$0xff]  ;;  %v11330_v27 = vsel %vm7975_vm6, %v13171_v35, 0  ;;  %v14952_v41 = vld [vmem:[#allocation4 + $0x60] sm:$0xff]   ;;  %v14953_v33 = vld [vmem:[#allocation4 + $0x6c] sm:$0xff]   ;;  %v10850_v1 = vshrl.u32 %v10799_v20, 16  ;;  %v10859_v46 = vshll.u32 %v20500_v13, 16 }
 0x8f8   : > { %14133 = vmatprep.mubr.msk.bf16.mxu1 %vm6305_vm12, %v13071_v44  ;;  %v22199_v44 = vld [vmem:[#allocation53_spill] sm:$0xff]  ;;  %v10863_v12 = vshrl.u32 %v20500_v13, 16  ;;  %v14955_v9 = vld [vmem:[#allocation4 + $0x84] sm:$0xff]   ;;  %v14956_v0 = vld [vmem:[#allocation4 + $0x90] sm:$0xff]  }
 0x8f9   : > { %v22200_v37 = vcombine.low %v22198_v51, %v22199_v44  ;;  %v10852_v34 = vrot.slane %v10850_v1, 4  ;;  %v10861_v47 = vrot.slane %v10859_v46, 5  ;;  %v22217_v7 = vld [vmem:[#allocation64_spill] sm:$0xff] }
 0x8fa   : > { %v10805_v16 = vld [vmem:[#allocation4 + $0x30] sm:$0xf] }
 0x8ff   : > { %14134 = vmatmul.mubr.msk.bf16.gmra.mrb[12].mxu1 %vm6305_vm12, %v13072_v28  ;;  %v22211_v28 = vld [vmem:[#allocation68_spill] sm:$0xff] }
 0x900   : > { %14139 = vmatprep.mubr.msk.bf16.mxu1 %vm6305_vm12, %v13106_v8  ;;  %v22212_v10 = vcombine.low %v22210_v63, %v22211_v28  ;;  %v22213_v8 = vld [vmem:[#allocation75_spill] sm:$0xff]  ;;  %v10898_v28 = vshrl.u32 %v10805_v16, 16 }
 0x901   : > { %v22215_v42 = vcombine.low %v22213_v8, %v22214_v21  ;;  %v22218_v8 = vld [vmem:[#allocation66_spill] sm:$0xff] }
 0x902   : > { %v10893_v21 = vshll.u32 %v22218_v8, 16 }
 0x904   : > { %v10895_v46 = vrot.slane %v10893_v21, 5 }
 0x907   : > { %14140 = vmatmul.mubr.msk.bf16.vlgmr.msra.gmra.mrb[16].mxu1 %vm6305_vm12, %v13107_v38  ;;  %v20992_v38 = vld [vmem:[%s21469_s7 + $0x20] sm:$0xf] }
 0x908   : > { %14172 = vmatpush3.bf16.msra.mxu1 %v10604_v22  ;;  %14143 = vmatprep.mubr.msk.bf16.mxu1 %vm6305_vm12, %v22176_v53  ;;  %v14949_v22 = vld [vmem:[#allocation4 + $0x3c] sm:$0xff]   ;;  %v14950_v53 = vld [vmem:[#allocation4 + $0x48] sm:$0xff]  }
 0x909   : > { %14870 = vmatprep.subr.msk.bf16.mxu1 %vm7975_vm6, %v13171_v35  ;;  %v14951_v35 = vld [vmem:[#allocation4 + $0x54] sm:$0xff]  }
 0x90f   : > { %14144 = vmatmul.mubr.msk.bf16.gmra.mrb[20].mxu1 %vm6305_vm12, %v22179_v32  ;;  %v14954_v32 = vld [vmem:[#allocation4 + $0x78] sm:$0xff]  }
 0x910   : > { %14147 = vmatprep.mubr.msk.bf16.mxu1 %vm6305_vm12, %v22182_v61  ;;  %v10853_v61 = vshll.u32 %v10799_v20, 16  ;;  %v10900_v20 = vrot.slane %v10898_v28, 4 }
 0x917   : > { %14148 = vmatmul.mubr.msk.bf16.gmra.mrb[24].mxu1 %vm6305_vm12, %v22185_v2  ;;  %v10802_v2 = vld [vmem:[#allocation4 + $0x24] sm:$0xf] }
 0x918   : > { %14151 = vmatprep.mubr.msk.bf16.mxu1 %vm6305_vm12, %v22188_v40  ;;  %v10855_v40 = vrot.slane %v10853_v61, 5  ;;  %v10874_v25 = vshrl.u32 %v10802_v2, 16  ;;  %v10877_v60 = vshll.u32 %v10802_v2, 16  ;;  %v10811_v61 = vld [vmem:[#allocation4 + $0x48] sm:$0xf] }
 0x91a   : > { %v10876_v13 = vrot.slane %v10874_v25, 4  ;;  %v10879_v44 = vrot.slane %v10877_v60, 5  ;;  %v14960_v60 = vld [vmem:[#allocation4 + $0xc0] sm:$0xff]  }
 0x91f   : > { %14152 = vmatmul.mubr.msk.bf16.gmra.mrb[28].mxu1 %vm6305_vm12, %v22191_v55  ;;  %v10865_v55 = vrot.slane %v10863_v12, 4 }
 0x920   : > { %14155 = vmatprep.mubr.msk.bf16.mxu1 %vm6305_vm12, %v22194_v11  ;;  %v22216_v11 = vld [vmem:[#allocation65_spill] sm:$0xff] }
 0x921   : > { %v10883_v49 = vshll.u32 %v22216_v11, 16  ;;  %v10887_v50 = vshrl.u32 %v22216_v11, 16  ;;  %v10866_v51 = vor.u32 %v10865_v55, %v10861_v47 }
 0x923   : > { %v10889_v23 = vrot.slane %v10887_v50, 4  ;;  %v10867_v36 = vrot.slane %v10866_v51, 4  ;;  %v10946_v50 = vshrl.u32 %v10811_v61, 16  ;;  %v10814_v51 = vld [vmem:[#allocation4 + $0x54] sm:$0xf] }
 0x925   : > { %v10948_v8 = vrot.slane %v10946_v50, 4 }
 0x927   : > { %14156 = vmatmul.mubr.msk.bf16.gmra.mrb[0].mxu1 %vm6305_vm12, %v22197_v58  ;;  %v10856_v58 = vor.u32 %v10855_v40, %v10852_v34  ;;  %v14959_v34 = vld [vmem:[#allocation4 + $0xb4] sm:$0xff]  }
 0x928   : > { %14159 = vmatprep.mubr.msk.bf16.mxu1 %vm6305_vm12, %v22200_v37  ;;  %v21010_v37 = vrot.slane %v10883_v49, 5 }
 0x929   : > { %v10857_v19 = vrot.slane %v10856_v58, 4  ;;  %v10949_v58 = vshll.u32 %v10811_v61, 16 }
 0x92a   : > { %v10890_v63 = vor.u32 %v10889_v23, %v21010_v37  ;;  %v22222_v23 = vld [vmem:[#allocation78_spill] sm:$0xff] }
 0x92b   : > { %v10951_v21 = vrot.slane %v10949_v58, 5 }
 0x92f   : > { %14160 = vmatmul.mubr.msk.bf16.gmra.mrb[4].mxu1 %vm6305_vm12, %v22203_v15  ;;  %v10869_v15 = vshll.u32 %v22217_v7, 16  ;;  %v10955_v7 = vshll.u32 %v22222_v23, 16 }
 0x930   : > { %14163 = vmatprep.mubr.msk.bf16.mxu1 %vm6305_vm12, %v22206_v43  ;;  %v14958_v43 = vld [vmem:[#allocation4 + $0xa8] sm:$0xff]  }
 0x937   : > { %14164 = vmatmul.mubr.msk.bf16.gmra.mrb[8].mxu1 %vm6305_vm12, %v22209_v24  ;;  %v10880_v24 = vor.u32 %v10879_v44, %v10876_v13 }
 0x938   : > { %14167 = vmatprep.mubr.msk.bf16.mxu1 %vm6305_vm12, %v22212_v10  ;;  %v10901_v10 = vshll.u32 %v10805_v16, 16  ;;  %v21044_v16 = vld [vmem:[#allocation4 + $0xd0] sm:$0xf] }
 0x93a   : > { %v10903_v1 = vrot.slane %v10901_v10, 5 }
 0x93c   : > { %v10904_v44 = vor.u32 %v10903_v1, %v10900_v20  ;;  %v10817_v1 = vld [vmem:[#allocation4 + $0x60] sm:$0xf] }
 0x93d   : > { %v10994_v58 = vshrl.u32 %v10817_v1, 16 }
 0x93f   : > { %14168 = vmatmul.mubr.msk.bf16.gmra.mrb[12].mxu1 %vm6305_vm12, %v22215_v42  ;;  %v22219_v42 = vld [vmem:[#allocation69_spill] sm:$0xff] }
 0x940   : > { %14173 = vmatprep.mubr.msk.bf16.mxu1 %vm6305_vm12, %v14946_v56  ;;  %v10871_v56 = vrot.slane %v10869_v15, 5  ;;  %v10959_v15 = vshrl.u32 %v22222_v23, 16 }
 0x947   : > { %14174 = vmatmul.mubr.msk.bf16.vlgmr.msra.gmra.mrb[16].mxu1 %vm6305_vm12, %v14947_v54  ;;  %v10907_v54 = vshll.u32 %v22219_v42, 16 }
 0x948   : > { %14206 = vmatpush3.bf16.msra.mxu1 %v11330_v27  ;;  %14177 = vmatprep.mubr.msk.bf16.mxu1 %vm6305_vm12, %v14948_v48  ;;  %v10911_v27 = vshrl.u32 %v22219_v42, 16  ;;  %v10808_v48 = vld [vmem:[#allocation4 + $0x3c] sm:$0xf]  ;;  %v10970_v42 = vshrl.u32 %v10814_v51, 16 }
 0x949   : > { %14871 = vmatprep.subr.msk.bf16.mxu1 %vm7975_vm6, %v20992_v38  ;;  %v21028_v12 = vrot.slane %v10907_v54, 5 }
 0x94a   : > { %v10913_v2 = vrot.slane %v10911_v27, 4  ;;  %v14961_v27 = vld [vmem:[#allocation4 + $0xcc] sm:$0xff]  }
 0x94f   : > { %14178 = vmatmul.mubr.msk.bf16.gmra.mrb[20].mxu1 %vm6305_vm12, %v14949_v22  ;;  %v10862_v22 = vsel %vm16062_vm14, %v10857_v19, %v10861_v47  ;;  %v22221_v47 = vld [vmem:[#allocation72_spill] sm:$0xff]  ;;  %v11540_v19 = vld [vmem:[#allocation4 + $0xcc] sm:$0xe] }
 0x950   : > { %14181 = vmatprep.mubr.msk.bf16.mxu1 %vm6305_vm12, %v14950_v53  ;;  %v10872_v53 = vsel %vm16062_vm14, %v10867_v36, %v10871_v56  ;;  %v10931_v55 = vshll.u32 %v22221_v47, 16  ;;  %v10935_v25 = vshrl.u32 %v22221_v47, 16  ;;  %v11698_v36 = vrot.slane %v21044_v16, 5 }
 0x951   : > { %v13172_v40 = vcombine.low %v10862_v22, %v10872_v53  ;;  %v13220_v56 = vrot.slane %v11540_v19, 9  ;;  %v10961_v22 = vrot.slane %v10959_v15, 4  ;;  %v10973_v53 = vshll.u32 %v10814_v51, 16 }
 0x952   : > { %v21052_v28 = vrot.slane %v10931_v55, 5  ;;  %v10937_v10 = vrot.slane %v10935_v25, 4  ;;  %v11700_v54 = vrot.slane %v11698_v36, 4  ;;  %v10952_v55 = vor.u32 %v10951_v21, %v10948_v8 }
 0x953   : > { %v10965_v25 = vshll.u32 %v20585_v6, 16  ;;  %v10975_v50 = vrot.slane %v10973_v53, 5  ;;  %v10997_v51 = vshll.u32 %v10817_v1, 16  ;;  %v22226_v1 = vld [vmem:[#allocation6_spill] sm:$0xff] }
 0x954   : > { %v10938_v47 = vor.u32 %v10937_v10, %v21052_v28 }
 0x955   : > { %v10999_v8 = vrot.slane %v10997_v51, 5 }
 0x957   : > { %14182 = vmatmul.mubr.msk.bf16.gmra.mrb[24].mxu1 %vm6305_vm12, %v14951_v35  ;;  %v21023_v35 = vrot.slane %v10880_v24, 4 }
 0x958   : > { %14185 = vmatprep.mubr.msk.bf16.mxu1 %vm6305_vm12, %v14952_v41  ;;  %v22220_v41 = vld [vmem:[#allocation71_spill] sm:$0xff] }
 0x959   : > { %v10886_v11 = vsel %vm16062_vm14, %v21023_v35, %v21010_v37  ;;  %v10914_v37 = vor.u32 %v10913_v2, %v21028_v12  ;;  %v21058_v35 = vsel %vm16900_vm7, %v13220_v56, %v11698_v36  ;;  %v22224_v2 = vld [vmem:[#allocation81_spill] sm:$0xff] }
 0x95f   : > { %14186 = vmatmul.mubr.msk.bf16.gmra.mrb[28].mxu1 %vm6305_vm12, %v14953_v33  ;;  %v10917_v33 = vshll.u32 %v22220_v41, 16  ;;  %v10905_v41 = vrot.slane %v10904_v44, 4 }
 0x960   : > { %14189 = vmatprep.mubr.msk.bf16.mxu1 %vm6305_vm12, %v14954_v32  ;;  %v21026_v32 = vrot.slane %v10890_v63, 4 }
 0x961   : > { %v21036_v49 = vrot.slane %v10917_v33, 5  ;;  %v10915_v33 = vrot.slane %v10914_v37, 4  ;;  %v10910_v23 = vsel %vm16062_vm14, %v10905_v41, %v21028_v12  ;;  %v10996_v12 = vrot.slane %v10994_v58, 4 }
 0x962   : > { %v10896_v13 = vsel %vm16062_vm14, %v21026_v32, %v10895_v46  ;;  %v22223_v32 = vld [vmem:[#allocation74_spill] sm:$0xff] }
 0x963   : > { %v10941_v20 = vshll.u32 %v22223_v32, 16  ;;  %v13173_v44 = vcombine.low %v10886_v11, %v10896_v13  ;;  %v10953_v11 = vrot.slane %v10952_v55, 4  ;;  %v10967_v13 = vrot.slane %v10965_v25, 5 }
 0x965   : > { %v10943_v6 = vrot.slane %v10941_v20, 5 }
 0x967   : > { %14190 = vmatmul.mubr.msk.bf16.gmra.mrb[0].mxu1 %vm6305_vm12, %v14955_v9  ;;  %v10922_v9 = vshrl.u32 %v10808_v48, 16 }
 0x968   : > { %14193 = vmatprep.mubr.msk.bf16.mxu1 %vm6305_vm12, %v14956_v0  ;;  %v10925_v0 = vshll.u32 %v10808_v48, 16  ;;  %v21054_v48 = vrot.slane %v10955_v7, 5  ;;  %v10920_v7 = vsel %vm16062_vm14, %v10915_v33, %v21036_v49  ;;  %v11027_v49 = vshll.u32 %v20605_v45, 16 }
 0x969   : > { %v13174_v33 = vcombine.low %v10910_v23, %v10920_v7 }
 0x96a   : > { %v10927_v63 = vrot.slane %v10925_v0, 5  ;;  %v10962_v4 = vor.u32 %v10961_v22, %v21054_v48  ;;  %v21110_v25 = vrot.slane %v11027_v49, 5 }
 0x96c   : > { %v10963_v10 = vrot.slane %v10962_v4, 4 }
 0x96f   : > { %14194 = vmatmul.mubr.msk.bf16.gmra.mrb[4].mxu1 %vm6305_vm12, %v14957_v29  ;;  %v21046_v29 = vld [vmem:[#allocation4 + $0xd4] sm:$0x1] }
 0x970   : > { %14197 = vmatprep.mubr.msk.bf16.mxu1 %vm6305_vm12, %v14958_v43  ;;  %v10924_v43 = vrot.slane %v10922_v9, 4  ;;  %v11701_v24 = vrot.slane %v21046_v29, 5  ;;  %v10979_v9 = vshll.u32 %v22224_v2, 16 }
 0x972   : > { %v21063_v61 = vsel %vm16900_vm7, %v11700_v54, %v11701_v24  ;;  %v10928_v46 = vor.u32 %v10927_v63, %v10924_v43  ;;  %v21080_v15 = vrot.slane %v10979_v9, 5  ;;  %v22225_v43 = vld [vmem:[#allocation8_spill] sm:$0xff]  ;;  %v10820_v24 = vld [vmem:[#allocation4 + $0x6c] sm:$0xf]  ;;  %v11031_v54 = vshrl.u32 %v20605_v45, 16 }
 0x973   : > { %v13236_v0 = vcombine.low %v21058_v35, %v21063_v61  ;;  %v11003_v19 = vshll.u32 %v22225_v43, 16  ;;  %v11007_v36 = vshrl.u32 %v22225_v43, 16  ;;  %v11018_v21 = vshrl.u32 %v10820_v24, 16  ;;  %v21100_v45 = vld [vmem:[%s21470_s8] sm:$0x3]  ;;  %v12002_v35 = vld [vmem:[%s15365_s18 + $0x38] sm:$0xff] }
 0x974   : > { %v10929_v63 = vrot.slane %v10928_v46, 4  ;;  %v10989_v46 = vshll.u32 %v22226_v1, 16  ;;  %v11013_v9 = vshll.u32 %v20603_v57, 16  ;;  %v12003_v61 = vld [vmem:[%s15365_s18 + $0x40] sm:$0xff] }
 0x975   : > { %v21089_v53 = vrot.slane %v11003_v19, 5  ;;  %v11009_v41 = vrot.slane %v11007_v36, 4 }
 0x976   : > { %v10934_v32 = vsel %vm16062_vm14, %v10929_v63, %v21052_v28  ;;  %v11015_v19 = vrot.slane %v11013_v9, 5  ;;  %v10826_v63 = vld [vmem:[#allocation4 + $0x84] sm:$0xf] }
 0x977   : > { %14198 = vmatmul.mubr.msk.bf16.gmra.mrb[8].mxu1 %vm6305_vm12, %v14959_v34  ;;  %v10983_v34 = vshrl.u32 %v22224_v2, 16  ;;  %v10968_v2 = vsel %vm16062_vm14, %v10963_v10, %v10967_v13  ;;  %v11010_v58 = vor.u32 %v11009_v41, %v21089_v53  ;;  %v22228_v10 = vld [vmem:[#allocation42_spill] sm:$0xff] }
 0x978   : > { %14201 = vmatprep.mubr.msk.bf16.mxu1 %vm6305_vm12, %v14960_v60  ;;  %v10972_v60 = vrot.slane %v10970_v42, 4  ;;  %v11021_v42 = vshll.u32 %v10820_v24, 16 }
 0x979   : > { %v10985_v37 = vrot.slane %v10983_v34, 4  ;;  %v10823_v34 = vld [vmem:[#allocation4 + $0x78] sm:$0xf]  ;;  %v11011_v13 = vrot.slane %v11010_v58, 4 }
 0x97a   : > { %v10976_v56 = vor.u32 %v10975_v50, %v10972_v60  ;;  %v11023_v55 = vrot.slane %v11021_v42, 5  ;;  %v11033_v60 = vrot.slane %v11031_v54, 4  ;;  %v11000_v50 = vor.u32 %v10999_v8, %v10996_v12  ;;  %v10829_v12 = vld [vmem:[#allocation4 + $0x90] sm:$0xf] }
 0x97b   : > { %v10986_v22 = vor.u32 %v10985_v37, %v21080_v15  ;;  %v11045_v51 = vshll.u32 %v10823_v34, 16  ;;  %v10991_v37 = vrot.slane %v10989_v46, 5  ;;  %v11069_v54 = vshll.u32 %v10826_v63, 16 }
 0x97c   : > { %v10977_v28 = vrot.slane %v10976_v56, 4  ;;  %v11034_v24 = vor.u32 %v11033_v60, %v21110_v25  ;;  %v11037_v56 = vshll.u32 %v22228_v10, 16  ;;  %v11093_v1 = vshll.u32 %v10829_v12, 16  ;;  %v22231_v60 = vld [vmem:[#allocation17_spill] sm:$0xff] }
 0x97d   : > { %v10987_v4 = vrot.slane %v10986_v22, 4  ;;  %v11071_v58 = vrot.slane %v11069_v54, 5 }
 0x97e   : > { %v10982_v43 = vsel %vm16062_vm14, %v10977_v28, %v21080_v15  ;;  %v11066_v15 = vshrl.u32 %v10826_v63, 16 }
 0x97f   : > { %14202 = vmatmul.mubr.msk.bf16.gmra.mrb[12].mxu1 %vm6305_vm12, %v14961_v27  ;;  %v11800_v27 = vsel %vm7975_vm6, %v20992_v38, 0  ;;  %v10958_v38 = vsel %vm16062_vm14, %v10953_v11, %v21054_v48  ;;  %v11042_v48 = vshrl.u32 %v10823_v34, 16  ;;  %v11001_v11 = vrot.slane %v11000_v50, 4 }
 0x980   : > { %14207 = vmatprep.mubr.msk.bf16.mxu1 %vm6305_vm12, %v13172_v40  ;;  %v10939_v40 = vrot.slane %v10938_v47, 4  ;;  %v11020_v47 = vrot.slane %v11018_v21, 4  ;;  %v11047_v21 = vrot.slane %v11045_v51, 5  ;;  %v11016_v34 = vsel %vm16062_vm14, %v11011_v13, %v11015_v19  ;;  %v10832_v19 = vld [vmem:[#allocation4 + $0x9c] sm:$0xf] }
 0x981   : > { %v11044_v8 = vrot.slane %v11042_v48, 4  ;;  %v11006_v46 = vsel %vm16062_vm14, %v11001_v11, %v21089_v53  ;;  %v11068_v50 = vrot.slane %v11066_v15, 4  ;;  %v10835_v11 = vld [vmem:[#allocation4 + $0xa8] sm:$0xf] }
 0x982   : > { %v10944_v20 = vsel %vm16062_vm14, %v10939_v40, %v10943_v6  ;;  %v13176_v6 = vcombine.low %v10958_v38, %v10968_v2  ;;  %v11024_v36 = vor.u32 %v11023_v55, %v11020_v47  ;;  %v10992_v40 = vsel %vm16062_vm14, %v10987_v4, %v10991_v37  ;;  %v22230_v2 = vld [vmem:[#allocation10_spill] sm:$0xff] }
 0x983   : > { %v13175_v7 = vcombine.low %v10934_v32, %v10944_v20  ;;  %v11035_v32 = vrot.slane %v11034_v24, 4  ;;  %v11090_v20 = vshrl.u32 %v10829_v12, 16  ;;  %v11039_v38 = vrot.slane %v11037_v56, 5 }
 0x984   : > { %v11099_v28 = vshll.u32 %v22230_v2, 16  ;;  %v11103_v9 = vshrl.u32 %v22230_v2, 16  ;;  %v11048_v47 = vor.u32 %v11047_v21, %v11044_v8  ;;  %v11061_v4 = vshll.u32 %v22231_v60, 16 }
 0x985   : > { %v11072_v56 = vor.u32 %v11071_v58, %v11068_v50  ;;  %v11114_v8 = vshrl.u32 %v10832_v19, 16  ;;  %v11138_v54 = vshrl.u32 %v10835_v11, 16  ;;  %v11109_v2 = vshll.u32 %v20695_v18, 16 }
 0x986   : > { %v11105_v37 = vrot.slane %v11103_v9, 4  ;;  %v11049_v24 = vrot.slane %v11048_v47, 4  ;;  %v11063_v63 = vrot.slane %v11061_v4, 5 }
 0x987   : > { %14208 = vmatmul.mubr.msk.bf16.vlgmr.msra.gmra.mrb[16].mxu1 %vm6305_vm12, %v13173_v44  ;;  %v22227_v44 = vld [vmem:[#allocation12_spill] sm:$0xff]  ;;  %v11116_v9 = vrot.slane %v11114_v8, 4  ;;  %v11140_v60 = vrot.slane %v11138_v54, 4  ;;  %v11195_v8 = vshll.u32 %v20747_v17, 16 }
 0x988   : > { %14240 = vmatpush3.bf16.msra.mxu1 %v11800_v27  ;;  %14211 = vmatprep.mubr.msk.bf16.mxu1 %vm6305_vm12, %v13174_v33  ;;  %v11051_v57 = vshll.u32 %v22227_v44, 16  ;;  %v11055_v23 = vshrl.u32 %v22227_v44, 16  ;;  %v22229_v27 = vld [vmem:[#allocation16_spill] sm:$0xff]  ;;  %v11025_v33 = vrot.slane %v11024_v36, 4  ;;  %v11040_v44 = vsel %vm16062_vm14, %v11035_v32, %v11039_v38 }
 0x989   : > { %14872 = vmatprep.subr.msk.bf16.mxu1 %vm2243_vm11, %v21100_v45  ;;  %v11075_v22 = vshll.u32 %v22229_v27, 16  ;;  %v11079_v41 = vshrl.u32 %v22229_v27, 16  ;;  %v13178_v36 = vcombine.low %v11006_v46, %v11016_v34  ;;  %v11141_v27 = vshll.u32 %v10835_v11, 16 }
 0x98a   : > { %v21124_v42 = vrot.slane %v11051_v57, 5  ;;  %v11057_v49 = vrot.slane %v11055_v23, 4  ;;  %v11030_v53 = vsel %vm16062_vm14, %v11025_v33, %v21110_v25  ;;  %v11092_v57 = vrot.slane %v11090_v20, 4 }
 0x98b   : > { %v21139_v48 = vrot.slane %v11075_v22, 5  ;;  %v11081_v51 = vrot.slane %v11079_v41, 4  ;;  %v11095_v23 = vrot.slane %v11093_v1, 5  ;;  %v13179_v13 = vcombine.low %v11030_v53, %v11040_v44  ;;  %v22233_v41 = vld [vmem:[#allocation14_spill] sm:$0xff]  ;;  %v10838_v53 = vld [vmem:[#allocation4 + $0xb4] sm:$0xf] }
 0x98c   : > { %v11058_v55 = vor.u32 %v11057_v49, %v21124_v42  ;;  %v11054_v22 = vsel %vm16062_vm14, %v11049_v24, %v21124_v42  ;;  %v11085_v33 = vshll.u32 %v22233_v41, 16  ;;  %v11147_v32 = vshll.u32 %v20710_v14, 16 }
 0x98d   : > { %v11082_v25 = vor.u32 %v11081_v51, %v21139_v48  ;;  %v11096_v12 = vor.u32 %v11095_v23, %v11092_v57  ;;  %v11151_v20 = vshrl.u32 %v20710_v14, 16  ;;  %v11073_v46 = vrot.slane %v11072_v56, 4 }
 0x98e   : > { %v11059_v10 = vrot.slane %v11058_v55, 4  ;;  %v11143_v4 = vrot.slane %v11141_v27, 5  ;;  %v11087_v58 = vrot.slane %v11085_v33, 5  ;;  %v21165_v51 = vrot.slane %v11147_v32, 5  ;;  %v10844_v33 = vld [vmem:[#allocation4 + $0xcc] sm:$0xf] }
 0x98f   : > { %14212 = vmatmul.mubr.msk.bf16.gmra.mrb[20].mxu1 %vm6305_vm12, %v13175_v7  ;;  %v13177_v7 = vcombine.low %v10982_v43, %v10992_v40  ;;  %v11117_v43 = vshll.u32 %v10832_v19, 16  ;;  %v22232_v40 = vld [vmem:[#allocation23_spill] sm:$0xff]  ;;  %v11083_v38 = vrot.slane %v11082_v25, 4  ;;  %v11153_v14 = vrot.slane %v11151_v20, 4 }
 0x990   : > { %14215 = vmatprep.mubr.msk.bf16.mxu1 %vm6305_vm12, %v13176_v6  ;;  %v21146_v6 = vrot.slane %v11099_v28, 5  ;;  %v11123_v21 = vshll.u32 %v22232_v40, 16  ;;  %v11127_v15 = vshrl.u32 %v22232_v40, 16  ;;  %v11064_v1 = vsel %vm16062_vm14, %v11059_v10, %v11063_v63 }
 0x991   : > { %v11097_v28 = vrot.slane %v11096_v12, 4  ;;  %v11119_v34 = vrot.slane %v11117_v43, 5  ;;  %v13180_v50 = vcombine.low %v11054_v22, %v11064_v1  ;;  %v11078_v18 = vsel %vm16062_vm14, %v11073_v46, %v21139_v48 }
 0x992   : > { %v11106_v49 = vor.u32 %v11105_v37, %v21146_v6  ;;  %v21163_v47 = vrot.slane %v11123_v21, 5  ;;  %v11129_v42 = vrot.slane %v11127_v15, 4  ;;  %v11111_v44 = vrot.slane %v11109_v2, 5  ;;  %v22234_v37 = vld [vmem:[#allocation24_spill] sm:$0xff] }
 0x993   : > { %v11088_v57 = vsel %vm16062_vm14, %v11083_v38, %v11087_v58  ;;  %v11102_v23 = vsel %vm16062_vm14, %v11097_v28, %v21146_v6  ;;  %v11133_v19 = vshll.u32 %v22234_v37, 16  ;;  %v11144_v48 = vor.u32 %v11143_v4, %v11140_v60 }
 0x994   : > { %v11107_v55 = vrot.slane %v11106_v49, 4  ;;  %v11130_v63 = vor.u32 %v11129_v42, %v21163_v47  ;;  %v11162_v11 = vshrl.u32 %v10838_v53, 16  ;;  %v11165_v10 = vshll.u32 %v10838_v53, 16 }
 0x995   : > { %v11171_v56 = vshll.u32 %v20730_v30, 16  ;;  %v11175_v25 = vshrl.u32 %v20730_v30, 16  ;;  %v11199_v43 = vshrl.u32 %v20747_v17, 16  ;;  %v13181_v40 = vcombine.low %v11078_v18, %v11088_v57 }
 0x996   : > { %v11112_v24 = vsel %vm16062_vm14, %v11107_v55, %v11111_v44  ;;  %v11135_v15 = vrot.slane %v11133_v19, 5  ;;  %v11131_v54 = vrot.slane %v11130_v63, 4  ;;  %v11145_v27 = vrot.slane %v11144_v48, 4 }
 0x997   : > { %14216 = vmatmul.mubr.msk.bf16.gmra.mrb[24].mxu1 %vm6305_vm12, %v13177_v7  ;;  %v11120_v7 = vor.u32 %v11119_v34, %v11116_v9  ;;  %v13182_v21 = vcombine.low %v11102_v23, %v11112_v24  ;;  %v11157_v22 = vshll.u32 %v20724_v26, 16  ;;  %v11164_v41 = vrot.slane %v11162_v11, 4 }
 0x998   : > { %14219 = vmatprep.mubr.msk.bf16.mxu1 %vm6305_vm12, %v13178_v36  ;;  %v10841_v36 = vld [vmem:[#allocation4 + $0xc0] sm:$0xf]  ;;  %v11167_v20 = vrot.slane %v11165_v10, 5  ;;  %v11173_v1 = vrot.slane %v11171_v56, 5  ;;  %v11177_v30 = vrot.slane %v11175_v25, 4  ;;  %v11197_v2 = vrot.slane %v11195_v8, 5 }
 0x999   : > { %v11186_v12 = vshrl.u32 %v10841_v36, 16  ;;  %v11189_v6 = vshll.u32 %v10841_v36, 16  ;;  %v11121_v49 = vrot.slane %v11120_v7, 4  ;;  %v11201_v17 = vrot.slane %v11199_v43, 4 }
 0x99a   : > { %v11210_v28 = vshrl.u32 %v10844_v33, 16  ;;  %v11213_v9 = vshll.u32 %v10844_v33, 16  ;;  %v11219_v34 = vshll.u32 %v21044_v16, 16  ;;  %v11223_v26 = vshrl.u32 %v21044_v16, 16  ;;  %v22238_v33 = vld [vmem:[#allocation82_spill] sm:$0xff] }
 0x99b   : > { %v11188_v46 = vrot.slane %v11186_v12, 4  ;;  %v11191_v38 = vrot.slane %v11189_v6, 5  ;;  %v11126_v55 = vsel %vm16062_vm14, %v11121_v49, %v21163_v47  ;;  %v11159_v42 = vrot.slane %v11157_v22, 5 }
 0x99c   : > { %v11136_v60 = vsel %vm16062_vm14, %v11131_v54, %v11135_v15  ;;  %v11168_v4 = vor.u32 %v11167_v20, %v11164_v41  ;;  %v11181_v58 = vshll.u32 %v20767_v62, 16  ;;  %v11202_v18 = vor.u32 %v11201_v17, %v11197_v2  ;;  %v22235_v54 = vld [vmem:[#allocation77_spill] sm:$0xff] }
 0x99d   : > { %v11192_v16 = vor.u32 %v11191_v38, %v11188_v46  ;;  %v11212_v44 = vrot.slane %v11210_v28, 4  ;;  %v11215_v57 = vrot.slane %v11213_v9, 5  ;;  %v11221_v47 = vrot.slane %v11219_v34, 5  ;;  %v22244_v46 = vld [vmem:[#allocation41_spill] sm:$0xff]  ;;  %v22245_v38 = vld [vmem:[#allocation20_spill] sm:$0xff]  ;;  %v22250_v9 = vld [vmem:[#allocation19_spill] sm:$0xff] }
 0x99e   : > { %v11225_v23 = vrot.slane %v11223_v26, 4  ;;  %v13183_v7 = vcombine.low %v11126_v55, %v11136_v60  ;;  %v11205_v37 = vshll.u32 %v20781_v39, 16  ;;  %v11169_v36 = vrot.slane %v11168_v4, 4  ;;  %v22247_v17 = vld [vmem:[#allocation33_spill] sm:$0xff]  ;;  %v22256_v4 = vld [vmem:[#allocation11_spill] sm:$0xff] }
 0x99f   : > { %14220 = vmatmul.mubr.msk.bf16.gmra.mrb[28].mxu1 %vm6305_vm12, %v13179_v13  ;;  %v11154_v13 = vor.u32 %v11153_v14, %v21165_v51  ;;  %v11150_v14 = vsel %vm16062_vm14, %v11145_v27, %v21165_v51  ;;  %v11193_v62 = vrot.slane %v11192_v16, 4  ;;  %v11203_v63 = vrot.slane %v11202_v18, 4  ;;  %v22236_v27 = vld [vmem:[#allocation79_spill] sm:$0xff]  ;;  %v22251_v34 = vld [vmem:[#allocation5_spill] sm:$0xff] }
 0x9a0   : > { %14223 = vmatprep.mubr.msk.bf16.mxu1 %vm6305_vm12, %v13180_v50  ;;  %v11178_v50 = vor.u32 %v11177_v30, %v11173_v1  ;;  %v11183_v51 = vrot.slane %v11181_v58, 5  ;;  %v11216_v48 = vor.u32 %v11215_v57, %v11212_v44  ;;  %v11226_v11 = vor.u32 %v11225_v23, %v11221_v47  ;;  %v22253_v55 = vld [vmem:[#allocation21_spill] sm:$0xff]  ;;  %v22263_v44 = vld [vmem:[#allocation30_spill] sm:$0xff]  ;;  %v22264_v57 = vld [vmem:[#allocation32_spill] sm:$0xff] }
 0x9a1   : > { %v11155_v32 = vrot.slane %v11154_v13, 4  ;;  %v11229_v13 = vshll.u32 %v21046_v29, 16  ;;  %v11207_v10 = vrot.slane %v11205_v37, 5  ;;  %v11174_v56 = vsel %vm16062_vm14, %v11169_v36, %v11173_v1  ;;  %v22242_v1 = vld [vmem:[#allocation22_spill] sm:$0xff]  ;;  %v22266_v23 = vld [vmem:[#allocation84_spill] sm:$0xff]  ;;  %v22270_v36 = vld [vmem:[#allocation89_spill] sm:$0xff] }
 0x9a2   : > { %v11179_v24 = vrot.slane %v11178_v50, 4  ;;  %v11198_v25 = vsel %vm16062_vm14, %v11193_v62, %v11197_v2  ;;  %v11217_v6 = vrot.slane %v11216_v48, 4  ;;  %v11227_v8 = vrot.slane %v11226_v11, 4  ;;  %v22257_v50 = vld [vmem:[#allocation27_spill] sm:$0xff]  ;;  %v11996_v48 = vld [vmem:[%s15365_s18 + $0x8] sm:$0xff] }
 0x9a3   : > { %v11160_v53 = vsel %vm16062_vm14, %v11155_v32, %v11159_v42  ;;  %v11208_v12 = vsel %vm16062_vm14, %v11203_v63, %v11207_v10  ;;  %v11231_v43 = vrot.slane %v11229_v13, 5  ;;  %v22237_v22 = vcombine.low %v22235_v54, %v22236_v27  ;;  %v22239_v32 = vld [vmem:[#allocation83_spill] sm:$0xff]  ;;  %v22254_v42 = vld [vmem:[#allocation25_spill] sm:$0xff]  ;;  %v12000_v10 = vld [vmem:[%s15365_s18 + $0x28] sm:$0xff] }
 0x9a4   : > { %v13184_v19 = vcombine.low %v11150_v14, %v11160_v53  ;;  %v11184_v39 = vsel %vm16062_vm14, %v11179_v24, %v11183_v51  ;;  %v11222_v29 = vsel %vm16062_vm14, %v11217_v6, %v11221_v47  ;;  %v12093_v41 = vsel %vm2243_vm11, %v21100_v45, 0  ;;  %v22248_v45 = vld [vmem:[#allocation18_spill] sm:$0xff]  ;;  %v22259_v14 = vld [vmem:[#allocation13_spill] sm:$0xff]  ;;  %v22260_v53 = vld [vmem:[#allocation31_spill] sm:$0xff] }
 0x9a5   : > { %v11232_v49 = vsel %vm16062_vm14, %v11227_v8, %v11231_v43  ;;  %v22240_v20 = vcombine.low %v22238_v33, %v22239_v32  ;;  %v22243_v30 = vcombine.low %v22241_v3, %v22242_v1  ;;  %v22246_v2 = vcombine.low %v22244_v46, %v22245_v38  ;;  %v22274_v62 = vld [vmem:[#allocation91_spill] sm:$0xff]  ;;  %v12005_v8 = vld [vmem:[%s15365_s18 + $0x50] sm:$0xff]  ;;  %v12006_v43 = vld [vmem:[%s15365_s18 + $0x58] sm:$0xff] }
 0x9a6   : > { %v13187_v15 = vcombine.low %v11222_v29, %v11232_v49  ;;  %v22249_v28 = vcombine.low %v22247_v17, %v22248_v45  ;;  %v22252_v26 = vcombine.low %v22250_v9, %v22251_v34  ;;  %v22255_v60 = vcombine.low %v22253_v55, %v22254_v42  ;;  %v11995_v51 = vld [vmem:[%s15365_s18] sm:$0xff]  ;;  %v12010_v54 = vld [vmem:[%s15365_s18 + $0x78] sm:$0xff]  ;;  %v12013_v32 = vld [vmem:[%s15365_s18 + $0x90] sm:$0xff] }
 0x9a7   : > { %14224 = vmatmul.mubr.msk.bf16.gmra.mrb[0].mxu1 %vm6305_vm12, %v13181_v40  ;;  %v13185_v40 = vcombine.low %v11174_v56, %v11184_v39  ;;  %v22258_v58 = vcombine.low %v22256_v4, %v22257_v50  ;;  %v22261_v16 = vcombine.low %v22259_v14, %v22260_v53  ;;  %v22262_v18 = vcombine.low %v20734_v59, %v20742_v52  ;;  %v22273_v59 = vld [vmem:[#allocation90_spill] sm:$0xff]  ;;  %v11999_v13 = vld [vmem:[%s15365_s18 + $0x20] sm:$0xff]  ;;  %v12016_v1 = vld [vmem:[%s15365_s18 + $0xa8] sm:$0xff] }
 0x9a8   : > { %14227 = vmatprep.mubr.msk.bf16.mxu1 %vm6305_vm12, %v13182_v21  ;;  %v13186_v21 = vcombine.low %v11198_v25, %v11208_v12  ;;  %v22265_v47 = vcombine.low %v22263_v44, %v22264_v57  ;;  %v22272_v52 = vcombine.low %v20810_v31, %v20814_v5  ;;  %v22275_v63 = vcombine.low %v22273_v59, %v22274_v62  ;;  %v11997_v31 = vld [vmem:[%s15365_s18 + $0x10] sm:$0xff]  ;;  %v11998_v5 = vld [vmem:[%s15365_s18 + $0x18] sm:$0xff]  ;;  %v12011_v27 = vld [vmem:[%s15365_s18 + $0x80] sm:$0xff] }
 0x9a9   : > { %v12027_v11 = vpack.c.bf16 %v11996_v48, %v11995_v51  ;;  %v12028_v56 = vpack.c.bf16 %v11998_v5, %v11997_v31  ;;  %v12029_v39 = vpack.c.bf16 %v12000_v10, %v11999_v13  ;;  %v12001_v25 = vld [vmem:[%s15365_s18 + $0x30] sm:$0xff]  ;;  %v12032_v29 = vpack.c.bf16 %v12006_v43, %v12005_v8  ;;  %v12015_v3 = vld [vmem:[%s15365_s18 + $0xa0] sm:$0xff]  ;;  %v12020_v45 = vld [vmem:[%s15365_s18 + $0xc8] sm:$0xff] }
 0x9aa   : > { %v12030_v12 = vpack.c.bf16 %v12002_v35, %v12001_v25  ;;  %v12037_v46 = vpack.c.bf16 %v12016_v1, %v12015_v3  ;;  %v12017_v38 = vld [vmem:[%s15365_s18 + $0xb0] sm:$0xff]  ;;  %v12019_v17 = vld [vmem:[%s15365_s18 + $0xc0] sm:$0xff]  ;;  %v12024_v42 = vld [vmem:[%s15365_s18 + $0xe8] sm:$0xff] }
 0x9ab   : > { %v12039_v9 = vpack.c.bf16 %v12020_v45, %v12019_v17  ;;  %v12021_v34 = vld [vmem:[%s15365_s18 + $0xd0] sm:$0xff]  ;;  %v12023_v55 = vld [vmem:[%s15365_s18 + $0xe0] sm:$0xff]  ;;  %v22279_v59 = vld [vmem:[#allocation54_spill] sm:$0xff] }
 0x9ac   : > { %v12041_v4 = vpack.c.bf16 %v12024_v42, %v12023_v55  ;;  %v12025_v50 = vld [vmem:[%s15365_s18 + $0xf0] sm:$0xff]  ;;  %v22282_v25 = vld [vmem:[#allocation59_spill] sm:$0xff]  ;;  %v22287_v3 = vld [vmem:[#allocation26_spill] sm:$0xff] }
 0x9ad   : > { %v22281_v13 = vld [vmem:[#allocation57_spill] sm:$0xff] }
 0x9ae   : > { %v22290_v55 = vld [vmem:[#allocation85_spill] sm:$0xff] }
 0x9af   : > { %14228 = vmatmul.mubr.msk.bf16.gmra.mrb[4].mxu1 %vm6305_vm12, %v13183_v7  ;;  %v22267_v7 = vld [vmem:[#allocation86_spill] sm:$0xff] }
 0x9b0   : > { %14231 = vmatprep.mubr.msk.bf16.mxu1 %vm6305_vm12, %v13184_v19  ;;  %v22268_v37 = vcombine.low %v22266_v23, %v22267_v7  ;;  %v22269_v19 = vld [vmem:[#allocation88_spill] sm:$0xff] }
 0x9b1   : > { %v22271_v24 = vcombine.low %v22269_v19, %v22270_v36  ;;  %v22278_v19 = vld [vmem:[#allocation52_spill] sm:$0xff] }
 0x9b7   : > { %14232 = vmatmul.mubr.msk.bf16.gmra.mrb[8].mxu1 %vm6305_vm12, %v13185_v40  ;;  %v12007_v40 = vld [vmem:[%s15365_s18 + $0x60] sm:$0xff] }
 0x9b8   : > { %14235 = vmatprep.mubr.msk.bf16.mxu1 %vm6305_vm12, %v13186_v21  ;;  %v12008_v21 = vld [vmem:[%s15365_s18 + $0x68] sm:$0xff] }
 0x9b9   : > { %v12033_v49 = vpack.c.bf16 %v12008_v21, %v12007_v40  ;;  %v22284_v21 = vld [vmem:[#allocation40_spill] sm:$0xff] }
 0x9bf   : > { %14236 = vmatmul.mubr.msk.bf16.gmra.mrb[12].mxu1 %vm6305_vm12, %v13187_v15  ;;  %v12009_v15 = vld [vmem:[%s15365_s18 + $0x70] sm:$0xff] }
 0x9c0   : > { %14241 = vmatprep.mubr.msk.bf16.mxu1 %vm6305_vm12, %v22237_v22  ;;  %v12012_v22 = vld [vmem:[%s15365_s18 + $0x88] sm:$0xff] }
 0x9c1   : > { %v12035_v33 = vpack.c.bf16 %v12012_v22, %v12011_v27 }
 0x9c7   : > { %14242 = vmatmul.mubr.msk.bf16.vlgmr.msra.gmra.mrb[16].mxu1 %vm6305_vm12, %v22240_v20  ;;  %v12014_v20 = vld [vmem:[%s15365_s18 + $0x98] sm:$0xff] }
 0x9c8   : > { %14274 = vmatpush3.bf16.msra.mxu1 %v12093_v41  ;;  %14245 = vmatprep.mubr.msk.bf16.mxu1 %vm6305_vm12, %v22243_v30  ;;  %v12034_v41 = vpack.c.bf16 %v12010_v54, %v12009_v15  ;;  %v12036_v30 = vpack.c.bf16 %v12014_v20, %v12013_v32  ;;  %v22285_v15 = vld [vmem:[#allocation15_spill] sm:$0xff] }
 0x9cf   : > { %14246 = vmatmul.mubr.msk.bf16.gmra.mrb[20].mxu1 %vm6305_vm12, %v22246_v2  ;;  %v12018_v2 = vld [vmem:[%s15365_s18 + $0xb8] sm:$0xff] }
 0x9d0   : > { %14249 = vmatprep.mubr.msk.bf16.mxu1 %vm6305_vm12, %v22249_v28  ;;  %v12038_v28 = vpack.c.bf16 %v12018_v2, %v12017_v38  ;;  %v22288_v2 = vld [vmem:[#allocation28_spill] sm:$0xff] }
 0x9d7   : > { %14250 = vmatmul.mubr.msk.bf16.gmra.mrb[24].mxu1 %vm6305_vm12, %v22252_v26  ;;  %v12022_v26 = vld [vmem:[%s15365_s18 + $0xd8] sm:$0xff] }
 0x9d8   : > { %14253 = vmatprep.mubr.msk.bf16.mxu1 %vm6305_vm12, %v22255_v60  ;;  %v12040_v60 = vpack.c.bf16 %v12022_v26, %v12021_v34 }
 0x9df   : > { %14254 = vmatmul.mubr.msk.bf16.gmra.mrb[28].mxu1 %vm6305_vm12, %v22258_v58  ;;  %v12026_v58 = vld [vmem:[%s15365_s18 + $0xf8] sm:$0xff] }
 0x9e0   : > { %14257 = vmatprep.mubr.msk.bf16.mxu1 %vm6305_vm12, %v22261_v16  ;;  %v12042_v14 = vpack.c.bf16 %v12026_v58, %v12025_v50  ;;  %v21338_v16 = vld [vmem:[%s21471_s9] ss:$0 sm:$0xff] }
 0x9e1   : > { %v22291_v50 = vld [vmem:[#allocation87_spill] sm:$0xff] }
 0x9e7   : > { %14258 = vmatmul.mubr.msk.bf16.gmra.mrb[0].mxu1 %vm6305_vm12, %v22262_v18  ;;  %v22276_v18 = vld [vmem:[#allocation76_spill] sm:$0xff] }
 0x9e8   : > { %14261 = vmatprep.mubr.msk.bf16.mxu1 %vm6305_vm12, %v22265_v47  ;;  %v22277_v47 = vld [vmem:[#allocation51_spill] sm:$0xff] }
 0x9ef   : > { %14262 = vmatmul.mubr.msk.bf16.gmra.mrb[4].mxu1 %vm6305_vm12, %v22268_v37 }
 0x9f0   : > { %14265 = vmatprep.mubr.msk.bf16.mxu1 %vm6305_vm12, %v22271_v24 }
 0x9f7   : > { %14266 = vmatmul.mubr.msk.bf16.gmra.mrb[8].mxu1 %vm6305_vm12, %v22272_v52 }
 0x9f8   : > { %14269 = vmatprep.mubr.msk.bf16.mxu1 %vm6305_vm12, %v22275_v63 }
 0x9ff   : > { %14270 = vmatmul.mubr.msk.bf16.gmra.mrb[12].mxu1 %vm6305_vm12, %v13236_v0  ;;  %v12004_v0 = vld [vmem:[%s15365_s18 + $0x48] sm:$0xff] }
 0xa00   : > { %14275 = vmatprep.mubr.msk.bf16.mxu1 %vm641_vm5, %v12027_v11  ;;  %v12031_v6 = vpack.c.bf16 %v12004_v0, %v12003_v61  ;;  %v22280_v11 = vld [vmem:[#allocation56_spill] sm:$0xff] }
 0xa07   : > { %14276 = vmatmul.mubr.msk.bf16.vlgmr.msra.gmra.mrb[16].mxu1 %vm641_vm5, %v12028_v56 }
 0xa08   : > { %14279 = vmatprep.mubr.msk.bf16.mxu1 %vm641_vm5, %v12029_v39 }
 0xa0f   : > { %14280 = vmatmul.mubr.msk.bf16.gmra.mrb[20].mxu1 %vm641_vm5, %v12030_v12  ;;  %v22283_v12 = vld [vmem:[#allocation61_spill] sm:$0xff] }
 0xa10   : > { %14283 = vmatprep.mubr.msk.bf16.mxu1 %vm641_vm5, %v12031_v6 }
 0xa17   : > { %14284 = vmatmul.mubr.msk.bf16.gmra.mrb[24].mxu1 %vm641_vm5, %v12032_v29 }
 0xa18   : > { %14287 = vmatprep.mubr.msk.bf16.mxu1 %vm641_vm5, %v12033_v49 }
 0xa1f   : > { %14288 = vmatmul.mubr.msk.bf16.gmra.mrb[28].mxu1 %vm641_vm5, %v12034_v41  ;;  %v22286_v41 = vld [vmem:[#allocation9_spill] sm:$0xff] }
 0xa20   : > { %14291 = vmatprep.mubr.msk.bf16.mxu1 %vm641_vm5, %v12035_v33 }
 0xa27   : > { %14292 = vmatmul.mubr.msk.bf16.gmra.mrb[0].mxu1 %vm641_vm5, %v12036_v30 }
 0xa28   : > { %14295 = vmatprep.mubr.msk.bf16.mxu1 %vm641_vm5, %v12037_v46 }
 0xa2f   : > { %14296 = vmatmul.mubr.msk.bf16.gmra.mrb[4].mxu1 %vm641_vm5, %v12038_v28  ;;  %v22289_v28 = vld [vmem:[#allocation29_spill] sm:$0xff] }
 0xa30   : > { %14299 = vmatprep.mubr.msk.bf16.mxu1 %vm641_vm5, %v12039_v9 }
 0xa37   : > { %14300 = vmatmul.mubr.msk.bf16.gmra.mrb[8].mxu1 %vm641_vm5, %v12040_v60 }
 0xa38   : > { %14303 = vmatprep.mubr.msk.bf16.mxu1 %vm641_vm5, %v12041_v4 }
 0xa3f   : > { %14304 = vmatmul.mubr.msk.bf16.gmra.mrb[12].mxu1 %vm641_vm5, %v12042_v14 }
 0xada   : > { %v14277_v53 = vpop.f32.mrb[16].mxu1 }
 0xadb   : > { %v14309_v44 = vadd.f32 %v14277_v53, %v22276_v18  ;;  %v12129_v57 = vpop.f32.mrb[17].mxu1 }
 0xadc   : > { %v14310_v23 = vadd.f32 %v12129_v57, %v22277_v47  ;;  %v14278_v7 = vpop.f32.mrb[18].mxu1 }
 0xadd   : > { %v12297_v37 = vadd.f32 %v14309_v44, %v21338_v16  ;;  %v14311_v36 = vadd.f32 %v14278_v7, %v22278_v19  ;;  %v12132_v24 = vpop.f32.mrb[19].mxu1 }
 0xade   : > { %v12295_v52 = vadd.f32 %v14310_v23, %v21338_v16  ;;  %v14312_v62 = vadd.f32 %v12132_v24, %v22279_v59 }
 0xadf   : > { %12329 = vst.msk [vmem:[%s21346_s26 + $0x10] sm:$0xff] %vm6305_vm12, %v12297_v37  ;;  %v12298_v63 = vadd.f32 %v14311_v36, %v21338_v16 }
 0xae0   : > { %12327 = vst.msk [vmem:[%s21346_s26] sm:$0xff] %vm6305_vm12, %v12295_v52  ;;  %v12296_v51 = vadd.f32 %v14312_v62, %v21338_v16 }
 0xae1   : > { %12330 = vst.msk [vmem:[%s21346_s26 + $0x18] sm:$0xff] %vm6305_vm12, %v12298_v63 }
 0xae2   : > { %12328 = vst.msk [vmem:[%s21346_s26 + $0x8] sm:$0xff] %vm6305_vm12, %v12296_v51  ;;  %v14281_v48 = vpop.f32.mrb[20].mxu1 }
 0xae3   : > { %v14313_v31 = vadd.f32 %v14281_v48, %v22280_v11  ;;  %v12145_v5 = vpop.f32.mrb[21].mxu1 }
 0xae4   : > { %v14314_v10 = vadd.f32 %v12145_v5, %v22281_v13  ;;  %v14282_v56 = vpop.f32.mrb[22].mxu1 }
 0xae5   : > { %v12301_v39 = vadd.f32 %v14313_v31, %v21338_v16  ;;  %v14315_v35 = vadd.f32 %v14282_v56, %v22282_v25  ;;  %v12148_v61 = vpop.f32.mrb[23].mxu1 }
 0xae6   : > { %v12299_v0 = vadd.f32 %v14314_v10, %v21338_v16  ;;  %v14316_v6 = vadd.f32 %v12148_v61, %v22283_v12 }
 0xae7   : > { %12333 = vst.msk [vmem:[%s21346_s26 + $0x30] sm:$0xff] %vm6305_vm12, %v12301_v39  ;;  %v12302_v8 = vadd.f32 %v14315_v35, %v21338_v16 }
 0xae8   : > { %12331 = vst.msk [vmem:[%s21346_s26 + $0x20] sm:$0xff] %vm6305_vm12, %v12299_v0  ;;  %v12300_v43 = vadd.f32 %v14316_v6, %v21338_v16 }
 0xae9   : > { %12334 = vst.msk [vmem:[%s21346_s26 + $0x38] sm:$0xff] %vm6305_vm12, %v12302_v8 }
 0xaea   : > { %12332 = vst.msk [vmem:[%s21346_s26 + $0x28] sm:$0xff] %vm6305_vm12, %v12300_v43  ;;  %v14285_v40 = vpop.f32.mrb[24].mxu1 }
 0xaeb   : > { %v14317_v29 = vadd.f32 %v14285_v40, %v22284_v21  ;;  %v12161_v49 = vpop.f32.mrb[25].mxu1 }
 0xaec   : > { %v14318_v54 = vadd.f32 %v12161_v49, %v22285_v15  ;;  %v14286_v27 = vpop.f32.mrb[26].mxu1 }
 0xaed   : > { %v12305_v22 = vadd.f32 %v14317_v29, %v21338_v16  ;;  %v14319_v33 = vadd.f32 %v14286_v27, %v22286_v41  ;;  %v12164_v32 = vpop.f32.mrb[27].mxu1 }
 0xaee   : > { %v12303_v20 = vadd.f32 %v14318_v54, %v21338_v16  ;;  %v14320_v1 = vadd.f32 %v12164_v32, %v22287_v3 }
 0xaef   : > { %12337 = vst.msk [vmem:[%s21346_s26 + $0x50] sm:$0xff] %vm6305_vm12, %v12305_v22  ;;  %v12306_v30 = vadd.f32 %v14319_v33, %v21338_v16 }
 0xaf0   : > { %12335 = vst.msk [vmem:[%s21346_s26 + $0x40] sm:$0xff] %vm6305_vm12, %v12303_v20  ;;  %v12304_v46 = vadd.f32 %v14320_v1, %v21338_v16 }
 0xaf1   : > { %12338 = vst.msk [vmem:[%s21346_s26 + $0x58] sm:$0xff] %vm6305_vm12, %v12306_v30 }
 0xaf2   : > { %12336 = vst.msk [vmem:[%s21346_s26 + $0x48] sm:$0xff] %vm6305_vm12, %v12304_v46  ;;  %v14289_v38 = vpop.f32.mrb[28].mxu1 }
 0xaf3   : > { %v14321_v17 = vadd.f32 %v14289_v38, %v22288_v2  ;;  %v12177_v45 = vpop.f32.mrb[29].mxu1 }
 0xaf4   : > { %v14322_v9 = vadd.f32 %v12177_v45, %v22289_v28  ;;  %v14290_v34 = vpop.f32.mrb[30].mxu1 }
 0xaf5   : > { %v12309_v26 = vadd.f32 %v14321_v17, %v21338_v16  ;;  %v14323_v42 = vadd.f32 %v14290_v34, %v22290_v55  ;;  %v12180_v60 = vpop.f32.mrb[31].mxu1 }
 0xaf6   : > { %v12307_v4 = vadd.f32 %v14322_v9, %v21338_v16  ;;  %v14324_v58 = vadd.f32 %v12180_v60, %v22291_v50 }
 0xaf7   : > { %12341 = vst.msk [vmem:[%s21346_s26 + $0x70] sm:$0xff] %vm6305_vm12, %v12309_v26  ;;  %v12310_v14 = vadd.f32 %v14323_v42, %v21338_v16 }
 0xaf8   : > { %12339 = vst.msk [vmem:[%s21346_s26 + $0x60] sm:$0xff] %vm6305_vm12, %v12307_v4  ;;  %v12308_v53 = vadd.f32 %v14324_v58, %v21338_v16 }
 0xaf9   : > { %12342 = vst.msk [vmem:[%s21346_s26 + $0x78] sm:$0xff] %vm6305_vm12, %v12310_v14 }
 0xafa   : > { %12340 = vst.msk [vmem:[%s21346_s26 + $0x68] sm:$0xff] %vm6305_vm12, %v12308_v53  ;;  %v14293_v18 = vpop.f32.mrb[0].mxu1 }
 0xafb   : > { %v12313_v44 = vadd.f32 %v14293_v18, %v21338_v16  ;;  %v12193_v57 = vpop.f32.mrb[1].mxu1 }
 0xafc   : > { %v12311_v47 = vadd.f32 %v21338_v16, %v12193_v57  ;;  %v14294_v23 = vpop.f32.mrb[2].mxu1 }
 0xafd   : > { %12345 = vst.msk [vmem:[%s21346_s26 + $0x90] sm:$0xff] %vm6305_vm12, %v12313_v44  ;;  %v12314_v7 = vadd.f32 %v14294_v23, %v21338_v16  ;;  %v12196_v37 = vpop.f32.mrb[3].mxu1 }
 0xafe   : > { %12343 = vst.msk [vmem:[%s21346_s26 + $0x80] sm:$0xff] %vm6305_vm12, %v12311_v47  ;;  %v12312_v19 = vadd.f32 %v21338_v16, %v12196_v37 }
 0xaff   : > { %12346 = vst.msk [vmem:[%s21346_s26 + $0x98] sm:$0xff] %vm6305_vm12, %v12314_v7 }
 0xb00   : > { %12344 = vst.msk [vmem:[%s21346_s26 + $0x88] sm:$0xff] %vm6305_vm12, %v12312_v19 }
 0xb02   : > { %v14297_v36 = vpop.f32.mrb[4].mxu1 }
 0xb03   : > { %v12317_v24 = vadd.f32 %v14297_v36, %v21338_v16  ;;  %v12209_v52 = vpop.f32.mrb[5].mxu1 }
 0xb04   : > { %v12315_v59 = vadd.f32 %v21338_v16, %v12209_v52  ;;  %v14298_v62 = vpop.f32.mrb[6].mxu1 }
 0xb05   : > { %12349 = vst.msk [vmem:[%s21346_s26 + $0xb0] sm:$0xff] %vm6305_vm12, %v12317_v24  ;;  %v12318_v63 = vadd.f32 %v14298_v62, %v21338_v16  ;;  %v12212_v51 = vpop.f32.mrb[7].mxu1 }
 0xb06   : > { %12347 = vst.msk [vmem:[%s21346_s26 + $0xa0] sm:$0xff] %vm6305_vm12, %v12315_v59  ;;  %v12316_v48 = vadd.f32 %v21338_v16, %v12212_v51 }
 0xb07   : > { %12350 = vst.msk [vmem:[%s21346_s26 + $0xb8] sm:$0xff] %vm6305_vm12, %v12318_v63 }
 0xb08   : > { %12348 = vst.msk [vmem:[%s21346_s26 + $0xa8] sm:$0xff] %vm6305_vm12, %v12316_v48 }
 0xb0a   : > { %v14301_v11 = vpop.f32.mrb[8].mxu1 }
 0xb0b   : > { %v12321_v31 = vadd.f32 %v14301_v11, %v21338_v16  ;;  %v12225_v5 = vpop.f32.mrb[9].mxu1 }
 0xb0c   : > { %v12319_v13 = vadd.f32 %v21338_v16, %v12225_v5  ;;  %v14302_v10 = vpop.f32.mrb[10].mxu1 }
 0xb0d   : > { %12353 = vst.msk [vmem:[%s21346_s26 + $0xd0] sm:$0xff] %vm6305_vm12, %v12321_v31  ;;  %v12322_v56 = vadd.f32 %v14302_v10, %v21338_v16  ;;  %v12228_v39 = vpop.f32.mrb[11].mxu1 }
 0xb0e   : > { %12351 = vst.msk [vmem:[%s21346_s26 + $0xc0] sm:$0xff] %vm6305_vm12, %v12319_v13  ;;  %v12320_v25 = vadd.f32 %v21338_v16, %v12228_v39 }
 0xb0f   : > { %12354 = vst.msk [vmem:[%s21346_s26 + $0xd8] sm:$0xff] %vm6305_vm12, %v12322_v56 }
 0xb10   : > { %12352 = vst.msk [vmem:[%s21346_s26 + $0xc8] sm:$0xff] %vm6305_vm12, %v12320_v25 }
 0xb12   : > { %v14305_v35 = vpop.f32.mrb[12].mxu1 }
 0xb13   : > { %v12325_v61 = vadd.f32 %v14305_v35, %v21338_v16  ;;  %v12241_v0 = vpop.f32.mrb[13].mxu1 }
 0xb14   : > { %v12323_v12 = vadd.f32 %v21338_v16, %v12241_v0  ;;  %v14306_v6 = vpop.f32.mrb[14].mxu1 }
 0xb15   : > { %12357 = vst.msk [vmem:[%s21346_s26 + $0xf0] sm:$0xff] %vm6305_vm12, %v12325_v61  ;;  %v12326_v8 = vadd.f32 %v14306_v6, %v21338_v16  ;;  %v12244_v43 = vpop.f32.mrb[15].mxu1 }
 0xb16   : > { %12355 = vst.msk [vmem:[%s21346_s26 + $0xe0] sm:$0xff] %vm6305_vm12, %v12323_v12  ;;  %v12324_v40 = vadd.f32 %v21338_v16, %v12244_v43 }
 0xb17   : > { %12358 = vst.msk [vmem:[%s21346_s26 + $0xf8] sm:$0xff] %vm6305_vm12, %v12326_v8 }
 0xb18   : > { %12356 = vst.msk [vmem:[%s21346_s26 + $0xe8] sm:$0xff] %vm6305_vm12, %v12324_v40 }
 0xb19 PF: > { %s20_s13 = sadd.s32 1, %s15250_s13  }
 0xb1a   : > { %p17_p4 = scmp.ge.s32.totalorder %s20_s13, 4  }
 0xb1c   :  { %19 = sbr.rel (!%p17_p4) target bundleno = 1 (0x1), region = 115 }

</bundles_post_ra>
